<compile_context>
chip_gen: v7x
topology: tpu7x:2x2x1
jax: 0.10.0
libtpu: 0.0.40
codegen_flags: <defaults>
</compile_context>

<pallas_src>
import math

import jax
import jax.numpy as jnp
from jax.experimental import pallas as pl
from jax.experimental.pallas import tpu as pltpu


def _round_up(x, m):
    return (x + m - 1) // m * m


# ----------------------------------------------------------------------------
# Chip detection (tile selection only; safe fallback)
# ----------------------------------------------------------------------------
_CHIP = None


def _chip_kind():
    global _CHIP
    if _CHIP is None:
        try:
            kind = jax.devices()[0].device_kind.lower()
        except Exception:
            kind = ""
        if "v5" in kind:
            _CHIP = "v5"
        elif "v6" in kind:
            _CHIP = "v6"
        elif "v7" in kind:
            _CHIP = "v7"
        else:
            _CHIP = "other"
    return _CHIP


def _pick_tk(Kp):
    """Largest K-block <= 1024 that divides Kp (Kp is a multiple of 128)."""
    if Kp <= 1024:
        return Kp
    for t in range(1024, 127, -128):
        if Kp % t == 0:
            return t
    return Kp


def _select_tiles(M, Nc, Kp):
    chip = _chip_kind()
    max_tm = 512 if chip == "v6" else 256
    max_tn = 128 if chip == "v5" else 256

    tm = min(max_tm, _round_up(M, 16))
    Mp = _round_up(M, tm)
    tn = Nc if Nc <= max_tn else max_tn
    Np = _round_up(Nc, tn)

    # v7x has 2 TensorCores: make sure there are >= 2 parallel grid blocks.
    if chip == "v7" and (Mp // tm) * (Np // tn) == 1:
        if Nc >= 256 and (Nc // 2) % 128 == 0:
            tn = Nc // 2
            Np = Nc
        elif Mp >= 32:
            tm = max(16, ((Mp // 2) // 16) * 16)
            Mp = _round_up(M, tm)

    tk = _pick_tk(Kp)
    return tm, tn, tk, Mp, Np


# ----------------------------------------------------------------------------
# Fused matmul + bias + (residual) + (ReLU) kernel, K split with f32 accumulator
# ----------------------------------------------------------------------------
def _make_matmul_kernel(relu, has_residual):
    if has_residual:
        def kernel(a_ref, b_ref, t_ref, r_ref, o_ref, acc_ref):
            k = pl.program_id(2)

            @pl.when(k == 0)
            def _():
                acc_ref[...] = jnp.zeros_like(acc_ref)

            acc_ref[...] += jnp.dot(a_ref[...], b_ref[...],
                                    preferred_element_type=jnp.float32)

            @pl.when(k == pl.num_programs(2) - 1)
            def _():
                y = acc_ref[...] + t_ref[...] + r_ref[...].astype(jnp.float32)
                if relu:
                    y = jnp.maximum(y, 0.0)
                o_ref[...] = y.astype(o_ref.dtype)
    else:
        def kernel(a_ref, b_ref, t_ref, o_ref, acc_ref):
            k = pl.program_id(2)

            @pl.when(k == 0)
            def _():
                acc_ref[...] = jnp.zeros_like(acc_ref)

            acc_ref[...] += jnp.dot(a_ref[...], b_ref[...],
                                    preferred_element_type=jnp.float32)

            @pl.when(k == pl.num_programs(2) - 1)
            def _():
                y = acc_ref[...] + t_ref[...]
                if relu:
                    y = jnp.maximum(y, 0.0)
                o_ref[...] = y.astype(o_ref.dtype)
    return kernel


def matmul_fused(a, b, bias, residual=None, relu=True, out_dtype=jnp.bfloat16):
    """act((a @ b) + bias [+ residual]) with bf16 operands, f32 accumulation."""
    M, K = a.shape
    K2, Nc = b.shape
    assert K == K2, (K, K2)

    a = a.astype(jnp.bfloat16)
    b = b.astype(jnp.bfloat16)
    bias = bias.astype(jnp.float32)

    tm, tn, tk, Mp, Np = _select_tiles(M, Nc, K)

    if Mp != M:
        a = jnp.pad(a, ((0, Mp - M), (0, 0)))
    if Np != Nc:
        b = jnp.pad(b, ((0, 0), (0, Np - Nc)))
        bias = jnp.pad(bias, ((0, 0), (0, Np - Nc)))

    nk = K // tk
    has_res = residual is not None

    inputs = [a, b, bias]
    in_specs = [
        pl.BlockSpec((tm, tk), lambda j, i, k: (i, k)),   # A
        pl.BlockSpec((tk, tn), lambda j, i, k: (k, j)),   # B (weights)
        pl.BlockSpec((1, tn), lambda j, i, k: (0, j)),    # bias row
    ]
    if has_res:
        r = residual.astype(jnp.bfloat16)
        if Mp != M or Np != Nc:
            r = jnp.pad(r, ((0, Mp - M), (0, Np - Nc)))
        inputs.append(r)
        in_specs.append(pl.BlockSpec((tm, tn), lambda j, i, k: (i, j)))

    out = pl.pallas_call(
        _make_matmul_kernel(relu, has_res),
        out_shape=jax.ShapeDtypeStruct((Mp, Np), out_dtype),
        grid=(Np // tn, Mp // tm, nk),
        in_specs=in_specs,
        out_specs=pl.BlockSpec((tm, tn), lambda j, i, k: (i, j)),
        scratch_shapes=[pltpu.VMEM((tm, tn), jnp.float32)],
        compiler_params=pltpu.CompilerParams(
            dimension_semantics=("parallel", "parallel", "arbitrary")),
    )(*inputs)

    if Mp != M or Np != Nc:
        out = out[:M, :Nc]
    return out


# ----------------------------------------------------------------------------
# Convolution = bf16 im2col (glue) + fused Pallas matmul
# ----------------------------------------------------------------------------
def conv2d_bn_act(x, pk, stride, padding, relu=True, residual=None):
    """x: NHWC bf16; pk: packed conv(+BN) params from pack_params."""
    N, H, W, Cin = x.shape
    kh, kw, cout = pk['kh'], pk['kw'], pk['cout']
    Ho = (H + 2 * padding - kh) // stride + 1
    Wo = (W + 2 * padding - kw) // stride + 1

    if kh == 1 and kw == 1 and padding == 0:
        # 1x1 conv: plain (strided) channel matmul, no patch expansion.
        a = x[:, ::stride, ::stride, :][:, :Ho, :Wo, :]
        a = a.reshape(N * Ho * Wo, Cin)
        if pk['kp'] != pk['k']:
            a = jnp.pad(a, ((0, 0), (0, pk['kp'] - pk['k'])))
    else:
        xp = jnp.pad(x, ((0, 0), (padding, padding), (padding, padding), (0, 0)))
        pats = [xp[:, dy:dy + stride * (Ho - 1) + 1:stride,
                      dx:dx + stride * (Wo - 1) + 1:stride, :]
                for dy in range(kh) for dx in range(kw)]
        if pk['kp'] != pk['k']:
            # Fold the K pad (to a 128 multiple) into the concat itself.
            pats.append(jnp.zeros((N, Ho, Wo, pk['kp'] - pk['k']), x.dtype))
        a = jnp.concatenate(pats, axis=-1).reshape(N * Ho * Wo, pk['kp'])

    res = residual.reshape(N * Ho * Wo, cout) if residual is not None else None
    out = matmul_fused(a, pk['w'], pk['bias'], residual=res, relu=relu,
                       out_dtype=jnp.bfloat16)
    return out.reshape(N, Ho, Wo, cout)


# ----------------------------------------------------------------------------
# MaxPool 3x3 / stride 2 / pad 1 (fused XLA maximum tree)
# ----------------------------------------------------------------------------
def maxpool_3x3_s2_p1(x):
    N, H, W, C = x.shape
    Ho = (H + 2 - 3) // 2 + 1
    Wo = (W + 2 - 3) // 2 + 1
    xp = jnp.pad(x, ((0, 0), (1, 1), (1, 1), (0, 0)), constant_values=-jnp.inf)
    out = None
    for dy in range(3):
        for dx in range(3):
            v = xp[:, dy:dy + 2 * (Ho - 1) + 1:2, dx:dx + 2 * (Wo - 1) + 1:2, :]
            out = v if out is None else jnp.maximum(out, v)
    return out


# ----------------------------------------------------------------------------
# Global average pool + FC fused into a single Pallas call
# ----------------------------------------------------------------------------
def _avgpool_fc_kernel(x_ref, w_ref, b_ref, o_ref):
    feats = jnp.mean(x_ref[...].astype(jnp.float32), axis=1)        # (N, C)
    y = jnp.dot(feats.astype(jnp.bfloat16), w_ref[...],
                preferred_element_type=jnp.float32)
    o_ref[...] = y + b_ref[...]


def avgpool_fc(x, fc):
    N, H, W, C = x.shape
    HW = H * W
    xr = x.reshape(N, HW, C).astype(jnp.bfloat16)
    w, bias, nclass = fc['w'], fc['bias'], fc['nclass']
    Npad = w.shape[1]
    out = pl.pallas_call(
        _avgpool_fc_kernel,
        out_shape=jax.ShapeDtypeStruct((N, Npad), jnp.float32),
        grid=(1,),
        in_specs=[pl.BlockSpec((N, HW, C), lambda n: (0, 0, 0)),
                  pl.BlockSpec((C, Npad), lambda n: (0, 0)),
                  pl.BlockSpec((1, Npad), lambda n: (0, 0))],
        out_specs=pl.BlockSpec((N, Npad), lambda n: (0, 0)),
    )(xr, w, bias)
    return out[:, :nclass]


# ----------------------------------------------------------------------------
# Parameter initialization (PyTorch layout, deterministic)
# ----------------------------------------------------------------------------
def _init_conv(key, cout, cin, kh, kw):
    # kaiming_normal_(mode='fan_out', nonlinearity='relu')
    std = math.sqrt(2.0 / (cout * kh * kw))
    return std * jax.random.normal(key, (cout, cin, kh, kw), dtype=jnp.float32)


def _init_bn(c):
    return dict(gamma=jnp.ones((c,), jnp.float32),
                beta=jnp.zeros((c,), jnp.float32),
                mean=jnp.zeros((c,), jnp.float32),
                var=jnp.ones((c,), jnp.float32))


def init_resnet18_params(key, num_classes=10):
    keys = iter(jax.random.split(key, 64))
    params = {}
    params['conv1'] = _init_conv(next(keys), 64, 3, 7, 7)
    params['bn1'] = _init_bn(64)
    in_ch = 64
    layer_cfg = [(64, 2, 1), (128, 2, 2), (256, 2, 2), (512, 2, 2)]
    for li, (ch, nblocks, stride) in enumerate(layer_cfg, start=1):
        blocks = []
        for b in range(nblocks):
            s = stride if b == 0 else 1
            bp = {'stride': s}
            bp['conv1'] = _init_conv(next(keys), ch, in_ch, 3, 3)
            bp['bn1'] = _init_bn(ch)
            bp['conv2'] = _init_conv(next(keys), ch, ch, 3, 3)
            bp['bn2'] = _init_bn(ch)
            if s != 1 or in_ch != ch:
                bp['ds_conv'] = _init_conv(next(keys), ch, in_ch, 1, 1)
                bp['ds_bn'] = _init_bn(ch)
            blocks.append(bp)
            in_ch = ch
        params[f'layer{li}'] = blocks
    bound = 1.0 / math.sqrt(512)
    params['fc_w'] = jax.random.uniform(next(keys), (num_classes, 512),
                                        minval=-bound, maxval=bound,
                                        dtype=jnp.float32)
    params['fc_b'] = jax.random.uniform(next(keys), (num_classes,),
                                        minval=-bound, maxval=bound,
                                        dtype=jnp.float32)
    return params


# ----------------------------------------------------------------------------
# One-time packing: fold BN scale into bf16 (K, Cout) weights, keep f32 bias
# ----------------------------------------------------------------------------
def _bn_fold(bn, eps=1e-5):
    scale = bn['gamma'] / jnp.sqrt(bn['var'] + eps)
    shift = bn['beta'] - bn['mean'] * scale
    return scale, shift


def _pack_conv_bn(w, bn):
    cout, cin, kh, kw = w.shape
    scale, shift = _bn_fold(bn)
    wm = jnp.transpose(w, (2, 3, 1, 0)).reshape(kh * kw * cin, cout)
    wm = wm * scale[None, :]                       # fold BN scale (f32 math)
    k = kh * kw * cin
    kp = _round_up(k, 128)                         # 128-aligned K (dense lanes)
    wm = jnp.pad(wm, ((0, kp - k), (0, 0))).astype(jnp.bfloat16)
    return dict(w=wm, bias=shift.reshape(1, -1).astype(jnp.float32),
                kh=kh, kw=kw, cin=cin, cout=cout, k=k, kp=kp)


def pack_params(params):
    packed = {'conv1': _pack_conv_bn(params['conv1'], params['bn1'])}
    for li in range(1, 5):
        blocks = []
        for bp in params[f'layer{li}']:
            blk = {'stride': bp['stride'],
                   'c1': _pack_conv_bn(bp['conv1'], bp['bn1']),
                   'c2': _pack_conv_bn(bp['conv2'], bp['bn2'])}
            if 'ds_conv' in bp:
                blk['ds'] = _pack_conv_bn(bp['ds_conv'], bp['ds_bn'])
            blocks.append(blk)
        packed[f'layer{li}'] = blocks
    nclass = params['fc_w'].shape[0]
    npad = _round_up(max(nclass, 128), 128)        # lane-dense FC output
    fcw = jnp.transpose(params['fc_w'])            # (512, nclass)
    fcw = jnp.pad(fcw, ((0, 0), (0, npad - nclass))).astype(jnp.bfloat16)
    fcb = jnp.pad(params['fc_b'].reshape(1, -1),
                  ((0, 0), (0, npad - nclass))).astype(jnp.float32)
    packed['fc'] = dict(w=fcw, bias=fcb, nclass=nclass)
    return packed


# ----------------------------------------------------------------------------
# Forward pass
# ----------------------------------------------------------------------------
def basic_block_fwd(x, blk):
    s = blk['stride']
    if 'ds' in blk:
        identity = conv2d_bn_act(x, blk['ds'], stride=s, padding=0, relu=False)
    else:
        identity = x
    out = conv2d_bn_act(x, blk['c1'], stride=s, padding=1, relu=True)
    # conv2 + bn2 + residual add + final ReLU fused into one Pallas call
    out = conv2d_bn_act(out, blk['c2'], stride=1, padding=1, relu=True,
                        residual=identity)
    return out


def resnet18_forward(x_nchw, packed):
    x = jnp.transpose(x_nchw, (0, 2, 3, 1)).astype(jnp.bfloat16)  # NCHW->NHWC
    x = conv2d_bn_act(x, packed['conv1'], stride=2, padding=3, relu=True)
    x = maxpool_3x3_s2_p1(x)
    for li in range(1, 5):
        for blk in packed[f'layer{li}']:
            x = basic_block_fwd(x, blk)
    logits = avgpool_fc(x, packed['fc'])                           # (N, classes)
    return logits


if __name__ == "__main__":
    key = jax.random.PRNGKey(0)
    kparam, kx = jax.random.split(key)
    params = init_resnet18_params(kparam, num_classes=10)
    packed = pack_params(params)
    x = jax.random.normal(kx, (2, 3, 32, 32), jnp.float32)

    fwd = jax.jit(lambda inp: resnet18_forward(inp, packed))
    out = jax.block_until_ready(fwd(x))
    assert out.shape == (2, 10), out.shape
    assert bool(jnp.all(jnp.isfinite(out)))
    print("KERNEL_OK")
</pallas_src>

<mosaic_0001>
module attributes {stable_mosaic.version = 11 : i64} {
  func.func @kernel(%arg0: i32, %arg1: i32, %arg2: i32, %arg3: memref<256x256xbf16, #tpu.memory_space<vmem>>, %arg4: memref<256x64xbf16, #tpu.memory_space<vmem>>, %arg5: memref<1x64xf32, #tpu.memory_space<vmem>>, %arg6: memref<256x64xbf16, #tpu.memory_space<vmem>>, %arg7: memref<256x64xf32, #tpu.memory_space<vmem>>) attributes {dimension_semantics = [#tpu.dimension_semantics<parallel>, #tpu.dimension_semantics<parallel>, #tpu.dimension_semantics<arbitrary>], iteration_bounds = array<i64: 1, 2, 1>, scalar_prefetch = 0 : i64, scratch_operands = 1 : i64, tpu.core_type = #tpu.core_type<tc>, window_params = [{transform_indices = @transform_0, window_bounds = array<i64: 256, 256>}, {transform_indices = @transform_1, window_bounds = array<i64: 256, 64>}, {transform_indices = @transform_2, window_bounds = array<i64: 1, 64>}, {transform_indices = @transform_3, window_bounds = array<i64: 256, 64>}]} {
    %c0_i32 = arith.constant 0 : i32
    %0 = arith.cmpi eq, %arg2, %c0_i32 : i32
    %1 = arith.extui %0 : i1 to i32
    %c0_i32_0 = arith.constant 0 : i32
    %2 = arith.cmpi ne, %1, %c0_i32_0 : i32
    scf.if %2 {
      %cst_10 = arith.constant 0.000000e+00 : f32
      %12 = vector.broadcast %cst_10 : f32 to vector<256x64xf32>
      %c0_11 = arith.constant 0 : index
      %c0_12 = arith.constant 0 : index
      %13 = vector.load %arg7[%c0_11, %c0_12] : memref<256x64xf32, #tpu.memory_space<vmem>>, vector<256x64xf32>
      tpu.vector_store %arg7[%c0_11, %c0_12], %12 {strides = array<i32>} : memref<256x64xf32, #tpu.memory_space<vmem>>, vector<256x64xf32>,
    } else {
    }
    %c0 = arith.constant 0 : index
    %c0_1 = arith.constant 0 : index
    %3 = vector.load %arg7[%c0, %c0_1] : memref<256x64xf32, #tpu.memory_space<vmem>>, vector<256x64xf32>
    %c0_2 = arith.constant 0 : index
    %c0_3 = arith.constant 0 : index
    %4 = vector.load %arg3[%c0_2, %c0_3] : memref<256x256xbf16, #tpu.memory_space<vmem>>, vector<256x256xbf16>
    %c0_4 = arith.constant 0 : index
    %c0_5 = arith.constant 0 : index
    %5 = vector.load %arg4[%c0_4, %c0_5] : memref<256x64xbf16, #tpu.memory_space<vmem>>, vector<256x64xbf16>
    %cst = arith.constant dense<0.000000e+00> : vector<256x64xf32>
    %6 = tpu.matmul %4, %5, %cst {dimension_numbers = #tpu.dot_dimension_numbers<[1], [0], [0], [1], [0, 0, 1, 1], [], []>} : vector<256x256xbf16>, vector<256x64xbf16>, vector<256x64xf32> -> vector<256x64xf32>
    %7 = arith.addf %3, %6 : vector<256x64xf32>
    %c0_6 = arith.constant 0 : index
    %c0_7 = arith.constant 0 : index
    %8 = vector.load %arg7[%c0_6, %c0_7] : memref<256x64xf32, #tpu.memory_space<vmem>>, vector<256x64xf32>
    tpu.vector_store %arg7[%c0_6, %c0_7], %7 {strides = array<i32>} : memref<256x64xf32, #tpu.memory_space<vmem>>, vector<256x64xf32>,
    %c0_i32_8 = arith.constant 0 : i32
    %9 = arith.cmpi eq, %arg2, %c0_i32_8 : i32
    %10 = arith.extui %9 : i1 to i32
    %c0_i32_9 = arith.constant 0 : i32
    %11 = arith.cmpi ne, %10, %c0_i32_9 : i32
    scf.if %11 {
      %c0_10 = arith.constant 0 : index
      %c0_11 = arith.constant 0 : index
      %12 = vector.load %arg7[%c0_10, %c0_11] : memref<256x64xf32, #tpu.memory_space<vmem>>, vector<256x64xf32>
      %c0_12 = arith.constant 0 : index
      %c0_13 = arith.constant 0 : index
      %13 = vector.load %arg5[%c0_12, %c0_13] : memref<1x64xf32, #tpu.memory_space<vmem>>, vector<1x64xf32>
      %14 = vector.broadcast %13 : vector<1x64xf32> to vector<256x64xf32>
      %15 = arith.addf %12, %14 : vector<256x64xf32>
      %cst_14 = arith.constant 0.000000e+00 : f32
      %16 = vector.broadcast %cst_14 : f32 to vector<256x64xf32>
      %17 = arith.maximumf %15, %16 : vector<256x64xf32>
      %18 = arith.truncf %17 : vector<256x64xf32> to vector<256x64xbf16>
      %c0_15 = arith.constant 0 : index
      %c0_16 = arith.constant 0 : index
      %19 = vector.load %arg6[%c0_15, %c0_16] : memref<256x64xbf16, #tpu.memory_space<vmem>>, vector<256x64xbf16>
      tpu.vector_store %arg6[%c0_15, %c0_16], %18 {strides = array<i32>} : memref<256x64xbf16, #tpu.memory_space<vmem>>, vector<256x64xbf16>,
    } else {
    }
    return
  }
  func.func @transform_0(%arg0: i32, %arg1: i32, %arg2: i32) -> (i32, i32) {
    %c0_i32 = arith.constant 0 : i32
    return %arg1, %arg2 : i32, i32
  }
  func.func @transform_1(%arg0: i32, %arg1: i32, %arg2: i32) -> (i32, i32) {
    %c0_i32 = arith.constant 0 : i32
    return %arg2, %arg0 : i32, i32
  }
  func.func @transform_2(%arg0: i32, %arg1: i32, %arg2: i32) -> (i32, i32) {
    %c0_i32 = arith.constant 0 : i32
    %c0_i32_0 = arith.constant 0 : i32
    return %c0_i32, %arg0 : i32, i32
  }
  func.func @transform_3(%arg0: i32, %arg1: i32, %arg2: i32) -> (i32, i32) {
    %c0_i32 = arith.constant 0 : i32
    return %arg1, %arg0 : i32, i32
  }
}

module attributes {stable_mosaic.version = 11 : i64} {
  func.func @kernel(%arg0: i32, %arg1: i32, %arg2: i32, %arg3: memref<128x640xbf16, #tpu.memory_space<vmem>>, %arg4: memref<640x64xbf16, #tpu.memory_space<vmem>>, %arg5: memref<1x64xf32, #tpu.memory_space<vmem>>, %arg6: memref<128x64xbf16, #tpu.memory_space<vmem>>, %arg7: memref<128x64xf32, #tpu.memory_space<vmem>>) attributes {dimension_semantics = [#tpu.dimension_semantics<parallel>, #tpu.dimension_semantics<parallel>, #tpu.dimension_semantics<arbitrary>], iteration_bounds = array<i64: 1, 1, 1>, scalar_prefetch = 0 : i64, scratch_operands = 1 : i64, tpu.core_type = #tpu.core_type<tc>, window_params = [{transform_indices = @transform_0, window_bounds = array<i64: 128, 640>}, {transform_indices = @transform_1, window_bounds = array<i64: 640, 64>}, {transform_indices = @transform_2, window_bounds = array<i64: 1, 64>}, {transform_indices = @transform_3, window_bounds = array<i64: 128, 64>}]} {
    %c0_i32 = arith.constant 0 : i32
    %0 = arith.cmpi eq, %arg2, %c0_i32 : i32
    %1 = arith.extui %0 : i1 to i32
    %c0_i32_0 = arith.constant 0 : i32
    %2 = arith.cmpi ne, %1, %c0_i32_0 : i32
    scf.if %2 {
      %cst_10 = arith.constant 0.000000e+00 : f32
      %12 = vector.broadcast %cst_10 : f32 to vector<128x64xf32>
      %c0_11 = arith.constant 0 : index
      %c0_12 = arith.constant 0 : index
      %13 = vector.load %arg7[%c0_11, %c0_12] : memref<128x64xf32, #tpu.memory_space<vmem>>, vector<128x64xf32>
      tpu.vector_store %arg7[%c0_11, %c0_12], %12 {strides = array<i32>} : memref<128x64xf32, #tpu.memory_space<vmem>>, vector<128x64xf32>,
    } else {
    }
    %c0 = arith.constant 0 : index
    %c0_1 = arith.constant 0 : index
    %3 = vector.load %arg7[%c0, %c0_1] : memref<128x64xf32, #tpu.memory_space<vmem>>, vector<128x64xf32>
    %c0_2 = arith.constant 0 : index
    %c0_3 = arith.constant 0 : index
    %4 = vector.load %arg3[%c0_2, %c0_3] : memref<128x640xbf16, #tpu.memory_space<vmem>>, vector<128x640xbf16>
    %c0_4 = arith.constant 0 : index
    %c0_5 = arith.constant 0 : index
    %5 = vector.load %arg4[%c0_4, %c0_5] : memref<640x64xbf16, #tpu.memory_space<vmem>>, vector<640x64xbf16>
    %cst = arith.constant dense<0.000000e+00> : vector<128x64xf32>
    %6 = tpu.matmul %4, %5, %cst {dimension_numbers = #tpu.dot_dimension_numbers<[1], [0], [0], [1], [0, 0, 1, 1], [], []>} : vector<128x640xbf16>, vector<640x64xbf16>, vector<128x64xf32> -> vector<128x64xf32>
    %7 = arith.addf %3, %6 : vector<128x64xf32>
    %c0_6 = arith.constant 0 : index
    %c0_7 = arith.constant 0 : index
    %8 = vector.load %arg7[%c0_6, %c0_7] : memref<128x64xf32, #tpu.memory_space<vmem>>, vector<128x64xf32>
    tpu.vector_store %arg7[%c0_6, %c0_7], %7 {strides = array<i32>} : memref<128x64xf32, #tpu.memory_space<vmem>>, vector<128x64xf32>,
    %c0_i32_8 = arith.constant 0 : i32
    %9 = arith.cmpi eq, %arg2, %c0_i32_8 : i32
    %10 = arith.extui %9 : i1 to i32
    %c0_i32_9 = arith.constant 0 : i32
    %11 = arith.cmpi ne, %10, %c0_i32_9 : i32
    scf.if %11 {
      %c0_10 = arith.constant 0 : index
      %c0_11 = arith.constant 0 : index
      %12 = vector.load %arg7[%c0_10, %c0_11] : memref<128x64xf32, #tpu.memory_space<vmem>>, vector<128x64xf32>
      %c0_12 = arith.constant 0 : index
      %c0_13 = arith.constant 0 : index
      %13 = vector.load %arg5[%c0_12, %c0_13] : memref<1x64xf32, #tpu.memory_space<vmem>>, vector<1x64xf32>
      %14 = vector.broadcast %13 : vector<1x64xf32> to vector<128x64xf32>
      %15 = arith.addf %12, %14 : vector<128x64xf32>
      %cst_14 = arith.constant 0.000000e+00 : f32
      %16 = vector.broadcast %cst_14 : f32 to vector<128x64xf32>
      %17 = arith.maximumf %15, %16 : vector<128x64xf32>
      %18 = arith.truncf %17 : vector<128x64xf32> to vector<128x64xbf16>
      %c0_15 = arith.constant 0 : index
      %c0_16 = arith.constant 0 : index
      %19 = vector.load %arg6[%c0_15, %c0_16] : memref<128x64xbf16, #tpu.memory_space<vmem>>, vector<128x64xbf16>
      tpu.vector_store %arg6[%c0_15, %c0_16], %18 {strides = array<i32>} : memref<128x64xbf16, #tpu.memory_space<vmem>>, vector<128x64xbf16>,
    } else {
    }
    return
  }
  func.func @transform_0(%arg0: i32, %arg1: i32, %arg2: i32) -> (i32, i32) {
    %c0_i32 = arith.constant 0 : i32
    return %arg1, %arg2 : i32, i32
  }
  func.func @transform_1(%arg0: i32, %arg1: i32, %arg2: i32) -> (i32, i32) {
    %c0_i32 = arith.constant 0 : i32
    return %arg2, %arg0 : i32, i32
  }
  func.func @transform_2(%arg0: i32, %arg1: i32, %arg2: i32) -> (i32, i32) {
    %c0_i32 = arith.constant 0 : i32
    %c0_i32_0 = arith.constant 0 : i32
    return %c0_i32, %arg0 : i32, i32
  }
  func.func @transform_3(%arg0: i32, %arg1: i32, %arg2: i32) -> (i32, i32) {
    %c0_i32 = arith.constant 0 : i32
    return %arg1, %arg0 : i32, i32
  }
}

module attributes {stable_mosaic.version = 11 : i64} {
  func.func @kernel(%arg0: i32, %arg1: i32, %arg2: i32, %arg3: memref<128x640xbf16, #tpu.memory_space<vmem>>, %arg4: memref<640x64xbf16, #tpu.memory_space<vmem>>, %arg5: memref<1x64xf32, #tpu.memory_space<vmem>>, %arg6: memref<128x64xbf16, #tpu.memory_space<vmem>>, %arg7: memref<128x64xbf16, #tpu.memory_space<vmem>>, %arg8: memref<128x64xf32, #tpu.memory_space<vmem>>) attributes {dimension_semantics = [#tpu.dimension_semantics<parallel>, #tpu.dimension_semantics<parallel>, #tpu.dimension_semantics<arbitrary>], iteration_bounds = array<i64: 1, 1, 1>, scalar_prefetch = 0 : i64, scratch_operands = 1 : i64, tpu.core_type = #tpu.core_type<tc>, window_params = [{transform_indices = @transform_0, window_bounds = array<i64: 128, 640>}, {transform_indices = @transform_1, window_bounds = array<i64: 640, 64>}, {transform_indices = @transform_2, window_bounds = array<i64: 1, 64>}, {transform_indices = @transform_3, window_bounds = array<i64: 128, 64>}, {transform_indices = @transform_4, window_bounds = array<i64: 128, 64>}]} {
    %c0_i32 = arith.constant 0 : i32
    %0 = arith.cmpi eq, %arg2, %c0_i32 : i32
    %1 = arith.extui %0 : i1 to i32
    %c0_i32_0 = arith.constant 0 : i32
    %2 = arith.cmpi ne, %1, %c0_i32_0 : i32
    scf.if %2 {
      %cst_10 = arith.constant 0.000000e+00 : f32
      %12 = vector.broadcast %cst_10 : f32 to vector<128x64xf32>
      %c0_11 = arith.constant 0 : index
      %c0_12 = arith.constant 0 : index
      %13 = vector.load %arg8[%c0_11, %c0_12] : memref<128x64xf32, #tpu.memory_space<vmem>>, vector<128x64xf32>
      tpu.vector_store %arg8[%c0_11, %c0_12], %12 {strides = array<i32>} : memref<128x64xf32, #tpu.memory_space<vmem>>, vector<128x64xf32>,
    } else {
    }
    %c0 = arith.constant 0 : index
    %c0_1 = arith.constant 0 : index
    %3 = vector.load %arg8[%c0, %c0_1] : memref<128x64xf32, #tpu.memory_space<vmem>>, vector<128x64xf32>
    %c0_2 = arith.constant 0 : index
    %c0_3 = arith.constant 0 : index
    %4 = vector.load %arg3[%c0_2, %c0_3] : memref<128x640xbf16, #tpu.memory_space<vmem>>, vector<128x640xbf16>
    %c0_4 = arith.constant 0 : index
    %c0_5 = arith.constant 0 : index
    %5 = vector.load %arg4[%c0_4, %c0_5] : memref<640x64xbf16, #tpu.memory_space<vmem>>, vector<640x64xbf16>
    %cst = arith.constant dense<0.000000e+00> : vector<128x64xf32>
    %6 = tpu.matmul %4, %5, %cst {dimension_numbers = #tpu.dot_dimension_numbers<[1], [0], [0], [1], [0, 0, 1, 1], [], []>} : vector<128x640xbf16>, vector<640x64xbf16>, vector<128x64xf32> -> vector<128x64xf32>
    %7 = arith.addf %3, %6 : vector<128x64xf32>
    %c0_6 = arith.constant 0 : index
    %c0_7 = arith.constant 0 : index
    %8 = vector.load %arg8[%c0_6, %c0_7] : memref<128x64xf32, #tpu.memory_space<vmem>>, vector<128x64xf32>
    tpu.vector_store %arg8[%c0_6, %c0_7], %7 {strides = array<i32>} : memref<128x64xf32, #tpu.memory_space<vmem>>, vector<128x64xf32>,
    %c0_i32_8 = arith.constant 0 : i32
    %9 = arith.cmpi eq, %arg2, %c0_i32_8 : i32
    %10 = arith.extui %9 : i1 to i32
    %c0_i32_9 = arith.constant 0 : i32
    %11 = arith.cmpi ne, %10, %c0_i32_9 : i32
    scf.if %11 {
      %c0_10 = arith.constant 0 : index
      %c0_11 = arith.constant 0 : index
      %12 = vector.load %arg8[%c0_10, %c0_11] : memref<128x64xf32, #tpu.memory_space<vmem>>, vector<128x64xf32>
      %c0_12 = arith.constant 0 : index
      %c0_13 = arith.constant 0 : index
      %13 = vector.load %arg5[%c0_12, %c0_13] : memref<1x64xf32, #tpu.memory_space<vmem>>, vector<1x64xf32>
      %14 = vector.broadcast %13 : vector<1x64xf32> to vector<128x64xf32>
      %15 = arith.addf %12, %14 : vector<128x64xf32>
      %c0_14 = arith.constant 0 : index
      %c0_15 = arith.constant 0 : index
      %16 = vector.load %arg6[%c0_14, %c0_15] : memref<128x64xbf16, #tpu.memory_space<vmem>>, vector<128x64xbf16>
      %17 = arith.extf %16 : vector<128x64xbf16> to vector<128x64xf32>
      %18 = arith.addf %15, %17 : vector<128x64xf32>
      %cst_16 = arith.constant 0.000000e+00 : f32
      %19 = vector.broadcast %cst_16 : f32 to vector<128x64xf32>
      %20 = arith.maximumf %18, %19 : vector<128x64xf32>
      %21 = arith.truncf %20 : vector<128x64xf32> to vector<128x64xbf16>
      %c0_17 = arith.constant 0 : index
      %c0_18 = arith.constant 0 : index
      %22 = vector.load %arg7[%c0_17, %c0_18] : memref<128x64xbf16, #tpu.memory_space<vmem>>, vector<128x64xbf16>
      tpu.vector_store %arg7[%c0_17, %c0_18], %21 {strides = array<i32>} : memref<128x64xbf16, #tpu.memory_space<vmem>>, vector<128x64xbf16>,
    } else {
    }
    return
  }
  func.func @transform_0(%arg0: i32, %arg1: i32, %arg2: i32) -> (i32, i32) {
    %c0_i32 = arith.constant 0 : i32
    return %arg1, %arg2 : i32, i32
  }
  func.func @transform_1(%arg0: i32, %arg1: i32, %arg2: i32) -> (i32, i32) {
    %c0_i32 = arith.constant 0 : i32
    return %arg2, %arg0 : i32, i32
  }
  func.func @transform_2(%arg0: i32, %arg1: i32, %arg2: i32) -> (i32, i32) {
    %c0_i32 = arith.constant 0 : i32
    %c0_i32_0 = arith.constant 0 : i32
    return %c0_i32, %arg0 : i32, i32
  }
  func.func @transform_3(%arg0: i32, %arg1: i32, %arg2: i32) -> (i32, i32) {
    %c0_i32 = arith.constant 0 : i32
    return %arg1, %arg0 : i32, i32
  }
  func.func @transform_4(%arg0: i32, %arg1: i32, %arg2: i32) -> (i32, i32) {
    %c0_i32 = arith.constant 0 : i32
    return %arg1, %arg0 : i32, i32
  }
}

module attributes {stable_mosaic.version = 11 : i64} {
  func.func @kernel(%arg0: i32, %arg1: i32, %arg2: i32, %arg3: memref<32x640xbf16, #tpu.memory_space<vmem>>, %arg4: memref<640x128xbf16, #tpu.memory_space<vmem>>, %arg5: memref<1x128xf32, #tpu.memory_space<vmem>>, %arg6: memref<32x128xbf16, #tpu.memory_space<vmem>>, %arg7: memref<32x128xf32, #tpu.memory_space<vmem>>) attributes {dimension_semantics = [#tpu.dimension_semantics<parallel>, #tpu.dimension_semantics<parallel>, #tpu.dimension_semantics<arbitrary>], iteration_bounds = array<i64: 1, 1, 1>, scalar_prefetch = 0 : i64, scratch_operands = 1 : i64, tpu.core_type = #tpu.core_type<tc>, window_params = [{transform_indices = @transform_0, window_bounds = array<i64: 32, 640>}, {transform_indices = @transform_1, window_bounds = array<i64: 640, 128>}, {transform_indices = @transform_2, window_bounds = array<i64: 1, 128>}, {transform_indices = @transform_3, window_bounds = array<i64: 32, 128>}]} {
    %c0_i32 = arith.constant 0 : i32
    %0 = arith.cmpi eq, %arg2, %c0_i32 : i32
    %1 = arith.extui %0 : i1 to i32
    %c0_i32_0 = arith.constant 0 : i32
    %2 = arith.cmpi ne, %1, %c0_i32_0 : i32
    scf.if %2 {
      %cst_10 = arith.constant 0.000000e+00 : f32
      %12 = vector.broadcast %cst_10 : f32 to vector<32x128xf32>
      %c0_11 = arith.constant 0 : index
      %c0_12 = arith.constant 0 : index
      %13 = vector.load %arg7[%c0_11, %c0_12] : memref<32x128xf32, #tpu.memory_space<vmem>>, vector<32x128xf32>
      tpu.vector_store %arg7[%c0_11, %c0_12], %12 {strides = array<i32>} : memref<32x128xf32, #tpu.memory_space<vmem>>, vector<32x128xf32>,
    } else {
    }
    %c0 = arith.constant 0 : index
    %c0_1 = arith.constant 0 : index
    %3 = vector.load %arg7[%c0, %c0_1] : memref<32x128xf32, #tpu.memory_space<vmem>>, vector<32x128xf32>
    %c0_2 = arith.constant 0 : index
    %c0_3 = arith.constant 0 : index
    %4 = vector.load %arg3[%c0_2, %c0_3] : memref<32x640xbf16, #tpu.memory_space<vmem>>, vector<32x640xbf16>
    %c0_4 = arith.constant 0 : index
    %c0_5 = arith.constant 0 : index
    %5 = vector.load %arg4[%c0_4, %c0_5] : memref<640x128xbf16, #tpu.memory_space<vmem>>, vector<640x128xbf16>
    %cst = arith.constant dense<0.000000e+00> : vector<32x128xf32>
    %6 = tpu.matmul %4, %5, %cst {dimension_numbers = #tpu.dot_dimension_numbers<[1], [0], [0], [1], [0, 0, 1, 1], [], []>} : vector<32x640xbf16>, vector<640x128xbf16>, vector<32x128xf32> -> vector<32x128xf32>
    %7 = arith.addf %3, %6 : vector<32x128xf32>
    %c0_6 = arith.constant 0 : index
    %c0_7 = arith.constant 0 : index
    %8 = vector.load %arg7[%c0_6, %c0_7] : memref<32x128xf32, #tpu.memory_space<vmem>>, vector<32x128xf32>
    tpu.vector_store %arg7[%c0_6, %c0_7], %7 {strides = array<i32>} : memref<32x128xf32, #tpu.memory_space<vmem>>, vector<32x128xf32>,
    %c0_i32_8 = arith.constant 0 : i32
    %9 = arith.cmpi eq, %arg2, %c0_i32_8 : i32
    %10 = arith.extui %9 : i1 to i32
    %c0_i32_9 = arith.constant 0 : i32
    %11 = arith.cmpi ne, %10, %c0_i32_9 : i32
    scf.if %11 {
      %c0_10 = arith.constant 0 : index
      %c0_11 = arith.constant 0 : index
      %12 = vector.load %arg7[%c0_10, %c0_11] : memref<32x128xf32, #tpu.memory_space<vmem>>, vector<32x128xf32>
      %c0_12 = arith.constant 0 : index
      %c0_13 = arith.constant 0 : index
      %13 = vector.load %arg5[%c0_12, %c0_13] : memref<1x128xf32, #tpu.memory_space<vmem>>, vector<1x128xf32>
      %14 = vector.broadcast %13 : vector<1x128xf32> to vector<32x128xf32>
      %15 = arith.addf %12, %14 : vector<32x128xf32>
      %cst_14 = arith.constant 0.000000e+00 : f32
      %16 = vector.broadcast %cst_14 : f32 to vector<32x128xf32>
      %17 = arith.maximumf %15, %16 : vector<32x128xf32>
      %18 = arith.truncf %17 : vector<32x128xf32> to vector<32x128xbf16>
      %c0_15 = arith.constant 0 : index
      %c0_16 = arith.constant 0 : index
      %19 = vector.load %arg6[%c0_15, %c0_16] : memref<32x128xbf16, #tpu.memory_space<vmem>>, vector<32x128xbf16>
      tpu.vector_store %arg6[%c0_15, %c0_16], %18 {strides = array<i32>} : memref<32x128xbf16, #tpu.memory_space<vmem>>, vector<32x128xbf16>,
    } else {
    }
    return
  }
  func.func @transform_0(%arg0: i32, %arg1: i32, %arg2: i32) -> (i32, i32) {
    %c0_i32 = arith.constant 0 : i32
    return %arg1, %arg2 : i32, i32
  }
  func.func @transform_1(%arg0: i32, %arg1: i32, %arg2: i32) -> (i32, i32) {
    %c0_i32 = arith.constant 0 : i32
    return %arg2, %arg0 : i32, i32
  }
  func.func @transform_2(%arg0: i32, %arg1: i32, %arg2: i32) -> (i32, i32) {
    %c0_i32 = arith.constant 0 : i32
    %c0_i32_0 = arith.constant 0 : i32
    return %c0_i32, %arg0 : i32, i32
  }
  func.func @transform_3(%arg0: i32, %arg1: i32, %arg2: i32) -> (i32, i32) {
    %c0_i32 = arith.constant 0 : i32
    return %arg1, %arg0 : i32, i32
  }
}

module attributes {stable_mosaic.version = 11 : i64} {
  func.func @kernel(%arg0: i32, %arg1: i32, %arg2: i32, %arg3: memref<32x384xbf16, #tpu.memory_space<vmem>>, %arg4: memref<384x128xbf16, #tpu.memory_space<vmem>>, %arg5: memref<1x128xf32, #tpu.memory_space<vmem>>, %arg6: memref<32x128xbf16, #tpu.memory_space<vmem>>, %arg7: memref<32x128xbf16, #tpu.memory_space<vmem>>, %arg8: memref<32x128xf32, #tpu.memory_space<vmem>>) attributes {dimension_semantics = [#tpu.dimension_semantics<parallel>, #tpu.dimension_semantics<parallel>, #tpu.dimension_semantics<arbitrary>], iteration_bounds = array<i64: 1, 1, 3>, scalar_prefetch = 0 : i64, scratch_operands = 1 : i64, tpu.core_type = #tpu.core_type<tc>, window_params = [{transform_indices = @transform_0, window_bounds = array<i64: 32, 384>}, {transform_indices = @transform_1, window_bounds = array<i64: 384, 128>}, {transform_indices = @transform_2, window_bounds = array<i64: 1, 128>}, {transform_indices = @transform_3, window_bounds = array<i64: 32, 128>}, {transform_indices = @transform_4, window_bounds = array<i64: 32, 128>}]} {
    %c0_i32 = arith.constant 0 : i32
    %0 = arith.cmpi eq, %arg2, %c0_i32 : i32
    %1 = arith.extui %0 : i1 to i32
    %c0_i32_0 = arith.constant 0 : i32
    %2 = arith.cmpi ne, %1, %c0_i32_0 : i32
    scf.if %2 {
      %cst_9 = arith.constant 0.000000e+00 : f32
      %12 = vector.broadcast %cst_9 : f32 to vector<32x128xf32>
      %c0_10 = arith.constant 0 : index
      %c0_11 = arith.constant 0 : index
      %13 = vector.load %arg8[%c0_10, %c0_11] : memref<32x128xf32, #tpu.memory_space<vmem>>, vector<32x128xf32>
      tpu.vector_store %arg8[%c0_10, %c0_11], %12 {strides = array<i32>} : memref<32x128xf32, #tpu.memory_space<vmem>>, vector<32x128xf32>,
    } else {
    }
    %c0 = arith.constant 0 : index
    %c0_1 = arith.constant 0 : index
    %3 = vector.load %arg8[%c0, %c0_1] : memref<32x128xf32, #tpu.memory_space<vmem>>, vector<32x128xf32>
    %c0_2 = arith.constant 0 : index
    %c0_3 = arith.constant 0 : index
    %4 = vector.load %arg3[%c0_2, %c0_3] : memref<32x384xbf16, #tpu.memory_space<vmem>>, vector<32x384xbf16>
    %c0_4 = arith.constant 0 : index
    %c0_5 = arith.constant 0 : index
    %5 = vector.load %arg4[%c0_4, %c0_5] : memref<384x128xbf16, #tpu.memory_space<vmem>>, vector<384x128xbf16>
    %cst = arith.constant dense<0.000000e+00> : vector<32x128xf32>
    %6 = tpu.matmul %4, %5, %cst {dimension_numbers = #tpu.dot_dimension_numbers<[1], [0], [0], [1], [0, 0, 1, 1], [], []>} : vector<32x384xbf16>, vector<384x128xbf16>, vector<32x128xf32> -> vector<32x128xf32>
    %7 = arith.addf %3, %6 : vector<32x128xf32>
    %c0_6 = arith.constant 0 : index
    %c0_7 = arith.constant 0 : index
    %8 = vector.load %arg8[%c0_6, %c0_7] : memref<32x128xf32, #tpu.memory_space<vmem>>, vector<32x128xf32>
    tpu.vector_store %arg8[%c0_6, %c0_7], %7 {strides = array<i32>} : memref<32x128xf32, #tpu.memory_space<vmem>>, vector<32x128xf32>,
    %c2_i32 = arith.constant 2 : i32
    %9 = arith.cmpi eq, %arg2, %c2_i32 : i32
    %10 = arith.extui %9 : i1 to i32
    %c0_i32_8 = arith.constant 0 : i32
    %11 = arith.cmpi ne, %10, %c0_i32_8 : i32
    scf.if %11 {
      %c0_9 = arith.constant 0 : index
      %c0_10 = arith.constant 0 : index
      %12 = vector.load %arg8[%c0_9, %c0_10] : memref<32x128xf32, #tpu.memory_space<vmem>>, vector<32x128xf32>
      %c0_11 = arith.constant 0 : index
      %c0_12 = arith.constant 0 : index
      %13 = vector.load %arg5[%c0_11, %c0_12] : memref<1x128xf32, #tpu.memory_space<vmem>>, vector<1x128xf32>
      %14 = vector.broadcast %13 : vector<1x128xf32> to vector<32x128xf32>
      %15 = arith.addf %12, %14 : vector<32x128xf32>
      %c0_13 = arith.constant 0 : index
      %c0_14 = arith.constant 0 : index
      %16 = vector.load %arg6[%c0_13, %c0_14] : memref<32x128xbf16, #tpu.memory_space<vmem>>, vector<32x128xbf16>
      %17 = arith.extf %16 : vector<32x128xbf16> to vector<32x128xf32>
      %18 = arith.addf %15, %17 : vector<32x128xf32>
      %cst_15 = arith.constant 0.000000e+00 : f32
      %19 = vector.broadcast %cst_15 : f32 to vector<32x128xf32>
      %20 = arith.maximumf %18, %19 : vector<32x128xf32>
      %21 = arith.truncf %20 : vector<32x128xf32> to vector<32x128xbf16>
      %c0_16 = arith.constant 0 : index
      %c0_17 = arith.constant 0 : index
      %22 = vector.load %arg7[%c0_16, %c0_17] : memref<32x128xbf16, #tpu.memory_space<vmem>>, vector<32x128xbf16>
      tpu.vector_store %arg7[%c0_16, %c0_17], %21 {strides = array<i32>} : memref<32x128xbf16, #tpu.memory_space<vmem>>, vector<32x128xbf16>,
    } else {
    }
    return
  }
  func.func @transform_0(%arg0: i32, %arg1: i32, %arg2: i32) -> (i32, i32) {
    %c0_i32 = arith.constant 0 : i32
    return %arg1, %arg2 : i32, i32
  }
  func.func @transform_1(%arg0: i32, %arg1: i32, %arg2: i32) -> (i32, i32) {
    %c0_i32 = arith.constant 0 : i32
    return %arg2, %arg0 : i32, i32
  }
  func.func @transform_2(%arg0: i32, %arg1: i32, %arg2: i32) -> (i32, i32) {
    %c0_i32 = arith.constant 0 : i32
    %c0_i32_0 = arith.constant 0 : i32
    return %c0_i32, %arg0 : i32, i32
  }
  func.func @transform_3(%arg0: i32, %arg1: i32, %arg2: i32) -> (i32, i32) {
    %c0_i32 = arith.constant 0 : i32
    return %arg1, %arg0 : i32, i32
  }
  func.func @transform_4(%arg0: i32, %arg1: i32, %arg2: i32) -> (i32, i32) {
    %c0_i32 = arith.constant 0 : i32
    return %arg1, %arg0 : i32, i32
  }
}

module attributes {stable_mosaic.version = 11 : i64} {
  func.func @kernel(%arg0: i32, %arg1: i32, %arg2: i32, %arg3: memref<32x128xbf16, #tpu.memory_space<vmem>>, %arg4: memref<128x128xbf16, #tpu.memory_space<vmem>>, %arg5: memref<1x128xf32, #tpu.memory_space<vmem>>, %arg6: memref<32x128xbf16, #tpu.memory_space<vmem>>, %arg7: memref<32x128xf32, #tpu.memory_space<vmem>>) attributes {dimension_semantics = [#tpu.dimension_semantics<parallel>, #tpu.dimension_semantics<parallel>, #tpu.dimension_semantics<arbitrary>], iteration_bounds = array<i64: 1, 1, 1>, scalar_prefetch = 0 : i64, scratch_operands = 1 : i64, tpu.core_type = #tpu.core_type<tc>, window_params = [{transform_indices = @transform_0, window_bounds = array<i64: 32, 128>}, {transform_indices = @transform_1, window_bounds = array<i64: 128, 128>}, {transform_indices = @transform_2, window_bounds = array<i64: 1, 128>}, {transform_indices = @transform_3, window_bounds = array<i64: 32, 128>}]} {
    %c0_i32 = arith.constant 0 : i32
    %0 = arith.cmpi eq, %arg2, %c0_i32 : i32
    %1 = arith.extui %0 : i1 to i32
    %c0_i32_0 = arith.constant 0 : i32
    %2 = arith.cmpi ne, %1, %c0_i32_0 : i32
    scf.if %2 {
      %cst_10 = arith.constant 0.000000e+00 : f32
      %12 = vector.broadcast %cst_10 : f32 to vector<32x128xf32>
      %c0_11 = arith.constant 0 : index
      %c0_12 = arith.constant 0 : index
      %13 = vector.load %arg7[%c0_11, %c0_12] : memref<32x128xf32, #tpu.memory_space<vmem>>, vector<32x128xf32>
      tpu.vector_store %arg7[%c0_11, %c0_12], %12 {strides = array<i32>} : memref<32x128xf32, #tpu.memory_space<vmem>>, vector<32x128xf32>,
    } else {
    }
    %c0 = arith.constant 0 : index
    %c0_1 = arith.constant 0 : index
    %3 = vector.load %arg7[%c0, %c0_1] : memref<32x128xf32, #tpu.memory_space<vmem>>, vector<32x128xf32>
    %c0_2 = arith.constant 0 : index
    %c0_3 = arith.constant 0 : index
    %4 = vector.load %arg3[%c0_2, %c0_3] : memref<32x128xbf16, #tpu.memory_space<vmem>>, vector<32x128xbf16>
    %c0_4 = arith.constant 0 : index
    %c0_5 = arith.constant 0 : index
    %5 = vector.load %arg4[%c0_4, %c0_5] : memref<128x128xbf16, #tpu.memory_space<vmem>>, vector<128x128xbf16>
    %cst = arith.constant dense<0.000000e+00> : vector<32x128xf32>
    %6 = tpu.matmul %4, %5, %cst {dimension_numbers = #tpu.dot_dimension_numbers<[1], [0], [0], [1], [0, 0, 1, 1], [], []>} : vector<32x128xbf16>, vector<128x128xbf16>, vector<32x128xf32> -> vector<32x128xf32>
    %7 = arith.addf %3, %6 : vector<32x128xf32>
    %c0_6 = arith.constant 0 : index
    %c0_7 = arith.constant 0 : index
    %8 = vector.load %arg7[%c0_6, %c0_7] : memref<32x128xf32, #tpu.memory_space<vmem>>, vector<32x128xf32>
    tpu.vector_store %arg7[%c0_6, %c0_7], %7 {strides = array<i32>} : memref<32x128xf32, #tpu.memory_space<vmem>>, vector<32x128xf32>,
    %c0_i32_8 = arith.constant 0 : i32
    %9 = arith.cmpi eq, %arg2, %c0_i32_8 : i32
    %10 = arith.extui %9 : i1 to i32
    %c0_i32_9 = arith.constant 0 : i32
    %11 = arith.cmpi ne, %10, %c0_i32_9 : i32
    scf.if %11 {
      %c0_10 = arith.constant 0 : index
      %c0_11 = arith.constant 0 : index
      %12 = vector.load %arg7[%c0_10, %c0_11] : memref<32x128xf32, #tpu.memory_space<vmem>>, vector<32x128xf32>
      %c0_12 = arith.constant 0 : index
      %c0_13 = arith.constant 0 : index
      %13 = vector.load %arg5[%c0_12, %c0_13] : memref<1x128xf32, #tpu.memory_space<vmem>>, vector<1x128xf32>
      %14 = vector.broadcast %13 : vector<1x128xf32> to vector<32x128xf32>
      %15 = arith.addf %12, %14 : vector<32x128xf32>
      %16 = arith.truncf %15 : vector<32x128xf32> to vector<32x128xbf16>
      %c0_14 = arith.constant 0 : index
      %c0_15 = arith.constant 0 : index
      %17 = vector.load %arg6[%c0_14, %c0_15] : memref<32x128xbf16, #tpu.memory_space<vmem>>, vector<32x128xbf16>
      tpu.vector_store %arg6[%c0_14, %c0_15], %16 {strides = array<i32>} : memref<32x128xbf16, #tpu.memory_space<vmem>>, vector<32x128xbf16>,
    } else {
    }
    return
  }
  func.func @transform_0(%arg0: i32, %arg1: i32, %arg2: i32) -> (i32, i32) {
    %c0_i32 = arith.constant 0 : i32
    return %arg1, %arg2 : i32, i32
  }
  func.func @transform_1(%arg0: i32, %arg1: i32, %arg2: i32) -> (i32, i32) {
    %c0_i32 = arith.constant 0 : i32
    return %arg2, %arg0 : i32, i32
  }
  func.func @transform_2(%arg0: i32, %arg1: i32, %arg2: i32) -> (i32, i32) {
    %c0_i32 = arith.constant 0 : i32
    %c0_i32_0 = arith.constant 0 : i32
    return %c0_i32, %arg0 : i32, i32
  }
  func.func @transform_3(%arg0: i32, %arg1: i32, %arg2: i32) -> (i32, i32) {
    %c0_i32 = arith.constant 0 : i32
    return %arg1, %arg0 : i32, i32
  }
}

module attributes {stable_mosaic.version = 11 : i64} {
  func.func @kernel(%arg0: i32, %arg1: i32, %arg2: i32, %arg3: memref<32x384xbf16, #tpu.memory_space<vmem>>, %arg4: memref<384x128xbf16, #tpu.memory_space<vmem>>, %arg5: memref<1x128xf32, #tpu.memory_space<vmem>>, %arg6: memref<32x128xbf16, #tpu.memory_space<vmem>>, %arg7: memref<32x128xf32, #tpu.memory_space<vmem>>) attributes {dimension_semantics = [#tpu.dimension_semantics<parallel>, #tpu.dimension_semantics<parallel>, #tpu.dimension_semantics<arbitrary>], iteration_bounds = array<i64: 1, 1, 3>, scalar_prefetch = 0 : i64, scratch_operands = 1 : i64, tpu.core_type = #tpu.core_type<tc>, window_params = [{transform_indices = @transform_0, window_bounds = array<i64: 32, 384>}, {transform_indices = @transform_1, window_bounds = array<i64: 384, 128>}, {transform_indices = @transform_2, window_bounds = array<i64: 1, 128>}, {transform_indices = @transform_3, window_bounds = array<i64: 32, 128>}]} {
    %c0_i32 = arith.constant 0 : i32
    %0 = arith.cmpi eq, %arg2, %c0_i32 : i32
    %1 = arith.extui %0 : i1 to i32
    %c0_i32_0 = arith.constant 0 : i32
    %2 = arith.cmpi ne, %1, %c0_i32_0 : i32
    scf.if %2 {
      %cst_9 = arith.constant 0.000000e+00 : f32
      %12 = vector.broadcast %cst_9 : f32 to vector<32x128xf32>
      %c0_10 = arith.constant 0 : index
      %c0_11 = arith.constant 0 : index
      %13 = vector.load %arg7[%c0_10, %c0_11] : memref<32x128xf32, #tpu.memory_space<vmem>>, vector<32x128xf32>
      tpu.vector_store %arg7[%c0_10, %c0_11], %12 {strides = array<i32>} : memref<32x128xf32, #tpu.memory_space<vmem>>, vector<32x128xf32>,
    } else {
    }
    %c0 = arith.constant 0 : index
    %c0_1 = arith.constant 0 : index
    %3 = vector.load %arg7[%c0, %c0_1] : memref<32x128xf32, #tpu.memory_space<vmem>>, vector<32x128xf32>
    %c0_2 = arith.constant 0 : index
    %c0_3 = arith.constant 0 : index
    %4 = vector.load %arg3[%c0_2, %c0_3] : memref<32x384xbf16, #tpu.memory_space<vmem>>, vector<32x384xbf16>
    %c0_4 = arith.constant 0 : index
    %c0_5 = arith.constant 0 : index
    %5 = vector.load %arg4[%c0_4, %c0_5] : memref<384x128xbf16, #tpu.memory_space<vmem>>, vector<384x128xbf16>
    %cst = arith.constant dense<0.000000e+00> : vector<32x128xf32>
    %6 = tpu.matmul %4, %5, %cst {dimension_numbers = #tpu.dot_dimension_numbers<[1], [0], [0], [1], [0, 0, 1, 1], [], []>} : vector<32x384xbf16>, vector<384x128xbf16>, vector<32x128xf32> -> vector<32x128xf32>
    %7 = arith.addf %3, %6 : vector<32x128xf32>
    %c0_6 = arith.constant 0 : index
    %c0_7 = arith.constant 0 : index
    %8 = vector.load %arg7[%c0_6, %c0_7] : memref<32x128xf32, #tpu.memory_space<vmem>>, vector<32x128xf32>
    tpu.vector_store %arg7[%c0_6, %c0_7], %7 {strides = array<i32>} : memref<32x128xf32, #tpu.memory_space<vmem>>, vector<32x128xf32>,
    %c2_i32 = arith.constant 2 : i32
    %9 = arith.cmpi eq, %arg2, %c2_i32 : i32
    %10 = arith.extui %9 : i1 to i32
    %c0_i32_8 = arith.constant 0 : i32
    %11 = arith.cmpi ne, %10, %c0_i32_8 : i32
    scf.if %11 {
      %c0_9 = arith.constant 0 : index
      %c0_10 = arith.constant 0 : index
      %12 = vector.load %arg7[%c0_9, %c0_10] : memref<32x128xf32, #tpu.memory_space<vmem>>, vector<32x128xf32>
      %c0_11 = arith.constant 0 : index
      %c0_12 = arith.constant 0 : index
      %13 = vector.load %arg5[%c0_11, %c0_12] : memref<1x128xf32, #tpu.memory_space<vmem>>, vector<1x128xf32>
      %14 = vector.broadcast %13 : vector<1x128xf32> to vector<32x128xf32>
      %15 = arith.addf %12, %14 : vector<32x128xf32>
      %cst_13 = arith.constant 0.000000e+00 : f32
      %16 = vector.broadcast %cst_13 : f32 to vector<32x128xf32>
      %17 = arith.maximumf %15, %16 : vector<32x128xf32>
      %18 = arith.truncf %17 : vector<32x128xf32> to vector<32x128xbf16>
      %c0_14 = arith.constant 0 : index
      %c0_15 = arith.constant 0 : index
      %19 = vector.load %arg6[%c0_14, %c0_15] : memref<32x128xbf16, #tpu.memory_space<vmem>>, vector<32x128xbf16>
      tpu.vector_store %arg6[%c0_14, %c0_15], %18 {strides = array<i32>} : memref<32x128xbf16, #tpu.memory_space<vmem>>, vector<32x128xbf16>,
    } else {
    }
    return
  }
  func.func @transform_0(%arg0: i32, %arg1: i32, %arg2: i32) -> (i32, i32) {
    %c0_i32 = arith.constant 0 : i32
    return %arg1, %arg2 : i32, i32
  }
  func.func @transform_1(%arg0: i32, %arg1: i32, %arg2: i32) -> (i32, i32) {
    %c0_i32 = arith.constant 0 : i32
    return %arg2, %arg0 : i32, i32
  }
  func.func @transform_2(%arg0: i32, %arg1: i32, %arg2: i32) -> (i32, i32) {
    %c0_i32 = arith.constant 0 : i32
    %c0_i32_0 = arith.constant 0 : i32
    return %c0_i32, %arg0 : i32, i32
  }
  func.func @transform_3(%arg0: i32, %arg1: i32, %arg2: i32) -> (i32, i32) {
    %c0_i32 = arith.constant 0 : i32
    return %arg1, %arg0 : i32, i32
  }
}

module attributes {stable_mosaic.version = 11 : i64} {
  func.func @kernel(%arg0: i32, %arg1: i32, %arg2: i32, %arg3: memref<16x384xbf16, #tpu.memory_space<vmem>>, %arg4: memref<384x256xbf16, #tpu.memory_space<vmem>>, %arg5: memref<1x256xf32, #tpu.memory_space<vmem>>, %arg6: memref<16x256xbf16, #tpu.memory_space<vmem>>, %arg7: memref<16x256xf32, #tpu.memory_space<vmem>>) attributes {dimension_semantics = [#tpu.dimension_semantics<parallel>, #tpu.dimension_semantics<parallel>, #tpu.dimension_semantics<arbitrary>], iteration_bounds = array<i64: 1, 1, 3>, scalar_prefetch = 0 : i64, scratch_operands = 1 : i64, tpu.core_type = #tpu.core_type<tc>, window_params = [{transform_indices = @transform_0, window_bounds = array<i64: 16, 384>}, {transform_indices = @transform_1, window_bounds = array<i64: 384, 256>}, {transform_indices = @transform_2, window_bounds = array<i64: 1, 256>}, {transform_indices = @transform_3, window_bounds = array<i64: 16, 256>}]} {
    %c0_i32 = arith.constant 0 : i32
    %0 = arith.cmpi eq, %arg2, %c0_i32 : i32
    %1 = arith.extui %0 : i1 to i32
    %c0_i32_0 = arith.constant 0 : i32
    %2 = arith.cmpi ne, %1, %c0_i32_0 : i32
    scf.if %2 {
      %cst_9 = arith.constant 0.000000e+00 : f32
      %12 = vector.broadcast %cst_9 : f32 to vector<16x256xf32>
      %c0_10 = arith.constant 0 : index
      %c0_11 = arith.constant 0 : index
      %13 = vector.load %arg7[%c0_10, %c0_11] : memref<16x256xf32, #tpu.memory_space<vmem>>, vector<16x256xf32>
      tpu.vector_store %arg7[%c0_10, %c0_11], %12 {strides = array<i32>} : memref<16x256xf32, #tpu.memory_space<vmem>>, vector<16x256xf32>,
    } else {
    }
    %c0 = arith.constant 0 : index
    %c0_1 = arith.constant 0 : index
    %3 = vector.load %arg7[%c0, %c0_1] : memref<16x256xf32, #tpu.memory_space<vmem>>, vector<16x256xf32>
    %c0_2 = arith.constant 0 : index
    %c0_3 = arith.constant 0 : index
    %4 = vector.load %arg3[%c0_2, %c0_3] : memref<16x384xbf16, #tpu.memory_space<vmem>>, vector<16x384xbf16>
    %c0_4 = arith.constant 0 : index
    %c0_5 = arith.constant 0 : index
    %5 = vector.load %arg4[%c0_4, %c0_5] : memref<384x256xbf16, #tpu.memory_space<vmem>>, vector<384x256xbf16>
    %cst = arith.constant dense<0.000000e+00> : vector<16x256xf32>
    %6 = tpu.matmul %4, %5, %cst {dimension_numbers = #tpu.dot_dimension_numbers<[1], [0], [0], [1], [0, 0, 1, 1], [], []>} : vector<16x384xbf16>, vector<384x256xbf16>, vector<16x256xf32> -> vector<16x256xf32>
    %7 = arith.addf %3, %6 : vector<16x256xf32>
    %c0_6 = arith.constant 0 : index
    %c0_7 = arith.constant 0 : index
    %8 = vector.load %arg7[%c0_6, %c0_7] : memref<16x256xf32, #tpu.memory_space<vmem>>, vector<16x256xf32>
    tpu.vector_store %arg7[%c0_6, %c0_7], %7 {strides = array<i32>} : memref<16x256xf32, #tpu.memory_space<vmem>>, vector<16x256xf32>,
    %c2_i32 = arith.constant 2 : i32
    %9 = arith.cmpi eq, %arg2, %c2_i32 : i32
    %10 = arith.extui %9 : i1 to i32
    %c0_i32_8 = arith.constant 0 : i32
    %11 = arith.cmpi ne, %10, %c0_i32_8 : i32
    scf.if %11 {
      %c0_9 = arith.constant 0 : index
      %c0_10 = arith.constant 0 : index
      %12 = vector.load %arg7[%c0_9, %c0_10] : memref<16x256xf32, #tpu.memory_space<vmem>>, vector<16x256xf32>
      %c0_11 = arith.constant 0 : index
      %c0_12 = arith.constant 0 : index
      %13 = vector.load %arg5[%c0_11, %c0_12] : memref<1x256xf32, #tpu.memory_space<vmem>>, vector<1x256xf32>
      %14 = vector.broadcast %13 : vector<1x256xf32> to vector<16x256xf32>
      %15 = arith.addf %12, %14 : vector<16x256xf32>
      %cst_13 = arith.constant 0.000000e+00 : f32
      %16 = vector.broadcast %cst_13 : f32 to vector<16x256xf32>
      %17 = arith.maximumf %15, %16 : vector<16x256xf32>
      %18 = arith.truncf %17 : vector<16x256xf32> to vector<16x256xbf16>
      %c0_14 = arith.constant 0 : index
      %c0_15 = arith.constant 0 : index
      %19 = vector.load %arg6[%c0_14, %c0_15] : memref<16x256xbf16, #tpu.memory_space<vmem>>, vector<16x256xbf16>
      tpu.vector_store %arg6[%c0_14, %c0_15], %18 {strides = array<i32>} : memref<16x256xbf16, #tpu.memory_space<vmem>>, vector<16x256xbf16>,
    } else {
    }
    return
  }
  func.func @transform_0(%arg0: i32, %arg1: i32, %arg2: i32) -> (i32, i32) {
    %c0_i32 = arith.constant 0 : i32
    return %arg1, %arg2 : i32, i32
  }
  func.func @transform_1(%arg0: i32, %arg1: i32, %arg2: i32) -> (i32, i32) {
    %c0_i32 = arith.constant 0 : i32
    return %arg2, %arg0 : i32, i32
  }
  func.func @transform_2(%arg0: i32, %arg1: i32, %arg2: i32) -> (i32, i32) {
    %c0_i32 = arith.constant 0 : i32
    %c0_i32_0 = arith.constant 0 : i32
    return %c0_i32, %arg0 : i32, i32
  }
  func.func @transform_3(%arg0: i32, %arg1: i32, %arg2: i32) -> (i32, i32) {
    %c0_i32 = arith.constant 0 : i32
    return %arg1, %arg0 : i32, i32
  }
}

module attributes {stable_mosaic.version = 11 : i64} {
  func.func @kernel(%arg0: i32, %arg1: i32, %arg2: i32, %arg3: memref<16x128xbf16, #tpu.memory_space<vmem>>, %arg4: memref<128x256xbf16, #tpu.memory_space<vmem>>, %arg5: memref<1x256xf32, #tpu.memory_space<vmem>>, %arg6: memref<16x256xbf16, #tpu.memory_space<vmem>>, %arg7: memref<16x256xf32, #tpu.memory_space<vmem>>) attributes {dimension_semantics = [#tpu.dimension_semantics<parallel>, #tpu.dimension_semantics<parallel>, #tpu.dimension_semantics<arbitrary>], iteration_bounds = array<i64: 1, 1, 1>, scalar_prefetch = 0 : i64, scratch_operands = 1 : i64, tpu.core_type = #tpu.core_type<tc>, window_params = [{transform_indices = @transform_0, window_bounds = array<i64: 16, 128>}, {transform_indices = @transform_1, window_bounds = array<i64: 128, 256>}, {transform_indices = @transform_2, window_bounds = array<i64: 1, 256>}, {transform_indices = @transform_3, window_bounds = array<i64: 16, 256>}]} {
    %c0_i32 = arith.constant 0 : i32
    %0 = arith.cmpi eq, %arg2, %c0_i32 : i32
    %1 = arith.extui %0 : i1 to i32
    %c0_i32_0 = arith.constant 0 : i32
    %2 = arith.cmpi ne, %1, %c0_i32_0 : i32
    scf.if %2 {
      %cst_10 = arith.constant 0.000000e+00 : f32
      %12 = vector.broadcast %cst_10 : f32 to vector<16x256xf32>
      %c0_11 = arith.constant 0 : index
      %c0_12 = arith.constant 0 : index
      %13 = vector.load %arg7[%c0_11, %c0_12] : memref<16x256xf32, #tpu.memory_space<vmem>>, vector<16x256xf32>
      tpu.vector_store %arg7[%c0_11, %c0_12], %12 {strides = array<i32>} : memref<16x256xf32, #tpu.memory_space<vmem>>, vector<16x256xf32>,
    } else {
    }
    %c0 = arith.constant 0 : index
    %c0_1 = arith.constant 0 : index
    %3 = vector.load %arg7[%c0, %c0_1] : memref<16x256xf32, #tpu.memory_space<vmem>>, vector<16x256xf32>
    %c0_2 = arith.constant 0 : index
    %c0_3 = arith.constant 0 : index
    %4 = vector.load %arg3[%c0_2, %c0_3] : memref<16x128xbf16, #tpu.memory_space<vmem>>, vector<16x128xbf16>
    %c0_4 = arith.constant 0 : index
    %c0_5 = arith.constant 0 : index
    %5 = vector.load %arg4[%c0_4, %c0_5] : memref<128x256xbf16, #tpu.memory_space<vmem>>, vector<128x256xbf16>
    %cst = arith.constant dense<0.000000e+00> : vector<16x256xf32>
    %6 = tpu.matmul %4, %5, %cst {dimension_numbers = #tpu.dot_dimension_numbers<[1], [0], [0], [1], [0, 0, 1, 1], [], []>} : vector<16x128xbf16>, vector<128x256xbf16>, vector<16x256xf32> -> vector<16x256xf32>
    %7 = arith.addf %3, %6 : vector<16x256xf32>
    %c0_6 = arith.constant 0 : index
    %c0_7 = arith.constant 0 : index
    %8 = vector.load %arg7[%c0_6, %c0_7] : memref<16x256xf32, #tpu.memory_space<vmem>>, vector<16x256xf32>
    tpu.vector_store %arg7[%c0_6, %c0_7], %7 {strides = array<i32>} : memref<16x256xf32, #tpu.memory_space<vmem>>, vector<16x256xf32>,
    %c0_i32_8 = arith.constant 0 : i32
    %9 = arith.cmpi eq, %arg2, %c0_i32_8 : i32
    %10 = arith.extui %9 : i1 to i32
    %c0_i32_9 = arith.constant 0 : i32
    %11 = arith.cmpi ne, %10, %c0_i32_9 : i32
    scf.if %11 {
      %c0_10 = arith.constant 0 : index
      %c0_11 = arith.constant 0 : index
      %12 = vector.load %arg7[%c0_10, %c0_11] : memref<16x256xf32, #tpu.memory_space<vmem>>, vector<16x256xf32>
      %c0_12 = arith.constant 0 : index
      %c0_13 = arith.constant 0 : index
      %13 = vector.load %arg5[%c0_12, %c0_13] : memref<1x256xf32, #tpu.memory_space<vmem>>, vector<1x256xf32>
      %14 = vector.broadcast %13 : vector<1x256xf32> to vector<16x256xf32>
      %15 = arith.addf %12, %14 : vector<16x256xf32>
      %16 = arith.truncf %15 : vector<16x256xf32> to vector<16x256xbf16>
      %c0_14 = arith.constant 0 : index
      %c0_15 = arith.constant 0 : index
      %17 = vector.load %arg6[%c0_14, %c0_15] : memref<16x256xbf16, #tpu.memory_space<vmem>>, vector<16x256xbf16>
      tpu.vector_store %arg6[%c0_14, %c0_15], %16 {strides = array<i32>} : memref<16x256xbf16, #tpu.memory_space<vmem>>, vector<16x256xbf16>,
    } else {
    }
    return
  }
  func.func @transform_0(%arg0: i32, %arg1: i32, %arg2: i32) -> (i32, i32) {
    %c0_i32 = arith.constant 0 : i32
    return %arg1, %arg2 : i32, i32
  }
  func.func @transform_1(%arg0: i32, %arg1: i32, %arg2: i32) -> (i32, i32) {
    %c0_i32 = arith.constant 0 : i32
    return %arg2, %arg0 : i32, i32
  }
  func.func @transform_2(%arg0: i32, %arg1: i32, %arg2: i32) -> (i32, i32) {
    %c0_i32 = arith.constant 0 : i32
    %c0_i32_0 = arith.constant 0 : i32
    return %c0_i32, %arg0 : i32, i32
  }
  func.func @transform_3(%arg0: i32, %arg1: i32, %arg2: i32) -> (i32, i32) {
    %c0_i32 = arith.constant 0 : i32
    return %arg1, %arg0 : i32, i32
  }
}

module attributes {stable_mosaic.version = 11 : i64} {
  func.func @kernel(%arg0: i32, %arg1: i32, %arg2: i32, %arg3: memref<16x768xbf16, #tpu.memory_space<vmem>>, %arg4: memref<768x256xbf16, #tpu.memory_space<vmem>>, %arg5: memref<1x256xf32, #tpu.memory_space<vmem>>, %arg6: memref<16x256xbf16, #tpu.memory_space<vmem>>, %arg7: memref<16x256xbf16, #tpu.memory_space<vmem>>, %arg8: memref<16x256xf32, #tpu.memory_space<vmem>>) attributes {dimension_semantics = [#tpu.dimension_semantics<parallel>, #tpu.dimension_semantics<parallel>, #tpu.dimension_semantics<arbitrary>], iteration_bounds = array<i64: 1, 1, 3>, scalar_prefetch = 0 : i64, scratch_operands = 1 : i64, tpu.core_type = #tpu.core_type<tc>, window_params = [{transform_indices = @transform_0, window_bounds = array<i64: 16, 768>}, {transform_indices = @transform_1, window_bounds = array<i64: 768, 256>}, {transform_indices = @transform_2, window_bounds = array<i64: 1, 256>}, {transform_indices = @transform_3, window_bounds = array<i64: 16, 256>}, {transform_indices = @transform_4, window_bounds = array<i64: 16, 256>}]} {
    %c0_i32 = arith.constant 0 : i32
    %0 = arith.cmpi eq, %arg2, %c0_i32 : i32
    %1 = arith.extui %0 : i1 to i32
    %c0_i32_0 = arith.constant 0 : i32
    %2 = arith.cmpi ne, %1, %c0_i32_0 : i32
    scf.if %2 {
      %cst_9 = arith.constant 0.000000e+00 : f32
      %12 = vector.broadcast %cst_9 : f32 to vector<16x256xf32>
      %c0_10 = arith.constant 0 : index
      %c0_11 = arith.constant 0 : index
      %13 = vector.load %arg8[%c0_10, %c0_11] : memref<16x256xf32, #tpu.memory_space<vmem>>, vector<16x256xf32>
      tpu.vector_store %arg8[%c0_10, %c0_11], %12 {strides = array<i32>} : memref<16x256xf32, #tpu.memory_space<vmem>>, vector<16x256xf32>,
    } else {
    }
    %c0 = arith.constant 0 : index
    %c0_1 = arith.constant 0 : index
    %3 = vector.load %arg8[%c0, %c0_1] : memref<16x256xf32, #tpu.memory_space<vmem>>, vector<16x256xf32>
    %c0_2 = arith.constant 0 : index
    %c0_3 = arith.constant 0 : index
    %4 = vector.load %arg3[%c0_2, %c0_3] : memref<16x768xbf16, #tpu.memory_space<vmem>>, vector<16x768xbf16>
    %c0_4 = arith.constant 0 : index
    %c0_5 = arith.constant 0 : index
    %5 = vector.load %arg4[%c0_4, %c0_5] : memref<768x256xbf16, #tpu.memory_space<vmem>>, vector<768x256xbf16>
    %cst = arith.constant dense<0.000000e+00> : vector<16x256xf32>
    %6 = tpu.matmul %4, %5, %cst {dimension_numbers = #tpu.dot_dimension_numbers<[1], [0], [0], [1], [0, 0, 1, 1], [], []>} : vector<16x768xbf16>, vector<768x256xbf16>, vector<16x256xf32> -> vector<16x256xf32>
    %7 = arith.addf %3, %6 : vector<16x256xf32>
    %c0_6 = arith.constant 0 : index
    %c0_7 = arith.constant 0 : index
    %8 = vector.load %arg8[%c0_6, %c0_7] : memref<16x256xf32, #tpu.memory_space<vmem>>, vector<16x256xf32>
    tpu.vector_store %arg8[%c0_6, %c0_7], %7 {strides = array<i32>} : memref<16x256xf32, #tpu.memory_space<vmem>>, vector<16x256xf32>,
    %c2_i32 = arith.constant 2 : i32
    %9 = arith.cmpi eq, %arg2, %c2_i32 : i32
    %10 = arith.extui %9 : i1 to i32
    %c0_i32_8 = arith.constant 0 : i32
    %11 = arith.cmpi ne, %10, %c0_i32_8 : i32
    scf.if %11 {
      %c0_9 = arith.constant 0 : index
      %c0_10 = arith.constant 0 : index
      %12 = vector.load %arg8[%c0_9, %c0_10] : memref<16x256xf32, #tpu.memory_space<vmem>>, vector<16x256xf32>
      %c0_11 = arith.constant 0 : index
      %c0_12 = arith.constant 0 : index
      %13 = vector.load %arg5[%c0_11, %c0_12] : memref<1x256xf32, #tpu.memory_space<vmem>>, vector<1x256xf32>
      %14 = vector.broadcast %13 : vector<1x256xf32> to vector<16x256xf32>
      %15 = arith.addf %12, %14 : vector<16x256xf32>
      %c0_13 = arith.constant 0 : index
      %c0_14 = arith.constant 0 : index
      %16 = vector.load %arg6[%c0_13, %c0_14] : memref<16x256xbf16, #tpu.memory_space<vmem>>, vector<16x256xbf16>
      %17 = arith.extf %16 : vector<16x256xbf16> to vector<16x256xf32>
      %18 = arith.addf %15, %17 : vector<16x256xf32>
      %cst_15 = arith.constant 0.000000e+00 : f32
      %19 = vector.broadcast %cst_15 : f32 to vector<16x256xf32>
      %20 = arith.maximumf %18, %19 : vector<16x256xf32>
      %21 = arith.truncf %20 : vector<16x256xf32> to vector<16x256xbf16>
      %c0_16 = arith.constant 0 : index
      %c0_17 = arith.constant 0 : index
      %22 = vector.load %arg7[%c0_16, %c0_17] : memref<16x256xbf16, #tpu.memory_space<vmem>>, vector<16x256xbf16>
      tpu.vector_store %arg7[%c0_16, %c0_17], %21 {strides = array<i32>} : memref<16x256xbf16, #tpu.memory_space<vmem>>, vector<16x256xbf16>,
    } else {
    }
    return
  }
  func.func @transform_0(%arg0: i32, %arg1: i32, %arg2: i32) -> (i32, i32) {
    %c0_i32 = arith.constant 0 : i32
    return %arg1, %arg2 : i32, i32
  }
  func.func @transform_1(%arg0: i32, %arg1: i32, %arg2: i32) -> (i32, i32) {
    %c0_i32 = arith.constant 0 : i32
    return %arg2, %arg0 : i32, i32
  }
  func.func @transform_2(%arg0: i32, %arg1: i32, %arg2: i32) -> (i32, i32) {
    %c0_i32 = arith.constant 0 : i32
    %c0_i32_0 = arith.constant 0 : i32
    return %c0_i32, %arg0 : i32, i32
  }
  func.func @transform_3(%arg0: i32, %arg1: i32, %arg2: i32) -> (i32, i32) {
    %c0_i32 = arith.constant 0 : i32
    return %arg1, %arg0 : i32, i32
  }
  func.func @transform_4(%arg0: i32, %arg1: i32, %arg2: i32) -> (i32, i32) {
    %c0_i32 = arith.constant 0 : i32
    return %arg1, %arg0 : i32, i32
  }
}

module attributes {stable_mosaic.version = 11 : i64} {
  func.func @kernel(%arg0: i32, %arg1: i32, %arg2: i32, %arg3: memref<16x768xbf16, #tpu.memory_space<vmem>>, %arg4: memref<768x256xbf16, #tpu.memory_space<vmem>>, %arg5: memref<1x256xf32, #tpu.memory_space<vmem>>, %arg6: memref<16x256xbf16, #tpu.memory_space<vmem>>, %arg7: memref<16x256xf32, #tpu.memory_space<vmem>>) attributes {dimension_semantics = [#tpu.dimension_semantics<parallel>, #tpu.dimension_semantics<parallel>, #tpu.dimension_semantics<arbitrary>], iteration_bounds = array<i64: 1, 1, 3>, scalar_prefetch = 0 : i64, scratch_operands = 1 : i64, tpu.core_type = #tpu.core_type<tc>, window_params = [{transform_indices = @transform_0, window_bounds = array<i64: 16, 768>}, {transform_indices = @transform_1, window_bounds = array<i64: 768, 256>}, {transform_indices = @transform_2, window_bounds = array<i64: 1, 256>}, {transform_indices = @transform_3, window_bounds = array<i64: 16, 256>}]} {
    %c0_i32 = arith.constant 0 : i32
    %0 = arith.cmpi eq, %arg2, %c0_i32 : i32
    %1 = arith.extui %0 : i1 to i32
    %c0_i32_0 = arith.constant 0 : i32
    %2 = arith.cmpi ne, %1, %c0_i32_0 : i32
    scf.if %2 {
      %cst_9 = arith.constant 0.000000e+00 : f32
      %12 = vector.broadcast %cst_9 : f32 to vector<16x256xf32>
      %c0_10 = arith.constant 0 : index
      %c0_11 = arith.constant 0 : index
      %13 = vector.load %arg7[%c0_10, %c0_11] : memref<16x256xf32, #tpu.memory_space<vmem>>, vector<16x256xf32>
      tpu.vector_store %arg7[%c0_10, %c0_11], %12 {strides = array<i32>} : memref<16x256xf32, #tpu.memory_space<vmem>>, vector<16x256xf32>,
    } else {
    }
    %c0 = arith.constant 0 : index
    %c0_1 = arith.constant 0 : index
    %3 = vector.load %arg7[%c0, %c0_1] : memref<16x256xf32, #tpu.memory_space<vmem>>, vector<16x256xf32>
    %c0_2 = arith.constant 0 : index
    %c0_3 = arith.constant 0 : index
    %4 = vector.load %arg3[%c0_2, %c0_3] : memref<16x768xbf16, #tpu.memory_space<vmem>>, vector<16x768xbf16>
    %c0_4 = arith.constant 0 : index
    %c0_5 = arith.constant 0 : index
    %5 = vector.load %arg4[%c0_4, %c0_5] : memref<768x256xbf16, #tpu.memory_space<vmem>>, vector<768x256xbf16>
    %cst = arith.constant dense<0.000000e+00> : vector<16x256xf32>
    %6 = tpu.matmul %4, %5, %cst {dimension_numbers = #tpu.dot_dimension_numbers<[1], [0], [0], [1], [0, 0, 1, 1], [], []>} : vector<16x768xbf16>, vector<768x256xbf16>, vector<16x256xf32> -> vector<16x256xf32>
    %7 = arith.addf %3, %6 : vector<16x256xf32>
    %c0_6 = arith.constant 0 : index
    %c0_7 = arith.constant 0 : index
    %8 = vector.load %arg7[%c0_6, %c0_7] : memref<16x256xf32, #tpu.memory_space<vmem>>, vector<16x256xf32>
    tpu.vector_store %arg7[%c0_6, %c0_7], %7 {strides = array<i32>} : memref<16x256xf32, #tpu.memory_space<vmem>>, vector<16x256xf32>,
    %c2_i32 = arith.constant 2 : i32
    %9 = arith.cmpi eq, %arg2, %c2_i32 : i32
    %10 = arith.extui %9 : i1 to i32
    %c0_i32_8 = arith.constant 0 : i32
    %11 = arith.cmpi ne, %10, %c0_i32_8 : i32
    scf.if %11 {
      %c0_9 = arith.constant 0 : index
      %c0_10 = arith.constant 0 : index
      %12 = vector.load %arg7[%c0_9, %c0_10] : memref<16x256xf32, #tpu.memory_space<vmem>>, vector<16x256xf32>
      %c0_11 = arith.constant 0 : index
      %c0_12 = arith.constant 0 : index
      %13 = vector.load %arg5[%c0_11, %c0_12] : memref<1x256xf32, #tpu.memory_space<vmem>>, vector<1x256xf32>
      %14 = vector.broadcast %13 : vector<1x256xf32> to vector<16x256xf32>
      %15 = arith.addf %12, %14 : vector<16x256xf32>
      %cst_13 = arith.constant 0.000000e+00 : f32
      %16 = vector.broadcast %cst_13 : f32 to vector<16x256xf32>
      %17 = arith.maximumf %15, %16 : vector<16x256xf32>
      %18 = arith.truncf %17 : vector<16x256xf32> to vector<16x256xbf16>
      %c0_14 = arith.constant 0 : index
      %c0_15 = arith.constant 0 : index
      %19 = vector.load %arg6[%c0_14, %c0_15] : memref<16x256xbf16, #tpu.memory_space<vmem>>, vector<16x256xbf16>
      tpu.vector_store %arg6[%c0_14, %c0_15], %18 {strides = array<i32>} : memref<16x256xbf16, #tpu.memory_space<vmem>>, vector<16x256xbf16>,
    } else {
    }
    return
  }
  func.func @transform_0(%arg0: i32, %arg1: i32, %arg2: i32) -> (i32, i32) {
    %c0_i32 = arith.constant 0 : i32
    return %arg1, %arg2 : i32, i32
  }
  func.func @transform_1(%arg0: i32, %arg1: i32, %arg2: i32) -> (i32, i32) {
    %c0_i32 = arith.constant 0 : i32
    return %arg2, %arg0 : i32, i32
  }
  func.func @transform_2(%arg0: i32, %arg1: i32, %arg2: i32) -> (i32, i32) {
    %c0_i32 = arith.constant 0 : i32
    %c0_i32_0 = arith.constant 0 : i32
    return %c0_i32, %arg0 : i32, i32
  }
  func.func @transform_3(%arg0: i32, %arg1: i32, %arg2: i32) -> (i32, i32) {
    %c0_i32 = arith.constant 0 : i32
    return %arg1, %arg0 : i32, i32
  }
}

module attributes {stable_mosaic.version = 11 : i64} {
  func.func @kernel(%arg0: i32, %arg1: i32, %arg2: i32, %arg3: memref<16x768xbf16, #tpu.memory_space<vmem>>, %arg4: memref<768x256xbf16, #tpu.memory_space<vmem>>, %arg5: memref<1x256xf32, #tpu.memory_space<vmem>>, %arg6: memref<16x256xbf16, #tpu.memory_space<vmem>>, %arg7: memref<16x256xf32, #tpu.memory_space<vmem>>) attributes {dimension_semantics = [#tpu.dimension_semantics<parallel>, #tpu.dimension_semantics<parallel>, #tpu.dimension_semantics<arbitrary>], iteration_bounds = array<i64: 2, 1, 3>, scalar_prefetch = 0 : i64, scratch_operands = 1 : i64, tpu.core_type = #tpu.core_type<tc>, window_params = [{transform_indices = @transform_0, window_bounds = array<i64: 16, 768>}, {transform_indices = @transform_1, window_bounds = array<i64: 768, 256>}, {transform_indices = @transform_2, window_bounds = array<i64: 1, 256>}, {transform_indices = @transform_3, window_bounds = array<i64: 16, 256>}]} {
    %c0_i32 = arith.constant 0 : i32
    %0 = arith.cmpi eq, %arg2, %c0_i32 : i32
    %1 = arith.extui %0 : i1 to i32
    %c0_i32_0 = arith.constant 0 : i32
    %2 = arith.cmpi ne, %1, %c0_i32_0 : i32
    scf.if %2 {
      %cst_9 = arith.constant 0.000000e+00 : f32
      %12 = vector.broadcast %cst_9 : f32 to vector<16x256xf32>
      %c0_10 = arith.constant 0 : index
      %c0_11 = arith.constant 0 : index
      %13 = vector.load %arg7[%c0_10, %c0_11] : memref<16x256xf32, #tpu.memory_space<vmem>>, vector<16x256xf32>
      tpu.vector_store %arg7[%c0_10, %c0_11], %12 {strides = array<i32>} : memref<16x256xf32, #tpu.memory_space<vmem>>, vector<16x256xf32>,
    } else {
    }
    %c0 = arith.constant 0 : index
    %c0_1 = arith.constant 0 : index
    %3 = vector.load %arg7[%c0, %c0_1] : memref<16x256xf32, #tpu.memory_space<vmem>>, vector<16x256xf32>
    %c0_2 = arith.constant 0 : index
    %c0_3 = arith.constant 0 : index
    %4 = vector.load %arg3[%c0_2, %c0_3] : memref<16x768xbf16, #tpu.memory_space<vmem>>, vector<16x768xbf16>
    %c0_4 = arith.constant 0 : index
    %c0_5 = arith.constant 0 : index
    %5 = vector.load %arg4[%c0_4, %c0_5] : memref<768x256xbf16, #tpu.memory_space<vmem>>, vector<768x256xbf16>
    %cst = arith.constant dense<0.000000e+00> : vector<16x256xf32>
    %6 = tpu.matmul %4, %5, %cst {dimension_numbers = #tpu.dot_dimension_numbers<[1], [0], [0], [1], [0, 0, 1, 1], [], []>} : vector<16x768xbf16>, vector<768x256xbf16>, vector<16x256xf32> -> vector<16x256xf32>
    %7 = arith.addf %3, %6 : vector<16x256xf32>
    %c0_6 = arith.constant 0 : index
    %c0_7 = arith.constant 0 : index
    %8 = vector.load %arg7[%c0_6, %c0_7] : memref<16x256xf32, #tpu.memory_space<vmem>>, vector<16x256xf32>
    tpu.vector_store %arg7[%c0_6, %c0_7], %7 {strides = array<i32>} : memref<16x256xf32, #tpu.memory_space<vmem>>, vector<16x256xf32>,
    %c2_i32 = arith.constant 2 : i32
    %9 = arith.cmpi eq, %arg2, %c2_i32 : i32
    %10 = arith.extui %9 : i1 to i32
    %c0_i32_8 = arith.constant 0 : i32
    %11 = arith.cmpi ne, %10, %c0_i32_8 : i32
    scf.if %11 {
      %c0_9 = arith.constant 0 : index
      %c0_10 = arith.constant 0 : index
      %12 = vector.load %arg7[%c0_9, %c0_10] : memref<16x256xf32, #tpu.memory_space<vmem>>, vector<16x256xf32>
      %c0_11 = arith.constant 0 : index
      %c0_12 = arith.constant 0 : index
      %13 = vector.load %arg5[%c0_11, %c0_12] : memref<1x256xf32, #tpu.memory_space<vmem>>, vector<1x256xf32>
      %14 = vector.broadcast %13 : vector<1x256xf32> to vector<16x256xf32>
      %15 = arith.addf %12, %14 : vector<16x256xf32>
      %cst_13 = arith.constant 0.000000e+00 : f32
      %16 = vector.broadcast %cst_13 : f32 to vector<16x256xf32>
      %17 = arith.maximumf %15, %16 : vector<16x256xf32>
      %18 = arith.truncf %17 : vector<16x256xf32> to vector<16x256xbf16>
      %c0_14 = arith.constant 0 : index
      %c0_15 = arith.constant 0 : index
      %19 = vector.load %arg6[%c0_14, %c0_15] : memref<16x256xbf16, #tpu.memory_space<vmem>>, vector<16x256xbf16>
      tpu.vector_store %arg6[%c0_14, %c0_15], %18 {strides = array<i32>} : memref<16x256xbf16, #tpu.memory_space<vmem>>, vector<16x256xbf16>,
    } else {
    }
    return
  }
  func.func @transform_0(%arg0: i32, %arg1: i32, %arg2: i32) -> (i32, i32) {
    %c0_i32 = arith.constant 0 : i32
    return %arg1, %arg2 : i32, i32
  }
  func.func @transform_1(%arg0: i32, %arg1: i32, %arg2: i32) -> (i32, i32) {
    %c0_i32 = arith.constant 0 : i32
    return %arg2, %arg0 : i32, i32
  }
  func.func @transform_2(%arg0: i32, %arg1: i32, %arg2: i32) -> (i32, i32) {
    %c0_i32 = arith.constant 0 : i32
    %c0_i32_0 = arith.constant 0 : i32
    return %c0_i32, %arg0 : i32, i32
  }
  func.func @transform_3(%arg0: i32, %arg1: i32, %arg2: i32) -> (i32, i32) {
    %c0_i32 = arith.constant 0 : i32
    return %arg1, %arg0 : i32, i32
  }
}

module attributes {stable_mosaic.version = 11 : i64} {
  func.func @kernel(%arg0: i32, %arg1: i32, %arg2: i32, %arg3: memref<16x256xbf16, #tpu.memory_space<vmem>>, %arg4: memref<256x256xbf16, #tpu.memory_space<vmem>>, %arg5: memref<1x256xf32, #tpu.memory_space<vmem>>, %arg6: memref<16x256xbf16, #tpu.memory_space<vmem>>, %arg7: memref<16x256xf32, #tpu.memory_space<vmem>>) attributes {dimension_semantics = [#tpu.dimension_semantics<parallel>, #tpu.dimension_semantics<parallel>, #tpu.dimension_semantics<arbitrary>], iteration_bounds = array<i64: 2, 1, 1>, scalar_prefetch = 0 : i64, scratch_operands = 1 : i64, tpu.core_type = #tpu.core_type<tc>, window_params = [{transform_indices = @transform_0, window_bounds = array<i64: 16, 256>}, {transform_indices = @transform_1, window_bounds = array<i64: 256, 256>}, {transform_indices = @transform_2, window_bounds = array<i64: 1, 256>}, {transform_indices = @transform_3, window_bounds = array<i64: 16, 256>}]} {
    %c0_i32 = arith.constant 0 : i32
    %0 = arith.cmpi eq, %arg2, %c0_i32 : i32
    %1 = arith.extui %0 : i1 to i32
    %c0_i32_0 = arith.constant 0 : i32
    %2 = arith.cmpi ne, %1, %c0_i32_0 : i32
    scf.if %2 {
      %cst_10 = arith.constant 0.000000e+00 : f32
      %12 = vector.broadcast %cst_10 : f32 to vector<16x256xf32>
      %c0_11 = arith.constant 0 : index
      %c0_12 = arith.constant 0 : index
      %13 = vector.load %arg7[%c0_11, %c0_12] : memref<16x256xf32, #tpu.memory_space<vmem>>, vector<16x256xf32>
      tpu.vector_store %arg7[%c0_11, %c0_12], %12 {strides = array<i32>} : memref<16x256xf32, #tpu.memory_space<vmem>>, vector<16x256xf32>,
    } else {
    }
    %c0 = arith.constant 0 : index
    %c0_1 = arith.constant 0 : index
    %3 = vector.load %arg7[%c0, %c0_1] : memref<16x256xf32, #tpu.memory_space<vmem>>, vector<16x256xf32>
    %c0_2 = arith.constant 0 : index
    %c0_3 = arith.constant 0 : index
    %4 = vector.load %arg3[%c0_2, %c0_3] : memref<16x256xbf16, #tpu.memory_space<vmem>>, vector<16x256xbf16>
    %c0_4 = arith.constant 0 : index
    %c0_5 = arith.constant 0 : index
    %5 = vector.load %arg4[%c0_4, %c0_5] : memref<256x256xbf16, #tpu.memory_space<vmem>>, vector<256x256xbf16>
    %cst = arith.constant dense<0.000000e+00> : vector<16x256xf32>
    %6 = tpu.matmul %4, %5, %cst {dimension_numbers = #tpu.dot_dimension_numbers<[1], [0], [0], [1], [0, 0, 1, 1], [], []>} : vector<16x256xbf16>, vector<256x256xbf16>, vector<16x256xf32> -> vector<16x256xf32>
    %7 = arith.addf %3, %6 : vector<16x256xf32>
    %c0_6 = arith.constant 0 : index
    %c0_7 = arith.constant 0 : index
    %8 = vector.load %arg7[%c0_6, %c0_7] : memref<16x256xf32, #tpu.memory_space<vmem>>, vector<16x256xf32>
    tpu.vector_store %arg7[%c0_6, %c0_7], %7 {strides = array<i32>} : memref<16x256xf32, #tpu.memory_space<vmem>>, vector<16x256xf32>,
    %c0_i32_8 = arith.constant 0 : i32
    %9 = arith.cmpi eq, %arg2, %c0_i32_8 : i32
    %10 = arith.extui %9 : i1 to i32
    %c0_i32_9 = arith.constant 0 : i32
    %11 = arith.cmpi ne, %10, %c0_i32_9 : i32
    scf.if %11 {
      %c0_10 = arith.constant 0 : index
      %c0_11 = arith.constant 0 : index
      %12 = vector.load %arg7[%c0_10, %c0_11] : memref<16x256xf32, #tpu.memory_space<vmem>>, vector<16x256xf32>
      %c0_12 = arith.constant 0 : index
      %c0_13 = arith.constant 0 : index
      %13 = vector.load %arg5[%c0_12, %c0_13] : memref<1x256xf32, #tpu.memory_space<vmem>>, vector<1x256xf32>
      %14 = vector.broadcast %13 : vector<1x256xf32> to vector<16x256xf32>
      %15 = arith.addf %12, %14 : vector<16x256xf32>
      %16 = arith.truncf %15 : vector<16x256xf32> to vector<16x256xbf16>
      %c0_14 = arith.constant 0 : index
      %c0_15 = arith.constant 0 : index
      %17 = vector.load %arg6[%c0_14, %c0_15] : memref<16x256xbf16, #tpu.memory_space<vmem>>, vector<16x256xbf16>
      tpu.vector_store %arg6[%c0_14, %c0_15], %16 {strides = array<i32>} : memref<16x256xbf16, #tpu.memory_space<vmem>>, vector<16x256xbf16>,
    } else {
    }
    return
  }
  func.func @transform_0(%arg0: i32, %arg1: i32, %arg2: i32) -> (i32, i32) {
    %c0_i32 = arith.constant 0 : i32
    return %arg1, %arg2 : i32, i32
  }
  func.func @transform_1(%arg0: i32, %arg1: i32, %arg2: i32) -> (i32, i32) {
    %c0_i32 = arith.constant 0 : i32
    return %arg2, %arg0 : i32, i32
  }
  func.func @transform_2(%arg0: i32, %arg1: i32, %arg2: i32) -> (i32, i32) {
    %c0_i32 = arith.constant 0 : i32
    %c0_i32_0 = arith.constant 0 : i32
    return %c0_i32, %arg0 : i32, i32
  }
  func.func @transform_3(%arg0: i32, %arg1: i32, %arg2: i32) -> (i32, i32) {
    %c0_i32 = arith.constant 0 : i32
    return %arg1, %arg0 : i32, i32
  }
}

module attributes {stable_mosaic.version = 11 : i64} {
  func.func @kernel(%arg0: i32, %arg1: i32, %arg2: i32, %arg3: memref<16x768xbf16, #tpu.memory_space<vmem>>, %arg4: memref<768x256xbf16, #tpu.memory_space<vmem>>, %arg5: memref<1x256xf32, #tpu.memory_space<vmem>>, %arg6: memref<16x256xbf16, #tpu.memory_space<vmem>>, %arg7: memref<16x256xbf16, #tpu.memory_space<vmem>>, %arg8: memref<16x256xf32, #tpu.memory_space<vmem>>) attributes {dimension_semantics = [#tpu.dimension_semantics<parallel>, #tpu.dimension_semantics<parallel>, #tpu.dimension_semantics<arbitrary>], iteration_bounds = array<i64: 2, 1, 6>, scalar_prefetch = 0 : i64, scratch_operands = 1 : i64, tpu.core_type = #tpu.core_type<tc>, window_params = [{transform_indices = @transform_0, window_bounds = array<i64: 16, 768>}, {transform_indices = @transform_1, window_bounds = array<i64: 768, 256>}, {transform_indices = @transform_2, window_bounds = array<i64: 1, 256>}, {transform_indices = @transform_3, window_bounds = array<i64: 16, 256>}, {transform_indices = @transform_4, window_bounds = array<i64: 16, 256>}]} {
    %c0_i32 = arith.constant 0 : i32
    %0 = arith.cmpi eq, %arg2, %c0_i32 : i32
    %1 = arith.extui %0 : i1 to i32
    %c0_i32_0 = arith.constant 0 : i32
    %2 = arith.cmpi ne, %1, %c0_i32_0 : i32
    scf.if %2 {
      %cst_9 = arith.constant 0.000000e+00 : f32
      %12 = vector.broadcast %cst_9 : f32 to vector<16x256xf32>
      %c0_10 = arith.constant 0 : index
      %c0_11 = arith.constant 0 : index
      %13 = vector.load %arg8[%c0_10, %c0_11] : memref<16x256xf32, #tpu.memory_space<vmem>>, vector<16x256xf32>
      tpu.vector_store %arg8[%c0_10, %c0_11], %12 {strides = array<i32>} : memref<16x256xf32, #tpu.memory_space<vmem>>, vector<16x256xf32>,
    } else {
    }
    %c0 = arith.constant 0 : index
    %c0_1 = arith.constant 0 : index
    %3 = vector.load %arg8[%c0, %c0_1] : memref<16x256xf32, #tpu.memory_space<vmem>>, vector<16x256xf32>
    %c0_2 = arith.constant 0 : index
    %c0_3 = arith.constant 0 : index
    %4 = vector.load %arg3[%c0_2, %c0_3] : memref<16x768xbf16, #tpu.memory_space<vmem>>, vector<16x768xbf16>
    %c0_4 = arith.constant 0 : index
    %c0_5 = arith.constant 0 : index
    %5 = vector.load %arg4[%c0_4, %c0_5] : memref<768x256xbf16, #tpu.memory_space<vmem>>, vector<768x256xbf16>
    %cst = arith.constant dense<0.000000e+00> : vector<16x256xf32>
    %6 = tpu.matmul %4, %5, %cst {dimension_numbers = #tpu.dot_dimension_numbers<[1], [0], [0], [1], [0, 0, 1, 1], [], []>} : vector<16x768xbf16>, vector<768x256xbf16>, vector<16x256xf32> -> vector<16x256xf32>
    %7 = arith.addf %3, %6 : vector<16x256xf32>
    %c0_6 = arith.constant 0 : index
    %c0_7 = arith.constant 0 : index
    %8 = vector.load %arg8[%c0_6, %c0_7] : memref<16x256xf32, #tpu.memory_space<vmem>>, vector<16x256xf32>
    tpu.vector_store %arg8[%c0_6, %c0_7], %7 {strides = array<i32>} : memref<16x256xf32, #tpu.memory_space<vmem>>, vector<16x256xf32>,
    %c5_i32 = arith.constant 5 : i32
    %9 = arith.cmpi eq, %arg2, %c5_i32 : i32
    %10 = arith.extui %9 : i1 to i32
    %c0_i32_8 = arith.constant 0 : i32
    %11 = arith.cmpi ne, %10, %c0_i32_8 : i32
    scf.if %11 {
      %c0_9 = arith.constant 0 : index
      %c0_10 = arith.constant 0 : index
      %12 = vector.load %arg8[%c0_9, %c0_10] : memref<16x256xf32, #tpu.memory_space<vmem>>, vector<16x256xf32>
      %c0_11 = arith.constant 0 : index
      %c0_12 = arith.constant 0 : index
      %13 = vector.load %arg5[%c0_11, %c0_12] : memref<1x256xf32, #tpu.memory_space<vmem>>, vector<1x256xf32>
      %14 = vector.broadcast %13 : vector<1x256xf32> to vector<16x256xf32>
      %15 = arith.addf %12, %14 : vector<16x256xf32>
      %c0_13 = arith.constant 0 : index
      %c0_14 = arith.constant 0 : index
      %16 = vector.load %arg6[%c0_13, %c0_14] : memref<16x256xbf16, #tpu.memory_space<vmem>>, vector<16x256xbf16>
      %17 = arith.extf %16 : vector<16x256xbf16> to vector<16x256xf32>
      %18 = arith.addf %15, %17 : vector<16x256xf32>
      %cst_15 = arith.constant 0.000000e+00 : f32
      %19 = vector.broadcast %cst_15 : f32 to vector<16x256xf32>
      %20 = arith.maximumf %18, %19 : vector<16x256xf32>
      %21 = arith.truncf %20 : vector<16x256xf32> to vector<16x256xbf16>
      %c0_16 = arith.constant 0 : index
      %c0_17 = arith.constant 0 : index
      %22 = vector.load %arg7[%c0_16, %c0_17] : memref<16x256xbf16, #tpu.memory_space<vmem>>, vector<16x256xbf16>
      tpu.vector_store %arg7[%c0_16, %c0_17], %21 {strides = array<i32>} : memref<16x256xbf16, #tpu.memory_space<vmem>>, vector<16x256xbf16>,
    } else {
    }
    return
  }
  func.func @transform_0(%arg0: i32, %arg1: i32, %arg2: i32) -> (i32, i32) {
    %c0_i32 = arith.constant 0 : i32
    return %arg1, %arg2 : i32, i32
  }
  func.func @transform_1(%arg0: i32, %arg1: i32, %arg2: i32) -> (i32, i32) {
    %c0_i32 = arith.constant 0 : i32
    return %arg2, %arg0 : i32, i32
  }
  func.func @transform_2(%arg0: i32, %arg1: i32, %arg2: i32) -> (i32, i32) {
    %c0_i32 = arith.constant 0 : i32
    %c0_i32_0 = arith.constant 0 : i32
    return %c0_i32, %arg0 : i32, i32
  }
  func.func @transform_3(%arg0: i32, %arg1: i32, %arg2: i32) -> (i32, i32) {
    %c0_i32 = arith.constant 0 : i32
    return %arg1, %arg0 : i32, i32
  }
  func.func @transform_4(%arg0: i32, %arg1: i32, %arg2: i32) -> (i32, i32) {
    %c0_i32 = arith.constant 0 : i32
    return %arg1, %arg0 : i32, i32
  }
}

module attributes {stable_mosaic.version = 11 : i64} {
  func.func @kernel(%arg0: i32, %arg1: i32, %arg2: i32, %arg3: memref<16x768xbf16, #tpu.memory_space<vmem>>, %arg4: memref<768x256xbf16, #tpu.memory_space<vmem>>, %arg5: memref<1x256xf32, #tpu.memory_space<vmem>>, %arg6: memref<16x256xbf16, #tpu.memory_space<vmem>>, %arg7: memref<16x256xf32, #tpu.memory_space<vmem>>) attributes {dimension_semantics = [#tpu.dimension_semantics<parallel>, #tpu.dimension_semantics<parallel>, #tpu.dimension_semantics<arbitrary>], iteration_bounds = array<i64: 2, 1, 6>, scalar_prefetch = 0 : i64, scratch_operands = 1 : i64, tpu.core_type = #tpu.core_type<tc>, window_params = [{transform_indices = @transform_0, window_bounds = array<i64: 16, 768>}, {transform_indices = @transform_1, window_bounds = array<i64: 768, 256>}, {transform_indices = @transform_2, window_bounds = array<i64: 1, 256>}, {transform_indices = @transform_3, window_bounds = array<i64: 16, 256>}]} {
    %c0_i32 = arith.constant 0 : i32
    %0 = arith.cmpi eq, %arg2, %c0_i32 : i32
    %1 = arith.extui %0 : i1 to i32
    %c0_i32_0 = arith.constant 0 : i32
    %2 = arith.cmpi ne, %1, %c0_i32_0 : i32
    scf.if %2 {
      %cst_9 = arith.constant 0.000000e+00 : f32
      %12 = vector.broadcast %cst_9 : f32 to vector<16x256xf32>
      %c0_10 = arith.constant 0 : index
      %c0_11 = arith.constant 0 : index
      %13 = vector.load %arg7[%c0_10, %c0_11] : memref<16x256xf32, #tpu.memory_space<vmem>>, vector<16x256xf32>
      tpu.vector_store %arg7[%c0_10, %c0_11], %12 {strides = array<i32>} : memref<16x256xf32, #tpu.memory_space<vmem>>, vector<16x256xf32>,
    } else {
    }
    %c0 = arith.constant 0 : index
    %c0_1 = arith.constant 0 : index
    %3 = vector.load %arg7[%c0, %c0_1] : memref<16x256xf32, #tpu.memory_space<vmem>>, vector<16x256xf32>
    %c0_2 = arith.constant 0 : index
    %c0_3 = arith.constant 0 : index
    %4 = vector.load %arg3[%c0_2, %c0_3] : memref<16x768xbf16, #tpu.memory_space<vmem>>, vector<16x768xbf16>
    %c0_4 = arith.constant 0 : index
    %c0_5 = arith.constant 0 : index
    %5 = vector.load %arg4[%c0_4, %c0_5] : memref<768x256xbf16, #tpu.memory_space<vmem>>, vector<768x256xbf16>
    %cst = arith.constant dense<0.000000e+00> : vector<16x256xf32>
    %6 = tpu.matmul %4, %5, %cst {dimension_numbers = #tpu.dot_dimension_numbers<[1], [0], [0], [1], [0, 0, 1, 1], [], []>} : vector<16x768xbf16>, vector<768x256xbf16>, vector<16x256xf32> -> vector<16x256xf32>
    %7 = arith.addf %3, %6 : vector<16x256xf32>
    %c0_6 = arith.constant 0 : index
    %c0_7 = arith.constant 0 : index
    %8 = vector.load %arg7[%c0_6, %c0_7] : memref<16x256xf32, #tpu.memory_space<vmem>>, vector<16x256xf32>
    tpu.vector_store %arg7[%c0_6, %c0_7], %7 {strides = array<i32>} : memref<16x256xf32, #tpu.memory_space<vmem>>, vector<16x256xf32>,
    %c5_i32 = arith.constant 5 : i32
    %9 = arith.cmpi eq, %arg2, %c5_i32 : i32
    %10 = arith.extui %9 : i1 to i32
    %c0_i32_8 = arith.constant 0 : i32
    %11 = arith.cmpi ne, %10, %c0_i32_8 : i32
    scf.if %11 {
      %c0_9 = arith.constant 0 : index
      %c0_10 = arith.constant 0 : index
      %12 = vector.load %arg7[%c0_9, %c0_10] : memref<16x256xf32, #tpu.memory_space<vmem>>, vector<16x256xf32>
      %c0_11 = arith.constant 0 : index
      %c0_12 = arith.constant 0 : index
      %13 = vector.load %arg5[%c0_11, %c0_12] : memref<1x256xf32, #tpu.memory_space<vmem>>, vector<1x256xf32>
      %14 = vector.broadcast %13 : vector<1x256xf32> to vector<16x256xf32>
      %15 = arith.addf %12, %14 : vector<16x256xf32>
      %cst_13 = arith.constant 0.000000e+00 : f32
      %16 = vector.broadcast %cst_13 : f32 to vector<16x256xf32>
      %17 = arith.maximumf %15, %16 : vector<16x256xf32>
      %18 = arith.truncf %17 : vector<16x256xf32> to vector<16x256xbf16>
      %c0_14 = arith.constant 0 : index
      %c0_15 = arith.constant 0 : index
      %19 = vector.load %arg6[%c0_14, %c0_15] : memref<16x256xbf16, #tpu.memory_space<vmem>>, vector<16x256xbf16>
      tpu.vector_store %arg6[%c0_14, %c0_15], %18 {strides = array<i32>} : memref<16x256xbf16, #tpu.memory_space<vmem>>, vector<16x256xbf16>,
    } else {
    }
    return
  }
  func.func @transform_0(%arg0: i32, %arg1: i32, %arg2: i32) -> (i32, i32) {
    %c0_i32 = arith.constant 0 : i32
    return %arg1, %arg2 : i32, i32
  }
  func.func @transform_1(%arg0: i32, %arg1: i32, %arg2: i32) -> (i32, i32) {
    %c0_i32 = arith.constant 0 : i32
    return %arg2, %arg0 : i32, i32
  }
  func.func @transform_2(%arg0: i32, %arg1: i32, %arg2: i32) -> (i32, i32) {
    %c0_i32 = arith.constant 0 : i32
    %c0_i32_0 = arith.constant 0 : i32
    return %c0_i32, %arg0 : i32, i32
  }
  func.func @transform_3(%arg0: i32, %arg1: i32, %arg2: i32) -> (i32, i32) {
    %c0_i32 = arith.constant 0 : i32
    return %arg1, %arg0 : i32, i32
  }
}

module attributes {stable_mosaic.version = 11 : i64} {
  func.func @_avgpool_fc_kernel(%arg0: i32, %arg1: memref<2x1x512xbf16, #tpu.memory_space<vmem>>, %arg2: memref<512x128xbf16, #tpu.memory_space<vmem>>, %arg3: memref<1x128xf32, #tpu.memory_space<vmem>>, %arg4: memref<2x128xf32, #tpu.memory_space<vmem>>) attributes {dimension_semantics = [#tpu.dimension_semantics<arbitrary>], iteration_bounds = array<i64: 1>, scalar_prefetch = 0 : i64, scratch_operands = 0 : i64, tpu.core_type = #tpu.core_type<tc>, window_params = [{pipeline_mode = #tpu.pipeline_mode<synchronous>, transform_indices = @transform_0, window_bounds = array<i64: 2, 1, 512>}, {pipeline_mode = #tpu.pipeline_mode<synchronous>, transform_indices = @transform_1, window_bounds = array<i64: 512, 128>}, {pipeline_mode = #tpu.pipeline_mode<synchronous>, transform_indices = @transform_2, window_bounds = array<i64: 1, 128>}, {pipeline_mode = #tpu.pipeline_mode<synchronous>, transform_indices = @transform_3, window_bounds = array<i64: 2, 128>}]} {
    %c0 = arith.constant 0 : index
    %c0_0 = arith.constant 0 : index
    %c0_1 = arith.constant 0 : index
    %0 = vector.load %arg1[%c0, %c0_0, %c0_1] : memref<2x1x512xbf16, #tpu.memory_space<vmem>>, vector<2x1x512xbf16>
    %1 = arith.extf %0 : vector<2x1x512xbf16> to vector<2x1x512xf32>
    %cst = arith.constant dense<0.000000e+00> : vector<2x512xf32>
    %2 = vector.multi_reduction <add>, %1, %cst [1] : vector<2x1x512xf32> to vector<2x512xf32>
    %cst_2 = arith.constant 1.000000e+00 : f32
    %3 = vector.broadcast %cst_2 : f32 to vector<2x512xf32>
    %4 = arith.divf %2, %3 : vector<2x512xf32>
    %5 = arith.truncf %4 : vector<2x512xf32> to vector<2x512xbf16>
    %c0_3 = arith.constant 0 : index
    %c0_4 = arith.constant 0 : index
    %6 = vector.load %arg2[%c0_3, %c0_4] : memref<512x128xbf16, #tpu.memory_space<vmem>>, vector<512x128xbf16>
    %cst_5 = arith.constant dense<0.000000e+00> : vector<2x128xf32>
    %7 = tpu.matmul %5, %6, %cst_5 {dimension_numbers = #tpu.dot_dimension_numbers<[1], [0], [0], [1], [0, 0, 1, 1], [], []>} : vector<2x512xbf16>, vector<512x128xbf16>, vector<2x128xf32> -> vector<2x128xf32>
    %c0_6 = arith.constant 0 : index
    %c0_7 = arith.constant 0 : index
    %8 = vector.load %arg3[%c0_6, %c0_7] : memref<1x128xf32, #tpu.memory_space<vmem>>, vector<1x128xf32>
    %9 = vector.broadcast %8 : vector<1x128xf32> to vector<2x128xf32>
    %10 = arith.addf %7, %9 : vector<2x128xf32>
    %c0_8 = arith.constant 0 : index
    %c0_9 = arith.constant 0 : index
    %11 = vector.load %arg4[%c0_8, %c0_9] : memref<2x128xf32, #tpu.memory_space<vmem>>, vector<2x128xf32>
    tpu.vector_store %arg4[%c0_8, %c0_9], %10 {strides = array<i32>} : memref<2x128xf32, #tpu.memory_space<vmem>>, vector<2x128xf32>,
    return
  }
  func.func @transform_0(%arg0: i32) -> (i32, i32, i32) {
    %c0_i32 = arith.constant 0 : i32
    %c0_i32_0 = arith.constant 0 : i32
    %c0_i32_1 = arith.constant 0 : i32
    %c0_i32_2 = arith.constant 0 : i32
    return %c0_i32, %c0_i32_0, %c0_i32_1 : i32, i32, i32
  }
  func.func @transform_1(%arg0: i32) -> (i32, i32) {
    %c0_i32 = arith.constant 0 : i32
    %c0_i32_0 = arith.constant 0 : i32
    %c0_i32_1 = arith.constant 0 : i32
    return %c0_i32, %c0_i32_0 : i32, i32
  }
  func.func @transform_2(%arg0: i32) -> (i32, i32) {
    %c0_i32 = arith.constant 0 : i32
    %c0_i32_0 = arith.constant 0 : i32
    %c0_i32_1 = arith.constant 0 : i32
    return %c0_i32, %c0_i32_0 : i32, i32
  }
  func.func @transform_3(%arg0: i32) -> (i32, i32) {
    %c0_i32 = arith.constant 0 : i32
    %c0_i32_0 = arith.constant 0 : i32
    %c0_i32_1 = arith.constant 0 : i32
    return %c0_i32, %c0_i32_0 : i32, i32
  }
}

</mosaic_0001>

<bundles_post_ra>
// kernel: _lambda_.21
= control target key start
LH: loop header
LB: loop body
LE: loop exit
PB: predicated region body
PF: predicated region fallthrough
CT: control target
= control target key end

     0   :  { %s1654_s12 = smov 0   ;;  %s1656_s13 = smov 0   ;;  %s1940_s0 = inlined_call_operand.vmem [shape: bf16[512,256], index: 0, kind: input, shape index: {}]   ;;  %s1941_s1 = inlined_call_operand.vmem [shape: bf16[256,64], index: 1, kind: input, shape index: {}]   ;;  %s1942_s2 = inlined_call_operand.vmem [shape: f32[1,64], index: 2, kind: input, shape index: {}]   ;;  %s1943_s3 = inlined_call_operand.vmem [shape: bf16[512,64], index: 3, kind: output, shape index: {}]  }
   0x1   :  { %s1658_s14 = smov 0  }
   0x2 LB: > { %s28_s15 = sadd.s32 1, %s1627_s13  ;;  %p1270_p0 = scmp.ge.s32.totalorder %s1631_s14, 1  ;;  %s1631_s14 = sphi %s1658_s14, %s13_s14   ;;  %s1627_s13 = sphi %s1656_s13, %s1945_s13   ;;  %s1623_s12 = sphi %s1654_s12, %s1944_s12  }
   0x3   : > { %p30_p1 = scmp.ge.s32.totalorder %s28_s15, 2  ;;  %p191_p2 = scmp.lt.s32.totalorder %s1631_s14, 3 }
   0x5   : > { %s1947_s15 = smov (%p30_p1, %s28_s15), 0  ;;  %p192_p3 = pnand %p1270_p0, %p191_p2 }
   0x6   : > { %v1545_v0 = vld [vmem:[%s1941_s1 + $0x40] sm:$0xff] (!%p192_p3)   ;;  %s1271_s18 = sshll.u32 (!%p192_p3), %s1623_s12, 5  ;;  %v1547_v2 = vld [vmem:[%s1941_s1 + $0x48] sm:$0xff] (!%p192_p3)   ;;  %v1549_v4 = vld [vmem:[%s1941_s1 + $0x50] sm:$0xff] (!%p192_p3)   ;;  %vm272_vm0 = vcmask (!%p192_p3), 523264   ;;  %v1633_v48 = vmov (!%p192_p3), 0.0  }
   0x7   : > { %195 = sbr.rel (%p192_p3) target bundleno = 332 (0x14c), region = 32  ;;  %v1546_v1 = vld [vmem:[%s1941_s1] sm:$0xff] (!%p192_p3)   ;;  %1392 = vmatprep.subr.bf16.mxu0 (!%p192_p3), %v1545_v0  ;;  %1504 = vmatprep.subr.bf16.mxu1 (!%p192_p3), %v1545_v0  ;;  %v1548_v3 = vld [vmem:[%s1941_s1 + $0x8] sm:$0xff] (!%p192_p3)   ;;  %p236_p4 = scmp.lt.s32.totalorder (!%p192_p3), %s1271_s18, 63  ;;  %v1550_v5 = vld [vmem:[%s1941_s1 + $0x10] sm:$0xff] (!%p192_p3)   ;;  %273 = vst.msk [vmem:[#allocation2] sm:$0xff] (!%p192_p3), %vm272_vm0, %v1633_v48 }
   0x8   : > { %1393 = vmatpush3.bf16.msra.mxu0 (!%p192_p3), %v1546_v1  ;;  %1512 = vmatpush3.bf16.msra.mxu1 (!%p192_p3), %v1546_v1  ;;  %v1551_v6 = vld [vmem:[%s1941_s1 + $0x58] sm:$0xff] (!%p192_p3)   ;;  %v1553_v8 = vld [vmem:[%s1941_s1 + $0x60] sm:$0xff] (!%p192_p3)   ;;  %v1555_v10 = vld [vmem:[%s1941_s1 + $0x68] sm:$0xff] (!%p192_p3)   ;;  %274 = vst.msk [vmem:[#allocation2 + $0x8] sm:$0xff] (!%p192_p3), %vm272_vm0, %v1633_v48  ;;  %vm1117_vm1 = vcmask (!%p192_p3), 519168  }
   0x9   : > { %1394 = vmatprep.subr.bf16.mxu0 (!%p192_p3), %v1547_v2  ;;  %1505 = vmatprep.subr.bf16.mxu1 (!%p192_p3), %v1547_v2  ;;  %v1552_v7 = vld [vmem:[%s1941_s1 + $0x18] sm:$0xff] (!%p192_p3)   ;;  %v1554_v9 = vld [vmem:[%s1941_s1 + $0x20] sm:$0xff] (!%p192_p3)   ;;  %v1556_v13 = vld [vmem:[%s1941_s1 + $0x28] sm:$0xff] (!%p192_p3)   ;;  %275 = vst.msk [vmem:[#allocation2 + $0x10] sm:$0xff] (!%p192_p3), %vm272_vm0, %v1633_v48 }
   0xa   : > { %v1557_v14 = vld [vmem:[%s1941_s1 + $0x70] sm:$0xff] (!%p192_p3)   ;;  %v1559_v16 = vld [vmem:[%s1941_s1 + $0x78] sm:$0xff] (!%p192_p3)   ;;  %276 = vst.msk [vmem:[#allocation2 + $0x18] sm:$0xff] (!%p192_p3), %vm272_vm0, %v1633_v48  ;;  %277 = vst.msk [vmem:[#allocation2 + $0x20] sm:$0xff] (!%p192_p3), %vm272_vm0, %v1633_v48 }
   0xb   : > { %v1558_v15 = vld [vmem:[%s1941_s1 + $0x30] sm:$0xff] (!%p192_p3)   ;;  %v1560_v17 = vld [vmem:[%s1941_s1 + $0x38] sm:$0xff] (!%p192_p3)   ;;  %278 = vst.msk [vmem:[#allocation2 + $0x28] sm:$0xff] (!%p192_p3), %vm272_vm0, %v1633_v48  ;;  %279 = vst.msk [vmem:[#allocation2 + $0x30] sm:$0xff] (!%p192_p3), %vm272_vm0, %v1633_v48 }
   0xc   : > { %1395 = vmatpush3.bf16.msra.mxu0 (!%p192_p3), %v1548_v3  ;;  %1513 = vmatpush3.bf16.msra.mxu1 (!%p192_p3), %v1548_v3  ;;  %280 = vst.msk [vmem:[#allocation2 + $0x38] sm:$0xff] (!%p192_p3), %vm272_vm0, %v1633_v48  ;;  %281 = vst.msk [vmem:[#allocation2 + $0x40] sm:$0xff] (!%p192_p3), %vm272_vm0, %v1633_v48 }
   0xd   : > { %1396 = vmatprep.subr.bf16.mxu0 (!%p192_p3), %v1549_v4  ;;  %1506 = vmatprep.subr.bf16.mxu1 (!%p192_p3), %v1549_v4  ;;  %282 = vst.msk [vmem:[#allocation2 + $0x48] sm:$0xff] (!%p192_p3), %vm272_vm0, %v1633_v48  ;;  %283 = vst.msk [vmem:[#allocation2 + $0x50] sm:$0xff] (!%p192_p3), %vm272_vm0, %v1633_v48 }
   0xe   : > { %s1949_s18 = smov (!%p236_p4, %s1271_s18), 63  ;;  %284 = vst.msk [vmem:[#allocation2 + $0x58] sm:$0xff] %vm272_vm0, %v1633_v48  ;;  %285 = vst.msk [vmem:[#allocation2 + $0x60] sm:$0xff] %vm272_vm0, %v1633_v48  ;;  %v305_v51 = vld [vmem:[#allocation2] sm:$0xff] }
   0xf   : > { %s1359_s6 = sshll.u32 %s1949_s18, 3  ;;  %286 = vst.msk [vmem:[#allocation2 + $0x68] sm:$0xff] %vm272_vm0, %v1633_v48  ;;  %287 = vst.msk [vmem:[#allocation2 + $0x70] sm:$0xff] %vm272_vm0, %v1633_v48  ;;  %v306_v59 = vld [vmem:[#allocation2 + $0x8] sm:$0xff]  ;;  %s1275_s5 = sshll.u32 %s1949_s18, 2 }
  0x10   : > { %1397 = vmatpush3.bf16.msra.mxu0 %v1550_v5  ;;  %1514 = vmatpush3.bf16.msra.mxu1 %v1550_v5  ;;  %s1705_s11 = scalar_lea.vmem %s1940_s0, %s1359_s6  ;;  %288 = vst.msk [vmem:[#allocation2 + $0x78] sm:$0xff] %vm272_vm0, %v1633_v48  ;;  %289 = vst.msk [vmem:[#allocation2 + $0x80] sm:$0xff] %vm272_vm0, %v1633_v48  ;;  %s1813_s7 = scalar_lea.vmem %s1943_s3, %s1275_s5 }
  0x11   : > { %1398 = vmatprep.subr.bf16.mxu0 %v1551_v6  ;;  %1507 = vmatprep.subr.bf16.mxu1 %v1551_v6  ;;  %v1563_v11 = vld [vmem:[%s1705_s11 + $0x4] ss:$8 sps:$4 sm:$0xff]   ;;  %v1561_v18 = vld [vmem:[%s1705_s11] ss:$8 sps:$4 sm:$0xff]   ;;  %v1567_v20 = vld [vmem:[%s1705_s11 + $0x14] ss:$8 sps:$4 sm:$0xff]  }
  0x12   : > { %v1566_v12 = vld [vmem:[%s1705_s11 + $0x84] ss:$8 sps:$4 sm:$0xff]   ;;  %689 = vmatprep.mubr.bf16.mxu0 %v1563_v11  ;;  %v1564_v19 = vld [vmem:[%s1705_s11 + $0x80] ss:$8 sps:$4 sm:$0xff]   ;;  %v1569_v21 = vld [vmem:[%s1705_s11 + $0x94] ss:$8 sps:$4 sm:$0xff]  }
  0x13   : > { %753 = vmatprep.mubr.bf16.mxu1 %v1566_v12  ;;  %v1571_v22 = vld [vmem:[%s1705_s11 + $0x10] ss:$8 sps:$4 sm:$0xff]   ;;  %v1573_v24 = vld [vmem:[%s1705_s11 + $0x24] ss:$8 sps:$4 sm:$0xff]   ;;  %v1577_v26 = vld [vmem:[%s1705_s11 + $0x20] ss:$8 sps:$4 sm:$0xff]  }
  0x14   : > { %1399 = vmatpush3.bf16.msra.mxu0 %v1552_v7  ;;  %1515 = vmatpush3.bf16.msra.mxu1 %v1552_v7  ;;  %v1572_v23 = vld [vmem:[%s1705_s11 + $0x90] ss:$8 sps:$4 sm:$0xff]   ;;  %v1575_v25 = vld [vmem:[%s1705_s11 + $0xa4] ss:$8 sps:$4 sm:$0xff]   ;;  %v1578_v27 = vld [vmem:[%s1705_s11 + $0xa0] ss:$8 sps:$4 sm:$0xff]  }
  0x15   : > { %1400 = vmatprep.subr.bf16.mxu0 %v1553_v8  ;;  %1508 = vmatprep.subr.bf16.mxu1 %v1553_v8  ;;  %v1579_v28 = vld [vmem:[%s1705_s11 + $0x34] ss:$8 sps:$4 sm:$0xff]   ;;  %v1583_v30 = vld [vmem:[%s1705_s11 + $0x30] ss:$8 sps:$4 sm:$0xff]   ;;  %v1585_v32 = vld [vmem:[%s1705_s11 + $0x44] ss:$8 sps:$4 sm:$0xff]  }
  0x16   : > { %v1581_v29 = vld [vmem:[%s1705_s11 + $0xb4] ss:$8 sps:$4 sm:$0xff]   ;;  %v1584_v31 = vld [vmem:[%s1705_s11 + $0xb0] ss:$8 sps:$4 sm:$0xff]   ;;  %v1587_v33 = vld [vmem:[%s1705_s11 + $0xc4] ss:$8 sps:$4 sm:$0xff]  }
  0x17   : > { %v1589_v34 = vld [vmem:[%s1705_s11 + $0x40] ss:$8 sps:$4 sm:$0xff]   ;;  %v1591_v36 = vld [vmem:[%s1705_s11 + $0x54] ss:$8 sps:$4 sm:$0xff]   ;;  %v1595_v38 = vld [vmem:[%s1705_s11 + $0x50] ss:$8 sps:$4 sm:$0xff]  }
  0x18   : > { %1401 = vmatpush3.bf16.msra.mxu0 %v1554_v9  ;;  %1516 = vmatpush3.bf16.msra.mxu1 %v1554_v9  ;;  %v1590_v35 = vld [vmem:[%s1705_s11 + $0xc0] ss:$8 sps:$4 sm:$0xff]   ;;  %v1593_v37 = vld [vmem:[%s1705_s11 + $0xd4] ss:$8 sps:$4 sm:$0xff]   ;;  %v1596_v39 = vld [vmem:[%s1705_s11 + $0xd0] ss:$8 sps:$4 sm:$0xff]  }
  0x19   : > { %1402 = vmatprep.subr.bf16.mxu0 %v1555_v10  ;;  %1509 = vmatprep.subr.bf16.mxu1 %v1555_v10  ;;  %v1597_v40 = vld [vmem:[%s1705_s11 + $0x64] ss:$8 sps:$4 sm:$0xff]   ;;  %v1601_v42 = vld [vmem:[%s1705_s11 + $0x60] ss:$8 sps:$4 sm:$0xff]   ;;  %v1603_v44 = vld [vmem:[%s1705_s11 + $0x74] ss:$8 sps:$4 sm:$0xff]  }
  0x1a   : > { %v1599_v41 = vld [vmem:[%s1705_s11 + $0xe4] ss:$8 sps:$4 sm:$0xff]   ;;  %v1602_v43 = vld [vmem:[%s1705_s11 + $0xe0] ss:$8 sps:$4 sm:$0xff]   ;;  %v1605_v45 = vld [vmem:[%s1705_s11 + $0xf4] ss:$8 sps:$4 sm:$0xff]  }
  0x1b   : > { %v1607_v46 = vld [vmem:[%s1705_s11 + $0x70] ss:$8 sps:$4 sm:$0xff]   ;;  %290 = vst.msk [vmem:[#allocation2 + $0x88] sm:$0xff] %vm272_vm0, %v1633_v48  ;;  %291 = vst.msk [vmem:[#allocation2 + $0x90] sm:$0xff] %vm272_vm0, %v1633_v48  ;;  %v321_v53 = vld [vmem:[#allocation2 + $0x80] sm:$0xff] }
  0x1c   : > { %1403 = vmatpush3.bf16.msra.mxu0 %v1556_v13  ;;  %1517 = vmatpush3.bf16.msra.mxu1 %v1556_v13  ;;  %v1608_v47 = vld [vmem:[%s1705_s11 + $0xf0] ss:$8 sps:$4 sm:$0xff]   ;;  %292 = vst.msk [vmem:[#allocation2 + $0x98] sm:$0xff] %vm272_vm0, %v1633_v48  ;;  %293 = vst.msk [vmem:[#allocation2 + $0xa0] sm:$0xff] %vm272_vm0, %v1633_v48 }
  0x1d   : > { %1404 = vmatprep.subr.bf16.mxu0 %v1557_v14  ;;  %1510 = vmatprep.subr.bf16.mxu1 %v1557_v14  ;;  %294 = vst.msk [vmem:[#allocation2 + $0xa8] sm:$0xff] %vm272_vm0, %v1633_v48  ;;  %295 = vst.msk [vmem:[#allocation2 + $0xb0] sm:$0xff] %vm272_vm0, %v1633_v48  ;;  %v307_v7 = vld [vmem:[#allocation2 + $0x10] sm:$0xff] }
  0x1e   : > { %296 = vst.msk [vmem:[#allocation2 + $0xb8] sm:$0xff] %vm272_vm0, %v1633_v48  ;;  %297 = vst.msk [vmem:[#allocation2 + $0xc0] sm:$0xff] %vm272_vm0, %v1633_v48 }
  0x1f   : > { %298 = vst.msk [vmem:[#allocation2 + $0xc8] sm:$0xff] %vm272_vm0, %v1633_v48  ;;  %299 = vst.msk [vmem:[#allocation2 + $0xd0] sm:$0xff] %vm272_vm0, %v1633_v48 }
  0x20   : > { %1405 = vmatpush3.bf16.msra.mxu0 %v1558_v15  ;;  %1518 = vmatpush3.bf16.msra.mxu1 %v1558_v15  ;;  %300 = vst.msk [vmem:[#allocation2 + $0xd8] sm:$0xff] %vm272_vm0, %v1633_v48  ;;  %301 = vst.msk [vmem:[#allocation2 + $0xe0] sm:$0xff] %vm272_vm0, %v1633_v48  ;;  %v1799_v15 = vld [vmem:[%s1942_s2] ss:$0 sm:$0xff] }
  0x21   : > { %1406 = vmatprep.subr.bf16.mxu0 %v1559_v16  ;;  %1511 = vmatprep.subr.bf16.mxu1 %v1559_v16  ;;  %302 = vst.msk [vmem:[#allocation2 + $0xe8] sm:$0xff] %vm272_vm0, %v1633_v48  ;;  %303 = vst.msk [vmem:[#allocation2 + $0xf0] sm:$0xff] %vm272_vm0, %v1633_v48  ;;  %v308_v16 = vld [vmem:[#allocation2 + $0x18] sm:$0xff] }
  0x22   : > { %304 = vst.msk [vmem:[#allocation2 + $0xf8] sm:$0xff] %vm272_vm0, %v1633_v48  ;;  %v322_v61 = vld [vmem:[#allocation2 + $0x88] sm:$0xff]  ;;  %v323_v9 = vld [vmem:[#allocation2 + $0x90] sm:$0xff] }
  0x24   : > { %1407 = vmatpush3.bf16.msra.mxu0 %v1560_v17  ;;  %1519 = vmatpush3.bf16.msra.mxu1 %v1560_v17 }
  0x27   : > { %690 = vmatmul.mubr.bf16.vlgmr.msra.gmra.mrb[0].mxu0 %v1561_v18  ;;  %754 = vmatmul.mubr.bf16.vlgmr.msra.gmra.mrb[0].mxu1 %v1564_v19  ;;  %v324_v18 = vld [vmem:[#allocation2 + $0x98] sm:$0xff] }
  0x28   : > { %697 = vmatprep.mubr.bf16.mxu0 %v1567_v20  ;;  %761 = vmatprep.mubr.bf16.mxu1 %v1569_v21 }
  0x2f   : > { %698 = vmatmul.mubr.bf16.gmra.mrb[4].mxu0 %v1571_v22  ;;  %762 = vmatmul.mubr.bf16.gmra.mrb[4].mxu1 %v1572_v23 }
  0x30   : > { %705 = vmatprep.mubr.bf16.mxu0 %v1573_v24  ;;  %769 = vmatprep.mubr.bf16.mxu1 %v1575_v25 }
  0x37   : > { %706 = vmatmul.mubr.bf16.gmra.mrb[8].mxu0 %v1577_v26  ;;  %770 = vmatmul.mubr.bf16.gmra.mrb[8].mxu1 %v1578_v27 }
  0x38   : > { %713 = vmatprep.mubr.bf16.mxu0 %v1579_v28  ;;  %777 = vmatprep.mubr.bf16.mxu1 %v1581_v29 }
  0x3f   : > { %714 = vmatmul.mubr.bf16.gmra.mrb[12].mxu0 %v1583_v30  ;;  %778 = vmatmul.mubr.bf16.gmra.mrb[12].mxu1 %v1584_v31 }
  0x40   : > { %721 = vmatprep.mubr.bf16.mxu0 %v1585_v32  ;;  %785 = vmatprep.mubr.bf16.mxu1 %v1587_v33 }
  0x47   : > { %722 = vmatmul.mubr.bf16.gmra.mrb[16].mxu0 %v1589_v34  ;;  %786 = vmatmul.mubr.bf16.gmra.mrb[16].mxu1 %v1590_v35 }
  0x48   : > { %729 = vmatprep.mubr.bf16.mxu0 %v1591_v36  ;;  %793 = vmatprep.mubr.bf16.mxu1 %v1593_v37 }
  0x4f   : > { %730 = vmatmul.mubr.bf16.gmra.mrb[20].mxu0 %v1595_v38  ;;  %794 = vmatmul.mubr.bf16.gmra.mrb[20].mxu1 %v1596_v39 }
  0x50   : > { %737 = vmatprep.mubr.bf16.mxu0 %v1597_v40  ;;  %801 = vmatprep.mubr.bf16.mxu1 %v1599_v41 }
  0x57   : > { %738 = vmatmul.mubr.bf16.gmra.mrb[24].mxu0 %v1601_v42  ;;  %802 = vmatmul.mubr.bf16.gmra.mrb[24].mxu1 %v1602_v43 }
  0x58   : > { %745 = vmatprep.mubr.bf16.mxu0 %v1603_v44  ;;  %809 = vmatprep.mubr.bf16.mxu1 %v1605_v45  ;;  %v309_v44 = vld [vmem:[#allocation2 + $0x20] sm:$0xff] }
  0x59   : > { %v325_v45 = vld [vmem:[#allocation2 + $0xa0] sm:$0xff] }
  0x5f   : > { %746 = vmatmul.mubr.bf16.gmra.mrb[28].mxu0 %v1607_v46  ;;  %810 = vmatmul.mubr.bf16.gmra.mrb[28].mxu1 %v1608_v47 }
  0xfa   : > { %v1408_v49 = vpop.f32.mrb[0].mxu0  ;;  %v1456_v50 = vpop.f32.mrb[0].mxu1 }
  0xfb   : > { %v1409_v52 = vpop.f32.mrb[1].mxu0  ;;  %v1457_v54 = vpop.f32.mrb[1].mxu1 }
  0xfc   : > { %v1410_v55 = vadd.f32 %v1409_v52, %v1408_v49  ;;  %v1458_v56 = vadd.f32 %v1457_v54, %v1456_v50  ;;  %v1411_v57 = vpop.f32.mrb[2].mxu0  ;;  %v1459_v58 = vpop.f32.mrb[2].mxu1  ;;  %v310_v50 = vld [vmem:[#allocation2 + $0x28] sm:$0xff] }
  0xfd   : > { %v1412_v60 = vpop.f32.mrb[3].mxu0  ;;  %v1460_v62 = vpop.f32.mrb[3].mxu1  ;;  %v326_v52 = vld [vmem:[#allocation2 + $0xa8] sm:$0xff] }
  0xfe   : > { %v818_v63 = vadd.f32 %v1410_v55, %v305_v51  ;;  %v834_v0 = vadd.f32 %v1458_v56, %v321_v53  ;;  %v1413_v1 = vadd.f32 %v1412_v60, %v1411_v57  ;;  %v1461_v2 = vadd.f32 %v1460_v62, %v1459_v58 }
 0x100   : > { %851 = vst.msk [vmem:[#allocation2] sm:$0xff] %vm272_vm0, %v818_v63  ;;  %867 = vst.msk [vmem:[#allocation2 + $0x80] sm:$0xff] %vm272_vm0, %v834_v0  ;;  %v819_v3 = vadd.f32 %v1413_v1, %v306_v59  ;;  %v835_v4 = vadd.f32 %v1461_v2, %v322_v61 }
 0x102   : > { %852 = vst.msk [vmem:[#allocation2 + $0x8] sm:$0xff] %vm272_vm0, %v819_v3  ;;  %868 = vst.msk [vmem:[#allocation2 + $0x88] sm:$0xff] %vm272_vm0, %v835_v4  ;;  %v1414_v5 = vpop.f32.mrb[4].mxu0  ;;  %v1462_v6 = vpop.f32.mrb[4].mxu1 }
 0x103   : > { %v1415_v8 = vpop.f32.mrb[5].mxu0  ;;  %v1463_v10 = vpop.f32.mrb[5].mxu1 }
 0x104   : > { %v1416_v11 = vadd.f32 %v1415_v8, %v1414_v5  ;;  %v1464_v12 = vadd.f32 %v1463_v10, %v1462_v6  ;;  %v1417_v13 = vpop.f32.mrb[6].mxu0  ;;  %v1465_v14 = vpop.f32.mrb[6].mxu1 }
 0x105   : > { %v1418_v17 = vpop.f32.mrb[7].mxu0  ;;  %v1466_v19 = vpop.f32.mrb[7].mxu1 }
 0x106   : > { %v820_v20 = vadd.f32 %v1416_v11, %v307_v7  ;;  %v836_v21 = vadd.f32 %v1464_v12, %v323_v9  ;;  %v1419_v22 = vadd.f32 %v1418_v17, %v1417_v13  ;;  %v1467_v23 = vadd.f32 %v1466_v19, %v1465_v14  ;;  %v311_v17 = vld [vmem:[#allocation2 + $0x30] sm:$0xff] }
 0x107   : > { %v886_v24 = vld [vmem:[#allocation2] sm:$0xff] }
 0x108   : > { %v902_v25 = vld [vmem:[#allocation2 + $0x80] sm:$0xff]  ;;  %v925_v26 = vadd.f32 %v1799_v15, %v886_v24  ;;  %853 = vst.msk [vmem:[#allocation2 + $0x10] sm:$0xff] %vm272_vm0, %v820_v20  ;;  %869 = vst.msk [vmem:[#allocation2 + $0x90] sm:$0xff] %vm272_vm0, %v836_v21  ;;  %v821_v28 = vadd.f32 %v1419_v22, %v308_v16  ;;  %v837_v29 = vadd.f32 %v1467_v23, %v324_v18  ;;  %v327_v18 = vld [vmem:[#allocation2 + $0xb0] sm:$0xff] }
 0x109   : > { %v941_v27 = vadd.f32 %v1799_v15, %v902_v25  ;;  %v887_v30 = vld [vmem:[#allocation2 + $0x8] sm:$0xff]  ;;  %v312_v23 = vld [vmem:[#allocation2 + $0x38] sm:$0xff] }
 0x10a   : > { %v903_v31 = vld [vmem:[#allocation2 + $0x88] sm:$0xff]  ;;  %v957_v32 = vmax.f32 %v925_v26, 0.0  ;;  %v926_v34 = vadd.f32 %v1799_v15, %v887_v30  ;;  %854 = vst.msk [vmem:[#allocation2 + $0x18] sm:$0xff] %vm272_vm0, %v821_v28  ;;  %870 = vst.msk [vmem:[#allocation2 + $0x98] sm:$0xff] %vm272_vm0, %v837_v29  ;;  %v1420_v36 = vpop.f32.mrb[8].mxu0  ;;  %v1468_v37 = vpop.f32.mrb[8].mxu1 }
 0x10b   : > { %v973_v33 = vmax.f32 %v941_v27, 0.0  ;;  %v942_v35 = vadd.f32 %v1799_v15, %v903_v31  ;;  %v1421_v38 = vpop.f32.mrb[9].mxu0  ;;  %v1469_v39 = vpop.f32.mrb[9].mxu1  ;;  %v328_v25 = vld [vmem:[#allocation2 + $0xb8] sm:$0xff] }
 0x10c   : > { %v1360_v40 = vpack.c.bf16 %v957_v32, %v957_v32  ;;  %v958_v42 = vmax.f32 %v926_v34, 0.0  ;;  %v1423_v46 = vpop.f32.mrb[10].mxu0  ;;  %v1471_v47 = vpop.f32.mrb[10].mxu1  ;;  %v1422_v48 = vadd.f32 %v1421_v38, %v1420_v36  ;;  %v1470_v49 = vadd.f32 %v1469_v39, %v1468_v37 }
 0x10d   : > { %v1376_v41 = vpack.c.bf16 %v973_v33, %v973_v33  ;;  %v974_v43 = vmax.f32 %v942_v35, 0.0  ;;  %v1424_v51 = vpop.f32.mrb[11].mxu0  ;;  %v1472_v53 = vpop.f32.mrb[11].mxu1 }
 0x10e   : > { %1118 = vst.msk [vmem:[%s1813_s7] sm:$0xf] %vm1117_vm1, %v1360_v40  ;;  %v1361_v54 = vpack.c.bf16 %v958_v42, %v958_v42  ;;  %v1425_v56 = vadd.f32 %v1424_v51, %v1423_v46  ;;  %v1473_v57 = vadd.f32 %v1472_v53, %v1471_v47  ;;  %v822_v60 = vadd.f32 %v1422_v48, %v309_v44  ;;  %v313_v47 = vld [vmem:[#allocation2 + $0x40] sm:$0xff] }
 0x10f   : > { %1134 = vst.msk [vmem:[%s1813_s7 + $0x40] sm:$0xf] %vm1117_vm1, %v1376_v41  ;;  %v1377_v55 = vpack.c.bf16 %v974_v43, %v974_v43  ;;  %v888_v58 = vld [vmem:[#allocation2 + $0x10] sm:$0xff]  ;;  %v838_v61 = vadd.f32 %v1470_v49, %v325_v45  ;;  %v329_v49 = vld [vmem:[#allocation2 + $0xc0] sm:$0xff] }
 0x110   : > { %v904_v59 = vld [vmem:[#allocation2 + $0x90] sm:$0xff]  ;;  %1119 = vst.msk [vmem:[%s1813_s7 + $0x4] sm:$0xf] %vm1117_vm1, %v1361_v54  ;;  %v927_v62 = vadd.f32 %v1799_v15, %v888_v58  ;;  %v823_v0 = vadd.f32 %v1425_v56, %v310_v50  ;;  %v839_v1 = vadd.f32 %v1473_v57, %v326_v52 }
 0x111   : > { %1135 = vst.msk [vmem:[%s1813_s7 + $0x44] sm:$0xf] %vm1117_vm1, %v1377_v55  ;;  %v943_v63 = vadd.f32 %v1799_v15, %v904_v59  ;;  %v889_v2 = vld [vmem:[#allocation2 + $0x18] sm:$0xff] }
 0x112   : > { %v905_v3 = vld [vmem:[#allocation2 + $0x98] sm:$0xff]  ;;  %855 = vst.msk [vmem:[#allocation2 + $0x20] sm:$0xff] %vm272_vm0, %v822_v60  ;;  %871 = vst.msk [vmem:[#allocation2 + $0xa0] sm:$0xff] %vm272_vm0, %v838_v61  ;;  %v959_v4 = vmax.f32 %v927_v62, 0.0  ;;  %v928_v6 = vadd.f32 %v1799_v15, %v889_v2  ;;  %v1426_v8 = vpop.f32.mrb[12].mxu0  ;;  %v1474_v9 = vpop.f32.mrb[12].mxu1 }
 0x113   : > { %v975_v5 = vmax.f32 %v943_v63, 0.0  ;;  %v944_v7 = vadd.f32 %v1799_v15, %v905_v3  ;;  %856 = vst.msk [vmem:[#allocation2 + $0x28] sm:$0xff] %vm272_vm0, %v823_v0  ;;  %872 = vst.msk [vmem:[#allocation2 + $0xa8] sm:$0xff] %vm272_vm0, %v839_v1  ;;  %v1427_v10 = vpop.f32.mrb[13].mxu0  ;;  %v1475_v11 = vpop.f32.mrb[13].mxu1  ;;  %v314_v1 = vld [vmem:[#allocation2 + $0x48] sm:$0xff] }
 0x114   : > { %v1362_v12 = vpack.c.bf16 %v959_v4, %v959_v4  ;;  %v960_v14 = vmax.f32 %v928_v6, 0.0  ;;  %v1429_v19 = vpop.f32.mrb[14].mxu0  ;;  %v1477_v20 = vpop.f32.mrb[14].mxu1  ;;  %v1428_v21 = vadd.f32 %v1427_v10, %v1426_v8  ;;  %v1476_v22 = vadd.f32 %v1475_v11, %v1474_v9  ;;  %v330_v2 = vld [vmem:[#allocation2 + $0xc8] sm:$0xff] }
 0x115   : > { %v1378_v13 = vpack.c.bf16 %v975_v5, %v975_v5  ;;  %v976_v16 = vmax.f32 %v944_v7, 0.0  ;;  %v1430_v24 = vpop.f32.mrb[15].mxu0  ;;  %v1478_v26 = vpop.f32.mrb[15].mxu1 }
 0x116   : > { %1120 = vst.msk [vmem:[%s1813_s7 + $0x8] sm:$0xf] %vm1117_vm1, %v1362_v12  ;;  %v1363_v27 = vpack.c.bf16 %v960_v14, %v960_v14  ;;  %v1431_v29 = vadd.f32 %v1430_v24, %v1429_v19  ;;  %v1479_v30 = vadd.f32 %v1478_v26, %v1477_v20  ;;  %v824_v31 = vadd.f32 %v1428_v21, %v311_v17  ;;  %v315_v20 = vld [vmem:[#allocation2 + $0x50] sm:$0xff] }
 0x117   : > { %1136 = vst.msk [vmem:[%s1813_s7 + $0x48] sm:$0xf] %vm1117_vm1, %v1378_v13  ;;  %v1379_v28 = vpack.c.bf16 %v976_v16, %v976_v16  ;;  %v840_v32 = vadd.f32 %v1476_v22, %v327_v18  ;;  %v331_v22 = vld [vmem:[#allocation2 + $0xd0] sm:$0xff] }
 0x118   : > { %1121 = vst.msk [vmem:[%s1813_s7 + $0xc] sm:$0xf] %vm1117_vm1, %v1363_v27  ;;  %v825_v35 = vadd.f32 %v1431_v29, %v312_v23  ;;  %v841_v36 = vadd.f32 %v1479_v30, %v328_v25 }
 0x119   : > { %1137 = vst.msk [vmem:[%s1813_s7 + $0x4c] sm:$0xf] %vm1117_vm1, %v1379_v28  ;;  %v890_v33 = vld [vmem:[#allocation2 + $0x20] sm:$0xff] }
 0x11a   : > { %v906_v34 = vld [vmem:[#allocation2 + $0xa0] sm:$0xff]  ;;  %v929_v37 = vadd.f32 %v1799_v15, %v890_v33  ;;  %v891_v39 = vld [vmem:[#allocation2 + $0x28] sm:$0xff]  ;;  %857 = vst.msk [vmem:[#allocation2 + $0x30] sm:$0xff] %vm272_vm0, %v824_v31  ;;  %873 = vst.msk [vmem:[#allocation2 + $0xb0] sm:$0xff] %vm272_vm0, %v840_v32  ;;  %v1432_v43 = vpop.f32.mrb[16].mxu0  ;;  %v1480_v44 = vpop.f32.mrb[16].mxu1 }
 0x11b   : > { %v945_v38 = vadd.f32 %v1799_v15, %v906_v34  ;;  %v907_v40 = vld [vmem:[#allocation2 + $0xa8] sm:$0xff]  ;;  %v930_v41 = vadd.f32 %v1799_v15, %v891_v39  ;;  %858 = vst.msk [vmem:[#allocation2 + $0x38] sm:$0xff] %vm272_vm0, %v825_v35  ;;  %874 = vst.msk [vmem:[#allocation2 + $0xb8] sm:$0xff] %vm272_vm0, %v841_v36  ;;  %v1433_v48 = vpop.f32.mrb[17].mxu0  ;;  %v1481_v50 = vpop.f32.mrb[17].mxu1  ;;  %v332_v39 = vld [vmem:[#allocation2 + $0xd8] sm:$0xff] }
 0x11c   : > { %v946_v42 = vadd.f32 %v1799_v15, %v907_v40  ;;  %v961_v45 = vmax.f32 %v929_v37, 0.0  ;;  %v1434_v53 = vadd.f32 %v1433_v48, %v1432_v43  ;;  %v1482_v54 = vadd.f32 %v1481_v50, %v1480_v44  ;;  %v1435_v55 = vpop.f32.mrb[18].mxu0  ;;  %v1483_v56 = vpop.f32.mrb[18].mxu1 }
 0x11d   : > { %v977_v46 = vmax.f32 %v945_v38, 0.0  ;;  %v962_v51 = vmax.f32 %v930_v41, 0.0  ;;  %v1436_v59 = vpop.f32.mrb[19].mxu0  ;;  %v1484_v60 = vpop.f32.mrb[19].mxu1  ;;  %v316_v38 = vld [vmem:[#allocation2 + $0x58] sm:$0xff] }
 0x11e   : > { %v978_v52 = vmax.f32 %v946_v42, 0.0  ;;  %v1364_v57 = vpack.c.bf16 %v961_v45, %v961_v45  ;;  %v826_v63 = vadd.f32 %v1434_v53, %v313_v47  ;;  %v842_v0 = vadd.f32 %v1482_v54, %v329_v49 }
 0x11f   : > { %v1380_v58 = vpack.c.bf16 %v977_v46, %v977_v46  ;;  %v1365_v61 = vpack.c.bf16 %v962_v51, %v962_v51  ;;  %v1437_v3 = vadd.f32 %v1436_v59, %v1435_v55  ;;  %v1485_v4 = vadd.f32 %v1484_v60, %v1483_v56  ;;  %v317_v56 = vld [vmem:[#allocation2 + $0x60] sm:$0xff] }
 0x120   : > { %v1381_v62 = vpack.c.bf16 %v978_v52, %v978_v52  ;;  %1122 = vst.msk [vmem:[%s1813_s7 + $0x10] sm:$0xf] %vm1117_vm1, %v1364_v57 }
 0x121   : > { %1138 = vst.msk [vmem:[%s1813_s7 + $0x50] sm:$0xf] %vm1117_vm1, %v1380_v58  ;;  %1123 = vst.msk [vmem:[%s1813_s7 + $0x14] sm:$0xf] %vm1117_vm1, %v1365_v61  ;;  %v892_v5 = vld [vmem:[#allocation2 + $0x30] sm:$0xff]  ;;  %v827_v11 = vadd.f32 %v1437_v3, %v314_v1  ;;  %v843_v12 = vadd.f32 %v1485_v4, %v330_v2  ;;  %v333_v58 = vld [vmem:[#allocation2 + $0xe0] sm:$0xff] }
 0x122   : > { %1139 = vst.msk [vmem:[%s1813_s7 + $0x54] sm:$0xf] %vm1117_vm1, %v1381_v62  ;;  %v908_v6 = vld [vmem:[#allocation2 + $0xb0] sm:$0xff]  ;;  %v931_v7 = vadd.f32 %v1799_v15, %v892_v5  ;;  %v893_v9 = vld [vmem:[#allocation2 + $0x38] sm:$0xff]  ;;  %v1438_v16 = vpop.f32.mrb[20].mxu0  ;;  %v1486_v17 = vpop.f32.mrb[20].mxu1 }
 0x123   : > { %859 = vst.msk [vmem:[#allocation2 + $0x40] sm:$0xff] %vm272_vm0, %v826_v63  ;;  %875 = vst.msk [vmem:[#allocation2 + $0xc0] sm:$0xff] %vm272_vm0, %v842_v0  ;;  %v947_v8 = vadd.f32 %v1799_v15, %v908_v6  ;;  %v909_v10 = vld [vmem:[#allocation2 + $0xb8] sm:$0xff]  ;;  %v932_v13 = vadd.f32 %v1799_v15, %v893_v9  ;;  %v1439_v21 = vpop.f32.mrb[21].mxu0  ;;  %v1487_v23 = vpop.f32.mrb[21].mxu1  ;;  %v318_v4 = vld [vmem:[#allocation2 + $0x68] sm:$0xff] }
 0x124   : > { %v948_v14 = vadd.f32 %v1799_v15, %v909_v10  ;;  %v963_v18 = vmax.f32 %v931_v7, 0.0  ;;  %860 = vst.msk [vmem:[#allocation2 + $0x48] sm:$0xff] %vm272_vm0, %v827_v11  ;;  %876 = vst.msk [vmem:[#allocation2 + $0xc8] sm:$0xff] %vm272_vm0, %v843_v12  ;;  %v1440_v26 = vadd.f32 %v1439_v21, %v1438_v16  ;;  %v1488_v27 = vadd.f32 %v1487_v23, %v1486_v17  ;;  %v1441_v28 = vpop.f32.mrb[22].mxu0  ;;  %v1489_v29 = vpop.f32.mrb[22].mxu1  ;;  %v334_v6 = vld [vmem:[#allocation2 + $0xe8] sm:$0xff] }
 0x125   : > { %v979_v19 = vmax.f32 %v947_v8, 0.0  ;;  %v964_v24 = vmax.f32 %v932_v13, 0.0  ;;  %v1442_v32 = vpop.f32.mrb[23].mxu0  ;;  %v1490_v33 = vpop.f32.mrb[23].mxu1 }
 0x126   : > { %v980_v25 = vmax.f32 %v948_v14, 0.0  ;;  %v1366_v30 = vpack.c.bf16 %v963_v18, %v963_v18  ;;  %v828_v36 = vadd.f32 %v1440_v26, %v315_v20  ;;  %v844_v37 = vadd.f32 %v1488_v27, %v331_v22 }
 0x127   : > { %v1382_v31 = vpack.c.bf16 %v979_v19, %v979_v19  ;;  %v1367_v34 = vpack.c.bf16 %v964_v24, %v964_v24  ;;  %v1443_v42 = vadd.f32 %v1442_v32, %v1441_v28  ;;  %v1491_v43 = vadd.f32 %v1490_v33, %v1489_v29  ;;  %v319_v29 = vld [vmem:[#allocation2 + $0x70] sm:$0xff] }
 0x128   : > { %v1383_v35 = vpack.c.bf16 %v980_v25, %v980_v25  ;;  %1124 = vst.msk [vmem:[%s1813_s7 + $0x18] sm:$0xf] %vm1117_vm1, %v1366_v30 }
 0x129   : > { %1140 = vst.msk [vmem:[%s1813_s7 + $0x58] sm:$0xf] %vm1117_vm1, %v1382_v31  ;;  %1125 = vst.msk [vmem:[%s1813_s7 + $0x1c] sm:$0xf] %vm1117_vm1, %v1367_v34  ;;  %v829_v46 = vadd.f32 %v1443_v42, %v316_v38  ;;  %v845_v47 = vadd.f32 %v1491_v43, %v332_v39  ;;  %v335_v31 = vld [vmem:[#allocation2 + $0xf0] sm:$0xff]  ;;  %v336_v43 = vld [vmem:[#allocation2 + $0xf8] sm:$0xff] }
 0x12a   : > { %v894_v40 = vld [vmem:[#allocation2 + $0x40] sm:$0xff]  ;;  %1141 = vst.msk [vmem:[%s1813_s7 + $0x5c] sm:$0xf] %vm1117_vm1, %v1383_v35  ;;  %v1444_v52 = vpop.f32.mrb[24].mxu0  ;;  %v1492_v53 = vpop.f32.mrb[24].mxu1 }
 0x12b   : > { %v910_v41 = vld [vmem:[#allocation2 + $0xc0] sm:$0xff]  ;;  %v933_v44 = vadd.f32 %v1799_v15, %v894_v40  ;;  %861 = vst.msk [vmem:[#allocation2 + $0x50] sm:$0xff] %vm272_vm0, %v828_v36  ;;  %877 = vst.msk [vmem:[#allocation2 + $0xd0] sm:$0xff] %vm272_vm0, %v844_v37  ;;  %v895_v50 = vld [vmem:[#allocation2 + $0x48] sm:$0xff]  ;;  %v1445_v57 = vpop.f32.mrb[25].mxu0  ;;  %v1493_v59 = vpop.f32.mrb[25].mxu1 }
 0x12c   : > { %v949_v45 = vadd.f32 %v1799_v15, %v910_v41  ;;  %v911_v51 = vld [vmem:[#allocation2 + $0xc8] sm:$0xff]  ;;  %v934_v54 = vadd.f32 %v1799_v15, %v895_v50  ;;  %862 = vst.msk [vmem:[#allocation2 + $0x58] sm:$0xff] %vm272_vm0, %v829_v46  ;;  %878 = vst.msk [vmem:[#allocation2 + $0xd8] sm:$0xff] %vm272_vm0, %v845_v47  ;;  %v1446_v62 = vadd.f32 %v1445_v57, %v1444_v52  ;;  %v1447_v0 = vpop.f32.mrb[26].mxu0  ;;  %v1495_v1 = vpop.f32.mrb[26].mxu1  ;;  %v320_v41 = vld [vmem:[#allocation2 + $0x78] sm:$0xff] }
 0x12d   : > { %v965_v48 = vmax.f32 %v933_v44, 0.0  ;;  %v950_v55 = vadd.f32 %v1799_v15, %v911_v51  ;;  %v1494_v63 = vadd.f32 %v1493_v59, %v1492_v53  ;;  %v1448_v5 = vpop.f32.mrb[27].mxu0  ;;  %v1496_v7 = vpop.f32.mrb[27].mxu1 }
 0x12e   : > { %v981_v49 = vmax.f32 %v949_v45, 0.0  ;;  %v966_v2 = vmax.f32 %v934_v54, 0.0  ;;  %v830_v8 = vadd.f32 %v1446_v62, %v317_v56  ;;  %v1449_v10 = vadd.f32 %v1448_v5, %v1447_v0 }
 0x12f   : > { %v1368_v60 = vpack.c.bf16 %v965_v48, %v965_v48  ;;  %v982_v3 = vmax.f32 %v950_v55, 0.0  ;;  %v846_v9 = vadd.f32 %v1494_v63, %v333_v58  ;;  %v1497_v11 = vadd.f32 %v1496_v7, %v1495_v1 }
 0x130   : > { %v1384_v61 = vpack.c.bf16 %v981_v49, %v981_v49  ;;  %v1369_v12 = vpack.c.bf16 %v966_v2, %v966_v2  ;;  %863 = vst.msk [vmem:[#allocation2 + $0x60] sm:$0xff] %vm272_vm0, %v830_v8  ;;  %v831_v19 = vadd.f32 %v1449_v10, %v318_v4 }
 0x131   : > { %1126 = vst.msk [vmem:[%s1813_s7 + $0x20] sm:$0xf] %vm1117_vm1, %v1368_v60  ;;  %v1385_v13 = vpack.c.bf16 %v982_v3, %v982_v3  ;;  %v847_v20 = vadd.f32 %v1497_v11, %v334_v6 }
 0x132   : > { %1142 = vst.msk [vmem:[%s1813_s7 + $0x60] sm:$0xf] %vm1117_vm1, %v1384_v61  ;;  %v896_v14 = vld [vmem:[#allocation2 + $0x50] sm:$0xff]  ;;  %1127 = vst.msk [vmem:[%s1813_s7 + $0x24] sm:$0xf] %vm1117_vm1, %v1369_v12  ;;  %v1450_v25 = vpop.f32.mrb[28].mxu0 }
 0x133   : > { %v912_v16 = vld [vmem:[#allocation2 + $0xd0] sm:$0xff]  ;;  %v935_v17 = vadd.f32 %v1799_v15, %v896_v14  ;;  %879 = vst.msk [vmem:[#allocation2 + $0xe0] sm:$0xff] %vm272_vm0, %v846_v9  ;;  %v897_v23 = vld [vmem:[#allocation2 + $0x58] sm:$0xff]  ;;  %864 = vst.msk [vmem:[#allocation2 + $0x68] sm:$0xff] %vm272_vm0, %v831_v19  ;;  %v1498_v26 = vpop.f32.mrb[28].mxu1  ;;  %v1451_v30 = vpop.f32.mrb[29].mxu0 }
 0x134   : > { %v951_v18 = vadd.f32 %v1799_v15, %v912_v16  ;;  %1143 = vst.msk [vmem:[%s1813_s7 + $0x64] sm:$0xf] %vm1117_vm1, %v1385_v13  ;;  %v913_v24 = vld [vmem:[#allocation2 + $0xd8] sm:$0xff]  ;;  %v936_v27 = vadd.f32 %v1799_v15, %v897_v23  ;;  %v1499_v32 = vpop.f32.mrb[29].mxu1  ;;  %v1452_v35 = vadd.f32 %v1451_v30, %v1450_v25  ;;  %v1453_v37 = vpop.f32.mrb[30].mxu0 }
 0x135   : > { %v967_v21 = vmax.f32 %v935_v17, 0.0  ;;  %880 = vst.msk [vmem:[#allocation2 + $0xe8] sm:$0xff] %vm272_vm0, %v847_v20  ;;  %v952_v28 = vadd.f32 %v1799_v15, %v913_v24  ;;  %v1500_v36 = vadd.f32 %v1499_v32, %v1498_v26  ;;  %v1501_v38 = vpop.f32.mrb[30].mxu1  ;;  %v1454_v42 = vpop.f32.mrb[31].mxu0 }
 0x136   : > { %v983_v22 = vmax.f32 %v951_v18, 0.0  ;;  %v968_v39 = vmax.f32 %v936_v27, 0.0  ;;  %v1502_v44 = vpop.f32.mrb[31].mxu1  ;;  %v832_v45 = vadd.f32 %v1452_v35, %v319_v29  ;;  %v1455_v47 = vadd.f32 %v1454_v42, %v1453_v37 }
 0x137   : > { %v1370_v33 = vpack.c.bf16 %v967_v21, %v967_v21  ;;  %v984_v40 = vmax.f32 %v952_v28, 0.0  ;;  %v848_v46 = vadd.f32 %v1500_v36, %v335_v31  ;;  %v1503_v48 = vadd.f32 %v1502_v44, %v1501_v38  ;;  %v898_v51 = vld [vmem:[#allocation2 + $0x60] sm:$0xff] }
 0x138   : > { %v1386_v34 = vpack.c.bf16 %v983_v22, %v983_v22  ;;  %v1371_v49 = vpack.c.bf16 %v968_v39, %v968_v39  ;;  %v937_v53 = vadd.f32 %v1799_v15, %v898_v51  ;;  %865 = vst.msk [vmem:[#allocation2 + $0x70] sm:$0xff] %vm272_vm0, %v832_v45  ;;  %v833_v55 = vadd.f32 %v1455_v47, %v320_v41 }
 0x139   : > { %1128 = vst.msk [vmem:[%s1813_s7 + $0x28] sm:$0xf] %vm1117_vm1, %v1370_v33  ;;  %v1387_v50 = vpack.c.bf16 %v984_v40, %v984_v40  ;;  %v849_v56 = vadd.f32 %v1503_v48, %v336_v43 }
 0x13a   : > { %1144 = vst.msk [vmem:[%s1813_s7 + $0x68] sm:$0xf] %vm1117_vm1, %v1386_v34  ;;  %v914_v52 = vld [vmem:[#allocation2 + $0xe0] sm:$0xff]  ;;  %1129 = vst.msk [vmem:[%s1813_s7 + $0x2c] sm:$0xf] %vm1117_vm1, %v1371_v49  ;;  %v899_v57 = vld [vmem:[#allocation2 + $0x68] sm:$0xff] }
 0x13b   : > { %v953_v54 = vadd.f32 %v1799_v15, %v914_v52  ;;  %881 = vst.msk [vmem:[#allocation2 + $0xf0] sm:$0xff] %vm272_vm0, %v848_v46  ;;  %v969_v59 = vmax.f32 %v937_v53, 0.0  ;;  %v938_v61 = vadd.f32 %v1799_v15, %v899_v57  ;;  %866 = vst.msk [vmem:[#allocation2 + $0x78] sm:$0xff] %vm272_vm0, %v833_v55 }
 0x13c   : > { %1145 = vst.msk [vmem:[%s1813_s7 + $0x6c] sm:$0xf] %vm1117_vm1, %v1387_v50  ;;  %v915_v58 = vld [vmem:[#allocation2 + $0xe8] sm:$0xff] }
 0x13d   : > { %v985_v60 = vmax.f32 %v953_v54, 0.0  ;;  %v954_v62 = vadd.f32 %v1799_v15, %v915_v58  ;;  %882 = vst.msk [vmem:[#allocation2 + $0xf8] sm:$0xff] %vm272_vm0, %v849_v56  ;;  %v1372_v63 = vpack.c.bf16 %v969_v59, %v969_v59  ;;  %v970_v1 = vmax.f32 %v938_v61, 0.0 }
 0x13f   : > { %v1388_v0 = vpack.c.bf16 %v985_v60, %v985_v60  ;;  %v986_v2 = vmax.f32 %v954_v62, 0.0  ;;  %1130 = vst.msk [vmem:[%s1813_s7 + $0x30] sm:$0xf] %vm1117_vm1, %v1372_v63  ;;  %v1373_v3 = vpack.c.bf16 %v970_v1, %v970_v1  ;;  %v900_v5 = vld [vmem:[#allocation2 + $0x70] sm:$0xff] }
 0x140   : > { %v939_v7 = vadd.f32 %v1799_v15, %v900_v5 }
 0x141   : > { %1146 = vst.msk [vmem:[%s1813_s7 + $0x70] sm:$0xf] %vm1117_vm1, %v1388_v0  ;;  %v1389_v4 = vpack.c.bf16 %v986_v2, %v986_v2  ;;  %1131 = vst.msk [vmem:[%s1813_s7 + $0x34] sm:$0xf] %vm1117_vm1, %v1373_v3 }
 0x142   : > { %v916_v6 = vld [vmem:[#allocation2 + $0xf0] sm:$0xff]  ;;  %v901_v9 = vld [vmem:[#allocation2 + $0x78] sm:$0xff]  ;;  %v971_v11 = vmax.f32 %v939_v7, 0.0 }
 0x143   : > { %1147 = vst.msk [vmem:[%s1813_s7 + $0x74] sm:$0xf] %vm1117_vm1, %v1389_v4  ;;  %v955_v8 = vadd.f32 %v1799_v15, %v916_v6  ;;  %v940_v13 = vadd.f32 %v1799_v15, %v901_v9 }
 0x144   : > { %v917_v10 = vld [vmem:[#allocation2 + $0xf8] sm:$0xff]  ;;  %v1374_v16 = vpack.c.bf16 %v971_v11, %v971_v11 }
 0x145   : > { %v987_v12 = vmax.f32 %v955_v8, 0.0  ;;  %v956_v14 = vadd.f32 %v1799_v15, %v917_v10  ;;  %v972_v18 = vmax.f32 %v940_v13, 0.0 }
 0x146   : > { %1132 = vst.msk [vmem:[%s1813_s7 + $0x38] sm:$0xf] %vm1117_vm1, %v1374_v16 }
 0x147   : > { %v1390_v17 = vpack.c.bf16 %v987_v12, %v987_v12  ;;  %v988_v19 = vmax.f32 %v956_v14, 0.0  ;;  %v1375_v20 = vpack.c.bf16 %v972_v18, %v972_v18 }
 0x149   : > { %1148 = vst.msk [vmem:[%s1813_s7 + $0x78] sm:$0xf] %vm1117_vm1, %v1390_v17  ;;  %v1391_v21 = vpack.c.bf16 %v988_v19, %v988_v19  ;;  %1133 = vst.msk [vmem:[%s1813_s7 + $0x3c] sm:$0xf] %vm1117_vm1, %v1375_v20 }
 0x14b   : > { %1149 = vst.msk [vmem:[%s1813_s7 + $0x7c] sm:$0xf] %vm1117_vm1, %v1391_v21 }
 0x14c PF: > { %s13_s14 = sadd.s32 1, %s1631_s14   ;;  %s1944_s12 = smov %s1627_s13 }
 0x14d   : > { %p10_p5 = scmp.ge.s32.totalorder %s13_s14, 4   ;;  %s1945_s13 = smov %s1947_s15 }
 0x14f   :  { %12 = sbr.rel (!%p10_p5) target bundleno = 2 (0x2), region = 76 }

// kernel: _lambda_.22
= control target key start
LH: loop header
LB: loop body
LE: loop exit
PB: predicated region body
PF: predicated region fallthrough
CT: control target
= control target key end

     0   :  { %vm19_vm0 = vcmask 523264   ;;  %vm1074_vm1 = vcmask 519168   ;;  %s1911_s1 = inlined_call_operand.vmem [shape: bf16[640,64], index: 1, kind: input, shape index: {}]   ;;  %s1912_s0 = inlined_call_operand.vmem [shape: bf16[128,640], index: 0, kind: input, shape index: {}]   ;;  %s1913_s2 = inlined_call_operand.vmem [shape: f32[1,64], index: 2, kind: input, shape index: {}]   ;;  %s1914_s3 = inlined_call_operand.vmem [shape: bf16[128,64], index: 3, kind: output, shape index: {}]  }
   0x1   :  { %v1401_v0 = vld [vmem:[%s1911_s1 + $0x40] sm:$0xff]   ;;  %v1405_v4 = vld [vmem:[%s1911_s1 + $0x48] sm:$0xff]   ;;  %v1409_v8 = vld [vmem:[%s1911_s1 + $0x50] sm:$0xff]  }
   0x2   :  { %v1402_v1 = vld [vmem:[%s1911_s1 + $0xc0] sm:$0xff]   ;;  %1208 = vmatprep.subr.bf16.mxu0 %v1401_v0  ;;  %v1406_v5 = vld [vmem:[%s1911_s1 + $0xc8] sm:$0xff]   ;;  %v1410_v9 = vld [vmem:[%s1911_s1 + $0xd0] sm:$0xff]  }
   0x3   :  { %v1403_v2 = vld [vmem:[%s1911_s1] sm:$0xff]   ;;  %1272 = vmatprep.subr.bf16.mxu1 %v1402_v1  ;;  %v1407_v6 = vld [vmem:[%s1911_s1 + $0x8] sm:$0xff]   ;;  %v1411_v10 = vld [vmem:[%s1911_s1 + $0x10] sm:$0xff]  }
   0x4   :  { %v1404_v3 = vld [vmem:[%s1911_s1 + $0x80] sm:$0xff]   ;;  %1209 = vmatpush3.bf16.msra.mxu0 %v1403_v2  ;;  %v1408_v7 = vld [vmem:[%s1911_s1 + $0x88] sm:$0xff]   ;;  %v1412_v11 = vld [vmem:[%s1911_s1 + $0x90] sm:$0xff]  }
   0x5   :  { %1273 = vmatpush3.bf16.msra.mxu1 %v1404_v3  ;;  %1210 = vmatprep.subr.bf16.mxu0 %v1405_v4  ;;  %v1413_v12 = vld [vmem:[%s1911_s1 + $0x58] sm:$0xff]   ;;  %v1417_v16 = vld [vmem:[%s1911_s1 + $0x60] sm:$0xff]   ;;  %v1421_v20 = vld [vmem:[%s1911_s1 + $0x68] sm:$0xff]  }
   0x6   :  { %1274 = vmatprep.subr.bf16.mxu1 %v1406_v5  ;;  %v1414_v13 = vld [vmem:[%s1911_s1 + $0xd8] sm:$0xff]   ;;  %v1418_v17 = vld [vmem:[%s1911_s1 + $0xe0] sm:$0xff]   ;;  %v1422_v21 = vld [vmem:[%s1911_s1 + $0xe8] sm:$0xff]  }
   0x7   :  { %v1415_v14 = vld [vmem:[%s1911_s1 + $0x18] sm:$0xff]   ;;  %v1419_v18 = vld [vmem:[%s1911_s1 + $0x20] sm:$0xff]   ;;  %v1423_v22 = vld [vmem:[%s1911_s1 + $0x28] sm:$0xff]  }
   0x8   :  { %1211 = vmatpush3.bf16.msra.mxu0 %v1407_v6  ;;  %v1416_v15 = vld [vmem:[%s1911_s1 + $0x98] sm:$0xff]   ;;  %v1420_v19 = vld [vmem:[%s1911_s1 + $0xa0] sm:$0xff]   ;;  %v1424_v23 = vld [vmem:[%s1911_s1 + $0xa8] sm:$0xff]  }
   0x9   :  { %1275 = vmatpush3.bf16.msra.mxu1 %v1408_v7  ;;  %1212 = vmatprep.subr.bf16.mxu0 %v1409_v8  ;;  %v1425_v24 = vld [vmem:[%s1911_s1 + $0x70] sm:$0xff]   ;;  %v1429_v28 = vld [vmem:[%s1911_s1 + $0x78] sm:$0xff]   ;;  %v1438_v35 = vld [vmem:[%s1912_s0 + $0xc] ss:$20 sps:$4 sm:$0xff]  }
   0xa   :  { %1276 = vmatprep.subr.bf16.mxu1 %v1410_v9  ;;  %v1426_v25 = vld [vmem:[%s1911_s1 + $0xf0] sm:$0xff]   ;;  %v1430_v29 = vld [vmem:[%s1911_s1 + $0xf8] sm:$0xff]   ;;  %v1439_v36 = vld [vmem:[%s1911_s1 + $0x100] sm:$0xff]   ;;  %757 = vmatprep.mubr.bf16.mxu1 %v1438_v35 }
   0xb   :  { %v1427_v26 = vld [vmem:[%s1911_s1 + $0x30] sm:$0xff]   ;;  %v1431_v30 = vld [vmem:[%s1911_s1 + $0x38] sm:$0xff]   ;;  %v1440_v37 = vld [vmem:[%s1912_s0 + $0x2c] ss:$20 sps:$4 sm:$0xff]  }
   0xc   :  { %1213 = vmatpush3.bf16.msra.mxu0 %v1411_v10  ;;  %v1428_v27 = vld [vmem:[%s1911_s1 + $0xb0] sm:$0xff]   ;;  %v1432_v31 = vld [vmem:[%s1911_s1 + $0xb8] sm:$0xff]   ;;  %v1446_v39 = vld [vmem:[%s1911_s1 + $0x108] sm:$0xff]  }
   0xd   :  { %1277 = vmatpush3.bf16.msra.mxu1 %v1412_v11  ;;  %1214 = vmatprep.subr.bf16.mxu0 %v1413_v12  ;;  %v1433_v32 = vld [vmem:[%s1912_s0] ss:$20 sps:$4 sm:$0xff]   ;;  %v1435_v33 = vld [vmem:[%s1912_s0 + $0x4] ss:$20 sps:$4 sm:$0xff]   ;;  %v1436_v34 = vld [vmem:[%s1912_s0 + $0x8] ss:$20 sps:$4 sm:$0xff]  }
   0xe   :  { %1278 = vmatprep.subr.bf16.mxu1 %v1414_v13  ;;  %660 = vmatprep.mubr.bf16.mxu0 %v1435_v33  ;;  %v1442_v38 = vld [vmem:[%s1912_s0 + $0x34] ss:$20 sps:$4 sm:$0xff]   ;;  %v1445_v41 = vld [vmem:[%s1912_s0 + $0x30] ss:$20 sps:$4 sm:$0xff]   ;;  %v1460_v45 = vld [vmem:[%s1911_s1 + $0x118] sm:$0xff]  }
   0xf   :  { %v1444_v40 = vld [vmem:[%s1912_s0 + $0x28] ss:$20 sps:$4 sm:$0xff]   ;;  %v1453_v44 = vld [vmem:[%s1911_s1 + $0x110] sm:$0xff]   ;;  %v1452_v47 = vld [vmem:[%s1912_s0 + $0x58] ss:$20 sps:$4 sm:$0xff]  }
  0x10   :  { %1215 = vmatpush3.bf16.msra.mxu0 %v1415_v14  ;;  %v1447_v42 = vld [vmem:[%s1912_s0 + $0x54] ss:$20 sps:$4 sm:$0xff]   ;;  %v1449_v43 = vld [vmem:[%s1912_s0 + $0x5c] ss:$20 sps:$4 sm:$0xff]   ;;  %v1456_v49 = vld [vmem:[%s1912_s0 + $0x84] ss:$20 sps:$4 sm:$0xff]  }
  0x11   :  { %1279 = vmatpush3.bf16.msra.mxu1 %v1416_v15  ;;  %1216 = vmatprep.subr.bf16.mxu0 %v1417_v16  ;;  %v1451_v46 = vld [vmem:[%s1912_s0 + $0x50] ss:$20 sps:$4 sm:$0xff]   ;;  %v1474_v51 = vld [vmem:[%s1911_s1 + $0x128] sm:$0xff]   ;;  %v1459_v53 = vld [vmem:[%s1912_s0 + $0x80] ss:$20 sps:$4 sm:$0xff]   ;;  %v1497_v16 = vmov 0.0  }
  0x12   :  { %1280 = vmatprep.subr.bf16.mxu1 %v1418_v17  ;;  %v1454_v48 = vld [vmem:[%s1912_s0 + $0x7c] ss:$20 sps:$4 sm:$0xff]   ;;  %v1467_v50 = vld [vmem:[%s1911_s1 + $0x120] sm:$0xff]   ;;  %v1458_v52 = vld [vmem:[%s1912_s0 + $0x78] ss:$20 sps:$4 sm:$0xff]   ;;  %22 = vst.msk [vmem:[#allocation2 + $0x10] sm:$0xff] %vm19_vm0, %v1497_v16 }
  0x13   :  { %v1461_v54 = vld [vmem:[%s1912_s0 + $0xa4] ss:$20 sps:$4 sm:$0xff]   ;;  %v1481_v55 = vld [vmem:[%s1911_s1 + $0x130] sm:$0xff]   ;;  %v1463_v56 = vld [vmem:[%s1912_s0 + $0xac] ss:$20 sps:$4 sm:$0xff]   ;;  %20 = vst.msk [vmem:[#allocation2] sm:$0xff] %vm19_vm0, %v1497_v16 }
  0x14   :  { %1217 = vmatpush3.bf16.msra.mxu0 %v1419_v18  ;;  %v1488_v57 = vld [vmem:[%s1911_s1 + $0x138] sm:$0xff]   ;;  %v1465_v58 = vld [vmem:[%s1912_s0 + $0xa0] ss:$20 sps:$4 sm:$0xff]   ;;  %v1473_v63 = vld [vmem:[%s1912_s0 + $0xd0] ss:$20 sps:$4 sm:$0xff]   ;;  %21 = vst.msk [vmem:[#allocation2 + $0x8] sm:$0xff] %vm19_vm0, %v1497_v16 }
  0x15   :  { %1281 = vmatpush3.bf16.msra.mxu1 %v1420_v19  ;;  %1218 = vmatprep.subr.bf16.mxu0 %v1421_v20  ;;  %v1466_v59 = vld [vmem:[%s1912_s0 + $0xa8] ss:$20 sps:$4 sm:$0xff]   ;;  %v1468_v60 = vld [vmem:[%s1912_s0 + $0xcc] ss:$20 sps:$4 sm:$0xff]   ;;  %v1479_v2 = vld [vmem:[%s1912_s0 + $0xf0] ss:$20 sps:$4 sm:$0xff]  }
  0x16   :  { %1282 = vmatprep.subr.bf16.mxu1 %v1422_v21  ;;  %v1470_v61 = vld [vmem:[%s1912_s0 + $0xd4] ss:$20 sps:$4 sm:$0xff]   ;;  %v1477_v1 = vld [vmem:[%s1912_s0 + $0xfc] ss:$20 sps:$4 sm:$0xff]   ;;  %v1480_v3 = vld [vmem:[%s1912_s0 + $0xf8] ss:$20 sps:$4 sm:$0xff]  }
  0x17   :  { %v1472_v62 = vld [vmem:[%s1912_s0 + $0xc8] ss:$20 sps:$4 sm:$0xff]   ;;  %v1484_v5 = vld [vmem:[%s1912_s0 + $0x124] ss:$20 sps:$4 sm:$0xff]   ;;  %v1487_v7 = vld [vmem:[%s1912_s0 + $0x120] ss:$20 sps:$4 sm:$0xff]  }
  0x18   :  { %1219 = vmatpush3.bf16.msra.mxu0 %v1423_v22  ;;  %v1475_v0 = vld [vmem:[%s1912_s0 + $0xf4] ss:$20 sps:$4 sm:$0xff]   ;;  %v1482_v4 = vld [vmem:[%s1912_s0 + $0x11c] ss:$20 sps:$4 sm:$0xff]   ;;  %v1486_v6 = vld [vmem:[%s1912_s0 + $0x118] ss:$20 sps:$4 sm:$0xff]  }
  0x19   :  { %1283 = vmatpush3.bf16.msra.mxu1 %v1424_v23  ;;  %1220 = vmatprep.subr.bf16.mxu0 %v1425_v24  ;;  %v1489_v8 = vld [vmem:[%s1912_s0 + $0x10] ss:$20 sps:$4 sm:$0xff]   ;;  %v1491_v10 = vld [vmem:[%s1912_s0 + $0x38] ss:$20 sps:$4 sm:$0xff]   ;;  %v1493_v12 = vld [vmem:[%s1912_s0 + $0x60] ss:$20 sps:$4 sm:$0xff]  }
  0x1a   :  { %1284 = vmatprep.subr.bf16.mxu1 %v1426_v25  ;;  %v1490_v9 = vld [vmem:[%s1912_s0 + $0xb0] ss:$20 sps:$4 sm:$0xff]   ;;  %v1492_v11 = vld [vmem:[%s1912_s0 + $0xd8] ss:$20 sps:$4 sm:$0xff]   ;;  %v1494_v13 = vld [vmem:[%s1912_s0 + $0x100] ss:$20 sps:$4 sm:$0xff]  }
  0x1b   :  { %v1495_v14 = vld [vmem:[%s1912_s0 + $0x88] ss:$20 sps:$4 sm:$0xff]   ;;  %23 = vst.msk [vmem:[#allocation2 + $0x18] sm:$0xff] %vm19_vm0, %v1497_v16  ;;  %24 = vst.msk [vmem:[#allocation2 + $0x20] sm:$0xff] %vm19_vm0, %v1497_v16 }
  0x1c   :  { %1221 = vmatpush3.bf16.msra.mxu0 %v1427_v26  ;;  %v1496_v15 = vld [vmem:[%s1912_s0 + $0x128] ss:$20 sps:$4 sm:$0xff]   ;;  %25 = vst.msk [vmem:[#allocation2 + $0x28] sm:$0xff] %vm19_vm0, %v1497_v16  ;;  %26 = vst.msk [vmem:[#allocation2 + $0x30] sm:$0xff] %vm19_vm0, %v1497_v16 }
  0x1d   :  { %1285 = vmatpush3.bf16.msra.mxu1 %v1428_v27  ;;  %1222 = vmatprep.subr.bf16.mxu0 %v1429_v28  ;;  %27 = vst.msk [vmem:[#allocation2 + $0x38] sm:$0xff] %vm19_vm0, %v1497_v16  ;;  %28 = vst.msk [vmem:[#allocation2 + $0x40] sm:$0xff] %vm19_vm0, %v1497_v16 }
  0x1e   :  { %1286 = vmatprep.subr.bf16.mxu1 %v1430_v29  ;;  %29 = vst.msk [vmem:[#allocation2 + $0x48] sm:$0xff] %vm19_vm0, %v1497_v16  ;;  %30 = vst.msk [vmem:[#allocation2 + $0x50] sm:$0xff] %vm19_vm0, %v1497_v16 }
  0x1f   :  { %31 = vst.msk [vmem:[#allocation2 + $0x58] sm:$0xff] %vm19_vm0, %v1497_v16  ;;  %32 = vst.msk [vmem:[#allocation2 + $0x60] sm:$0xff] %vm19_vm0, %v1497_v16 }
  0x20   :  { %1223 = vmatpush3.bf16.msra.mxu0 %v1431_v30  ;;  %33 = vst.msk [vmem:[#allocation2 + $0x68] sm:$0xff] %vm19_vm0, %v1497_v16  ;;  %34 = vst.msk [vmem:[#allocation2 + $0x70] sm:$0xff] %vm19_vm0, %v1497_v16 }
  0x21   :  { %1287 = vmatpush3.bf16.msra.mxu1 %v1432_v31  ;;  %1352 = vmatprep.subr.bf16.mxu0 %v1439_v36  ;;  %35 = vst.msk [vmem:[#allocation2 + $0x78] sm:$0xff] %vm19_vm0, %v1497_v16 }
  0x22   :  { %1384 = vmatprep.subr.bf16.mxu1 %v1439_v36 }
  0x23   :  { %661 = vmatmul.mubr.bf16.vlgmr.msra.gmra.mrb[0].mxu0 %v1433_v32 }
  0x24   :  { %758 = vmatmul.mubr.bf16.vlgmr.msra.gmra.mrb[0].mxu1 %v1436_v34  ;;  %1353 = vmatpush3.bf16.msra.mxu0 %v1439_v36 }
  0x25   :  { %1392 = vmatpush3.bf16.msra.mxu1 %v1439_v36  ;;  %668 = vmatprep.mubr.bf16.mxu0 %v1440_v37 }
  0x26   :  { %765 = vmatprep.mubr.bf16.mxu1 %v1442_v38  ;;  %1354 = vmatprep.subr.bf16.mxu0 %v1446_v39 }
  0x27   :  { %1385 = vmatprep.subr.bf16.mxu1 %v1446_v39 }
  0x28   :  { %1355 = vmatpush3.bf16.msra.mxu0 %v1446_v39 }
  0x29   :  { %1393 = vmatpush3.bf16.msra.mxu1 %v1446_v39  ;;  %1356 = vmatprep.subr.bf16.mxu0 %v1453_v44 }
  0x2a   :  { %1386 = vmatprep.subr.bf16.mxu1 %v1453_v44 }
  0x2b   :  { %669 = vmatmul.mubr.bf16.gmra.mrb[4].mxu0 %v1444_v40 }
  0x2c   :  { %766 = vmatmul.mubr.bf16.gmra.mrb[4].mxu1 %v1445_v41  ;;  %676 = vmatprep.mubr.bf16.mxu0 %v1447_v42 }
  0x2d   :  { %773 = vmatprep.mubr.bf16.mxu1 %v1449_v43  ;;  %1357 = vmatpush3.bf16.msra.mxu0 %v1453_v44 }
  0x2e   :  { %1394 = vmatpush3.bf16.msra.mxu1 %v1453_v44  ;;  %1358 = vmatprep.subr.bf16.mxu0 %v1460_v45 }
  0x2f   :  { %1387 = vmatprep.subr.bf16.mxu1 %v1460_v45 }
  0x31   :  { %1359 = vmatpush3.bf16.msra.mxu0 %v1460_v45 }
  0x32   :  { %1395 = vmatpush3.bf16.msra.mxu1 %v1460_v45  ;;  %1360 = vmatprep.subr.bf16.mxu0 %v1467_v50 }
  0x33   :  { %677 = vmatmul.mubr.bf16.gmra.mrb[8].mxu0 %v1451_v46  ;;  %1388 = vmatprep.subr.bf16.mxu1 %v1467_v50 }
  0x34   :  { %774 = vmatmul.mubr.bf16.gmra.mrb[8].mxu1 %v1452_v47  ;;  %684 = vmatprep.mubr.bf16.mxu0 %v1454_v48 }
  0x35   :  { %781 = vmatprep.mubr.bf16.mxu1 %v1456_v49  ;;  %1361 = vmatpush3.bf16.msra.mxu0 %v1467_v50 }
  0x36   :  { %1396 = vmatpush3.bf16.msra.mxu1 %v1467_v50  ;;  %1362 = vmatprep.subr.bf16.mxu0 %v1474_v51 }
  0x37   :  { %1389 = vmatprep.subr.bf16.mxu1 %v1474_v51 }
  0x39   :  { %1363 = vmatpush3.bf16.msra.mxu0 %v1474_v51 }
  0x3a   :  { %1397 = vmatpush3.bf16.msra.mxu1 %v1474_v51  ;;  %1364 = vmatprep.subr.bf16.mxu0 %v1481_v55 }
  0x3b   :  { %685 = vmatmul.mubr.bf16.gmra.mrb[12].mxu0 %v1458_v52  ;;  %1390 = vmatprep.subr.bf16.mxu1 %v1481_v55 }
  0x3c   :  { %782 = vmatmul.mubr.bf16.gmra.mrb[12].mxu1 %v1459_v53  ;;  %692 = vmatprep.mubr.bf16.mxu0 %v1461_v54 }
  0x3d   :  { %789 = vmatprep.mubr.bf16.mxu1 %v1463_v56  ;;  %1365 = vmatpush3.bf16.msra.mxu0 %v1481_v55 }
  0x3e   :  { %1398 = vmatpush3.bf16.msra.mxu1 %v1481_v55  ;;  %1366 = vmatprep.subr.bf16.mxu0 %v1488_v57 }
  0x3f   :  { %1391 = vmatprep.subr.bf16.mxu1 %v1488_v57 }
  0x41   :  { %1367 = vmatpush3.bf16.msra.mxu0 %v1488_v57 }
  0x42   :  { %1399 = vmatpush3.bf16.msra.mxu1 %v1488_v57 }
  0x43   :  { %693 = vmatmul.mubr.bf16.gmra.mrb[16].mxu0 %v1465_v58 }
  0x44   :  { %790 = vmatmul.mubr.bf16.gmra.mrb[16].mxu1 %v1466_v59  ;;  %700 = vmatprep.mubr.bf16.mxu0 %v1468_v60 }
  0x45   :  { %797 = vmatprep.mubr.bf16.mxu1 %v1470_v61 }
  0x4b   :  { %701 = vmatmul.mubr.bf16.gmra.mrb[20].mxu0 %v1472_v62 }
  0x4c   :  { %798 = vmatmul.mubr.bf16.gmra.mrb[20].mxu1 %v1473_v63  ;;  %708 = vmatprep.mubr.bf16.mxu0 %v1475_v0 }
  0x4d   :  { %805 = vmatprep.mubr.bf16.mxu1 %v1477_v1 }
  0x53   :  { %709 = vmatmul.mubr.bf16.gmra.mrb[24].mxu0 %v1479_v2 }
  0x54   :  { %806 = vmatmul.mubr.bf16.gmra.mrb[24].mxu1 %v1480_v3  ;;  %716 = vmatprep.mubr.bf16.mxu0 %v1482_v4 }
  0x55   :  { %813 = vmatprep.mubr.bf16.mxu1 %v1484_v5 }
  0x5b   :  { %717 = vmatmul.mubr.bf16.gmra.mrb[28].mxu0 %v1486_v6 }
  0x5c   :  { %814 = vmatmul.mubr.bf16.gmra.mrb[28].mxu1 %v1487_v7  ;;  %1368 = vmatprep.mubr.bf16.mxu0 %v1489_v8 }
  0x5d   :  { %1376 = vmatprep.mubr.bf16.mxu1 %v1490_v9 }
  0x63   :  { %1369 = vmatmul.mubr.bf16.vlgmr.msra.gmra.mrb[32].mxu0 %v1491_v10 }
  0x64   :  { %1377 = vmatmul.mubr.bf16.vlgmr.msra.gmra.mrb[32].mxu1 %v1492_v11  ;;  %1372 = vmatprep.mubr.bf16.mxu0 %v1493_v12 }
  0x65   :  { %1380 = vmatprep.mubr.bf16.mxu1 %v1494_v13 }
  0x6b   :  { %1373 = vmatmul.mubr.bf16.gmra.mrb[36].mxu0 %v1495_v14 }
  0x6c   :  { %1381 = vmatmul.mubr.bf16.gmra.mrb[36].mxu1 %v1496_v15 }
  0xf6   :  { %v1224_v17 = vpop.f32.mrb[0].mxu0 }
  0xf7   :  { %v1288_v18 = vpop.f32.mrb[0].mxu1  ;;  %v1225_v19 = vpop.f32.mrb[1].mxu0 }
  0xf8   :  { %v1226_v20 = vadd.f32 %v1225_v19, %v1224_v17  ;;  %v1289_v21 = vpop.f32.mrb[1].mxu1  ;;  %v1227_v22 = vpop.f32.mrb[2].mxu0 }
  0xf9   :  { %v1290_v23 = vadd.f32 %v1289_v21, %v1288_v18  ;;  %v1291_v24 = vpop.f32.mrb[2].mxu1  ;;  %v1228_v25 = vpop.f32.mrb[3].mxu0 }
  0xfa   :  { %v1229_v26 = vadd.f32 %v1228_v25, %v1227_v22  ;;  %v1292_v27 = vpop.f32.mrb[3].mxu1 }
  0xfb   :  { %v1293_v28 = vadd.f32 %v1292_v27, %v1291_v24  ;;  %v1774_v29 = vadd.f32 %v1290_v23, %v1226_v20 }
  0xfd   :  { %v1776_v30 = vadd.f32 %v1293_v28, %v1229_v26 }
  0xfe   :  { %v1230_v31 = vpop.f32.mrb[4].mxu0 }
  0xff   :  { %v1294_v32 = vpop.f32.mrb[4].mxu1  ;;  %v1231_v33 = vpop.f32.mrb[5].mxu0 }
 0x100   :  { %v1232_v34 = vadd.f32 %v1231_v33, %v1230_v31  ;;  %v1295_v35 = vpop.f32.mrb[5].mxu1  ;;  %v1233_v36 = vpop.f32.mrb[6].mxu0 }
 0x101   :  { %v1296_v37 = vadd.f32 %v1295_v35, %v1294_v32  ;;  %v1297_v38 = vpop.f32.mrb[6].mxu1  ;;  %v1234_v39 = vpop.f32.mrb[7].mxu0 }
 0x102   :  { %v1235_v40 = vadd.f32 %v1234_v39, %v1233_v36  ;;  %v1298_v41 = vpop.f32.mrb[7].mxu1 }
 0x103   :  { %v1299_v42 = vadd.f32 %v1298_v41, %v1297_v38  ;;  %v1778_v43 = vadd.f32 %v1296_v37, %v1232_v34 }
 0x105   :  { %v1780_v44 = vadd.f32 %v1299_v42, %v1235_v40 }
 0x106   :  { %v1236_v45 = vpop.f32.mrb[8].mxu0 }
 0x107   :  { %v1300_v46 = vpop.f32.mrb[8].mxu1  ;;  %v1237_v47 = vpop.f32.mrb[9].mxu0 }
 0x108   :  { %v1238_v48 = vadd.f32 %v1237_v47, %v1236_v45  ;;  %v1301_v49 = vpop.f32.mrb[9].mxu1  ;;  %v1239_v50 = vpop.f32.mrb[10].mxu0 }
 0x109   :  { %v1302_v51 = vadd.f32 %v1301_v49, %v1300_v46  ;;  %v1303_v52 = vpop.f32.mrb[10].mxu1  ;;  %v1240_v53 = vpop.f32.mrb[11].mxu0 }
 0x10a   :  { %v1241_v54 = vadd.f32 %v1240_v53, %v1239_v50  ;;  %v1304_v55 = vpop.f32.mrb[11].mxu1 }
 0x10b   :  { %v1305_v56 = vadd.f32 %v1304_v55, %v1303_v52  ;;  %v1782_v57 = vadd.f32 %v1302_v51, %v1238_v48 }
 0x10d   :  { %v1784_v58 = vadd.f32 %v1305_v56, %v1241_v54 }
 0x10e   :  { %v1242_v59 = vpop.f32.mrb[12].mxu0 }
 0x10f   :  { %v1306_v60 = vpop.f32.mrb[12].mxu1  ;;  %v1243_v61 = vpop.f32.mrb[13].mxu0 }
 0x110   :  { %v1244_v62 = vadd.f32 %v1243_v61, %v1242_v59  ;;  %v1307_v63 = vpop.f32.mrb[13].mxu1  ;;  %v1245_v0 = vpop.f32.mrb[14].mxu0 }
 0x111   :  { %v1308_v1 = vadd.f32 %v1307_v63, %v1306_v60  ;;  %v1309_v2 = vpop.f32.mrb[14].mxu1  ;;  %v1246_v3 = vpop.f32.mrb[15].mxu0 }
 0x112   :  { %v1247_v4 = vadd.f32 %v1246_v3, %v1245_v0  ;;  %v1310_v5 = vpop.f32.mrb[15].mxu1 }
 0x113   :  { %v1311_v6 = vadd.f32 %v1310_v5, %v1309_v2  ;;  %v1786_v7 = vadd.f32 %v1308_v1, %v1244_v62 }
 0x115   :  { %v1788_v8 = vadd.f32 %v1311_v6, %v1247_v4 }
 0x116   :  { %v1248_v9 = vpop.f32.mrb[16].mxu0 }
 0x117   :  { %v1312_v10 = vpop.f32.mrb[16].mxu1  ;;  %v1249_v11 = vpop.f32.mrb[17].mxu0 }
 0x118   :  { %v1250_v12 = vadd.f32 %v1249_v11, %v1248_v9  ;;  %v1313_v13 = vpop.f32.mrb[17].mxu1  ;;  %v1251_v14 = vpop.f32.mrb[18].mxu0  ;;  %v38_v9 = vld [vmem:[#allocation2 + $0x10] sm:$0xff] }
 0x119   :  { %v1314_v15 = vadd.f32 %v1313_v13, %v1312_v10  ;;  %v1315_v16 = vpop.f32.mrb[18].mxu1  ;;  %v1252_v17 = vpop.f32.mrb[19].mxu0 }
 0x11a   :  { %v1253_v18 = vadd.f32 %v1252_v17, %v1251_v14  ;;  %v1316_v19 = vpop.f32.mrb[19].mxu1  ;;  %v36_v14 = vld [vmem:[#allocation2] sm:$0xff] }
 0x11b   :  { %v1317_v20 = vadd.f32 %v1316_v19, %v1315_v16  ;;  %v792_v21 = vadd.f32 %v1314_v15, %v1250_v12  ;;  %v46_v12 = vld [vmem:[#allocation2 + $0x50] sm:$0xff] }
 0x11d   :  { %v1790_v22 = vadd.f32 %v1317_v20, %v1253_v18  ;;  %v44_v18 = vld [vmem:[#allocation2 + $0x40] sm:$0xff]  ;;  %v39_v20 = vld [vmem:[#allocation2 + $0x18] sm:$0xff] }
 0x11e   :  { %v1254_v23 = vpop.f32.mrb[20].mxu0 }
 0x11f   :  { %v1318_v24 = vpop.f32.mrb[20].mxu1  ;;  %v1255_v25 = vpop.f32.mrb[21].mxu0 }
 0x120   :  { %v1256_v26 = vadd.f32 %v1255_v25, %v1254_v23  ;;  %v1319_v27 = vpop.f32.mrb[21].mxu1  ;;  %v1257_v28 = vpop.f32.mrb[22].mxu0 }
 0x121   :  { %v1320_v31 = vadd.f32 %v1319_v27, %v1318_v24  ;;  %v1321_v32 = vpop.f32.mrb[22].mxu1  ;;  %v1258_v33 = vpop.f32.mrb[23].mxu0  ;;  %v47_v27 = vld [vmem:[#allocation2 + $0x58] sm:$0xff] }
 0x122   :  { %v1259_v34 = vadd.f32 %v1258_v33, %v1257_v28  ;;  %v1322_v35 = vpop.f32.mrb[23].mxu1 }
 0x123   :  { %v1323_v36 = vadd.f32 %v1322_v35, %v1321_v32  ;;  %v800_v37 = vadd.f32 %v1320_v31, %v1256_v26  ;;  %v37_v31 = vld [vmem:[#allocation2 + $0x8] sm:$0xff] }
 0x125   :  { %v803_v38 = vadd.f32 %v1323_v36, %v1259_v34  ;;  %v45_v36 = vld [vmem:[#allocation2 + $0x48] sm:$0xff] }
 0x126   :  { %v1260_v39 = vpop.f32.mrb[24].mxu0 }
 0x127   :  { %v1324_v40 = vpop.f32.mrb[24].mxu1  ;;  %v1261_v41 = vpop.f32.mrb[25].mxu0 }
 0x128   :  { %v1262_v42 = vadd.f32 %v1261_v41, %v1260_v39  ;;  %v1325_v45 = vpop.f32.mrb[25].mxu1  ;;  %v1263_v46 = vpop.f32.mrb[26].mxu0 }
 0x129   :  { %v1326_v47 = vadd.f32 %v1325_v45, %v1324_v40  ;;  %v1327_v48 = vpop.f32.mrb[26].mxu1  ;;  %v1264_v49 = vpop.f32.mrb[27].mxu0 }
 0x12a   :  { %v1265_v50 = vadd.f32 %v1264_v49, %v1263_v46  ;;  %v1328_v51 = vpop.f32.mrb[27].mxu1  ;;  %v40_v46 = vld [vmem:[#allocation2 + $0x20] sm:$0xff] }
 0x12b   :  { %v1329_v52 = vadd.f32 %v1328_v51, %v1327_v48  ;;  %v1792_v53 = vadd.f32 %v1326_v47, %v1262_v42  ;;  %v50_v42 = vld [vmem:[#allocation2 + $0x70] sm:$0xff]  ;;  %v1815_v48 = vld [vmem:[%s1913_s2] ss:$0 sm:$0xff] }
 0x12c   :  { %v48_v51 = vld [vmem:[#allocation2 + $0x60] sm:$0xff] }
 0x12d   :  { %v1794_v54 = vadd.f32 %v1329_v52, %v1265_v50 }
 0x12e   :  { %v1266_v55 = vpop.f32.mrb[28].mxu0 }
 0x12f   :  { %v1330_v56 = vpop.f32.mrb[28].mxu1  ;;  %v1267_v59 = vpop.f32.mrb[29].mxu0 }
 0x130   :  { %v1268_v60 = vadd.f32 %v1267_v59, %v1266_v55  ;;  %v1331_v61 = vpop.f32.mrb[29].mxu1  ;;  %v1269_v62 = vpop.f32.mrb[30].mxu0  ;;  %v43_v55 = vld [vmem:[#allocation2 + $0x38] sm:$0xff] }
 0x131   :  { %v1332_v63 = vadd.f32 %v1331_v61, %v1330_v56  ;;  %v1333_v0 = vpop.f32.mrb[30].mxu1  ;;  %v1270_v1 = vpop.f32.mrb[31].mxu0  ;;  %v51_v61 = vld [vmem:[#allocation2 + $0x78] sm:$0xff] }
 0x132   :  { %v1271_v2 = vadd.f32 %v1270_v1, %v1269_v62  ;;  %v1334_v3 = vpop.f32.mrb[31].mxu1 }
 0x133   :  { %v1335_v4 = vadd.f32 %v1334_v3, %v1333_v0  ;;  %v816_v5 = vadd.f32 %v1332_v63, %v1268_v60  ;;  %v41_v63 = vld [vmem:[#allocation2 + $0x28] sm:$0xff] }
 0x135   :  { %v1796_v6 = vadd.f32 %v1335_v4, %v1271_v2 }
 0x136   :  { %v1370_v10 = vpop.f32.mrb[32].mxu0 }
 0x137   :  { %v865_v11 = vadd.f32 %v1370_v10, %v1778_v43  ;;  %v1378_v13 = vpop.f32.mrb[32].mxu1  ;;  %v856_v15 = vpop.f32.mrb[33].mxu0 }
 0x138   :  { %v897_v16 = vadd.f32 %v1378_v13, %v800_v37  ;;  %v857_v17 = vadd.f32 %v856_v15, %v1774_v29  ;;  %v888_v19 = vpop.f32.mrb[33].mxu1  ;;  %v1371_v23 = vpop.f32.mrb[34].mxu0 }
 0x139   :  { %v921_v24 = vadd.f32 %v865_v11, %v38_v9  ;;  %v889_v25 = vadd.f32 %v888_v19, %v792_v21  ;;  %v868_v26 = vadd.f32 %v1371_v23, %v1780_v44  ;;  %v1379_v28 = vpop.f32.mrb[34].mxu1  ;;  %v859_v32 = vpop.f32.mrb[35].mxu0 }
 0x13a   :  { %v929_v43 = vadd.f32 %v897_v16, %v46_v12  ;;  %v919_v33 = vadd.f32 %v857_v17, %v36_v14  ;;  %v900_v34 = vadd.f32 %v1379_v28, %v803_v38  ;;  %v860_v35 = vadd.f32 %v859_v32, %v1776_v30  ;;  %v891_v37 = vpop.f32.mrb[35].mxu1  ;;  %v42_v30 = vld [vmem:[#allocation2 + $0x30] sm:$0xff] }
 0x13b   :  { %938 = vst.msk [vmem:[#allocation2 + $0x10] sm:$0xff] %vm19_vm0, %v921_v24  ;;  %v927_v29 = vadd.f32 %v889_v25, %v44_v18  ;;  %v922_v39 = vadd.f32 %v868_v26, %v39_v20  ;;  %v892_v40 = vadd.f32 %v891_v37, %v1790_v22 }
 0x13c   :  { %946 = vst.msk [vmem:[#allocation2 + $0x50] sm:$0xff] %vm19_vm0, %v929_v43  ;;  %936 = vst.msk [vmem:[#allocation2] sm:$0xff] %vm19_vm0, %v919_v33  ;;  %v930_v44 = vadd.f32 %v900_v34, %v47_v27  ;;  %v920_v21 = vadd.f32 %v860_v35, %v37_v31 }
 0x13d   :  { %944 = vst.msk [vmem:[#allocation2 + $0x40] sm:$0xff] %vm19_vm0, %v927_v29  ;;  %939 = vst.msk [vmem:[#allocation2 + $0x18] sm:$0xff] %vm19_vm0, %v922_v39  ;;  %v928_v38 = vadd.f32 %v892_v40, %v45_v36 }
 0x13e   :  { %947 = vst.msk [vmem:[#allocation2 + $0x58] sm:$0xff] %vm19_vm0, %v930_v44  ;;  %937 = vst.msk [vmem:[#allocation2 + $0x8] sm:$0xff] %vm19_vm0, %v920_v21  ;;  %v1374_v41 = vpop.f32.mrb[36].mxu0 }
 0x13f   :  { %945 = vst.msk [vmem:[#allocation2 + $0x48] sm:$0xff] %vm19_vm0, %v928_v38  ;;  %v881_v22 = vadd.f32 %v1374_v41, %v1786_v7  ;;  %v1382_v45 = vpop.f32.mrb[36].mxu1  ;;  %v872_v47 = vpop.f32.mrb[37].mxu0 }
 0x140   :  { %v913_v49 = vadd.f32 %v1382_v45, %v816_v5  ;;  %v873_v50 = vadd.f32 %v872_v47, %v1782_v57  ;;  %v904_v52 = vpop.f32.mrb[37].mxu1  ;;  %v1375_v56 = vpop.f32.mrb[38].mxu0  ;;  %v49_v5 = vld [vmem:[#allocation2 + $0x68] sm:$0xff] }
 0x141   :  { %v925_v59 = vadd.f32 %v881_v22, %v42_v30  ;;  %v905_v7 = vadd.f32 %v904_v52, %v1792_v53  ;;  %v884_v60 = vadd.f32 %v1375_v56, %v1788_v8  ;;  %v1383_v62 = vpop.f32.mrb[38].mxu1  ;;  %v875_v0 = vpop.f32.mrb[39].mxu0 }
 0x142   :  { %v957_v1 = vld [vmem:[#allocation2 + $0x10] sm:$0xff]  ;;  %v933_v2 = vadd.f32 %v913_v49, %v50_v42  ;;  %v923_v3 = vadd.f32 %v873_v50, %v40_v46  ;;  %v916_v4 = vadd.f32 %v1383_v62, %v1796_v6  ;;  %v876_v57 = vadd.f32 %v875_v0, %v1784_v58  ;;  %v907_v9 = vpop.f32.mrb[39].mxu1 }
 0x143   :  { %v980_v10 = vadd.f32 %v1815_v48, %v957_v1  ;;  %v965_v11 = vld [vmem:[#allocation2 + $0x50] sm:$0xff]  ;;  %v955_v12 = vld [vmem:[#allocation2] sm:$0xff]  ;;  %942 = vst.msk [vmem:[#allocation2 + $0x30] sm:$0xff] %vm19_vm0, %v925_v59  ;;  %v931_v8 = vadd.f32 %v905_v7, %v48_v51  ;;  %v926_v53 = vadd.f32 %v884_v60, %v43_v55  ;;  %v908_v13 = vadd.f32 %v907_v9, %v1794_v54 }
 0x144   :  { %v988_v14 = vadd.f32 %v1815_v48, %v965_v11  ;;  %v978_v15 = vadd.f32 %v1815_v48, %v955_v12  ;;  %v963_v16 = vld [vmem:[#allocation2 + $0x40] sm:$0xff]  ;;  %v958_v6 = vld [vmem:[#allocation2 + $0x18] sm:$0xff]  ;;  %950 = vst.msk [vmem:[#allocation2 + $0x70] sm:$0xff] %vm19_vm0, %v933_v2  ;;  %940 = vst.msk [vmem:[#allocation2 + $0x20] sm:$0xff] %vm19_vm0, %v923_v3  ;;  %v934_v58 = vadd.f32 %v916_v4, %v51_v61 }
 0x145   :  { %v924_v17 = vadd.f32 %v876_v57, %v41_v63  ;;  %v996_v18 = vmax.f32 %v980_v10, 0.0  ;;  %v986_v19 = vadd.f32 %v1815_v48, %v963_v16  ;;  %v981_v20 = vadd.f32 %v1815_v48, %v958_v6  ;;  %v966_v23 = vld [vmem:[#allocation2 + $0x58] sm:$0xff]  ;;  %v956_v24 = vld [vmem:[#allocation2 + $0x8] sm:$0xff]  ;;  %948 = vst.msk [vmem:[#allocation2 + $0x60] sm:$0xff] %vm19_vm0, %v931_v8  ;;  %943 = vst.msk [vmem:[#allocation2 + $0x38] sm:$0xff] %vm19_vm0, %v926_v53 }
 0x146   :  { %v932_v54 = vadd.f32 %v908_v13, %v49_v5  ;;  %v1004_v25 = vmax.f32 %v988_v14, 0.0  ;;  %v994_v26 = vmax.f32 %v978_v15, 0.0  ;;  %v989_v27 = vadd.f32 %v1815_v48, %v966_v23  ;;  %v964_v31 = vld [vmem:[#allocation2 + $0x48] sm:$0xff]  ;;  %951 = vst.msk [vmem:[#allocation2 + $0x78] sm:$0xff] %vm19_vm0, %v934_v58 }
 0x147   :  { %v979_v28 = vadd.f32 %v1815_v48, %v956_v24  ;;  %941 = vst.msk [vmem:[#allocation2 + $0x28] sm:$0xff] %vm19_vm0, %v924_v17  ;;  %v1194_v32 = vpack.c.bf16 %v996_v18, %v996_v18  ;;  %v1002_v43 = vmax.f32 %v986_v19, 0.0  ;;  %v997_v33 = vmax.f32 %v981_v20, 0.0 }
 0x148   :  { %v987_v34 = vadd.f32 %v1815_v48, %v964_v31  ;;  %949 = vst.msk [vmem:[#allocation2 + $0x68] sm:$0xff] %vm19_vm0, %v932_v54  ;;  %v1202_v35 = vpack.c.bf16 %v1004_v25, %v1004_v25  ;;  %v1192_v36 = vpack.c.bf16 %v994_v26, %v994_v26  ;;  %v1005_v37 = vmax.f32 %v989_v27, 0.0 }
 0x149   :  { %v995_v29 = vmax.f32 %v979_v28, 0.0  ;;  %1077 = vst.msk [vmem:[%s1914_s3 + $0x8] sm:$0xf] %vm1074_vm1, %v1194_v32  ;;  %v1200_v39 = vpack.c.bf16 %v1002_v43, %v1002_v43  ;;  %v1195_v40 = vpack.c.bf16 %v997_v33, %v997_v33 }
 0x14a   :  { %v1003_v44 = vmax.f32 %v987_v34, 0.0  ;;  %1085 = vst.msk [vmem:[%s1914_s3 + $0x28] sm:$0xf] %vm1074_vm1, %v1202_v35  ;;  %1075 = vst.msk [vmem:[%s1914_s3] sm:$0xf] %vm1074_vm1, %v1192_v36  ;;  %v1203_v21 = vpack.c.bf16 %v1005_v37, %v1005_v37  ;;  %v961_v30 = vld [vmem:[#allocation2 + $0x30] sm:$0xff] }
 0x14b   :  { %v1193_v38 = vpack.c.bf16 %v995_v29, %v995_v29  ;;  %1083 = vst.msk [vmem:[%s1914_s3 + $0x20] sm:$0xf] %vm1074_vm1, %v1200_v39  ;;  %1078 = vst.msk [vmem:[%s1914_s3 + $0xc] sm:$0xf] %vm1074_vm1, %v1195_v40  ;;  %v984_v22 = vadd.f32 %v1815_v48, %v961_v30  ;;  %v969_v42 = vld [vmem:[#allocation2 + $0x70] sm:$0xff]  ;;  %v959_v45 = vld [vmem:[#allocation2 + $0x20] sm:$0xff] }
 0x14c   :  { %v1201_v41 = vpack.c.bf16 %v1003_v44, %v1003_v44  ;;  %1086 = vst.msk [vmem:[%s1914_s3 + $0x2c] sm:$0xf] %vm1074_vm1, %v1203_v21  ;;  %v992_v46 = vadd.f32 %v1815_v48, %v969_v42  ;;  %v982_v47 = vadd.f32 %v1815_v48, %v959_v45  ;;  %v967_v49 = vld [vmem:[#allocation2 + $0x60] sm:$0xff]  ;;  %v962_v50 = vld [vmem:[#allocation2 + $0x38] sm:$0xff] }
 0x14d   :  { %1076 = vst.msk [vmem:[%s1914_s3 + $0x4] sm:$0xf] %vm1074_vm1, %v1193_v38  ;;  %v1000_v51 = vmax.f32 %v984_v22, 0.0  ;;  %v990_v52 = vadd.f32 %v1815_v48, %v967_v49  ;;  %v985_v55 = vadd.f32 %v1815_v48, %v962_v50  ;;  %v970_v56 = vld [vmem:[#allocation2 + $0x78] sm:$0xff] }
 0x14e   :  { %1084 = vst.msk [vmem:[%s1914_s3 + $0x24] sm:$0xf] %vm1074_vm1, %v1201_v41  ;;  %v960_v59 = vld [vmem:[#allocation2 + $0x28] sm:$0xff]  ;;  %v1008_v7 = vmax.f32 %v992_v46, 0.0  ;;  %v998_v60 = vmax.f32 %v982_v47, 0.0  ;;  %v993_v61 = vadd.f32 %v1815_v48, %v970_v56 }
 0x14f   :  { %v983_v62 = vadd.f32 %v1815_v48, %v960_v59  ;;  %v968_v63 = vld [vmem:[#allocation2 + $0x68] sm:$0xff]  ;;  %v1198_v0 = vpack.c.bf16 %v1000_v51, %v1000_v51  ;;  %v1006_v1 = vmax.f32 %v990_v52, 0.0  ;;  %v1001_v2 = vmax.f32 %v985_v55, 0.0 }
 0x150   :  { %v991_v3 = vadd.f32 %v1815_v48, %v968_v63  ;;  %v1206_v4 = vpack.c.bf16 %v1008_v7, %v1008_v7  ;;  %v1196_v57 = vpack.c.bf16 %v998_v60, %v998_v60  ;;  %v1009_v5 = vmax.f32 %v993_v61, 0.0 }
 0x151   :  { %v999_v9 = vmax.f32 %v983_v62, 0.0  ;;  %1081 = vst.msk [vmem:[%s1914_s3 + $0x18] sm:$0xf] %vm1074_vm1, %v1198_v0  ;;  %v1204_v10 = vpack.c.bf16 %v1006_v1, %v1006_v1  ;;  %v1199_v11 = vpack.c.bf16 %v1001_v2, %v1001_v2 }
 0x152   :  { %v1007_v12 = vmax.f32 %v991_v3, 0.0  ;;  %1089 = vst.msk [vmem:[%s1914_s3 + $0x38] sm:$0xf] %vm1074_vm1, %v1206_v4  ;;  %1079 = vst.msk [vmem:[%s1914_s3 + $0x10] sm:$0xf] %vm1074_vm1, %v1196_v57  ;;  %v1207_v48 = vpack.c.bf16 %v1009_v5, %v1009_v5 }
 0x153   :  { %v1197_v8 = vpack.c.bf16 %v999_v9, %v999_v9  ;;  %1087 = vst.msk [vmem:[%s1914_s3 + $0x30] sm:$0xf] %vm1074_vm1, %v1204_v10  ;;  %1082 = vst.msk [vmem:[%s1914_s3 + $0x1c] sm:$0xf] %vm1074_vm1, %v1199_v11 }
 0x154   :  { %v1205_v53 = vpack.c.bf16 %v1007_v12, %v1007_v12  ;;  %1090 = vst.msk [vmem:[%s1914_s3 + $0x3c] sm:$0xf] %vm1074_vm1, %v1207_v48 }
 0x155   :  { %1080 = vst.msk [vmem:[%s1914_s3 + $0x14] sm:$0xf] %vm1074_vm1, %v1197_v8 }
 0x156   :  { %1088 = vst.msk [vmem:[%s1914_s3 + $0x34] sm:$0xf] %vm1074_vm1, %v1205_v53 }

// kernel: _lambda_.23
= control target key start
LH: loop header
LB: loop body
LE: loop exit
PB: predicated region body
PF: predicated region fallthrough
CT: control target
= control target key end

     0   :  { %vm22_vm0 = vcmask 523264   ;;  %vm1125_vm1 = vcmask 519168   ;;  %s2100_s1 = inlined_call_operand.vmem [shape: bf16[640,64], index: 1, kind: input, shape index: {}]   ;;  %s2101_s0 = inlined_call_operand.vmem [shape: bf16[128,640], index: 0, kind: input, shape index: {}]   ;;  %s2102_s3 = inlined_call_operand.vmem [shape: bf16[128,64], index: 3, kind: input, shape index: {}]   ;;  %s2103_s2 = inlined_call_operand.vmem [shape: f32[1,64], index: 2, kind: input, shape index: {}]   ;;  %s2104_s4 = inlined_call_operand.vmem [shape: bf16[128,64], index: 4, kind: output, shape index: {}]  }
   0x1   :  { %v1491_v0 = vld [vmem:[%s2100_s1 + $0x40] sm:$0xff]   ;;  %v1495_v4 = vld [vmem:[%s2100_s1 + $0x48] sm:$0xff]   ;;  %v1499_v8 = vld [vmem:[%s2100_s1 + $0x50] sm:$0xff]  }
   0x2   :  { %v1492_v1 = vld [vmem:[%s2100_s1 + $0xc0] sm:$0xff]   ;;  %1298 = vmatprep.subr.bf16.mxu0 %v1491_v0  ;;  %v1496_v5 = vld [vmem:[%s2100_s1 + $0xc8] sm:$0xff]   ;;  %v1500_v9 = vld [vmem:[%s2100_s1 + $0xd0] sm:$0xff]  }
   0x3   :  { %v1493_v2 = vld [vmem:[%s2100_s1] sm:$0xff]   ;;  %1362 = vmatprep.subr.bf16.mxu1 %v1492_v1  ;;  %v1497_v6 = vld [vmem:[%s2100_s1 + $0x8] sm:$0xff]   ;;  %v1501_v10 = vld [vmem:[%s2100_s1 + $0x10] sm:$0xff]  }
   0x4   :  { %v1494_v3 = vld [vmem:[%s2100_s1 + $0x80] sm:$0xff]   ;;  %1299 = vmatpush3.bf16.msra.mxu0 %v1493_v2  ;;  %v1498_v7 = vld [vmem:[%s2100_s1 + $0x88] sm:$0xff]   ;;  %v1502_v11 = vld [vmem:[%s2100_s1 + $0x90] sm:$0xff]  }
   0x5   :  { %1363 = vmatpush3.bf16.msra.mxu1 %v1494_v3  ;;  %1300 = vmatprep.subr.bf16.mxu0 %v1495_v4  ;;  %v1503_v12 = vld [vmem:[%s2100_s1 + $0x58] sm:$0xff]   ;;  %v1507_v16 = vld [vmem:[%s2100_s1 + $0x60] sm:$0xff]   ;;  %v1511_v20 = vld [vmem:[%s2100_s1 + $0x68] sm:$0xff]  }
   0x6   :  { %1364 = vmatprep.subr.bf16.mxu1 %v1496_v5  ;;  %v1504_v13 = vld [vmem:[%s2100_s1 + $0xd8] sm:$0xff]   ;;  %v1508_v17 = vld [vmem:[%s2100_s1 + $0xe0] sm:$0xff]   ;;  %v1512_v21 = vld [vmem:[%s2100_s1 + $0xe8] sm:$0xff]  }
   0x7   :  { %v1505_v14 = vld [vmem:[%s2100_s1 + $0x18] sm:$0xff]   ;;  %v1509_v18 = vld [vmem:[%s2100_s1 + $0x20] sm:$0xff]   ;;  %v1513_v22 = vld [vmem:[%s2100_s1 + $0x28] sm:$0xff]  }
   0x8   :  { %1301 = vmatpush3.bf16.msra.mxu0 %v1497_v6  ;;  %v1506_v15 = vld [vmem:[%s2100_s1 + $0x98] sm:$0xff]   ;;  %v1510_v19 = vld [vmem:[%s2100_s1 + $0xa0] sm:$0xff]   ;;  %v1514_v23 = vld [vmem:[%s2100_s1 + $0xa8] sm:$0xff]  }
   0x9   :  { %1365 = vmatpush3.bf16.msra.mxu1 %v1498_v7  ;;  %1302 = vmatprep.subr.bf16.mxu0 %v1499_v8  ;;  %v1515_v24 = vld [vmem:[%s2100_s1 + $0x70] sm:$0xff]   ;;  %v1519_v28 = vld [vmem:[%s2100_s1 + $0x78] sm:$0xff]   ;;  %v1528_v35 = vld [vmem:[%s2101_s0 + $0xc] ss:$20 sps:$4 sm:$0xff]  }
   0xa   :  { %1366 = vmatprep.subr.bf16.mxu1 %v1500_v9  ;;  %v1516_v25 = vld [vmem:[%s2100_s1 + $0xf0] sm:$0xff]   ;;  %v1520_v29 = vld [vmem:[%s2100_s1 + $0xf8] sm:$0xff]   ;;  %v1529_v36 = vld [vmem:[%s2100_s1 + $0x100] sm:$0xff]   ;;  %760 = vmatprep.mubr.bf16.mxu1 %v1528_v35 }
   0xb   :  { %v1517_v26 = vld [vmem:[%s2100_s1 + $0x30] sm:$0xff]   ;;  %v1521_v30 = vld [vmem:[%s2100_s1 + $0x38] sm:$0xff]   ;;  %v1530_v37 = vld [vmem:[%s2101_s0 + $0x2c] ss:$20 sps:$4 sm:$0xff]  }
   0xc   :  { %1303 = vmatpush3.bf16.msra.mxu0 %v1501_v10  ;;  %v1518_v27 = vld [vmem:[%s2100_s1 + $0xb0] sm:$0xff]   ;;  %v1522_v31 = vld [vmem:[%s2100_s1 + $0xb8] sm:$0xff]   ;;  %v1536_v39 = vld [vmem:[%s2100_s1 + $0x108] sm:$0xff]  }
   0xd   :  { %1367 = vmatpush3.bf16.msra.mxu1 %v1502_v11  ;;  %1304 = vmatprep.subr.bf16.mxu0 %v1503_v12  ;;  %v1523_v32 = vld [vmem:[%s2101_s0] ss:$20 sps:$4 sm:$0xff]   ;;  %v1525_v33 = vld [vmem:[%s2101_s0 + $0x4] ss:$20 sps:$4 sm:$0xff]   ;;  %v1526_v34 = vld [vmem:[%s2101_s0 + $0x8] ss:$20 sps:$4 sm:$0xff]  }
   0xe   :  { %1368 = vmatprep.subr.bf16.mxu1 %v1504_v13  ;;  %663 = vmatprep.mubr.bf16.mxu0 %v1525_v33  ;;  %v1532_v38 = vld [vmem:[%s2101_s0 + $0x34] ss:$20 sps:$4 sm:$0xff]   ;;  %v1535_v41 = vld [vmem:[%s2101_s0 + $0x30] ss:$20 sps:$4 sm:$0xff]   ;;  %v1550_v45 = vld [vmem:[%s2100_s1 + $0x118] sm:$0xff]  }
   0xf   :  { %v1534_v40 = vld [vmem:[%s2101_s0 + $0x28] ss:$20 sps:$4 sm:$0xff]   ;;  %v1543_v44 = vld [vmem:[%s2100_s1 + $0x110] sm:$0xff]   ;;  %v1542_v47 = vld [vmem:[%s2101_s0 + $0x58] ss:$20 sps:$4 sm:$0xff]  }
  0x10   :  { %1305 = vmatpush3.bf16.msra.mxu0 %v1505_v14  ;;  %v1537_v42 = vld [vmem:[%s2101_s0 + $0x54] ss:$20 sps:$4 sm:$0xff]   ;;  %v1539_v43 = vld [vmem:[%s2101_s0 + $0x5c] ss:$20 sps:$4 sm:$0xff]   ;;  %v1546_v49 = vld [vmem:[%s2101_s0 + $0x84] ss:$20 sps:$4 sm:$0xff]  }
  0x11   :  { %1369 = vmatpush3.bf16.msra.mxu1 %v1506_v15  ;;  %1306 = vmatprep.subr.bf16.mxu0 %v1507_v16  ;;  %v1541_v46 = vld [vmem:[%s2101_s0 + $0x50] ss:$20 sps:$4 sm:$0xff]   ;;  %v1564_v51 = vld [vmem:[%s2100_s1 + $0x128] sm:$0xff]   ;;  %v1549_v53 = vld [vmem:[%s2101_s0 + $0x80] ss:$20 sps:$4 sm:$0xff]   ;;  %v1587_v16 = vmov 0.0  }
  0x12   :  { %1370 = vmatprep.subr.bf16.mxu1 %v1508_v17  ;;  %v1544_v48 = vld [vmem:[%s2101_s0 + $0x7c] ss:$20 sps:$4 sm:$0xff]   ;;  %v1557_v50 = vld [vmem:[%s2100_s1 + $0x120] sm:$0xff]   ;;  %v1548_v52 = vld [vmem:[%s2101_s0 + $0x78] ss:$20 sps:$4 sm:$0xff]   ;;  %25 = vst.msk [vmem:[#allocation2 + $0x10] sm:$0xff] %vm22_vm0, %v1587_v16 }
  0x13   :  { %v1551_v54 = vld [vmem:[%s2101_s0 + $0xa4] ss:$20 sps:$4 sm:$0xff]   ;;  %v1571_v55 = vld [vmem:[%s2100_s1 + $0x130] sm:$0xff]   ;;  %v1553_v56 = vld [vmem:[%s2101_s0 + $0xac] ss:$20 sps:$4 sm:$0xff]   ;;  %23 = vst.msk [vmem:[#allocation2] sm:$0xff] %vm22_vm0, %v1587_v16 }
  0x14   :  { %1307 = vmatpush3.bf16.msra.mxu0 %v1509_v18  ;;  %v1578_v57 = vld [vmem:[%s2100_s1 + $0x138] sm:$0xff]   ;;  %v1555_v58 = vld [vmem:[%s2101_s0 + $0xa0] ss:$20 sps:$4 sm:$0xff]   ;;  %v1563_v63 = vld [vmem:[%s2101_s0 + $0xd0] ss:$20 sps:$4 sm:$0xff]   ;;  %24 = vst.msk [vmem:[#allocation2 + $0x8] sm:$0xff] %vm22_vm0, %v1587_v16 }
  0x15   :  { %1371 = vmatpush3.bf16.msra.mxu1 %v1510_v19  ;;  %1308 = vmatprep.subr.bf16.mxu0 %v1511_v20  ;;  %v1556_v59 = vld [vmem:[%s2101_s0 + $0xa8] ss:$20 sps:$4 sm:$0xff]   ;;  %v1558_v60 = vld [vmem:[%s2101_s0 + $0xcc] ss:$20 sps:$4 sm:$0xff]   ;;  %v1569_v2 = vld [vmem:[%s2101_s0 + $0xf0] ss:$20 sps:$4 sm:$0xff]  }
  0x16   :  { %1372 = vmatprep.subr.bf16.mxu1 %v1512_v21  ;;  %v1560_v61 = vld [vmem:[%s2101_s0 + $0xd4] ss:$20 sps:$4 sm:$0xff]   ;;  %v1567_v1 = vld [vmem:[%s2101_s0 + $0xfc] ss:$20 sps:$4 sm:$0xff]   ;;  %v1570_v3 = vld [vmem:[%s2101_s0 + $0xf8] ss:$20 sps:$4 sm:$0xff]  }
  0x17   :  { %v1562_v62 = vld [vmem:[%s2101_s0 + $0xc8] ss:$20 sps:$4 sm:$0xff]   ;;  %v1574_v5 = vld [vmem:[%s2101_s0 + $0x124] ss:$20 sps:$4 sm:$0xff]   ;;  %v1577_v7 = vld [vmem:[%s2101_s0 + $0x120] ss:$20 sps:$4 sm:$0xff]  }
  0x18   :  { %1309 = vmatpush3.bf16.msra.mxu0 %v1513_v22  ;;  %v1565_v0 = vld [vmem:[%s2101_s0 + $0xf4] ss:$20 sps:$4 sm:$0xff]   ;;  %v1572_v4 = vld [vmem:[%s2101_s0 + $0x11c] ss:$20 sps:$4 sm:$0xff]   ;;  %v1576_v6 = vld [vmem:[%s2101_s0 + $0x118] ss:$20 sps:$4 sm:$0xff]  }
  0x19   :  { %1373 = vmatpush3.bf16.msra.mxu1 %v1514_v23  ;;  %1310 = vmatprep.subr.bf16.mxu0 %v1515_v24  ;;  %v1579_v8 = vld [vmem:[%s2101_s0 + $0x10] ss:$20 sps:$4 sm:$0xff]   ;;  %v1581_v10 = vld [vmem:[%s2101_s0 + $0x38] ss:$20 sps:$4 sm:$0xff]   ;;  %v1583_v12 = vld [vmem:[%s2101_s0 + $0x60] ss:$20 sps:$4 sm:$0xff]  }
  0x1a   :  { %1374 = vmatprep.subr.bf16.mxu1 %v1516_v25  ;;  %v1580_v9 = vld [vmem:[%s2101_s0 + $0xb0] ss:$20 sps:$4 sm:$0xff]   ;;  %v1582_v11 = vld [vmem:[%s2101_s0 + $0xd8] ss:$20 sps:$4 sm:$0xff]   ;;  %v1584_v13 = vld [vmem:[%s2101_s0 + $0x100] ss:$20 sps:$4 sm:$0xff]  }
  0x1b   :  { %v1585_v14 = vld [vmem:[%s2101_s0 + $0x88] ss:$20 sps:$4 sm:$0xff]   ;;  %26 = vst.msk [vmem:[#allocation2 + $0x18] sm:$0xff] %vm22_vm0, %v1587_v16  ;;  %27 = vst.msk [vmem:[#allocation2 + $0x20] sm:$0xff] %vm22_vm0, %v1587_v16 }
  0x1c   :  { %1311 = vmatpush3.bf16.msra.mxu0 %v1517_v26  ;;  %v1586_v15 = vld [vmem:[%s2101_s0 + $0x128] ss:$20 sps:$4 sm:$0xff]   ;;  %28 = vst.msk [vmem:[#allocation2 + $0x28] sm:$0xff] %vm22_vm0, %v1587_v16  ;;  %29 = vst.msk [vmem:[#allocation2 + $0x30] sm:$0xff] %vm22_vm0, %v1587_v16 }
  0x1d   :  { %1375 = vmatpush3.bf16.msra.mxu1 %v1518_v27  ;;  %1312 = vmatprep.subr.bf16.mxu0 %v1519_v28  ;;  %30 = vst.msk [vmem:[#allocation2 + $0x38] sm:$0xff] %vm22_vm0, %v1587_v16  ;;  %31 = vst.msk [vmem:[#allocation2 + $0x40] sm:$0xff] %vm22_vm0, %v1587_v16 }
  0x1e   :  { %1376 = vmatprep.subr.bf16.mxu1 %v1520_v29  ;;  %32 = vst.msk [vmem:[#allocation2 + $0x48] sm:$0xff] %vm22_vm0, %v1587_v16  ;;  %33 = vst.msk [vmem:[#allocation2 + $0x50] sm:$0xff] %vm22_vm0, %v1587_v16 }
  0x1f   :  { %34 = vst.msk [vmem:[#allocation2 + $0x58] sm:$0xff] %vm22_vm0, %v1587_v16  ;;  %35 = vst.msk [vmem:[#allocation2 + $0x60] sm:$0xff] %vm22_vm0, %v1587_v16 }
  0x20   :  { %1313 = vmatpush3.bf16.msra.mxu0 %v1521_v30  ;;  %36 = vst.msk [vmem:[#allocation2 + $0x68] sm:$0xff] %vm22_vm0, %v1587_v16  ;;  %37 = vst.msk [vmem:[#allocation2 + $0x70] sm:$0xff] %vm22_vm0, %v1587_v16 }
  0x21   :  { %1377 = vmatpush3.bf16.msra.mxu1 %v1522_v31  ;;  %1442 = vmatprep.subr.bf16.mxu0 %v1529_v36  ;;  %38 = vst.msk [vmem:[#allocation2 + $0x78] sm:$0xff] %vm22_vm0, %v1587_v16 }
  0x22   :  { %1474 = vmatprep.subr.bf16.mxu1 %v1529_v36 }
  0x23   :  { %664 = vmatmul.mubr.bf16.vlgmr.msra.gmra.mrb[0].mxu0 %v1523_v32 }
  0x24   :  { %761 = vmatmul.mubr.bf16.vlgmr.msra.gmra.mrb[0].mxu1 %v1526_v34  ;;  %1443 = vmatpush3.bf16.msra.mxu0 %v1529_v36 }
  0x25   :  { %1482 = vmatpush3.bf16.msra.mxu1 %v1529_v36  ;;  %671 = vmatprep.mubr.bf16.mxu0 %v1530_v37 }
  0x26   :  { %768 = vmatprep.mubr.bf16.mxu1 %v1532_v38  ;;  %1444 = vmatprep.subr.bf16.mxu0 %v1536_v39 }
  0x27   :  { %1475 = vmatprep.subr.bf16.mxu1 %v1536_v39 }
  0x28   :  { %1445 = vmatpush3.bf16.msra.mxu0 %v1536_v39 }
  0x29   :  { %1483 = vmatpush3.bf16.msra.mxu1 %v1536_v39  ;;  %1446 = vmatprep.subr.bf16.mxu0 %v1543_v44 }
  0x2a   :  { %1476 = vmatprep.subr.bf16.mxu1 %v1543_v44 }
  0x2b   :  { %672 = vmatmul.mubr.bf16.gmra.mrb[4].mxu0 %v1534_v40 }
  0x2c   :  { %769 = vmatmul.mubr.bf16.gmra.mrb[4].mxu1 %v1535_v41  ;;  %679 = vmatprep.mubr.bf16.mxu0 %v1537_v42 }
  0x2d   :  { %776 = vmatprep.mubr.bf16.mxu1 %v1539_v43  ;;  %1447 = vmatpush3.bf16.msra.mxu0 %v1543_v44 }
  0x2e   :  { %1484 = vmatpush3.bf16.msra.mxu1 %v1543_v44  ;;  %1448 = vmatprep.subr.bf16.mxu0 %v1550_v45 }
  0x2f   :  { %1477 = vmatprep.subr.bf16.mxu1 %v1550_v45 }
  0x31   :  { %1449 = vmatpush3.bf16.msra.mxu0 %v1550_v45 }
  0x32   :  { %1485 = vmatpush3.bf16.msra.mxu1 %v1550_v45  ;;  %1450 = vmatprep.subr.bf16.mxu0 %v1557_v50 }
  0x33   :  { %680 = vmatmul.mubr.bf16.gmra.mrb[8].mxu0 %v1541_v46  ;;  %1478 = vmatprep.subr.bf16.mxu1 %v1557_v50 }
  0x34   :  { %777 = vmatmul.mubr.bf16.gmra.mrb[8].mxu1 %v1542_v47  ;;  %687 = vmatprep.mubr.bf16.mxu0 %v1544_v48 }
  0x35   :  { %784 = vmatprep.mubr.bf16.mxu1 %v1546_v49  ;;  %1451 = vmatpush3.bf16.msra.mxu0 %v1557_v50 }
  0x36   :  { %1486 = vmatpush3.bf16.msra.mxu1 %v1557_v50  ;;  %1452 = vmatprep.subr.bf16.mxu0 %v1564_v51 }
  0x37   :  { %1479 = vmatprep.subr.bf16.mxu1 %v1564_v51 }
  0x39   :  { %1453 = vmatpush3.bf16.msra.mxu0 %v1564_v51 }
  0x3a   :  { %1487 = vmatpush3.bf16.msra.mxu1 %v1564_v51  ;;  %1454 = vmatprep.subr.bf16.mxu0 %v1571_v55 }
  0x3b   :  { %688 = vmatmul.mubr.bf16.gmra.mrb[12].mxu0 %v1548_v52  ;;  %1480 = vmatprep.subr.bf16.mxu1 %v1571_v55 }
  0x3c   :  { %785 = vmatmul.mubr.bf16.gmra.mrb[12].mxu1 %v1549_v53  ;;  %695 = vmatprep.mubr.bf16.mxu0 %v1551_v54 }
  0x3d   :  { %792 = vmatprep.mubr.bf16.mxu1 %v1553_v56  ;;  %1455 = vmatpush3.bf16.msra.mxu0 %v1571_v55 }
  0x3e   :  { %1488 = vmatpush3.bf16.msra.mxu1 %v1571_v55  ;;  %1456 = vmatprep.subr.bf16.mxu0 %v1578_v57 }
  0x3f   :  { %1481 = vmatprep.subr.bf16.mxu1 %v1578_v57 }
  0x41   :  { %1457 = vmatpush3.bf16.msra.mxu0 %v1578_v57 }
  0x42   :  { %1489 = vmatpush3.bf16.msra.mxu1 %v1578_v57 }
  0x43   :  { %696 = vmatmul.mubr.bf16.gmra.mrb[16].mxu0 %v1555_v58 }
  0x44   :  { %793 = vmatmul.mubr.bf16.gmra.mrb[16].mxu1 %v1556_v59  ;;  %703 = vmatprep.mubr.bf16.mxu0 %v1558_v60 }
  0x45   :  { %800 = vmatprep.mubr.bf16.mxu1 %v1560_v61 }
  0x4b   :  { %704 = vmatmul.mubr.bf16.gmra.mrb[20].mxu0 %v1562_v62 }
  0x4c   :  { %801 = vmatmul.mubr.bf16.gmra.mrb[20].mxu1 %v1563_v63  ;;  %711 = vmatprep.mubr.bf16.mxu0 %v1565_v0 }
  0x4d   :  { %808 = vmatprep.mubr.bf16.mxu1 %v1567_v1 }
  0x53   :  { %712 = vmatmul.mubr.bf16.gmra.mrb[24].mxu0 %v1569_v2 }
  0x54   :  { %809 = vmatmul.mubr.bf16.gmra.mrb[24].mxu1 %v1570_v3  ;;  %719 = vmatprep.mubr.bf16.mxu0 %v1572_v4 }
  0x55   :  { %816 = vmatprep.mubr.bf16.mxu1 %v1574_v5 }
  0x5b   :  { %720 = vmatmul.mubr.bf16.gmra.mrb[28].mxu0 %v1576_v6 }
  0x5c   :  { %817 = vmatmul.mubr.bf16.gmra.mrb[28].mxu1 %v1577_v7  ;;  %1458 = vmatprep.mubr.bf16.mxu0 %v1579_v8 }
  0x5d   :  { %1466 = vmatprep.mubr.bf16.mxu1 %v1580_v9 }
  0x63   :  { %1459 = vmatmul.mubr.bf16.vlgmr.msra.gmra.mrb[32].mxu0 %v1581_v10 }
  0x64   :  { %1467 = vmatmul.mubr.bf16.vlgmr.msra.gmra.mrb[32].mxu1 %v1582_v11  ;;  %1462 = vmatprep.mubr.bf16.mxu0 %v1583_v12 }
  0x65   :  { %1470 = vmatprep.mubr.bf16.mxu1 %v1584_v13 }
  0x6b   :  { %1463 = vmatmul.mubr.bf16.gmra.mrb[36].mxu0 %v1585_v14 }
  0x6c   :  { %1471 = vmatmul.mubr.bf16.gmra.mrb[36].mxu1 %v1586_v15 }
  0xf6   :  { %v1314_v17 = vpop.f32.mrb[0].mxu0 }
  0xf7   :  { %v1378_v18 = vpop.f32.mrb[0].mxu1  ;;  %v1315_v19 = vpop.f32.mrb[1].mxu0 }
  0xf8   :  { %v1316_v20 = vadd.f32 %v1315_v19, %v1314_v17  ;;  %v1379_v21 = vpop.f32.mrb[1].mxu1  ;;  %v1317_v22 = vpop.f32.mrb[2].mxu0 }
  0xf9   :  { %v1380_v23 = vadd.f32 %v1379_v21, %v1378_v18  ;;  %v1381_v24 = vpop.f32.mrb[2].mxu1  ;;  %v1318_v25 = vpop.f32.mrb[3].mxu0 }
  0xfa   :  { %v1319_v26 = vadd.f32 %v1318_v25, %v1317_v22  ;;  %v1382_v27 = vpop.f32.mrb[3].mxu1 }
  0xfb   :  { %v1383_v28 = vadd.f32 %v1382_v27, %v1381_v24  ;;  %v1869_v29 = vadd.f32 %v1380_v23, %v1316_v20 }
  0xfd   :  { %v1871_v30 = vadd.f32 %v1383_v28, %v1319_v26 }
  0xfe   :  { %v1320_v31 = vpop.f32.mrb[4].mxu0 }
  0xff   :  { %v1384_v32 = vpop.f32.mrb[4].mxu1  ;;  %v1321_v33 = vpop.f32.mrb[5].mxu0 }
 0x100   :  { %v1322_v34 = vadd.f32 %v1321_v33, %v1320_v31  ;;  %v1385_v35 = vpop.f32.mrb[5].mxu1  ;;  %v1323_v36 = vpop.f32.mrb[6].mxu0 }
 0x101   :  { %v1386_v37 = vadd.f32 %v1385_v35, %v1384_v32  ;;  %v1387_v38 = vpop.f32.mrb[6].mxu1  ;;  %v1324_v39 = vpop.f32.mrb[7].mxu0 }
 0x102   :  { %v1325_v40 = vadd.f32 %v1324_v39, %v1323_v36  ;;  %v1388_v41 = vpop.f32.mrb[7].mxu1 }
 0x103   :  { %v1389_v42 = vadd.f32 %v1388_v41, %v1387_v38  ;;  %v1873_v43 = vadd.f32 %v1386_v37, %v1322_v34 }
 0x105   :  { %v1875_v44 = vadd.f32 %v1389_v42, %v1325_v40 }
 0x106   :  { %v1326_v45 = vpop.f32.mrb[8].mxu0 }
 0x107   :  { %v1390_v46 = vpop.f32.mrb[8].mxu1  ;;  %v1327_v47 = vpop.f32.mrb[9].mxu0 }
 0x108   :  { %v1328_v48 = vadd.f32 %v1327_v47, %v1326_v45  ;;  %v1391_v49 = vpop.f32.mrb[9].mxu1  ;;  %v1329_v50 = vpop.f32.mrb[10].mxu0 }
 0x109   :  { %v1392_v51 = vadd.f32 %v1391_v49, %v1390_v46  ;;  %v1393_v52 = vpop.f32.mrb[10].mxu1  ;;  %v1330_v53 = vpop.f32.mrb[11].mxu0 }
 0x10a   :  { %v1331_v54 = vadd.f32 %v1330_v53, %v1329_v50  ;;  %v1394_v55 = vpop.f32.mrb[11].mxu1 }
 0x10b   :  { %v1395_v56 = vadd.f32 %v1394_v55, %v1393_v52  ;;  %v1877_v57 = vadd.f32 %v1392_v51, %v1328_v48 }
 0x10d   :  { %v1879_v58 = vadd.f32 %v1395_v56, %v1331_v54 }
 0x10e   :  { %v1332_v59 = vpop.f32.mrb[12].mxu0 }
 0x10f   :  { %v1396_v60 = vpop.f32.mrb[12].mxu1  ;;  %v1333_v61 = vpop.f32.mrb[13].mxu0 }
 0x110   :  { %v1334_v62 = vadd.f32 %v1333_v61, %v1332_v59  ;;  %v1397_v63 = vpop.f32.mrb[13].mxu1  ;;  %v1335_v0 = vpop.f32.mrb[14].mxu0 }
 0x111   :  { %v1398_v1 = vadd.f32 %v1397_v63, %v1396_v60  ;;  %v1399_v2 = vpop.f32.mrb[14].mxu1  ;;  %v1336_v3 = vpop.f32.mrb[15].mxu0 }
 0x112   :  { %v1337_v4 = vadd.f32 %v1336_v3, %v1335_v0  ;;  %v1400_v5 = vpop.f32.mrb[15].mxu1 }
 0x113   :  { %v1401_v6 = vadd.f32 %v1400_v5, %v1399_v2  ;;  %v1881_v7 = vadd.f32 %v1398_v1, %v1334_v62 }
 0x115   :  { %v1883_v8 = vadd.f32 %v1401_v6, %v1337_v4 }
 0x116   :  { %v1338_v9 = vpop.f32.mrb[16].mxu0 }
 0x117   :  { %v1402_v10 = vpop.f32.mrb[16].mxu1  ;;  %v1339_v11 = vpop.f32.mrb[17].mxu0 }
 0x118   :  { %v1340_v12 = vadd.f32 %v1339_v11, %v1338_v9  ;;  %v1403_v13 = vpop.f32.mrb[17].mxu1  ;;  %v1341_v14 = vpop.f32.mrb[18].mxu0  ;;  %v41_v9 = vld [vmem:[#allocation2 + $0x10] sm:$0xff] }
 0x119   :  { %v1404_v15 = vadd.f32 %v1403_v13, %v1402_v10  ;;  %v1405_v16 = vpop.f32.mrb[18].mxu1  ;;  %v1342_v17 = vpop.f32.mrb[19].mxu0 }
 0x11a   :  { %v1343_v18 = vadd.f32 %v1342_v17, %v1341_v14  ;;  %v1406_v19 = vpop.f32.mrb[19].mxu1  ;;  %v39_v14 = vld [vmem:[#allocation2] sm:$0xff]  ;;  %v1901_v17 = vld [vmem:[%s2102_s3 + $0x8] sm:$0xff]  }
 0x11b   :  { %v1407_v20 = vadd.f32 %v1406_v19, %v1405_v16  ;;  %v1885_v21 = vadd.f32 %v1404_v15, %v1340_v12  ;;  %v49_v12 = vld [vmem:[#allocation2 + $0x50] sm:$0xff]  ;;  %v47_v16 = vld [vmem:[#allocation2 + $0x40] sm:$0xff] }
 0x11d   :  { %v1887_v22 = vadd.f32 %v1407_v20, %v1343_v18 }
 0x11e   :  { %v1344_v23 = vpop.f32.mrb[20].mxu0 }
 0x11f   :  { %v1408_v24 = vpop.f32.mrb[20].mxu1  ;;  %v1345_v25 = vpop.f32.mrb[21].mxu0 }
 0x120   :  { %v1346_v26 = vadd.f32 %v1345_v25, %v1344_v23  ;;  %v1409_v27 = vpop.f32.mrb[21].mxu1  ;;  %v1347_v28 = vpop.f32.mrb[22].mxu0  ;;  %v42_v23 = vld [vmem:[#allocation2 + $0x18] sm:$0xff] }
 0x121   :  { %v1410_v31 = vadd.f32 %v1409_v27, %v1408_v24  ;;  %v1411_v32 = vpop.f32.mrb[22].mxu1  ;;  %v1348_v33 = vpop.f32.mrb[23].mxu0  ;;  %v50_v25 = vld [vmem:[#allocation2 + $0x58] sm:$0xff]  ;;  %v1912_v27 = vld [vmem:[%s2102_s3] sm:$0xff]  }
 0x122   :  { %v1349_v34 = vadd.f32 %v1348_v33, %v1347_v28  ;;  %v1412_v35 = vpop.f32.mrb[23].mxu1 }
 0x123   :  { %v1413_v36 = vadd.f32 %v1412_v35, %v1411_v32  ;;  %v803_v37 = vadd.f32 %v1410_v31, %v1346_v26  ;;  %v40_v32 = vld [vmem:[#allocation2 + $0x8] sm:$0xff] }
 0x125   :  { %v806_v38 = vadd.f32 %v1413_v36, %v1349_v34  ;;  %v1919_v36 = vld [vmem:[%s2102_s3 + $0x20] sm:$0xff]  }
 0x126   :  { %v1350_v39 = vpop.f32.mrb[24].mxu0 }
 0x127   :  { %v1414_v40 = vpop.f32.mrb[24].mxu1  ;;  %v1351_v41 = vpop.f32.mrb[25].mxu0 }
 0x128   :  { %v1352_v42 = vadd.f32 %v1351_v41, %v1350_v39  ;;  %v1415_v45 = vpop.f32.mrb[25].mxu1  ;;  %v1353_v46 = vpop.f32.mrb[26].mxu0 }
 0x129   :  { %v1416_v47 = vadd.f32 %v1415_v45, %v1414_v40  ;;  %v1417_v48 = vpop.f32.mrb[26].mxu1  ;;  %v1354_v49 = vpop.f32.mrb[27].mxu0  ;;  %v48_v40 = vld [vmem:[#allocation2 + $0x48] sm:$0xff] }
 0x12a   :  { %v1355_v50 = vadd.f32 %v1354_v49, %v1353_v46  ;;  %v1418_v51 = vpop.f32.mrb[27].mxu1  ;;  %v1928_v46 = vld [vmem:[%s2102_s3 + $0x18] sm:$0xff]   ;;  %v1942_v49 = vld [vmem:[%s2102_s3 + $0x10] sm:$0xff]  }
 0x12b   :  { %v1419_v52 = vadd.f32 %v1418_v51, %v1417_v48  ;;  %v1889_v53 = vadd.f32 %v1416_v47, %v1352_v42  ;;  %v1261_v47 = vunpack.c.l.bf16 %v1912_v27  ;;  %v1277_v51 = vunpack.c.l.bf16 %v1919_v36 }
 0x12d   :  { %v1891_v54 = vadd.f32 %v1419_v52, %v1355_v50  ;;  %v1947_v50 = vld [vmem:[%s2102_s3 + $0x30] sm:$0xff]   ;;  %v1266_v52 = vunpack.c.h.bf16 %v1901_v17 }
 0x12e   :  { %v1356_v55 = vpop.f32.mrb[28].mxu0 }
 0x12f   :  { %v1420_v56 = vpop.f32.mrb[28].mxu1  ;;  %v1357_v59 = vpop.f32.mrb[29].mxu0 }
 0x130   :  { %v1358_v60 = vadd.f32 %v1357_v59, %v1356_v55  ;;  %v1421_v61 = vpop.f32.mrb[29].mxu1  ;;  %v1359_v62 = vpop.f32.mrb[30].mxu0  ;;  %v1262_v59 = vunpack.c.h.bf16 %v1912_v27 }
 0x131   :  { %v1422_v63 = vadd.f32 %v1421_v61, %v1420_v56  ;;  %v1423_v0 = vpop.f32.mrb[30].mxu1  ;;  %v1360_v1 = vpop.f32.mrb[31].mxu0  ;;  %v45_v61 = vld [vmem:[#allocation2 + $0x30] sm:$0xff] }
 0x132   :  { %v1361_v2 = vadd.f32 %v1360_v1, %v1359_v62  ;;  %v1424_v3 = vpop.f32.mrb[31].mxu1 }
 0x133   :  { %v1425_v4 = vadd.f32 %v1424_v3, %v1423_v0  ;;  %v1893_v5 = vadd.f32 %v1422_v63, %v1358_v60  ;;  %v1278_v60 = vunpack.c.h.bf16 %v1919_v36  ;;  %v1273_v63 = vunpack.c.l.bf16 %v1928_v46 }
 0x135   :  { %v1895_v6 = vadd.f32 %v1425_v4, %v1361_v2  ;;  %v53_v2 = vld [vmem:[#allocation2 + $0x70] sm:$0xff]  ;;  %v43_v4 = vld [vmem:[#allocation2 + $0x20] sm:$0xff] }
 0x136   :  { %v1460_v10 = vpop.f32.mrb[32].mxu0 }
 0x137   :  { %v868_v11 = vadd.f32 %v1460_v10, %v1873_v43  ;;  %v1468_v13 = vpop.f32.mrb[32].mxu1  ;;  %v859_v15 = vpop.f32.mrb[33].mxu0  ;;  %v1907_v43 = vld [vmem:[%s2102_s3 + $0x28] sm:$0xff]   ;;  %v1269_v10 = vunpack.c.l.bf16 %v1942_v49 }
 0x138   :  { %v900_v18 = vadd.f32 %v1468_v13, %v803_v37  ;;  %v860_v19 = vadd.f32 %v859_v15, %v1869_v29  ;;  %v891_v20 = vpop.f32.mrb[33].mxu1  ;;  %v1461_v24 = vpop.f32.mrb[34].mxu0  ;;  %v1282_v55 = vunpack.c.h.bf16 %v1907_v43  ;;  %v1968_v13 = vld [vmem:[%s2103_s2] ss:$0 sm:$0xff] }
 0x139   :  { %v924_v26 = vadd.f32 %v868_v11, %v41_v9  ;;  %v892_v28 = vadd.f32 %v891_v20, %v1885_v21  ;;  %v871_v31 = vadd.f32 %v1461_v24, %v1875_v44  ;;  %v1469_v29 = vpop.f32.mrb[34].mxu1  ;;  %v862_v33 = vpop.f32.mrb[35].mxu0  ;;  %v1265_v21 = vunpack.c.l.bf16 %v1901_v17  ;;  %v51_v15 = vld [vmem:[#allocation2 + $0x60] sm:$0xff] }
 0x13a   :  { %v932_v34 = vadd.f32 %v900_v18, %v49_v12  ;;  %v922_v35 = vadd.f32 %v860_v19, %v39_v14  ;;  %v903_v37 = vadd.f32 %v1469_v29, %v806_v38  ;;  %v863_v39 = vadd.f32 %v862_v33, %v1871_v30  ;;  %v894_v41 = vpop.f32.mrb[35].mxu1  ;;  %v1933_v38 = vld [vmem:[%s2102_s3 + $0x38] sm:$0xff]   ;;  %v44_v29 = vld [vmem:[#allocation2 + $0x28] sm:$0xff] }
 0x13b   :  { %941 = vst.msk [vmem:[#allocation2 + $0x10] sm:$0xff] %vm22_vm0, %v924_v26  ;;  %v930_v44 = vadd.f32 %v892_v28, %v47_v16  ;;  %v925_v42 = vadd.f32 %v871_v31, %v42_v23  ;;  %v895_v45 = vadd.f32 %v894_v41, %v1887_v22  ;;  %v1281_v30 = vunpack.c.l.bf16 %v1907_v43  ;;  %v46_v18 = vld [vmem:[#allocation2 + $0x38] sm:$0xff] }
 0x13c   :  { %949 = vst.msk [vmem:[#allocation2 + $0x50] sm:$0xff] %vm22_vm0, %v932_v34  ;;  %939 = vst.msk [vmem:[#allocation2] sm:$0xff] %vm22_vm0, %v922_v35  ;;  %v933_v48 = vadd.f32 %v903_v37, %v50_v25  ;;  %v923_v22 = vadd.f32 %v863_v39, %v40_v32  ;;  %v1289_v0 = vunpack.c.l.bf16 %v1933_v38  ;;  %v1285_v11 = vunpack.c.l.bf16 %v1947_v50  ;;  %v54_v28 = vld [vmem:[#allocation2 + $0x78] sm:$0xff]  ;;  %v52_v39 = vld [vmem:[#allocation2 + $0x68] sm:$0xff] }
 0x13d   :  { %947 = vst.msk [vmem:[#allocation2 + $0x40] sm:$0xff] %vm22_vm0, %v930_v44  ;;  %942 = vst.msk [vmem:[#allocation2 + $0x18] sm:$0xff] %vm22_vm0, %v925_v42  ;;  %v931_v56 = vadd.f32 %v895_v45, %v48_v40  ;;  %v1274_v12 = vunpack.c.h.bf16 %v1928_v46  ;;  %v1290_v20 = vunpack.c.h.bf16 %v1933_v38  ;;  %v1270_v23 = vunpack.c.h.bf16 %v1942_v49 }
 0x13e   :  { %950 = vst.msk [vmem:[#allocation2 + $0x58] sm:$0xff] %vm22_vm0, %v933_v48  ;;  %940 = vst.msk [vmem:[#allocation2 + $0x8] sm:$0xff] %vm22_vm0, %v923_v22  ;;  %v1464_v62 = vpop.f32.mrb[36].mxu0 }
 0x13f   :  { %948 = vst.msk [vmem:[#allocation2 + $0x48] sm:$0xff] %vm22_vm0, %v931_v56  ;;  %v884_v1 = vadd.f32 %v1464_v62, %v1881_v7  ;;  %v1472_v3 = vpop.f32.mrb[36].mxu1  ;;  %v875_v9 = vpop.f32.mrb[37].mxu0 }
 0x140   :  { %v916_v14 = vadd.f32 %v1472_v3, %v1893_v5  ;;  %v876_v7 = vadd.f32 %v875_v9, %v1877_v57  ;;  %v907_v16 = vpop.f32.mrb[37].mxu1  ;;  %v1465_v19 = vpop.f32.mrb[38].mxu0  ;;  %v1286_v5 = vunpack.c.h.bf16 %v1947_v50 }
 0x141   :  { %v928_v24 = vadd.f32 %v884_v1, %v45_v61  ;;  %v908_v25 = vadd.f32 %v907_v16, %v1889_v53  ;;  %v887_v26 = vadd.f32 %v1465_v19, %v1883_v8  ;;  %v1473_v31 = vpop.f32.mrb[38].mxu1  ;;  %v878_v32 = vpop.f32.mrb[39].mxu0 }
 0x142   :  { %v960_v57 = vld [vmem:[#allocation2 + $0x10] sm:$0xff]  ;;  %v936_v33 = vadd.f32 %v916_v14, %v53_v2  ;;  %v926_v34 = vadd.f32 %v876_v7, %v43_v4  ;;  %v919_v35 = vadd.f32 %v1473_v31, %v1895_v6  ;;  %v879_v37 = vadd.f32 %v878_v32, %v1879_v58  ;;  %v910_v40 = vpop.f32.mrb[39].mxu1 }
 0x143   :  { %v983_v41 = vadd.f32 %v1968_v13, %v960_v57  ;;  %v968_v53 = vld [vmem:[#allocation2 + $0x50] sm:$0xff]  ;;  %v958_v44 = vld [vmem:[#allocation2] sm:$0xff]  ;;  %945 = vst.msk [vmem:[#allocation2 + $0x30] sm:$0xff] %vm22_vm0, %v928_v24  ;;  %v934_v8 = vadd.f32 %v908_v25, %v51_v15  ;;  %v929_v42 = vadd.f32 %v887_v26, %v46_v18  ;;  %v911_v45 = vadd.f32 %v910_v40, %v1891_v54 }
 0x144   :  { %v991_v48 = vadd.f32 %v1968_v13, %v968_v53  ;;  %v981_v22 = vadd.f32 %v1968_v13, %v958_v44  ;;  %v966_v56 = vld [vmem:[#allocation2 + $0x40] sm:$0xff]  ;;  %v961_v6 = vld [vmem:[#allocation2 + $0x18] sm:$0xff]  ;;  %953 = vst.msk [vmem:[#allocation2 + $0x70] sm:$0xff] %vm22_vm0, %v936_v33  ;;  %943 = vst.msk [vmem:[#allocation2 + $0x20] sm:$0xff] %vm22_vm0, %v926_v34  ;;  %v937_v58 = vadd.f32 %v919_v35, %v54_v28 }
 0x145   :  { %v927_v61 = vadd.f32 %v879_v37, %v44_v29  ;;  %v1031_v62 = vadd.f32 %v1265_v21, %v983_v41  ;;  %v989_v1 = vadd.f32 %v1968_v13, %v966_v56  ;;  %v984_v2 = vadd.f32 %v1968_v13, %v961_v6  ;;  %v969_v54 = vld [vmem:[#allocation2 + $0x58] sm:$0xff]  ;;  %v959_v3 = vld [vmem:[#allocation2 + $0x8] sm:$0xff]  ;;  %951 = vst.msk [vmem:[#allocation2 + $0x60] sm:$0xff] %vm22_vm0, %v934_v8 }
 0x146   :  { %946 = vst.msk [vmem:[#allocation2 + $0x38] sm:$0xff] %vm22_vm0, %v929_v42  ;;  %v935_v4 = vadd.f32 %v911_v45, %v52_v39  ;;  %v1039_v9 = vadd.f32 %v1281_v30, %v991_v48  ;;  %v1029_v14 = vadd.f32 %v1261_v47, %v981_v22  ;;  %v992_v7 = vadd.f32 %v1968_v13, %v969_v54  ;;  %v967_v15 = vld [vmem:[#allocation2 + $0x48] sm:$0xff] }
 0x147   :  { %v982_v21 = vadd.f32 %v1968_v13, %v959_v3  ;;  %954 = vst.msk [vmem:[#allocation2 + $0x78] sm:$0xff] %vm22_vm0, %v937_v58  ;;  %944 = vst.msk [vmem:[#allocation2 + $0x28] sm:$0xff] %vm22_vm0, %v927_v61  ;;  %v1047_v16 = vmax.f32 %v1031_v62, 0.0  ;;  %v1037_v18 = vadd.f32 %v1277_v51, %v989_v1  ;;  %v1032_v19 = vadd.f32 %v1266_v52, %v984_v2 }
 0x148   :  { %v990_v30 = vadd.f32 %v1968_v13, %v967_v15  ;;  %952 = vst.msk [vmem:[#allocation2 + $0x68] sm:$0xff] %vm22_vm0, %v935_v4  ;;  %v1055_v47 = vmax.f32 %v1039_v9, 0.0  ;;  %v1045_v24 = vmax.f32 %v1029_v14, 0.0  ;;  %v1040_v25 = vadd.f32 %v1282_v55, %v992_v7 }
 0x149   :  { %v1030_v26 = vadd.f32 %v1262_v59, %v982_v21  ;;  %v1245_v28 = vpack.c.bf16 %v1047_v16, %v1047_v16  ;;  %v1053_v31 = vmax.f32 %v1037_v18, 0.0  ;;  %v1048_v29 = vmax.f32 %v1032_v19, 0.0 }
 0x14a   :  { %v1038_v51 = vadd.f32 %v1278_v60, %v990_v30  ;;  %v1253_v17 = vpack.c.bf16 %v1055_v47, %v1055_v47  ;;  %v1243_v52 = vpack.c.bf16 %v1045_v24, %v1045_v24  ;;  %v1056_v32 = vmax.f32 %v1040_v25, 0.0  ;;  %v964_v33 = vld [vmem:[#allocation2 + $0x30] sm:$0xff] }
 0x14b   :  { %v1046_v57 = vmax.f32 %v1030_v26, 0.0  ;;  %1128 = vst.msk [vmem:[%s2104_s4 + $0x8] sm:$0xf] %vm1125_vm1, %v1245_v28  ;;  %v1251_v43 = vpack.c.bf16 %v1053_v31, %v1053_v31  ;;  %v1246_v55 = vpack.c.bf16 %v1048_v29, %v1048_v29  ;;  %v987_v59 = vadd.f32 %v1968_v13, %v964_v33  ;;  %v972_v34 = vld [vmem:[#allocation2 + $0x70] sm:$0xff]  ;;  %v962_v35 = vld [vmem:[#allocation2 + $0x20] sm:$0xff] }
 0x14c   :  { %v1054_v27 = vmax.f32 %v1038_v51, 0.0  ;;  %1136 = vst.msk [vmem:[%s2104_s4 + $0x28] sm:$0xf] %vm1125_vm1, %v1253_v17  ;;  %1126 = vst.msk [vmem:[%s2104_s4] sm:$0xf] %vm1125_vm1, %v1243_v52  ;;  %v1254_v36 = vpack.c.bf16 %v1056_v32, %v1056_v32  ;;  %v995_v37 = vadd.f32 %v1968_v13, %v972_v34  ;;  %v985_v39 = vadd.f32 %v1968_v13, %v962_v35  ;;  %v970_v40 = vld [vmem:[#allocation2 + $0x60] sm:$0xff] }
 0x14d   :  { %v1244_v60 = vpack.c.bf16 %v1046_v57, %v1046_v57  ;;  %v965_v41 = vld [vmem:[#allocation2 + $0x38] sm:$0xff]  ;;  %1134 = vst.msk [vmem:[%s2104_s4 + $0x20] sm:$0xf] %vm1125_vm1, %v1251_v43  ;;  %1129 = vst.msk [vmem:[%s2104_s4 + $0xc] sm:$0xf] %vm1125_vm1, %v1246_v55  ;;  %v1035_v44 = vadd.f32 %v1273_v63, %v987_v59  ;;  %v993_v8 = vadd.f32 %v1968_v13, %v970_v40 }
 0x14e   :  { %v1252_v53 = vpack.c.bf16 %v1054_v27, %v1054_v27  ;;  %v988_v42 = vadd.f32 %v1968_v13, %v965_v41  ;;  %v973_v45 = vld [vmem:[#allocation2 + $0x78] sm:$0xff]  ;;  %v963_v48 = vld [vmem:[#allocation2 + $0x28] sm:$0xff]  ;;  %1137 = vst.msk [vmem:[%s2104_s4 + $0x2c] sm:$0xf] %vm1125_vm1, %v1254_v36  ;;  %v1043_v22 = vadd.f32 %v1289_v0, %v995_v37  ;;  %v1033_v63 = vadd.f32 %v1269_v10, %v985_v39 }
 0x14f   :  { %1127 = vst.msk [vmem:[%s2104_s4 + $0x4] sm:$0xf] %vm1125_vm1, %v1244_v60  ;;  %v996_v56 = vadd.f32 %v1968_v13, %v973_v45  ;;  %v986_v6 = vadd.f32 %v1968_v13, %v963_v48  ;;  %v971_v58 = vld [vmem:[#allocation2 + $0x68] sm:$0xff]  ;;  %v1051_v61 = vmax.f32 %v1035_v44, 0.0  ;;  %v1041_v62 = vadd.f32 %v1285_v11, %v993_v8 }
 0x150   :  { %1135 = vst.msk [vmem:[%s2104_s4 + $0x24] sm:$0xf] %vm1125_vm1, %v1252_v53  ;;  %v1036_v0 = vadd.f32 %v1274_v12, %v988_v42  ;;  %v994_v1 = vadd.f32 %v1968_v13, %v971_v58  ;;  %v1059_v10 = vmax.f32 %v1043_v22, 0.0  ;;  %v1049_v2 = vmax.f32 %v1033_v63, 0.0 }
 0x151   :  { %v1044_v54 = vadd.f32 %v1290_v20, %v996_v56  ;;  %v1034_v3 = vadd.f32 %v1270_v23, %v986_v6  ;;  %v1249_v4 = vpack.c.bf16 %v1051_v61, %v1051_v61  ;;  %v1057_v9 = vmax.f32 %v1041_v62, 0.0 }
 0x152   :  { %v1052_v14 = vmax.f32 %v1036_v0, 0.0  ;;  %v1042_v7 = vadd.f32 %v1286_v5, %v994_v1  ;;  %v1257_v11 = vpack.c.bf16 %v1059_v10, %v1059_v10  ;;  %v1247_v21 = vpack.c.bf16 %v1049_v2, %v1049_v2 }
 0x153   :  { %v1060_v46 = vmax.f32 %v1044_v54, 0.0  ;;  %v1050_v12 = vmax.f32 %v1034_v3, 0.0  ;;  %1132 = vst.msk [vmem:[%s2104_s4 + $0x18] sm:$0xf] %vm1125_vm1, %v1249_v4  ;;  %v1255_v38 = vpack.c.bf16 %v1057_v9, %v1057_v9 }
 0x154   :  { %v1250_v13 = vpack.c.bf16 %v1052_v14, %v1052_v14  ;;  %v1058_v20 = vmax.f32 %v1042_v7, 0.0  ;;  %1140 = vst.msk [vmem:[%s2104_s4 + $0x38] sm:$0xf] %vm1125_vm1, %v1257_v11  ;;  %1130 = vst.msk [vmem:[%s2104_s4 + $0x10] sm:$0xf] %vm1125_vm1, %v1247_v21 }
 0x155   :  { %v1258_v49 = vpack.c.bf16 %v1060_v46, %v1060_v46  ;;  %v1248_v50 = vpack.c.bf16 %v1050_v12, %v1050_v12  ;;  %1138 = vst.msk [vmem:[%s2104_s4 + $0x30] sm:$0xf] %vm1125_vm1, %v1255_v38 }
 0x156   :  { %1133 = vst.msk [vmem:[%s2104_s4 + $0x1c] sm:$0xf] %vm1125_vm1, %v1250_v13  ;;  %v1256_v23 = vpack.c.bf16 %v1058_v20, %v1058_v20 }
 0x157   :  { %1141 = vst.msk [vmem:[%s2104_s4 + $0x3c] sm:$0xf] %vm1125_vm1, %v1258_v49  ;;  %1131 = vst.msk [vmem:[%s2104_s4 + $0x14] sm:$0xf] %vm1125_vm1, %v1248_v50 }
 0x158   :  { %1139 = vst.msk [vmem:[%s2104_s4 + $0x34] sm:$0xf] %vm1125_vm1, %v1256_v23 }

// kernel: _lambda_.27
= control target key start
LH: loop header
LB: loop body
LE: loop exit
PB: predicated region body
PF: predicated region fallthrough
CT: control target
= control target key end

     0   :  { %s1001_s1 = inlined_call_operand.vmem [shape: bf16[640,128], index: 1, kind: input, shape index: {}]   ;;  %s1002_s0 = inlined_call_operand.vmem [shape: bf16[32,640], index: 0, kind: input, shape index: {}]   ;;  %s1003_s2 = inlined_call_operand.vmem [shape: f32[1,128], index: 2, kind: input, shape index: {}]   ;;  %s1004_s3 = inlined_call_operand.vmem [shape: bf16[32,128], index: 3, kind: output, shape index: {}]  }
   0x1   :  { %v768_v0 = vld [vmem:[%s1001_s1 + $0x40] sm:$0xff]   ;;  %v772_v4 = vld [vmem:[%s1001_s1 + $0x48] sm:$0xff]   ;;  %v776_v8 = vld [vmem:[%s1001_s1 + $0x50] sm:$0xff]  }
   0x2   :  { %v769_v1 = vld [vmem:[%s1001_s1 + $0xc0] sm:$0xff]   ;;  %682 = vmatprep.subr.bf16.mxu0 %v768_v0  ;;  %v773_v5 = vld [vmem:[%s1001_s1 + $0xc8] sm:$0xff]   ;;  %v777_v9 = vld [vmem:[%s1001_s1 + $0xd0] sm:$0xff]  }
   0x3   :  { %v770_v2 = vld [vmem:[%s1001_s1] sm:$0xff]   ;;  %710 = vmatprep.subr.bf16.mxu1 %v769_v1  ;;  %v774_v6 = vld [vmem:[%s1001_s1 + $0x8] sm:$0xff]   ;;  %v778_v10 = vld [vmem:[%s1001_s1 + $0x10] sm:$0xff]  }
   0x4   :  { %v771_v3 = vld [vmem:[%s1001_s1 + $0x80] sm:$0xff]   ;;  %683 = vmatpush3.bf16.msra.mxu0 %v770_v2  ;;  %v775_v7 = vld [vmem:[%s1001_s1 + $0x88] sm:$0xff]   ;;  %v779_v11 = vld [vmem:[%s1001_s1 + $0x90] sm:$0xff]  }
   0x5   :  { %711 = vmatpush3.bf16.msra.mxu1 %v771_v3  ;;  %684 = vmatprep.subr.bf16.mxu0 %v772_v4  ;;  %v780_v12 = vld [vmem:[%s1001_s1 + $0x58] sm:$0xff]   ;;  %v784_v16 = vld [vmem:[%s1001_s1 + $0x60] sm:$0xff]   ;;  %v788_v20 = vld [vmem:[%s1001_s1 + $0x68] sm:$0xff]  }
   0x6   :  { %712 = vmatprep.subr.bf16.mxu1 %v773_v5  ;;  %v781_v13 = vld [vmem:[%s1001_s1 + $0xd8] sm:$0xff]   ;;  %v785_v17 = vld [vmem:[%s1001_s1 + $0xe0] sm:$0xff]   ;;  %v789_v21 = vld [vmem:[%s1001_s1 + $0xe8] sm:$0xff]  }
   0x7   :  { %v782_v14 = vld [vmem:[%s1001_s1 + $0x18] sm:$0xff]   ;;  %v786_v18 = vld [vmem:[%s1001_s1 + $0x20] sm:$0xff]   ;;  %v790_v22 = vld [vmem:[%s1001_s1 + $0x28] sm:$0xff]  }
   0x8   :  { %685 = vmatpush3.bf16.msra.mxu0 %v774_v6  ;;  %v783_v15 = vld [vmem:[%s1001_s1 + $0x98] sm:$0xff]   ;;  %v787_v19 = vld [vmem:[%s1001_s1 + $0xa0] sm:$0xff]   ;;  %v791_v23 = vld [vmem:[%s1001_s1 + $0xa8] sm:$0xff]  }
   0x9   :  { %713 = vmatpush3.bf16.msra.mxu1 %v775_v7  ;;  %686 = vmatprep.subr.bf16.mxu0 %v776_v8  ;;  %v792_v24 = vld [vmem:[%s1001_s1 + $0x70] sm:$0xff]   ;;  %v796_v28 = vld [vmem:[%s1001_s1 + $0x78] sm:$0xff]   ;;  %v805_v35 = vld [vmem:[%s1002_s0 + $0xc] ss:$20 sps:$4 sm:$0xff]  }
   0xa   :  { %714 = vmatprep.subr.bf16.mxu1 %v777_v9  ;;  %v793_v25 = vld [vmem:[%s1001_s1 + $0xf0] sm:$0xff]   ;;  %v797_v29 = vld [vmem:[%s1001_s1 + $0xf8] sm:$0xff]   ;;  %v806_v36 = vld [vmem:[%s1001_s1 + $0x100] sm:$0xff]   ;;  %492 = vmatprep.mubr.bf16.mxu1 %v805_v35 }
   0xb   :  { %v794_v26 = vld [vmem:[%s1001_s1 + $0x30] sm:$0xff]   ;;  %v798_v30 = vld [vmem:[%s1001_s1 + $0x38] sm:$0xff]   ;;  %v807_v37 = vld [vmem:[%s1001_s1 + $0x108] sm:$0xff]  }
   0xc   :  { %687 = vmatpush3.bf16.msra.mxu0 %v778_v10  ;;  %v795_v27 = vld [vmem:[%s1001_s1 + $0xb0] sm:$0xff]   ;;  %v799_v31 = vld [vmem:[%s1001_s1 + $0xb8] sm:$0xff]   ;;  %v811_v39 = vld [vmem:[%s1002_s0 + $0x2c] ss:$20 sps:$4 sm:$0xff]  }
   0xd   :  { %715 = vmatpush3.bf16.msra.mxu1 %v779_v11  ;;  %688 = vmatprep.subr.bf16.mxu0 %v780_v12  ;;  %v800_v32 = vld [vmem:[%s1002_s0] ss:$20 sps:$4 sm:$0xff]   ;;  %v802_v33 = vld [vmem:[%s1002_s0 + $0x4] ss:$20 sps:$4 sm:$0xff]   ;;  %v803_v34 = vld [vmem:[%s1002_s0 + $0x8] ss:$20 sps:$4 sm:$0xff]  }
   0xe   :  { %716 = vmatprep.subr.bf16.mxu1 %v781_v13  ;;  %443 = vmatprep.mubr.bf16.mxu0 %v802_v33  ;;  %v808_v38 = vld [vmem:[%s1001_s1 + $0x110] sm:$0xff]   ;;  %v809_v41 = vld [vmem:[%s1001_s1 + $0x118] sm:$0xff]   ;;  %v810_v45 = vld [vmem:[%s1001_s1 + $0x120] sm:$0xff]  }
   0xf   :  { %v813_v40 = vld [vmem:[%s1002_s0 + $0x34] ss:$20 sps:$4 sm:$0xff]   ;;  %v817_v43 = vld [vmem:[%s1002_s0 + $0x30] ss:$20 sps:$4 sm:$0xff]   ;;  %v819_v48 = vld [vmem:[%s1001_s1 + $0x138] sm:$0xff]  }
  0x10   :  { %689 = vmatpush3.bf16.msra.mxu0 %v782_v14  ;;  %v816_v42 = vld [vmem:[%s1002_s0 + $0x28] ss:$20 sps:$4 sm:$0xff]   ;;  %v820_v44 = vld [vmem:[%s1002_s0 + $0x10] ss:$20 sps:$4 sm:$0xff]   ;;  %v821_v49 = vld [vmem:[%s1002_s0 + $0x38] ss:$20 sps:$4 sm:$0xff]  }
  0x11   :  { %717 = vmatpush3.bf16.msra.mxu1 %v783_v15  ;;  %690 = vmatprep.subr.bf16.mxu0 %v784_v16  ;;  %v815_v46 = vld [vmem:[%s1001_s1 + $0x128] sm:$0xff]   ;;  %v818_v47 = vld [vmem:[%s1001_s1 + $0x130] sm:$0xff]   ;;  %v662_v15 = vld [vmem:[%s1003_s2] ss:$0 sm:$0xff] }
  0x12   :  { %718 = vmatprep.subr.bf16.mxu1 %v785_v17 }
  0x14   :  { %691 = vmatpush3.bf16.msra.mxu0 %v786_v18 }
  0x15   :  { %719 = vmatpush3.bf16.msra.mxu1 %v787_v19  ;;  %692 = vmatprep.subr.bf16.mxu0 %v788_v20 }
  0x16   :  { %720 = vmatprep.subr.bf16.mxu1 %v789_v21 }
  0x18   :  { %693 = vmatpush3.bf16.msra.mxu0 %v790_v22 }
  0x19   :  { %721 = vmatpush3.bf16.msra.mxu1 %v791_v23  ;;  %694 = vmatprep.subr.bf16.mxu0 %v792_v24 }
  0x1a   :  { %722 = vmatprep.subr.bf16.mxu1 %v793_v25 }
  0x1c   :  { %695 = vmatpush3.bf16.msra.mxu0 %v794_v26 }
  0x1d   :  { %723 = vmatpush3.bf16.msra.mxu1 %v795_v27  ;;  %696 = vmatprep.subr.bf16.mxu0 %v796_v28 }
  0x1e   :  { %724 = vmatprep.subr.bf16.mxu1 %v797_v29 }
  0x20   :  { %697 = vmatpush3.bf16.msra.mxu0 %v798_v30 }
  0x21   :  { %725 = vmatpush3.bf16.msra.mxu1 %v799_v31  ;;  %748 = vmatprep.subr.bf16.mxu0 %v806_v36 }
  0x23   :  { %444 = vmatmul.mubr.bf16.vlgmr.msra.gmra.mrb[0].mxu0 %v800_v32 }
  0x24   :  { %493 = vmatmul.mubr.bf16.vlgmr.msra.gmra.mrb[0].mxu1 %v803_v34  ;;  %749 = vmatpush3.bf16.msra.mxu0 %v806_v36 }
  0x25   :  { %750 = vmatprep.subr.bf16.mxu0 %v807_v37  ;;  %451 = vmatprep.mubr.bf16.mxu0 %v811_v39 }
  0x26   :  { %500 = vmatprep.mubr.bf16.mxu1 %v813_v40 }
  0x28   :  { %751 = vmatpush3.bf16.msra.mxu0 %v807_v37 }
  0x29   :  { %752 = vmatprep.subr.bf16.mxu0 %v808_v38 }
  0x2b   :  { %452 = vmatmul.mubr.bf16.gmra.mrb[4].mxu0 %v816_v42 }
  0x2c   :  { %501 = vmatmul.mubr.bf16.gmra.mrb[4].mxu1 %v817_v43  ;;  %753 = vmatpush3.bf16.msra.mxu0 %v808_v38 }
  0x2d   :  { %754 = vmatprep.subr.bf16.mxu0 %v809_v41  ;;  %764 = vmatprep.mubr.bf16.mxu0 %v820_v44 }
  0x30   :  { %755 = vmatpush3.bf16.msra.mxu0 %v809_v41 }
  0x31   :  { %756 = vmatprep.subr.bf16.mxu0 %v810_v45 }
  0x34   :  { %757 = vmatpush3.bf16.msra.mxu0 %v810_v45 }
  0x35   :  { %758 = vmatprep.subr.bf16.mxu0 %v815_v46 }
  0x38   :  { %759 = vmatpush3.bf16.msra.mxu0 %v815_v46 }
  0x39   :  { %760 = vmatprep.subr.bf16.mxu0 %v818_v47 }
  0x3c   :  { %761 = vmatpush3.bf16.msra.mxu0 %v818_v47 }
  0x3d   :  { %762 = vmatprep.subr.bf16.mxu0 %v819_v48 }
  0x40   :  { %763 = vmatpush3.bf16.msra.mxu0 %v819_v48 }
  0x43   :  { %765 = vmatmul.mubr.bf16.vlgmr.msra.gmra.mrb[8].mxu0 %v821_v49 }
  0xf6   :  { %v698_v50 = vpop.f32.mrb[0].mxu0 }
  0xf7   :  { %v726_v51 = vpop.f32.mrb[0].mxu1  ;;  %v699_v52 = vpop.f32.mrb[1].mxu0 }
  0xf8   :  { %v700_v53 = vadd.f32 %v699_v52, %v698_v50  ;;  %v727_v54 = vpop.f32.mrb[1].mxu1  ;;  %v701_v55 = vpop.f32.mrb[2].mxu0 }
  0xf9   :  { %v728_v56 = vadd.f32 %v727_v54, %v726_v51  ;;  %v729_v57 = vpop.f32.mrb[2].mxu1  ;;  %v702_v58 = vpop.f32.mrb[3].mxu0 }
  0xfa   :  { %v703_v59 = vadd.f32 %v702_v58, %v701_v55  ;;  %v730_v60 = vpop.f32.mrb[3].mxu1 }
  0xfb   :  { %v731_v61 = vadd.f32 %v730_v60, %v729_v57  ;;  %v495_v62 = vadd.f32 %v728_v56, %v700_v53 }
  0xfd   :  { %v498_v63 = vadd.f32 %v731_v61, %v703_v59 }
  0xfe   :  { %v704_v0 = vpop.f32.mrb[4].mxu0 }
  0xff   :  { %v732_v1 = vpop.f32.mrb[4].mxu1  ;;  %v705_v2 = vpop.f32.mrb[5].mxu0 }
 0x100   :  { %v706_v3 = vadd.f32 %v705_v2, %v704_v0  ;;  %v733_v4 = vpop.f32.mrb[5].mxu1  ;;  %v707_v5 = vpop.f32.mrb[6].mxu0 }
 0x101   :  { %v734_v6 = vadd.f32 %v733_v4, %v732_v1  ;;  %v735_v7 = vpop.f32.mrb[6].mxu1  ;;  %v708_v8 = vpop.f32.mrb[7].mxu0 }
 0x102   :  { %v709_v9 = vadd.f32 %v708_v8, %v707_v5  ;;  %v736_v10 = vpop.f32.mrb[7].mxu1 }
 0x103   :  { %v737_v11 = vadd.f32 %v736_v10, %v735_v7  ;;  %v503_v12 = vadd.f32 %v734_v6, %v706_v3 }
 0x105   :  { %v506_v13 = vadd.f32 %v737_v11, %v709_v9 }
 0x116   :  { %v766_v14 = vpop.f32.mrb[8].mxu0 }
 0x117   :  { %v552_v16 = vadd.f32 %v766_v14, %v503_v12  ;;  %v543_v17 = vpop.f32.mrb[9].mxu0 }
 0x118   :  { %v544_v18 = vadd.f32 %v543_v17, %v495_v62  ;;  %v767_v19 = vpop.f32.mrb[10].mxu0 }
 0x119   :  { %v582_v20 = vadd.f32 %v662_v15, %v552_v16  ;;  %v555_v21 = vadd.f32 %v767_v19, %v506_v13  ;;  %v546_v22 = vpop.f32.mrb[11].mxu0 }
 0x11a   :  { %v580_v23 = vadd.f32 %v662_v15, %v544_v18  ;;  %v547_v24 = vadd.f32 %v546_v22, %v498_v63 }
 0x11b   :  { %v583_v25 = vadd.f32 %v662_v15, %v555_v21  ;;  %v586_v27 = vmax.f32 %v582_v20, 0.0 }
 0x11c   :  { %v581_v26 = vadd.f32 %v662_v15, %v547_v24  ;;  %v584_v29 = vmax.f32 %v580_v23, 0.0 }
 0x11d   :  { %v587_v28 = vmax.f32 %v583_v25, 0.0 }
 0x11e   :  { %v585_v30 = vmax.f32 %v581_v26, 0.0 }
 0x11f   :  { %v679_v31 = vpack.c.bf16 %v587_v28, %v586_v27 }
 0x120   :  { %v674_v32 = vpack.c.bf16 %v585_v30, %v584_v29 }
 0x121   :  { %681 = vst [vmem:[%s1004_s3 + $0x8] sm:$0xff] %v679_v31  }
 0x122   :  { %675 = vst [vmem:[%s1004_s3] sm:$0xff] %v674_v32  }

// kernel: _lambda_.26
= control target key start
LH: loop header
LB: loop body
LE: loop exit
PB: predicated region body
PF: predicated region fallthrough
CT: control target
= control target key end

     0   :  { %s335_s1 = inlined_call_operand.vmem [shape: bf16[128,128], index: 1, kind: input, shape index: {}]   ;;  %s336_s0 = inlined_call_operand.vmem [shape: bf16[32,128], index: 0, kind: input, shape index: {}]   ;;  %s337_s2 = inlined_call_operand.vmem [shape: f32[1,128], index: 2, kind: input, shape index: {}]   ;;  %s338_s3 = inlined_call_operand.vmem [shape: bf16[32,128], index: 3, kind: output, shape index: {}]  }
   0x1   :  { %v266_v0 = vld [vmem:[%s335_s1] sm:$0xff]   ;;  %v267_v1 = vld [vmem:[%s335_s1 + $0x8] sm:$0xff]   ;;  %v268_v2 = vld [vmem:[%s335_s1 + $0x10] sm:$0xff]  }
   0x2   :  { %246 = vmatprep.subr.bf16.mxu0 %v266_v0  ;;  %v269_v3 = vld [vmem:[%s335_s1 + $0x18] sm:$0xff]   ;;  %v274_v4 = vld [vmem:[%s336_s0] sm:$0xff]   ;;  %v271_v6 = vld [vmem:[%s335_s1 + $0x28] sm:$0xff]  }
   0x3   :  { %247 = vmatpush3.bf16.msra.mxu0 %v266_v0  ;;  %262 = vmatprep.mubr.bf16.mxu0 %v274_v4  ;;  %v270_v5 = vld [vmem:[%s335_s1 + $0x20] sm:$0xff]   ;;  %v272_v7 = vld [vmem:[%s335_s1 + $0x30] sm:$0xff]   ;;  %v273_v8 = vld [vmem:[%s335_s1 + $0x38] sm:$0xff]  }
   0x4   :  { %248 = vmatprep.subr.bf16.mxu0 %v267_v1  ;;  %v275_v9 = vld [vmem:[%s336_s0 + $0x8] sm:$0xff]   ;;  %v216_v11 = vld [vmem:[%s337_s2] ss:$0 sm:$0xff] }
   0x7   :  { %249 = vmatpush3.bf16.msra.mxu0 %v267_v1 }
   0x8   :  { %250 = vmatprep.subr.bf16.mxu0 %v268_v2 }
   0xb   :  { %251 = vmatpush3.bf16.msra.mxu0 %v268_v2 }
   0xc   :  { %252 = vmatprep.subr.bf16.mxu0 %v269_v3 }
   0xf   :  { %253 = vmatpush3.bf16.msra.mxu0 %v269_v3 }
  0x10   :  { %254 = vmatprep.subr.bf16.mxu0 %v270_v5 }
  0x13   :  { %255 = vmatpush3.bf16.msra.mxu0 %v270_v5 }
  0x14   :  { %256 = vmatprep.subr.bf16.mxu0 %v271_v6 }
  0x17   :  { %257 = vmatpush3.bf16.msra.mxu0 %v271_v6 }
  0x18   :  { %258 = vmatprep.subr.bf16.mxu0 %v272_v7 }
  0x1b   :  { %259 = vmatpush3.bf16.msra.mxu0 %v272_v7 }
  0x1c   :  { %260 = vmatprep.subr.bf16.mxu0 %v273_v8 }
  0x1f   :  { %261 = vmatpush3.bf16.msra.mxu0 %v273_v8 }
  0x22   :  { %263 = vmatmul.mubr.bf16.vlgmr.msra.gmra.mrb[0].mxu0 %v275_v9 }
  0xf5   :  { %v264_v10 = vpop.f32.mrb[0].mxu0 }
  0xf6   :  { %v141_v12 = vpop.f32.mrb[1].mxu0  ;;  %v180_v14 = vadd.f32 %v264_v10, %v216_v11 }
  0xf7   :  { %v265_v13 = vpop.f32.mrb[2].mxu0  ;;  %v178_v17 = vadd.f32 %v216_v11, %v141_v12 }
  0xf8   :  { %v181_v15 = vadd.f32 %v265_v13, %v216_v11  ;;  %v144_v16 = vpop.f32.mrb[3].mxu0 }
  0xf9   :  { %v179_v18 = vadd.f32 %v216_v11, %v144_v16 }
  0xfa   :  { %v233_v19 = vpack.c.bf16 %v181_v15, %v180_v14 }
  0xfb   :  { %v228_v20 = vpack.c.bf16 %v179_v18, %v178_v17 }
  0xfc   :  { %235 = vst [vmem:[%s338_s3 + $0x8] sm:$0xff] %v233_v19  }
  0xfd   :  { %229 = vst [vmem:[%s338_s3] sm:$0xff] %v228_v20  }

// kernel: _lambda_.29
= control target key start
LH: loop header
LB: loop body
LE: loop exit
PB: predicated region body
PF: predicated region fallthrough
CT: control target
= control target key end

     0   :  { %s1071_s12 = smov 0   ;;  %s1073_s13 = smov 0   ;;  %s1181_s0 = inlined_call_operand.vmem [shape: bf16[32,1152], index: 0, kind: input, shape index: {}]   ;;  %s1182_s1 = inlined_call_operand.vmem [shape: bf16[1152,128], index: 1, kind: input, shape index: {}]   ;;  %s1183_s2 = inlined_call_operand.vmem [shape: f32[1,128], index: 2, kind: input, shape index: {}]   ;;  %s1184_s3 = inlined_call_operand.vmem [shape: bf16[32,128], index: 3, kind: output, shape index: {}]  }
   0x1   :  { %s1075_s14 = smov 0   ;;  %s1077_s15 = smov 0  }
   0x2   :  { %s1079_s16 = smov 0  }
   0x3 LB: > { %s25_s17 = sadd.s32 1, %s1044_s15  ;;  %p48_p1 = scmp.ne.s32.totalorder %s1036_s13, %s1032_s12  ;;  %s1048_s16 = sphi %s1079_s16, %s13_s16   ;;  %s1044_s15 = sphi %s1077_s15, %s1188_s15   ;;  %s1040_s14 = sphi %s1075_s14, %s1187_s14   ;;  %s1036_s13 = sphi %s1073_s13, %s1186_s13   ;;  %s1032_s12 = sphi %s1071_s12, %s1185_s12  }
   0x4   : > { %p26_p0 = scmp.ge.s32.totalorder %s25_s17, 3  ;;  %p49_p2 = scmp.eq.s32.totalorder %s1048_s16, 0 }
   0x5   : > { %s41_s19 = sadd.s32 1, %s1036_s13  ;;  %p808_p5 = scmp.ge.s32.totalorder %s1048_s16, 3 }
   0x6   : > { %s1190_s17 = smov (%p26_p0, %s25_s17), 0  ;;  %p50_p3 = por %p49_p2, %p48_p1 }
   0x7   : > { %s37_s18 = ssub.s32 %s1044_s15, %s1190_s17  ;;  %162 = sbr.rel (%p808_p5) target bundleno = 23 (0x17), region = 20 }
   0x8   : > { %p39_p4 = scmp.eq.s32.totalorder %s37_s18, 0 }
   0xa   : > { %s1106_s20 = scalar_select %p39_p4, %s1036_s13, %s41_s19  }
   0xe   : > { %165 = sbr.rel (!%p50_p3) target bundleno = 23 (0x17), region = 24  ;;  %s167_s21 = sand.u32 (%p50_p3), 1, %s1036_s13  }
   0xf   : > { %s861_s22 = smul.u32 (%p50_p3), 12, %s1044_s15 }
  0x10   : > { %s935_s23 = smul.u32 (%p50_p3), 48, %s167_s21 }
  0x11   : > { %s175_s26 = scalar_lea.vmem (%p50_p3), %s1181_s0, %s861_s22 }
  0x12   : > { %v190_v0 = vld [vmem:[%s175_s26] sm:$0xff] (%p50_p3)  ;;  %v194_v2 = vld [vmem:[%s175_s26 + $0x48] sm:$0xff] (%p50_p3)  ;;  %s169_s27 = scalar_lea.vmem (%p50_p3), [#allocation3], %s935_s23  ;;  %v814_v6 = vld [vmem:[%s175_s26 + $0x50] sm:$0xf] (%p50_p3) }
  0x13   : > { %v192_v1 = vld [vmem:[%s175_s26 + $0x24] sm:$0xff] (%p50_p3)  ;;  %191 = vst [vmem:[%s169_s27] sm:$0xff] (%p50_p3), %v190_v0  ;;  %195 = vst [vmem:[%s169_s27 + $0x18] sm:$0xff] (%p50_p3), %v194_v2  ;;  %v196_v3 = vld [vmem:[%s175_s26 + $0x6c] sm:$0xff] (%p50_p3) }
  0x14   : > { %193 = vst [vmem:[%s169_s27 + $0xc] sm:$0xff] (%p50_p3), %v192_v1  ;;  %v810_v4 = vld [vmem:[%s175_s26 + $0x8] sm:$0xf] (%p50_p3)  ;;  %v812_v5 = vld [vmem:[%s175_s26 + $0x2c] sm:$0xf] (%p50_p3)  ;;  %197 = vst [vmem:[%s169_s27 + $0x24] sm:$0xff] (%p50_p3), %v196_v3 }
  0x15   : > { %811 = vst [vmem:[%s169_s27 + $0x8] sm:$0xf] %v810_v4  ;;  %813 = vst [vmem:[%s169_s27 + $0x14] sm:$0xf] %v812_v5  ;;  %v816_v7 = vld [vmem:[%s175_s26 + $0x74] sm:$0xf] }
  0x16   : > { %815 = vst [vmem:[%s169_s27 + $0x20] sm:$0xf] %v814_v6  ;;  %817 = vst [vmem:[%s169_s27 + $0x2c] sm:$0xf] %v816_v7 }
  0x17 PF: > { %p818_p6 = scmp.ge.s32.totalorder %s1048_s16, 1  ;;  %p229_p7 = scmp.lt.s32.totalorder %s1048_s16, 4 }
  0x19   : > { %p230_p8 = pnand %p818_p6, %p229_p7 }
  0x1a   : > { %s236_s28 = sand.u32 (!%p230_p8), 1, %s1032_s12   ;;  %s275_s29 = smul.u32 (!%p230_p8), 48, %s1040_s14 }
  0x1b   : > { %233 = sbr.rel (%p230_p8) target bundleno = 318 (0x13e), region = 54  ;;  %p820_p10 = scmp.ne.s32.totalorder (!%p230_p8), %s1040_s14, 0 }
  0x1c   : > { %s936_s30 = smul.u32 (!%p230_p8), 48, %s236_s28  ;;  %p276_p9 = scmp.lt.s32.totalorder (!%p230_p8), %s275_s29, 143 }
  0x1e   : > { %s1123_s8 = scalar_lea.vmem (!%p230_p8), [#allocation3], %s936_s30 }
  0x22   : > { %s1192_s29 = smov (!%p276_p9, %s275_s29), 143  ;;  %300 = sbr.rel (%p820_p10) target bundleno = 41 (0x29), region = 62 }
  0x23   : > { %s819_s4 = sshll.u32 %s1192_s29, 2  ;;  %v1050_v8 = vmov (!%p820_p10), 0.0  }
  0x24   : > { %s1121_s7 = scalar_lea.vmem %s1182_s1, %s819_s4  ;;  %301 = vst [vmem:[#allocation2] sm:$0xff] (!%p820_p10), %v1050_v8  ;;  %302 = vst [vmem:[#allocation2 + $0x8] sm:$0xff] (!%p820_p10), %v1050_v8 }
  0x25   : > { %303 = vst [vmem:[#allocation2 + $0x10] sm:$0xff] (!%p820_p10), %v1050_v8  ;;  %304 = vst [vmem:[#allocation2 + $0x18] sm:$0xff] (!%p820_p10), %v1050_v8 }
  0x29 PF: > { %v978_v9 = vld [vmem:[%s1121_s7 + $0x40] sm:$0xff]   ;;  %v981_v12 = vld [vmem:[%s1121_s7 + $0x48] sm:$0xff]   ;;  %v984_v15 = vld [vmem:[%s1121_s7 + $0x50] sm:$0xff]   ;;  %p851_p11 = scmp.ne.s32.totalorder %s1040_s14, 2 }
  0x2a   : > { %v979_v10 = vld [vmem:[%s1121_s7] sm:$0xff]   ;;  %877 = vmatprep.subr.bf16.mxu0 %v978_v9  ;;  %v982_v13 = vld [vmem:[%s1121_s7 + $0x8] sm:$0xff]   ;;  %v985_v16 = vld [vmem:[%s1121_s7 + $0x10] sm:$0xff]  }
  0x2b   : > { %v980_v11 = vld [vmem:[%s1121_s7 + $0x80] sm:$0xff]   ;;  %878 = vmatpush3.bf16.msra.mxu0 %v979_v10  ;;  %v983_v14 = vld [vmem:[%s1121_s7 + $0x88] sm:$0xff]   ;;  %v986_v17 = vld [vmem:[%s1121_s7 + $0x90] sm:$0xff]  }
  0x2c   : > { %915 = vmatprep.subr.bf16.mxu1 %v980_v11  ;;  %879 = vmatprep.subr.bf16.mxu0 %v981_v12  ;;  %v987_v18 = vld [vmem:[%s1121_s7 + $0x58] sm:$0xff]   ;;  %v990_v21 = vld [vmem:[%s1121_s7 + $0x60] sm:$0xff]   ;;  %v993_v24 = vld [vmem:[%s1121_s7 + $0x68] sm:$0xff]  }
  0x2d   : > { %916 = vmatpush3.bf16.msra.mxu1 %v980_v11  ;;  %v988_v19 = vld [vmem:[%s1121_s7 + $0x18] sm:$0xff]   ;;  %v992_v22 = vld [vmem:[%s1121_s7 + $0xa0] sm:$0xff]   ;;  %v995_v25 = vld [vmem:[%s1121_s7 + $0xa8] sm:$0xff]  }
  0x2e   : > { %917 = vmatprep.subr.bf16.mxu1 %v983_v14  ;;  %v989_v20 = vld [vmem:[%s1121_s7 + $0x98] sm:$0xff]   ;;  %v991_v23 = vld [vmem:[%s1121_s7 + $0x20] sm:$0xff]   ;;  %v994_v26 = vld [vmem:[%s1121_s7 + $0x28] sm:$0xff]  }
  0x2f   : > { %880 = vmatpush3.bf16.msra.mxu0 %v982_v13  ;;  %v996_v27 = vld [vmem:[%s1121_s7 + $0x70] sm:$0xff]   ;;  %v999_v30 = vld [vmem:[%s1121_s7 + $0x78] sm:$0xff]   ;;  %v305_v45 = vld [vmem:[#allocation2] sm:$0xff] }
  0x30   : > { %881 = vmatprep.subr.bf16.mxu0 %v984_v15  ;;  %v997_v28 = vld [vmem:[%s1121_s7 + $0x30] sm:$0xff]   ;;  %v1001_v31 = vld [vmem:[%s1121_s7 + $0xb8] sm:$0xff]   ;;  %v306_v50 = vld [vmem:[#allocation2 + $0x8] sm:$0xff] }
  0x31   : > { %918 = vmatpush3.bf16.msra.mxu1 %v983_v14  ;;  %v998_v29 = vld [vmem:[%s1121_s7 + $0xb0] sm:$0xff]   ;;  %v1000_v34 = vld [vmem:[%s1121_s7 + $0x38] sm:$0xff]   ;;  %v852_v5 = vld [vmem:[%s1183_s2] ss:$0 sm:$0xff] (!%p851_p11) }
  0x32   : > { %919 = vmatprep.subr.bf16.mxu1 %v986_v17  ;;  %v1004_v32 = vld [vmem:[%s1123_s8 + $0x4] ss:$12 sps:$4 sm:$0xff]   ;;  %v1005_v33 = vld [vmem:[%s1123_s8 + $0x8] ss:$12 sps:$4 sm:$0xff]   ;;  %v1002_v35 = vld [vmem:[%s1123_s8] ss:$12 sps:$4 sm:$0xff]  }
  0x33   : > { %882 = vmatpush3.bf16.msra.mxu0 %v985_v16  ;;  %573 = vmatprep.mubr.bf16.mxu0 %v1004_v32  ;;  %v1007_v36 = vld [vmem:[%s1123_s8 + $0x1c] ss:$12 sps:$4 sm:$0xff]   ;;  %v1006_v37 = vld [vmem:[%s1123_s8 + $0x20] ss:$12 sps:$4 sm:$0xff]   ;;  %v1009_v38 = vld [vmem:[%s1123_s8 + $0x18] ss:$12 sps:$4 sm:$0xff]  }
  0x34   : > { %883 = vmatprep.subr.bf16.mxu0 %v987_v18  ;;  %931 = vmatprep.mubr.bf16.mxu1 %v1005_v33  ;;  %v307_v59 = vld [vmem:[#allocation2 + $0x10] sm:$0xff]  ;;  %v308_v63 = vld [vmem:[#allocation2 + $0x18] sm:$0xff] }
  0x35   : > { %920 = vmatpush3.bf16.msra.mxu1 %v986_v17 }
  0x36   : > { %921 = vmatprep.subr.bf16.mxu1 %v989_v20 }
  0x37   : > { %884 = vmatpush3.bf16.msra.mxu0 %v988_v19 }
  0x38   : > { %885 = vmatprep.subr.bf16.mxu0 %v990_v21 }
  0x39   : > { %922 = vmatpush3.bf16.msra.mxu1 %v989_v20 }
  0x3a   : > { %923 = vmatprep.subr.bf16.mxu1 %v992_v22 }
  0x3b   : > { %886 = vmatpush3.bf16.msra.mxu0 %v991_v23 }
  0x3c   : > { %887 = vmatprep.subr.bf16.mxu0 %v993_v24 }
  0x3d   : > { %924 = vmatpush3.bf16.msra.mxu1 %v992_v22 }
  0x3e   : > { %925 = vmatprep.subr.bf16.mxu1 %v995_v25 }
  0x3f   : > { %888 = vmatpush3.bf16.msra.mxu0 %v994_v26 }
  0x40   : > { %889 = vmatprep.subr.bf16.mxu0 %v996_v27 }
  0x41   : > { %926 = vmatpush3.bf16.msra.mxu1 %v995_v25 }
  0x42   : > { %927 = vmatprep.subr.bf16.mxu1 %v998_v29 }
  0x43   : > { %890 = vmatpush3.bf16.msra.mxu0 %v997_v28 }
  0x44   : > { %891 = vmatprep.subr.bf16.mxu0 %v999_v30 }
  0x45   : > { %928 = vmatpush3.bf16.msra.mxu1 %v998_v29 }
  0x46   : > { %929 = vmatprep.subr.bf16.mxu1 %v1001_v31 }
  0x47   : > { %892 = vmatpush3.bf16.msra.mxu0 %v1000_v34 }
  0x49   : > { %930 = vmatpush3.bf16.msra.mxu1 %v1001_v31 }
  0x4a   : > { %574 = vmatmul.mubr.bf16.vlgmr.msra.gmra.mrb[0].mxu0 %v1002_v35 }
  0x4b   : > { %581 = vmatprep.mubr.bf16.mxu0 %v1007_v36 }
  0x4c   : > { %932 = vmatmul.mubr.bf16.vlgmr.msra.gmra.mrb[0].mxu1 %v1006_v37 }
  0x52   : > { %582 = vmatmul.mubr.bf16.gmra.mrb[4].mxu0 %v1009_v38 }
 0x11d   : > { %v893_v39 = vpop.f32.mrb[0].mxu0 }
 0x11e   : > { %v894_v40 = vpop.f32.mrb[1].mxu0 }
 0x11f   : > { %v895_v41 = vadd.f32 %v894_v40, %v893_v39  ;;  %v896_v42 = vpop.f32.mrb[2].mxu0  ;;  %v933_v43 = vpop.f32.mrb[0].mxu1 }
 0x120   : > { %v897_v44 = vpop.f32.mrb[3].mxu0  ;;  %v624_v46 = vpop.f32.mrb[1].mxu1 }
 0x121   : > { %v898_v47 = vadd.f32 %v897_v44, %v896_v42  ;;  %v625_v48 = vadd.f32 %v895_v41, %v624_v46  ;;  %v934_v49 = vpop.f32.mrb[2].mxu1 }
 0x122   : > { %v627_v51 = vpop.f32.mrb[3].mxu1 }
 0x123   : > { %v639_v52 = vadd.f32 %v625_v48, %v305_v45  ;;  %v628_v53 = vadd.f32 %v898_v47, %v627_v51 }
 0x125   : > { %643 = vst [vmem:[#allocation2] sm:$0xff] %v639_v52  ;;  %v640_v54 = vadd.f32 %v628_v53, %v306_v50  ;;  %v899_v55 = vpop.f32.mrb[4].mxu0 }
 0x126   : > { %v900_v56 = vpop.f32.mrb[5].mxu0 }
 0x127   : > { %644 = vst [vmem:[#allocation2 + $0x8] sm:$0xff] %v640_v54  ;;  %v901_v57 = vadd.f32 %v900_v56, %v899_v55  ;;  %v902_v58 = vpop.f32.mrb[6].mxu0 }
 0x128   : > { %v903_v60 = vpop.f32.mrb[7].mxu0 }
 0x129   : > { %v633_v61 = vadd.f32 %v933_v43, %v901_v57  ;;  %v904_v62 = vadd.f32 %v903_v60, %v902_v58  ;;  %650 = sbr.rel (%p851_p11) target bundleno = 318 (0x13e), region = 66 }
 0x12b   : > { %v641_v0 = vadd.f32 %v633_v61, %v307_v59  ;;  %v636_v1 = vadd.f32 %v934_v49, %v904_v62 }
 0x12c   : > { %v651_v3 = vld [vmem:[#allocation2] sm:$0xff] (!%p851_p11) }
 0x12d   : > { %645 = vst [vmem:[#allocation2 + $0x10] sm:$0xff] %v641_v0  ;;  %v642_v2 = vadd.f32 %v636_v1, %v308_v63  ;;  %v662_v6 = vadd.f32 (!%p851_p11), %v852_v5, %v651_v3 }
 0x12e   : > { %v652_v4 = vld [vmem:[#allocation2 + $0x8] sm:$0xff] (!%p851_p11) }
 0x12f   : > { %646 = vst [vmem:[#allocation2 + $0x18] sm:$0xff] %v642_v2  ;;  %v663_v7 = vadd.f32 (!%p851_p11), %v852_v5, %v652_v4  ;;  %v666_v12 = vmax.f32 (!%p851_p11), %v662_v6, 0.0 }
 0x131   : > { %v667_v13 = vmax.f32 %v663_v7, 0.0 }
 0x133   : > { %v869_v16 = vpack.c.bf16 %v667_v13, %v666_v12 }
 0x134   : > { %v653_v8 = vld [vmem:[#allocation2 + $0x10] sm:$0xff] }
 0x135   : > { %v664_v10 = vadd.f32 %v852_v5, %v653_v8  ;;  %870 = vst [vmem:[%s1184_s3] sm:$0xff] %v869_v16  }
 0x136   : > { %v654_v9 = vld [vmem:[#allocation2 + $0x18] sm:$0xff] }
 0x137   : > { %v665_v11 = vadd.f32 %v852_v5, %v654_v9  ;;  %v668_v14 = vmax.f32 %v664_v10, 0.0 }
 0x139   : > { %v669_v15 = vmax.f32 %v665_v11, 0.0 }
 0x13b   : > { %v874_v17 = vpack.c.bf16 %v669_v15, %v668_v14 }
 0x13d   : > { %876 = vst [vmem:[%s1184_s3 + $0x8] sm:$0xff] %v874_v17  }
 0x13e PF: > { %s13_s16 = sadd.s32 1, %s1048_s16   ;;  %s1185_s12 = smov %s1036_s13 }
 0x13f   : > { %p10_p12 = scmp.ge.s32.totalorder %s13_s16, 5   ;;  %s1186_s13 = smov %s1106_s20 }
 0x140   : > { %s1187_s14 = smov %s1044_s15  ;;  %s1188_s15 = smov %s1190_s17 }
 0x141   :  { %12 = sbr.rel (!%p10_p12) target bundleno = 3 (0x3), region = 113 }

// kernel: _lambda_.28
= control target key start
LH: loop header
LB: loop body
LE: loop exit
PB: predicated region body
PF: predicated region fallthrough
CT: control target
= control target key end

     0   :  { %s1176_s15 = smov 0   ;;  %s1178_s16 = smov 0   ;;  %s1292_s0 = inlined_call_operand.vmem [shape: bf16[32,1152], index: 0, kind: input, shape index: {}]   ;;  %s1293_s1 = inlined_call_operand.vmem [shape: bf16[1152,128], index: 1, kind: input, shape index: {}]   ;;  %s1294_s2 = inlined_call_operand.vmem [shape: f32[1,128], index: 2, kind: input, shape index: {}]   ;;  %s1295_s3 = inlined_call_operand.vmem [shape: bf16[32,128], index: 3, kind: input, shape index: {}]   ;;  %s1296_s4 = inlined_call_operand.vmem [shape: bf16[32,128], index: 4, kind: output, shape index: {}]  }
   0x1   :  { %s1180_s17 = smov 0   ;;  %s1182_s18 = smov 0  }
   0x2   :  { %s1184_s19 = smov 0  }
   0x3 LB: > { %s26_s20 = sadd.s32 1, %s1144_s18  ;;  %p49_p1 = scmp.ne.s32.totalorder %s1136_s16, %s1132_s15  ;;  %s1148_s19 = sphi %s1184_s19, %s14_s19   ;;  %s1144_s18 = sphi %s1182_s18, %s1300_s18   ;;  %s1140_s17 = sphi %s1180_s17, %s1299_s17   ;;  %s1136_s16 = sphi %s1178_s16, %s1298_s16   ;;  %s1132_s15 = sphi %s1176_s15, %s1297_s15  }
   0x4   : > { %p27_p0 = scmp.ge.s32.totalorder %s26_s20, 3  ;;  %p50_p2 = scmp.eq.s32.totalorder %s1148_s19, 0 }
   0x5   : > { %s42_s22 = sadd.s32 1, %s1136_s16  ;;  %p899_p5 = scmp.ge.s32.totalorder %s1148_s19, 3 }
   0x6   : > { %s1302_s20 = smov (%p27_p0, %s26_s20), 0  ;;  %p51_p3 = por %p50_p2, %p49_p1 }
   0x7   : > { %s38_s21 = ssub.s32 %s1144_s18, %s1302_s20  ;;  %203 = sbr.rel (%p899_p5) target bundleno = 23 (0x17), region = 24 }
   0x8   : > { %p40_p4 = scmp.eq.s32.totalorder %s38_s21, 0 }
   0xa   : > { %s1211_s23 = scalar_select %p40_p4, %s1136_s16, %s42_s22  }
   0xe   : > { %206 = sbr.rel (!%p51_p3) target bundleno = 23 (0x17), region = 28  ;;  %s208_s24 = sand.u32 (%p51_p3), 1, %s1136_s16  }
   0xf   : > { %s952_s25 = smul.u32 (%p51_p3), 12, %s1144_s18 }
  0x10   : > { %s1035_s26 = smul.u32 (%p51_p3), 48, %s208_s24 }
  0x11   : > { %s216_s29 = scalar_lea.vmem (%p51_p3), %s1292_s0, %s952_s25 }
  0x12   : > { %v231_v0 = vld [vmem:[%s216_s29] sm:$0xff] (%p51_p3)  ;;  %v235_v2 = vld [vmem:[%s216_s29 + $0x48] sm:$0xff] (%p51_p3)  ;;  %s210_s30 = scalar_lea.vmem (%p51_p3), [#allocation3], %s1035_s26  ;;  %v905_v6 = vld [vmem:[%s216_s29 + $0x50] sm:$0xf] (%p51_p3) }
  0x13   : > { %v233_v1 = vld [vmem:[%s216_s29 + $0x24] sm:$0xff] (%p51_p3)  ;;  %232 = vst [vmem:[%s210_s30] sm:$0xff] (%p51_p3), %v231_v0  ;;  %236 = vst [vmem:[%s210_s30 + $0x18] sm:$0xff] (%p51_p3), %v235_v2  ;;  %v237_v3 = vld [vmem:[%s216_s29 + $0x6c] sm:$0xff] (%p51_p3) }
  0x14   : > { %234 = vst [vmem:[%s210_s30 + $0xc] sm:$0xff] (%p51_p3), %v233_v1  ;;  %v901_v4 = vld [vmem:[%s216_s29 + $0x8] sm:$0xf] (%p51_p3)  ;;  %v903_v5 = vld [vmem:[%s216_s29 + $0x2c] sm:$0xf] (%p51_p3)  ;;  %238 = vst [vmem:[%s210_s30 + $0x24] sm:$0xff] (%p51_p3), %v237_v3 }
  0x15   : > { %902 = vst [vmem:[%s210_s30 + $0x8] sm:$0xf] %v901_v4  ;;  %904 = vst [vmem:[%s210_s30 + $0x14] sm:$0xf] %v903_v5  ;;  %v907_v7 = vld [vmem:[%s216_s29 + $0x74] sm:$0xf] }
  0x16   : > { %906 = vst [vmem:[%s210_s30 + $0x20] sm:$0xf] %v905_v6  ;;  %908 = vst [vmem:[%s210_s30 + $0x2c] sm:$0xf] %v907_v7 }
  0x17 PF: > { %p909_p6 = scmp.ge.s32.totalorder %s1148_s19, 1  ;;  %p270_p7 = scmp.lt.s32.totalorder %s1148_s19, 4 }
  0x19   : > { %p271_p8 = pnand %p909_p6, %p270_p7 }
  0x1a   : > { %s277_s5 = sand.u32 (!%p271_p8), 1, %s1132_s15   ;;  %s326_s6 = smul.u32 (!%p271_p8), 48, %s1140_s17 }
  0x1b   : > { %274 = sbr.rel (%p271_p8) target bundleno = 320 (0x140), region = 58  ;;  %p911_p10 = scmp.ne.s32.totalorder (!%p271_p8), %s1140_s17, 0 }
  0x1c   : > { %s1036_s7 = smul.u32 (!%p271_p8), 48, %s277_s5  ;;  %p327_p9 = scmp.lt.s32.totalorder (!%p271_p8), %s326_s6, 143 }
  0x1e   : > { %s1228_s12 = scalar_lea.vmem (!%p271_p8), [#allocation3], %s1036_s7 }
  0x22   : > { %s1304_s6 = smov (!%p327_p9, %s326_s6), 143  ;;  %360 = sbr.rel (%p911_p10) target bundleno = 41 (0x29), region = 66 }
  0x23   : > { %s910_s8 = sshll.u32 %s1304_s6, 2  ;;  %v1150_v8 = vmov (!%p911_p10), 0.0  }
  0x24   : > { %s1226_s11 = scalar_lea.vmem %s1293_s1, %s910_s8  ;;  %361 = vst [vmem:[#allocation2] sm:$0xff] (!%p911_p10), %v1150_v8  ;;  %362 = vst [vmem:[#allocation2 + $0x8] sm:$0xff] (!%p911_p10), %v1150_v8 }
  0x25   : > { %363 = vst [vmem:[#allocation2 + $0x10] sm:$0xff] (!%p911_p10), %v1150_v8  ;;  %364 = vst [vmem:[#allocation2 + $0x18] sm:$0xff] (!%p911_p10), %v1150_v8 }
  0x29 PF: > { %v1078_v9 = vld [vmem:[%s1226_s11 + $0x40] sm:$0xff]   ;;  %v1081_v12 = vld [vmem:[%s1226_s11 + $0x48] sm:$0xff]   ;;  %v1084_v15 = vld [vmem:[%s1226_s11 + $0x50] sm:$0xff]   ;;  %p942_p11 = scmp.ne.s32.totalorder %s1140_s17, 2 }
  0x2a   : > { %v1079_v10 = vld [vmem:[%s1226_s11] sm:$0xff]   ;;  %977 = vmatprep.subr.bf16.mxu0 %v1078_v9  ;;  %v1082_v13 = vld [vmem:[%s1226_s11 + $0x8] sm:$0xff]   ;;  %v1085_v16 = vld [vmem:[%s1226_s11 + $0x10] sm:$0xff]  }
  0x2b   : > { %v1080_v11 = vld [vmem:[%s1226_s11 + $0x80] sm:$0xff]   ;;  %978 = vmatpush3.bf16.msra.mxu0 %v1079_v10  ;;  %v1083_v14 = vld [vmem:[%s1226_s11 + $0x88] sm:$0xff]   ;;  %v1086_v17 = vld [vmem:[%s1226_s11 + $0x90] sm:$0xff]  }
  0x2c   : > { %1015 = vmatprep.subr.bf16.mxu1 %v1080_v11  ;;  %979 = vmatprep.subr.bf16.mxu0 %v1081_v12  ;;  %v1087_v18 = vld [vmem:[%s1226_s11 + $0x58] sm:$0xff]   ;;  %v1090_v21 = vld [vmem:[%s1226_s11 + $0x60] sm:$0xff]   ;;  %v1093_v24 = vld [vmem:[%s1226_s11 + $0x68] sm:$0xff]  }
  0x2d   : > { %1016 = vmatpush3.bf16.msra.mxu1 %v1080_v11  ;;  %v1088_v19 = vld [vmem:[%s1226_s11 + $0x18] sm:$0xff]   ;;  %v1092_v22 = vld [vmem:[%s1226_s11 + $0xa0] sm:$0xff]   ;;  %v1095_v25 = vld [vmem:[%s1226_s11 + $0xa8] sm:$0xff]  }
  0x2e   : > { %1017 = vmatprep.subr.bf16.mxu1 %v1083_v14  ;;  %v1089_v20 = vld [vmem:[%s1226_s11 + $0x98] sm:$0xff]   ;;  %v1091_v23 = vld [vmem:[%s1226_s11 + $0x20] sm:$0xff]   ;;  %v1094_v26 = vld [vmem:[%s1226_s11 + $0x28] sm:$0xff]  }
  0x2f   : > { %980 = vmatpush3.bf16.msra.mxu0 %v1082_v13  ;;  %v1096_v27 = vld [vmem:[%s1226_s11 + $0x70] sm:$0xff]   ;;  %v1099_v30 = vld [vmem:[%s1226_s11 + $0x78] sm:$0xff]   ;;  %v365_v45 = vld [vmem:[#allocation2] sm:$0xff] }
  0x30   : > { %981 = vmatprep.subr.bf16.mxu0 %v1084_v15  ;;  %v1097_v28 = vld [vmem:[%s1226_s11 + $0x30] sm:$0xff]   ;;  %v1101_v31 = vld [vmem:[%s1226_s11 + $0xb8] sm:$0xff]   ;;  %v366_v50 = vld [vmem:[#allocation2 + $0x8] sm:$0xff] }
  0x31   : > { %1018 = vmatpush3.bf16.msra.mxu1 %v1083_v14  ;;  %v1098_v29 = vld [vmem:[%s1226_s11 + $0xb0] sm:$0xff]   ;;  %v1100_v34 = vld [vmem:[%s1226_s11 + $0x38] sm:$0xff]   ;;  %v943_v5 = vld [vmem:[%s1294_s2] ss:$0 sm:$0xff] (!%p942_p11) }
  0x32   : > { %1019 = vmatprep.subr.bf16.mxu1 %v1086_v17  ;;  %v1104_v32 = vld [vmem:[%s1228_s12 + $0x4] ss:$12 sps:$4 sm:$0xff]   ;;  %v1105_v33 = vld [vmem:[%s1228_s12 + $0x8] ss:$12 sps:$4 sm:$0xff]   ;;  %v1102_v35 = vld [vmem:[%s1228_s12] ss:$12 sps:$4 sm:$0xff]  }
  0x33   : > { %982 = vmatpush3.bf16.msra.mxu0 %v1085_v16  ;;  %633 = vmatprep.mubr.bf16.mxu0 %v1104_v32  ;;  %v1107_v36 = vld [vmem:[%s1228_s12 + $0x1c] ss:$12 sps:$4 sm:$0xff]   ;;  %v1106_v37 = vld [vmem:[%s1228_s12 + $0x20] ss:$12 sps:$4 sm:$0xff]   ;;  %v1109_v38 = vld [vmem:[%s1228_s12 + $0x18] ss:$12 sps:$4 sm:$0xff]  }
  0x34   : > { %983 = vmatprep.subr.bf16.mxu0 %v1087_v18  ;;  %1031 = vmatprep.mubr.bf16.mxu1 %v1105_v33  ;;  %v367_v59 = vld [vmem:[#allocation2 + $0x10] sm:$0xff]  ;;  %v368_v63 = vld [vmem:[#allocation2 + $0x18] sm:$0xff]  ;;  %v958_v8 = vld [vmem:[%s1295_s3] sm:$0xff] (!%p942_p11)  }
  0x35   : > { %1020 = vmatpush3.bf16.msra.mxu1 %v1086_v17  ;;  %v959_v11 = vunpack.c.l.bf16 (!%p942_p11), %v958_v8  ;;  %v960_v12 = vunpack.c.h.bf16 (!%p942_p11), %v958_v8  ;;  %v975_v15 = vld [vmem:[%s1295_s3 + $0x8] sm:$0xff] (!%p942_p11)  }
  0x36   : > { %1021 = vmatprep.subr.bf16.mxu1 %v1089_v20  ;;  %v963_v16 = vunpack.c.l.bf16 (!%p942_p11), %v975_v15  ;;  %v964_v17 = vunpack.c.h.bf16 (!%p942_p11), %v975_v15 }
  0x37   : > { %984 = vmatpush3.bf16.msra.mxu0 %v1088_v19 }
  0x38   : > { %985 = vmatprep.subr.bf16.mxu0 %v1090_v21 }
  0x39   : > { %1022 = vmatpush3.bf16.msra.mxu1 %v1089_v20 }
  0x3a   : > { %1023 = vmatprep.subr.bf16.mxu1 %v1092_v22 }
  0x3b   : > { %986 = vmatpush3.bf16.msra.mxu0 %v1091_v23 }
  0x3c   : > { %987 = vmatprep.subr.bf16.mxu0 %v1093_v24 }
  0x3d   : > { %1024 = vmatpush3.bf16.msra.mxu1 %v1092_v22 }
  0x3e   : > { %1025 = vmatprep.subr.bf16.mxu1 %v1095_v25 }
  0x3f   : > { %988 = vmatpush3.bf16.msra.mxu0 %v1094_v26 }
  0x40   : > { %989 = vmatprep.subr.bf16.mxu0 %v1096_v27 }
  0x41   : > { %1026 = vmatpush3.bf16.msra.mxu1 %v1095_v25 }
  0x42   : > { %1027 = vmatprep.subr.bf16.mxu1 %v1098_v29 }
  0x43   : > { %990 = vmatpush3.bf16.msra.mxu0 %v1097_v28 }
  0x44   : > { %991 = vmatprep.subr.bf16.mxu0 %v1099_v30 }
  0x45   : > { %1028 = vmatpush3.bf16.msra.mxu1 %v1098_v29 }
  0x46   : > { %1029 = vmatprep.subr.bf16.mxu1 %v1101_v31 }
  0x47   : > { %992 = vmatpush3.bf16.msra.mxu0 %v1100_v34 }
  0x49   : > { %1030 = vmatpush3.bf16.msra.mxu1 %v1101_v31 }
  0x4a   : > { %634 = vmatmul.mubr.bf16.vlgmr.msra.gmra.mrb[0].mxu0 %v1102_v35 }
  0x4b   : > { %641 = vmatprep.mubr.bf16.mxu0 %v1107_v36 }
  0x4c   : > { %1032 = vmatmul.mubr.bf16.vlgmr.msra.gmra.mrb[0].mxu1 %v1106_v37 }
  0x52   : > { %642 = vmatmul.mubr.bf16.gmra.mrb[4].mxu0 %v1109_v38 }
 0x11d   : > { %v993_v39 = vpop.f32.mrb[0].mxu0 }
 0x11e   : > { %v994_v40 = vpop.f32.mrb[1].mxu0 }
 0x11f   : > { %v995_v41 = vadd.f32 %v994_v40, %v993_v39  ;;  %v996_v42 = vpop.f32.mrb[2].mxu0  ;;  %v1033_v43 = vpop.f32.mrb[0].mxu1 }
 0x120   : > { %v997_v44 = vpop.f32.mrb[3].mxu0  ;;  %v684_v46 = vpop.f32.mrb[1].mxu1 }
 0x121   : > { %v998_v47 = vadd.f32 %v997_v44, %v996_v42  ;;  %v685_v48 = vadd.f32 %v995_v41, %v684_v46  ;;  %v1034_v49 = vpop.f32.mrb[2].mxu1 }
 0x122   : > { %v687_v51 = vpop.f32.mrb[3].mxu1 }
 0x123   : > { %v699_v52 = vadd.f32 %v685_v48, %v365_v45  ;;  %v688_v53 = vadd.f32 %v998_v47, %v687_v51 }
 0x125   : > { %703 = vst [vmem:[#allocation2] sm:$0xff] %v699_v52  ;;  %v700_v54 = vadd.f32 %v688_v53, %v366_v50  ;;  %v999_v55 = vpop.f32.mrb[4].mxu0 }
 0x126   : > { %v1000_v56 = vpop.f32.mrb[5].mxu0 }
 0x127   : > { %704 = vst [vmem:[#allocation2 + $0x8] sm:$0xff] %v700_v54  ;;  %v1001_v57 = vadd.f32 %v1000_v56, %v999_v55  ;;  %v1002_v58 = vpop.f32.mrb[6].mxu0 }
 0x128   : > { %v1003_v60 = vpop.f32.mrb[7].mxu0 }
 0x129   : > { %v693_v61 = vadd.f32 %v1033_v43, %v1001_v57  ;;  %v1004_v62 = vadd.f32 %v1003_v60, %v1002_v58  ;;  %710 = sbr.rel (%p942_p11) target bundleno = 320 (0x140), region = 70 }
 0x12b   : > { %v701_v0 = vadd.f32 %v693_v61, %v367_v59  ;;  %v696_v1 = vadd.f32 %v1034_v49, %v1004_v62 }
 0x12c   : > { %v711_v3 = vld [vmem:[#allocation2] sm:$0xff] (!%p942_p11) }
 0x12d   : > { %705 = vst [vmem:[#allocation2 + $0x10] sm:$0xff] %v701_v0  ;;  %v702_v2 = vadd.f32 %v696_v1, %v368_v63  ;;  %v722_v6 = vadd.f32 (!%p942_p11), %v943_v5, %v711_v3 }
 0x12e   : > { %v712_v4 = vld [vmem:[#allocation2 + $0x8] sm:$0xff] (!%p942_p11) }
 0x12f   : > { %706 = vst [vmem:[#allocation2 + $0x18] sm:$0xff] %v702_v2  ;;  %v723_v7 = vadd.f32 (!%p942_p11), %v943_v5, %v712_v4  ;;  %v734_v18 = vadd.f32 (!%p942_p11), %v959_v11, %v722_v6 }
 0x131   : > { %v735_v19 = vadd.f32 %v960_v12, %v723_v7  ;;  %v738_v22 = vmax.f32 %v734_v18, 0.0 }
 0x133   : > { %v739_v23 = vmax.f32 %v735_v19, 0.0 }
 0x134   : > { %v713_v9 = vld [vmem:[#allocation2 + $0x10] sm:$0xff] }
 0x135   : > { %v724_v13 = vadd.f32 %v943_v5, %v713_v9  ;;  %v968_v26 = vpack.c.bf16 %v739_v23, %v738_v22 }
 0x136   : > { %v714_v10 = vld [vmem:[#allocation2 + $0x18] sm:$0xff] }
 0x137   : > { %v725_v14 = vadd.f32 %v943_v5, %v714_v10  ;;  %v736_v20 = vadd.f32 %v963_v16, %v724_v13  ;;  %969 = vst [vmem:[%s1296_s4] sm:$0xff] %v968_v26  }
 0x139   : > { %v737_v21 = vadd.f32 %v964_v17, %v725_v14  ;;  %v740_v24 = vmax.f32 %v736_v20, 0.0 }
 0x13b   : > { %v741_v25 = vmax.f32 %v737_v21, 0.0 }
 0x13d   : > { %v973_v27 = vpack.c.bf16 %v741_v25, %v740_v24 }
 0x13f   : > { %976 = vst [vmem:[%s1296_s4 + $0x8] sm:$0xff] %v973_v27  }
 0x140 PF: > { %s14_s19 = sadd.s32 1, %s1148_s19   ;;  %s1297_s15 = smov %s1136_s16 }
 0x141   : > { %p11_p12 = scmp.ge.s32.totalorder %s14_s19, 5   ;;  %s1298_s16 = smov %s1211_s23 }
 0x142   : > { %s1299_s17 = smov %s1144_s18  ;;  %s1300_s18 = smov %s1302_s20 }
 0x143   :  { %13 = sbr.rel (!%p11_p12) target bundleno = 3 (0x3), region = 120 }

// kernel: _lambda_.32
= control target key start
LH: loop header
LB: loop body
LE: loop exit
PB: predicated region body
PF: predicated region fallthrough
CT: control target
= control target key end

     0   :  { %s1151_s12 = smov 0   ;;  %s1153_s13 = smov 0   ;;  %s1282_s0 = inlined_call_operand.vmem [shape: bf16[16,1152], index: 0, kind: input, shape index: {}]   ;;  %s1283_s1 = inlined_call_operand.vmem [shape: bf16[1152,256], index: 1, kind: input, shape index: {}]   ;;  %s1284_s2 = inlined_call_operand.vmem [shape: f32[1,256], index: 2, kind: input, shape index: {}]   ;;  %s1285_s3 = inlined_call_operand.vmem [shape: bf16[16,256], index: 3, kind: output, shape index: {}]  }
   0x1   :  { %s1155_s14 = smov 0   ;;  %s1157_s15 = smov 0  }
   0x2   :  { %s1159_s16 = smov 0  }
   0x3 LB: > { %s25_s17 = sadd.s32 1, %s1123_s15  ;;  %p48_p1 = scmp.ne.s32.totalorder %s1115_s13, %s1111_s12  ;;  %s1127_s16 = sphi %s1159_s16, %s13_s16   ;;  %s1123_s15 = sphi %s1157_s15, %s1289_s15   ;;  %s1119_s14 = sphi %s1155_s14, %s1288_s14   ;;  %s1115_s13 = sphi %s1153_s13, %s1287_s13   ;;  %s1111_s12 = sphi %s1151_s12, %s1286_s12  }
   0x4   : > { %p26_p0 = scmp.ge.s32.totalorder %s25_s17, 3  ;;  %p49_p2 = scmp.eq.s32.totalorder %s1127_s16, 0 }
   0x5   : > { %s41_s19 = sadd.s32 1, %s1115_s13  ;;  %p893_p5 = scmp.ge.s32.totalorder %s1127_s16, 3 }
   0x6   : > { %s1291_s17 = smov (%p26_p0, %s25_s17), 0  ;;  %p50_p3 = por %p49_p2, %p48_p1 }
   0x7   : > { %s37_s18 = ssub.s32 %s1123_s15, %s1291_s17  ;;  %164 = sbr.rel (%p893_p5) target bundleno = 21 (0x15), region = 20 }
   0x8   : > { %p39_p4 = scmp.eq.s32.totalorder %s37_s18, 0 }
   0xa   : > { %s1186_s20 = scalar_select %p39_p4, %s1115_s13, %s41_s19  }
   0xe   : > { %167 = sbr.rel (!%p50_p3) target bundleno = 21 (0x15), region = 24  ;;  %s169_s21 = sand.u32 (%p50_p3), 1, %s1115_s13  }
   0xf   : > { %s961_s22 = smul.u32 (%p50_p3), 12, %s1123_s15 }
  0x10   : > { %s969_s23 = smul.u32 (%p50_p3), 24, %s169_s21 }
  0x11   : > { %s177_s26 = scalar_lea.vmem (%p50_p3), %s1282_s0, %s961_s22 }
  0x12   : > { %v192_v0 = vld [vmem:[%s177_s26] sm:$0xff] (%p50_p3)  ;;  %v895_v2 = vld [vmem:[%s177_s26 + $0x8] sm:$0xf] (%p50_p3)  ;;  %s171_s27 = scalar_lea.vmem (%p50_p3), [#allocation3], %s969_s23  ;;  %v897_v3 = vld [vmem:[%s177_s26 + $0x2c] sm:$0xf] (%p50_p3) }
  0x13   : > { %v194_v1 = vld [vmem:[%s177_s26 + $0x24] sm:$0xff] (%p50_p3)  ;;  %193 = vst [vmem:[%s171_s27] sm:$0xff] (%p50_p3), %v192_v0  ;;  %896 = vst [vmem:[%s171_s27 + $0x8] sm:$0xf] (%p50_p3), %v895_v2 }
  0x14   : > { %195 = vst [vmem:[%s171_s27 + $0xc] sm:$0xff] (%p50_p3), %v194_v1  ;;  %898 = vst [vmem:[%s171_s27 + $0x14] sm:$0xf] (%p50_p3), %v897_v3 }
  0x15 PF: > { %p899_p6 = scmp.ge.s32.totalorder %s1127_s16, 1  ;;  %p226_p7 = scmp.lt.s32.totalorder %s1127_s16, 4 }
  0x17   : > { %p227_p8 = pnand %p899_p6, %p226_p7 }
  0x18   : > { %s233_s28 = sand.u32 (!%p227_p8), 1, %s1111_s12   ;;  %s277_s29 = smul.u32 (!%p227_p8), 48, %s1119_s14 }
  0x19   : > { %230 = sbr.rel (%p227_p8) target bundleno = 338 (0x152), region = 54  ;;  %p902_p10 = scmp.ne.s32.totalorder (!%p227_p8), %s1119_s14, 0 }
  0x1a   : > { %s970_s30 = smul.u32 (!%p227_p8), 24, %s233_s28  ;;  %p279_p9 = scmp.lt.s32.totalorder (!%p227_p8), %s277_s29, 143 }
  0x1c   : > { %s1203_s8 = scalar_lea.vmem (!%p227_p8), [#allocation3], %s970_s30 }
  0x20   : > { %s1293_s29 = smov (!%p279_p9, %s277_s29), 143  ;;  %310 = sbr.rel (%p902_p10) target bundleno = 39 (0x27), region = 62 }
  0x21   : > { %s962_s4 = sshll.u32 %s1293_s29, 3  ;;  %v1129_v4 = vmov (!%p902_p10), 0.0  }
  0x22   : > { %s1201_s7 = scalar_lea.vmem %s1283_s1, %s962_s4  ;;  %311 = vst [vmem:[#allocation2] sm:$0xff] (!%p902_p10), %v1129_v4  ;;  %312 = vst [vmem:[#allocation2 + $0x8] sm:$0xff] (!%p902_p10), %v1129_v4 }
  0x23   : > { %313 = vst [vmem:[#allocation2 + $0x10] sm:$0xff] (!%p902_p10), %v1129_v4  ;;  %314 = vst [vmem:[#allocation2 + $0x18] sm:$0xff] (!%p902_p10), %v1129_v4 }
  0x27 PF: > { %v1013_v5 = vld [vmem:[%s1201_s7 + $0x4] ss:$8 sps:$4 sm:$0xff]   ;;  %v1015_v6 = vld [vmem:[%s1201_s7] ss:$8 sps:$4 sm:$0xff]   ;;  %v1130_v7 = vmov 0   ;;  %p954_p11 = scmp.ne.s32.totalorder %s1119_s14, 2 }
  0x28   : > { %702 = vmatprep.mubr.bf16.mxu0 %v1130_v7  ;;  %627 = vmatprep.subr.bf16.mxu1 %v1013_v5  ;;  %v1016_v8 = vld [vmem:[%s1201_s7 + $0x14] ss:$8 sps:$4 sm:$0xff]   ;;  %v1018_v9 = vld [vmem:[%s1201_s7 + $0x10] ss:$8 sps:$4 sm:$0xff]   ;;  %v1019_v10 = vld [vmem:[%s1201_s7 + $0x24] ss:$8 sps:$4 sm:$0xff]  }
  0x29   : > { %628 = vmatpush1.bf16.msra.mxu1 %v1015_v6  ;;  %v1021_v11 = vld [vmem:[%s1201_s7 + $0x20] ss:$8 sps:$4 sm:$0xff]   ;;  %v1022_v12 = vld [vmem:[%s1201_s7 + $0x34] ss:$8 sps:$4 sm:$0xff]   ;;  %v1024_v13 = vld [vmem:[%s1201_s7 + $0x30] ss:$8 sps:$4 sm:$0xff]  }
  0x2a   : > { %629 = vmatprep.subr.bf16.mxu1 %v1016_v8  ;;  %v1037_v14 = vld [vmem:[%s1201_s7 + $0x104] ss:$8 sps:$4 sm:$0xff]   ;;  %v1039_v15 = vld [vmem:[%s1201_s7 + $0x100] ss:$8 sps:$4 sm:$0xff]   ;;  %v1043_v17 = vld [vmem:[%s1201_s7 + $0x114] ss:$8 sps:$4 sm:$0xff]  }
  0x2b   : > { %v1025_v16 = vld [vmem:[%s1201_s7 + $0x44] ss:$8 sps:$4 sm:$0xff]   ;;  %670 = vmatprep.subr.bf16.mxu0 %v1037_v14  ;;  %v1045_v18 = vld [vmem:[%s1201_s7 + $0x110] ss:$8 sps:$4 sm:$0xff]   ;;  %v1027_v19 = vld [vmem:[%s1201_s7 + $0x40] ss:$8 sps:$4 sm:$0xff]  }
  0x2c   : > { %671 = vmatpush1.bf16.msra.mxu0 %v1039_v15  ;;  %v1028_v20 = vld [vmem:[%s1201_s7 + $0x54] ss:$8 sps:$4 sm:$0xff]   ;;  %v1049_v21 = vld [vmem:[%s1201_s7 + $0x124] ss:$8 sps:$4 sm:$0xff]   ;;  %v1051_v22 = vld [vmem:[%s1201_s7 + $0x120] ss:$8 sps:$4 sm:$0xff]  }
  0x2d   : > { %630 = vmatpush1.bf16.msra.mxu1 %v1018_v9  ;;  %672 = vmatprep.subr.bf16.mxu0 %v1043_v17  ;;  %v1030_v23 = vld [vmem:[%s1201_s7 + $0x50] ss:$8 sps:$4 sm:$0xff]   ;;  %v1055_v24 = vld [vmem:[%s1201_s7 + $0x134] ss:$8 sps:$4 sm:$0xff]   ;;  %v1031_v25 = vld [vmem:[%s1201_s7 + $0x64] ss:$8 sps:$4 sm:$0xff]  }
  0x2e   : > { %631 = vmatprep.subr.bf16.mxu1 %v1019_v10  ;;  %v1057_v26 = vld [vmem:[%s1201_s7 + $0x130] ss:$8 sps:$4 sm:$0xff]   ;;  %v1033_v27 = vld [vmem:[%s1201_s7 + $0x60] ss:$8 sps:$4 sm:$0xff]   ;;  %v1061_v28 = vld [vmem:[%s1201_s7 + $0x144] ss:$8 sps:$4 sm:$0xff]  }
  0x2f   : > { %v1034_v29 = vld [vmem:[%s1201_s7 + $0x74] ss:$8 sps:$4 sm:$0xff]   ;;  %v1063_v30 = vld [vmem:[%s1201_s7 + $0x140] ss:$8 sps:$4 sm:$0xff]   ;;  %v1036_v31 = vld [vmem:[%s1201_s7 + $0x70] ss:$8 sps:$4 sm:$0xff]  }
  0x30   : > { %673 = vmatpush1.bf16.msra.mxu0 %v1045_v18  ;;  %v1067_v32 = vld [vmem:[%s1201_s7 + $0x154] ss:$8 sps:$4 sm:$0xff]   ;;  %v1040_v33 = vld [vmem:[%s1201_s7 + $0x84] ss:$8 sps:$4 sm:$0xff]   ;;  %v1069_v34 = vld [vmem:[%s1201_s7 + $0x150] ss:$8 sps:$4 sm:$0xff]  }
  0x31   : > { %632 = vmatpush1.bf16.msra.mxu1 %v1021_v11  ;;  %674 = vmatprep.subr.bf16.mxu0 %v1049_v21  ;;  %v1042_v35 = vld [vmem:[%s1201_s7 + $0x80] ss:$8 sps:$4 sm:$0xff]   ;;  %v1073_v36 = vld [vmem:[%s1201_s7 + $0x164] ss:$8 sps:$4 sm:$0xff]   ;;  %v1046_v37 = vld [vmem:[%s1201_s7 + $0x94] ss:$8 sps:$4 sm:$0xff]  }
  0x32   : > { %633 = vmatprep.subr.bf16.mxu1 %v1022_v12  ;;  %v1075_v38 = vld [vmem:[%s1201_s7 + $0x160] ss:$8 sps:$4 sm:$0xff]   ;;  %v1048_v40 = vld [vmem:[%s1201_s7 + $0x90] ss:$8 sps:$4 sm:$0xff]   ;;  %v1079_v41 = vld [vmem:[%s1201_s7 + $0x174] ss:$8 sps:$4 sm:$0xff]  }
  0x33   : > { %v1088_v39 = vld [vmem:[%s1203_s8 + $0x4] ss:$12 sps:$4 sm:$0xff]   ;;  %v1085_v46 = vld [vmem:[%s1203_s8 + $0x8] ss:$12 sps:$4 sm:$0xff]   ;;  %v1086_v56 = vld [vmem:[%s1203_s8] ss:$12 sps:$4 sm:$0xff]  }
  0x34   : > { %675 = vmatpush1.bf16.msra.mxu0 %v1051_v22  ;;  %v1052_v42 = vld [vmem:[%s1201_s7 + $0xa4] ss:$8 sps:$4 sm:$0xff]   ;;  %659 = vmatprep.mubr.bf16.mxu1 %v1088_v39  ;;  %v1081_v43 = vld [vmem:[%s1201_s7 + $0x170] ss:$8 sps:$4 sm:$0xff]   ;;  %v1054_v44 = vld [vmem:[%s1201_s7 + $0xa0] ss:$8 sps:$4 sm:$0xff]  }
  0x35   : > { %634 = vmatpush1.bf16.msra.mxu1 %v1024_v13  ;;  %676 = vmatprep.subr.bf16.mxu0 %v1055_v24  ;;  %v1058_v45 = vld [vmem:[%s1201_s7 + $0xb4] ss:$8 sps:$4 sm:$0xff]   ;;  %v1060_v47 = vld [vmem:[%s1201_s7 + $0xb0] ss:$8 sps:$4 sm:$0xff]   ;;  %v1064_v48 = vld [vmem:[%s1201_s7 + $0xc4] ss:$8 sps:$4 sm:$0xff]   ;;  %v731_v13 = vlaneseq (!%p954_p11) }
  0x36   : > { %635 = vmatprep.subr.bf16.mxu1 %v1025_v16  ;;  %v1066_v49 = vld [vmem:[%s1201_s7 + $0xc0] ss:$8 sps:$4 sm:$0xff]   ;;  %v1070_v50 = vld [vmem:[%s1201_s7 + $0xd4] ss:$8 sps:$4 sm:$0xff]   ;;  %v1072_v51 = vld [vmem:[%s1201_s7 + $0xd0] ss:$8 sps:$4 sm:$0xff]  }
  0x37   : > { %v1076_v52 = vld [vmem:[%s1201_s7 + $0xe4] ss:$8 sps:$4 sm:$0xff]   ;;  %v1078_v53 = vld [vmem:[%s1201_s7 + $0xe0] ss:$8 sps:$4 sm:$0xff]   ;;  %v1082_v54 = vld [vmem:[%s1201_s7 + $0xf4] ss:$8 sps:$4 sm:$0xff]  }
  0x38   : > { %677 = vmatpush1.bf16.msra.mxu0 %v1057_v26  ;;  %v1084_v55 = vld [vmem:[%s1201_s7 + $0xf0] ss:$8 sps:$4 sm:$0xff]   ;;  %v315_v61 = vld [vmem:[#allocation2] sm:$0xff]  ;;  %v316_v0 = vld [vmem:[#allocation2 + $0x8] sm:$0xff]  ;;  %v732_v14 = vshrl.u32 (!%p954_p11), %v731_v13, 7 }
  0x39   : > { %636 = vmatpush1.bf16.msra.mxu1 %v1027_v19  ;;  %678 = vmatprep.subr.bf16.mxu0 %v1061_v28  ;;  %v317_v3 = vld [vmem:[#allocation2 + $0x10] sm:$0xff]  ;;  %v318_v7 = vld [vmem:[#allocation2 + $0x18] sm:$0xff]  ;;  %v729_v15 = vld [vmem:[%s1284_s2] sm:$0x3] (!%p954_p11) }
  0x3a   : > { %637 = vmatprep.subr.bf16.mxu1 %v1028_v20  ;;  %v733_v17 = vsub.s32 (!%p954_p11), 0, %v732_v14  ;;  %v737_v18 = vsub.s32 (!%p954_p11), 1, %v732_v14 }
  0x3c   : > { %679 = vmatpush1.bf16.msra.mxu0 %v1063_v30  ;;  %v734_v22 = vrot.slane (!%p954_p11), %v729_v15, %v733_v17 }
  0x3d   : > { %638 = vmatpush1.bf16.msra.mxu1 %v1030_v23  ;;  %680 = vmatprep.subr.bf16.mxu0 %v1067_v32  ;;  %v738_v23 = vrot.slane (!%p954_p11), %v729_v15, %v737_v18 }
  0x3e   : > { %639 = vmatprep.subr.bf16.mxu1 %v1031_v25 }
  0x40   : > { %681 = vmatpush1.bf16.msra.mxu0 %v1069_v34 }
  0x41   : > { %640 = vmatpush1.bf16.msra.mxu1 %v1033_v27  ;;  %682 = vmatprep.subr.bf16.mxu0 %v1073_v36 }
  0x42   : > { %641 = vmatprep.subr.bf16.mxu1 %v1034_v29 }
  0x44   : > { %683 = vmatpush1.bf16.msra.mxu0 %v1075_v38 }
  0x45   : > { %642 = vmatpush1.bf16.msra.mxu1 %v1036_v31  ;;  %684 = vmatprep.subr.bf16.mxu0 %v1079_v41 }
  0x46   : > { %643 = vmatprep.subr.bf16.mxu1 %v1040_v33 }
  0x48   : > { %685 = vmatpush1.bf16.msra.mxu0 %v1081_v43 }
  0x49   : > { %644 = vmatpush1.bf16.msra.mxu1 %v1042_v35 }
  0x4a   : > { %645 = vmatprep.subr.bf16.mxu1 %v1046_v37 }
  0x4b   : > { %703 = vmatmul.mubr.bf16.vlgmr.msra.gmra.mrb[0].mxu0 %v1085_v46 }
  0x4d   : > { %646 = vmatpush1.bf16.msra.mxu1 %v1048_v40 }
  0x4e   : > { %647 = vmatprep.subr.bf16.mxu1 %v1052_v42 }
  0x51   : > { %648 = vmatpush1.bf16.msra.mxu1 %v1054_v44 }
  0x52   : > { %649 = vmatprep.subr.bf16.mxu1 %v1058_v45 }
  0x55   : > { %650 = vmatpush1.bf16.msra.mxu1 %v1060_v47 }
  0x56   : > { %651 = vmatprep.subr.bf16.mxu1 %v1064_v48 }
  0x59   : > { %652 = vmatpush1.bf16.msra.mxu1 %v1066_v49 }
  0x5a   : > { %653 = vmatprep.subr.bf16.mxu1 %v1070_v50 }
  0x5d   : > { %654 = vmatpush1.bf16.msra.mxu1 %v1072_v51 }
  0x5e   : > { %655 = vmatprep.subr.bf16.mxu1 %v1076_v52 }
  0x61   : > { %656 = vmatpush1.bf16.msra.mxu1 %v1078_v53 }
  0x62   : > { %657 = vmatprep.subr.bf16.mxu1 %v1082_v54 }
  0x65   : > { %658 = vmatpush1.bf16.msra.mxu1 %v1084_v55 }
  0x68   : > { %660 = vmatmul.mubr.bf16.vlgmr.msra.gmra.mrb[0].mxu1 %v1086_v56 }
 0x11e   : > { %v704_v57 = vpop.f32.mrb[0].mxu0 }
 0x11f   : > { %v706_v58 = vpop.f32.mrb[1].mxu0 }
 0x120   : > { %v708_v59 = vpop.f32.mrb[2].mxu0 }
 0x121   : > { %v710_v60 = vpop.f32.mrb[3].mxu0 }
 0x13b   : > { %v661_v62 = vpop.f32.mrb[0].mxu1 }
 0x13c   : > { %v705_v63 = vadd.f32 %v704_v57, %v661_v62  ;;  %v663_v1 = vpop.f32.mrb[1].mxu1 }
 0x13d   : > { %v707_v2 = vadd.f32 %v706_v58, %v663_v1  ;;  %v665_v4 = vpop.f32.mrb[2].mxu1  ;;  %724 = sbr.rel (%p954_p11) target bundleno = 338 (0x152), region = 66 }
 0x13e   : > { %v713_v5 = vadd.f32 %v705_v63, %v315_v61  ;;  %v709_v6 = vadd.f32 %v708_v59, %v665_v4  ;;  %v667_v8 = vpop.f32.mrb[3].mxu1 }
 0x13f   : > { %v714_v9 = vadd.f32 %v707_v2, %v316_v0  ;;  %v711_v10 = vadd.f32 %v710_v60, %v667_v8 }
 0x140   : > { %717 = vst [vmem:[#allocation2] sm:$0xff] %v713_v5  ;;  %v715_v11 = vadd.f32 %v709_v6, %v317_v3 }
 0x141   : > { %718 = vst [vmem:[#allocation2 + $0x8] sm:$0xff] %v714_v9  ;;  %v716_v12 = vadd.f32 %v711_v10, %v318_v7 }
 0x142   : > { %719 = vst [vmem:[#allocation2 + $0x10] sm:$0xff] %v715_v11 }
 0x143   : > { %720 = vst [vmem:[#allocation2 + $0x18] sm:$0xff] %v716_v12 }
 0x147   : > { %v725_v16 = vld [vmem:[#allocation2] sm:$0xff] }
 0x148   : > { %v726_v19 = vld [vmem:[#allocation2 + $0x8] sm:$0xff]  ;;  %v741_v24 = vadd.f32 %v734_v22, %v725_v16 }
 0x149   : > { %v727_v20 = vld [vmem:[#allocation2 + $0x10] sm:$0xff]  ;;  %v742_v25 = vadd.f32 %v738_v23, %v726_v19 }
 0x14a   : > { %v728_v21 = vld [vmem:[#allocation2 + $0x18] sm:$0xff]  ;;  %v743_v26 = vadd.f32 %v734_v22, %v727_v20  ;;  %v745_v28 = vmax.f32 %v741_v24, 0.0 }
 0x14b   : > { %v744_v27 = vadd.f32 %v738_v23, %v728_v21  ;;  %v746_v29 = vmax.f32 %v742_v25, 0.0 }
 0x14c   : > { %v747_v30 = vmax.f32 %v743_v26, 0.0 }
 0x14d   : > { %v748_v31 = vmax.f32 %v744_v27, 0.0  ;;  %v963_v32 = vpack.c.bf16 %v746_v29, %v745_v28 }
 0x14f   : > { %v964_v33 = vpack.c.bf16 %v748_v31, %v747_v30  ;;  %761 = vst [vmem:[%s1285_s3] sm:$0xff] %v963_v32 }
 0x151   : > { %762 = vst [vmem:[%s1285_s3 + $0x8] sm:$0xff] %v964_v33 }
 0x152 PF: > { %s13_s16 = sadd.s32 1, %s1127_s16   ;;  %s1286_s12 = smov %s1115_s13 }
 0x153   : > { %p10_p12 = scmp.ge.s32.totalorder %s13_s16, 5   ;;  %s1287_s13 = smov %s1186_s20 }
 0x154   : > { %s1288_s14 = smov %s1123_s15  ;;  %s1289_s15 = smov %s1291_s17 }
 0x155   :  { %12 = sbr.rel (!%p10_p12) target bundleno = 3 (0x3), region = 113 }

// kernel: _lambda_.31
= control target key start
LH: loop header
LB: loop body
LE: loop exit
PB: predicated region body
PF: predicated region fallthrough
CT: control target
= control target key end

     0   :  { %v270_v1 = vmov 0   ;;  %v191_v18 = vlaneseq  ;;  %s351_s1 = inlined_call_operand.vmem [shape: bf16[128,256], index: 1, kind: input, shape index: {}]   ;;  %s352_s0 = inlined_call_operand.vmem [shape: bf16[16,128], index: 0, kind: input, shape index: {}]   ;;  %s353_s2 = inlined_call_operand.vmem [shape: f32[1,256], index: 2, kind: input, shape index: {}]   ;;  %s354_s3 = inlined_call_operand.vmem [shape: bf16[16,256], index: 3, kind: output, shape index: {}]  }
   0x1   :  { %v245_v0 = vld [vmem:[%s351_s1 + $0x4] ss:$8 sps:$4 sm:$0xff]   ;;  %163 = vmatprep.mubr.bf16.mxu0 %v270_v1  ;;  %v247_v2 = vld [vmem:[%s351_s1] ss:$8 sps:$4 sm:$0xff]   ;;  %v248_v3 = vld [vmem:[%s351_s1 + $0x14] ss:$8 sps:$4 sm:$0xff]  }
   0x2   :  { %131 = vmatprep.subr.bf16.mxu0 %v245_v0  ;;  %v250_v4 = vld [vmem:[%s351_s1 + $0x10] ss:$8 sps:$4 sm:$0xff]   ;;  %v251_v5 = vld [vmem:[%s351_s1 + $0x24] ss:$8 sps:$4 sm:$0xff]   ;;  %v253_v6 = vld [vmem:[%s351_s1 + $0x20] ss:$8 sps:$4 sm:$0xff]  }
   0x3   :  { %132 = vmatpush1.bf16.msra.mxu0 %v247_v2  ;;  %v254_v7 = vld [vmem:[%s351_s1 + $0x34] ss:$8 sps:$4 sm:$0xff]   ;;  %v256_v8 = vld [vmem:[%s351_s1 + $0x30] ss:$8 sps:$4 sm:$0xff]   ;;  %v257_v9 = vld [vmem:[%s351_s1 + $0x44] ss:$8 sps:$4 sm:$0xff]  }
   0x4   :  { %133 = vmatprep.subr.bf16.mxu0 %v248_v3  ;;  %v259_v10 = vld [vmem:[%s351_s1 + $0x40] ss:$8 sps:$4 sm:$0xff]   ;;  %v260_v11 = vld [vmem:[%s351_s1 + $0x54] ss:$8 sps:$4 sm:$0xff]   ;;  %v262_v12 = vld [vmem:[%s351_s1 + $0x50] ss:$8 sps:$4 sm:$0xff]  }
   0x5   :  { %v263_v13 = vld [vmem:[%s351_s1 + $0x64] ss:$8 sps:$4 sm:$0xff]   ;;  %v265_v14 = vld [vmem:[%s351_s1 + $0x60] ss:$8 sps:$4 sm:$0xff]   ;;  %v266_v15 = vld [vmem:[%s351_s1 + $0x74] ss:$8 sps:$4 sm:$0xff]  }
   0x6   :  { %v268_v16 = vld [vmem:[%s351_s1 + $0x70] ss:$8 sps:$4 sm:$0xff]   ;;  %v269_v17 = vld [vmem:[%s352_s0] sm:$0xff]   ;;  %v192_v19 = vshrl.u32 %v191_v18, 7 }
   0x7   :  { %134 = vmatpush1.bf16.msra.mxu0 %v250_v4  ;;  %v189_v21 = vld [vmem:[%s353_s2] sm:$0x3] }
   0x8   :  { %135 = vmatprep.subr.bf16.mxu0 %v251_v5  ;;  %v193_v20 = vsub.s32 0, %v192_v19  ;;  %v197_v22 = vsub.s32 1, %v192_v19 }
   0xa   :  { %v194_v23 = vrot.slane %v189_v21, %v193_v20  ;;  %v198_v24 = vrot.slane %v189_v21, %v197_v22 }
   0xb   :  { %136 = vmatpush1.bf16.msra.mxu0 %v253_v6 }
   0xc   :  { %137 = vmatprep.subr.bf16.mxu0 %v254_v7 }
   0xf   :  { %138 = vmatpush1.bf16.msra.mxu0 %v256_v8 }
  0x10   :  { %139 = vmatprep.subr.bf16.mxu0 %v257_v9 }
  0x13   :  { %140 = vmatpush1.bf16.msra.mxu0 %v259_v10 }
  0x14   :  { %141 = vmatprep.subr.bf16.mxu0 %v260_v11 }
  0x17   :  { %142 = vmatpush1.bf16.msra.mxu0 %v262_v12 }
  0x18   :  { %143 = vmatprep.subr.bf16.mxu0 %v263_v13 }
  0x1b   :  { %144 = vmatpush1.bf16.msra.mxu0 %v265_v14 }
  0x1c   :  { %145 = vmatprep.subr.bf16.mxu0 %v266_v15 }
  0x1f   :  { %146 = vmatpush1.bf16.msra.mxu0 %v268_v16 }
  0x22   :  { %164 = vmatmul.mubr.bf16.vlgmr.msra.gmra.mrb[0].mxu0 %v269_v17 }
  0xf5   :  { %v165_v25 = vpop.f32.mrb[0].mxu0 }
  0xf6   :  { %v201_v26 = vadd.f32 %v194_v23, %v165_v25  ;;  %v167_v27 = vpop.f32.mrb[1].mxu0 }
  0xf7   :  { %v202_v28 = vadd.f32 %v198_v24, %v167_v27  ;;  %v169_v29 = vpop.f32.mrb[2].mxu0 }
  0xf8   :  { %v203_v30 = vadd.f32 %v194_v23, %v169_v29  ;;  %v171_v31 = vpop.f32.mrb[3].mxu0 }
  0xf9   :  { %v242_v32 = vpack.c.bf16 %v202_v28, %v201_v26  ;;  %v204_v33 = vadd.f32 %v198_v24, %v171_v31 }
  0xfb   :  { %217 = vst [vmem:[%s354_s3] sm:$0xff] %v242_v32  ;;  %v243_v34 = vpack.c.bf16 %v204_v33, %v203_v30 }
  0xfd   :  { %218 = vst [vmem:[%s354_s3 + $0x8] sm:$0xff] %v243_v34 }

// kernel: _lambda_.34
= control target key start
LH: loop header
LB: loop body
LE: loop exit
PB: predicated region body
PF: predicated region fallthrough
CT: control target
= control target key end

     0   :  { %s1614_s12 = smov 0   ;;  %s1616_s13 = smov 0   ;;  %s1796_s0 = inlined_call_operand.vmem [shape: bf16[16,2304], index: 0, kind: input, shape index: {}]   ;;  %s1797_s1 = inlined_call_operand.vmem [shape: bf16[2304,256], index: 1, kind: input, shape index: {}]   ;;  %s1798_s2 = inlined_call_operand.vmem [shape: f32[1,256], index: 2, kind: input, shape index: {}]   ;;  %s1799_s3 = inlined_call_operand.vmem [shape: bf16[16,256], index: 3, kind: output, shape index: {}]  }
   0x1   :  { %s1618_s14 = smov 0   ;;  %s1620_s15 = smov 0  }
   0x2   :  { %s1622_s16 = smov 0  }
   0x3 LB: > { %s25_s17 = sadd.s32 1, %s1587_s15  ;;  %p48_p1 = scmp.ne.s32.totalorder %s1579_s13, %s1575_s12  ;;  %s1591_s16 = sphi %s1622_s16, %s13_s16   ;;  %s1587_s15 = sphi %s1620_s15, %s1803_s15   ;;  %s1583_s14 = sphi %s1618_s14, %s1802_s14   ;;  %s1579_s13 = sphi %s1616_s13, %s1801_s13   ;;  %s1575_s12 = sphi %s1614_s12, %s1800_s12  }
   0x4   : > { %p26_p0 = scmp.ge.s32.totalorder %s25_s17, 3  ;;  %p49_p2 = scmp.eq.s32.totalorder %s1591_s16, 0 }
   0x5   : > { %s41_s19 = sadd.s32 1, %s1579_s13  ;;  %p1230_p5 = scmp.ge.s32.totalorder %s1591_s16, 3 }
   0x6   : > { %s1805_s17 = smov (%p26_p0, %s25_s17), 0  ;;  %p50_p3 = por %p49_p2, %p48_p1 }
   0x7   : > { %s37_s18 = ssub.s32 %s1587_s15, %s1805_s17  ;;  %164 = sbr.rel (%p1230_p5) target bundleno = 22 (0x16), region = 20 }
   0x8   : > { %p39_p4 = scmp.eq.s32.totalorder %s37_s18, 0 }
   0xa   : > { %s1649_s20 = scalar_select %p39_p4, %s1579_s13, %s41_s19  }
   0xe   : > { %167 = sbr.rel (!%p50_p3) target bundleno = 22 (0x16), region = 24  ;;  %s169_s21 = sand.u32 (%p50_p3), 1, %s1579_s13  }
   0xf   : > { %s1345_s22 = smul.u32 (%p50_p3), 24, %s1587_s15 }
  0x10   : > { %s1357_s23 = smul.u32 (%p50_p3), 48, %s169_s21 }
  0x11   : > { %s177_s26 = scalar_lea.vmem (%p50_p3), %s1796_s0, %s1345_s22 }
  0x12   : > { %v190_v0 = vld [vmem:[%s177_s26] sm:$0xff] (%p50_p3)  ;;  %v192_v1 = vld [vmem:[%s177_s26 + $0x8] sm:$0xff] (%p50_p3)  ;;  %v194_v2 = vld [vmem:[%s177_s26 + $0x10] sm:$0xff] (%p50_p3)  ;;  %s171_s27 = scalar_lea.vmem (%p50_p3), [#allocation3], %s1357_s23 }
  0x13   : > { %191 = vst [vmem:[%s171_s27] sm:$0xff] (%p50_p3), %v190_v0  ;;  %193 = vst [vmem:[%s171_s27 + $0x8] sm:$0xff] (%p50_p3), %v192_v1  ;;  %v196_v3 = vld [vmem:[%s177_s26 + $0x48] sm:$0xff] (%p50_p3)  ;;  %v198_v4 = vld [vmem:[%s177_s26 + $0x50] sm:$0xff] (%p50_p3) }
  0x14   : > { %195 = vst [vmem:[%s171_s27 + $0x10] sm:$0xff] (%p50_p3), %v194_v2  ;;  %v200_v5 = vld [vmem:[%s177_s26 + $0x58] sm:$0xff] (%p50_p3)  ;;  %197 = vst [vmem:[%s171_s27 + $0x18] sm:$0xff] (%p50_p3), %v196_v3 }
  0x15   : > { %199 = vst [vmem:[%s171_s27 + $0x20] sm:$0xff] %v198_v4  ;;  %201 = vst [vmem:[%s171_s27 + $0x28] sm:$0xff] %v200_v5 }
  0x16 PF: > { %p1232_p6 = scmp.ge.s32.totalorder %s1591_s16, 1  ;;  %p221_p7 = scmp.lt.s32.totalorder %s1591_s16, 4 }
  0x18   : > { %p222_p8 = pnand %p1232_p6, %p221_p7 }
  0x19   : > { %s228_s28 = sand.u32 (!%p222_p8), 1, %s1575_s12   ;;  %s272_s29 = smul.u32 (!%p222_p8), 96, %s1583_s14 }
  0x1a   : > { %225 = sbr.rel (%p222_p8) target bundleno = 403 (0x193), region = 51  ;;  %p1235_p10 = scmp.ne.s32.totalorder (!%p222_p8), %s1583_s14, 0 }
  0x1b   : > { %s1358_s30 = smul.u32 (!%p222_p8), 48, %s228_s28  ;;  %p274_p9 = scmp.lt.s32.totalorder (!%p222_p8), %s272_s29, 287 }
  0x1d   : > { %s1666_s8 = scalar_lea.vmem (!%p222_p8), [#allocation3], %s1358_s30 }
  0x21   : > { %s1807_s29 = smov (!%p274_p9, %s272_s29), 287  ;;  %304 = sbr.rel (%p1235_p10) target bundleno = 40 (0x28), region = 59 }
  0x22   : > { %s1346_s4 = sshll.u32 %s1807_s29, 3  ;;  %v1593_v6 = vmov (!%p1235_p10), 0.0  }
  0x23   : > { %s1664_s7 = scalar_lea.vmem %s1797_s1, %s1346_s4  ;;  %305 = vst [vmem:[#allocation2] sm:$0xff] (!%p1235_p10), %v1593_v6  ;;  %306 = vst [vmem:[#allocation2 + $0x8] sm:$0xff] (!%p1235_p10), %v1593_v6 }
  0x24   : > { %307 = vst [vmem:[#allocation2 + $0x10] sm:$0xff] (!%p1235_p10), %v1593_v6  ;;  %308 = vst [vmem:[#allocation2 + $0x18] sm:$0xff] (!%p1235_p10), %v1593_v6 }
  0x28 PF: > { %v1400_v7 = vld [vmem:[%s1664_s7 + $0x104] ss:$8 sps:$4 sm:$0xff]   ;;  %v1402_v8 = vld [vmem:[%s1664_s7 + $0x100] ss:$8 sps:$4 sm:$0xff]   ;;  %v1403_v9 = vld [vmem:[%s1664_s7 + $0x114] ss:$8 sps:$4 sm:$0xff]  }
  0x29   : > { %968 = vmatprep.subr.bf16.mxu0 %v1400_v7  ;;  %v1405_v10 = vld [vmem:[%s1664_s7 + $0x110] ss:$8 sps:$4 sm:$0xff]   ;;  %v1406_v11 = vld [vmem:[%s1664_s7 + $0x124] ss:$8 sps:$4 sm:$0xff]   ;;  %v1408_v12 = vld [vmem:[%s1664_s7 + $0x120] ss:$8 sps:$4 sm:$0xff]  }
  0x2a   : > { %969 = vmatpush1.bf16.msra.mxu0 %v1402_v8  ;;  %v1409_v13 = vld [vmem:[%s1664_s7 + $0x134] ss:$8 sps:$4 sm:$0xff]   ;;  %v1411_v14 = vld [vmem:[%s1664_s7 + $0x130] ss:$8 sps:$4 sm:$0xff]   ;;  %v1412_v15 = vld [vmem:[%s1664_s7 + $0x144] ss:$8 sps:$4 sm:$0xff]  }
  0x2b   : > { %970 = vmatprep.subr.bf16.mxu0 %v1403_v9  ;;  %v1414_v16 = vld [vmem:[%s1664_s7 + $0x140] ss:$8 sps:$4 sm:$0xff]   ;;  %v1415_v17 = vld [vmem:[%s1664_s7 + $0x154] ss:$8 sps:$4 sm:$0xff]   ;;  %v1417_v18 = vld [vmem:[%s1664_s7 + $0x150] ss:$8 sps:$4 sm:$0xff]  }
  0x2c   : > { %v1418_v19 = vld [vmem:[%s1664_s7 + $0x164] ss:$8 sps:$4 sm:$0xff]   ;;  %v1450_v21 = vld [vmem:[%s1664_s7] ss:$8 sps:$4 sm:$0xff]   ;;  %v1421_v24 = vld [vmem:[%s1664_s7 + $0x174] ss:$8 sps:$4 sm:$0xff]  }
  0x2d   : > { %v1447_v20 = vld [vmem:[%s1664_s7 + $0x4] ss:$8 sps:$4 sm:$0xff]   ;;  %v1420_v22 = vld [vmem:[%s1664_s7 + $0x160] ss:$8 sps:$4 sm:$0xff]   ;;  %v1457_v25 = vld [vmem:[%s1664_s7 + $0x14] ss:$8 sps:$4 sm:$0xff]  }
  0x2e   : > { %971 = vmatpush1.bf16.msra.mxu0 %v1405_v10  ;;  %925 = vmatprep.subr.bf16.mxu1 %v1447_v20  ;;  %v1453_v23 = vld [vmem:[%s1666_s8 + $0xc] ss:$24 sps:$4 sm:$0xff]   ;;  %v1459_v26 = vld [vmem:[%s1664_s7 + $0x10] ss:$8 sps:$4 sm:$0xff]   ;;  %v1465_v30 = vld [vmem:[%s1664_s7 + $0x20] ss:$8 sps:$4 sm:$0xff]  }
  0x2f   : > { %972 = vmatprep.subr.bf16.mxu0 %v1406_v11  ;;  %926 = vmatpush1.bf16.msra.mxu1 %v1450_v21  ;;  %v1423_v27 = vld [vmem:[%s1664_s7 + $0x170] ss:$8 sps:$4 sm:$0xff]   ;;  %v1424_v28 = vld [vmem:[%s1664_s7 + $0x184] ss:$8 sps:$4 sm:$0xff]   ;;  %v1426_v31 = vld [vmem:[%s1664_s7 + $0x180] ss:$8 sps:$4 sm:$0xff]  }
  0x30   : > { %1000 = vmatprep.mubr.bf16.mxu0 %v1453_v23  ;;  %927 = vmatprep.subr.bf16.mxu1 %v1457_v25  ;;  %v1463_v29 = vld [vmem:[%s1664_s7 + $0x24] ss:$8 sps:$4 sm:$0xff]   ;;  %v1469_v32 = vld [vmem:[%s1664_s7 + $0x34] ss:$8 sps:$4 sm:$0xff]   ;;  %v1471_v34 = vld [vmem:[%s1664_s7 + $0x30] ss:$8 sps:$4 sm:$0xff]  }
  0x31   : > { %v1427_v33 = vld [vmem:[%s1664_s7 + $0x194] ss:$8 sps:$4 sm:$0xff]   ;;  %v1475_v35 = vld [vmem:[%s1664_s7 + $0x44] ss:$8 sps:$4 sm:$0xff]   ;;  %v1429_v36 = vld [vmem:[%s1664_s7 + $0x190] ss:$8 sps:$4 sm:$0xff]  }
  0x32   : > { %973 = vmatpush1.bf16.msra.mxu0 %v1408_v12  ;;  %v1430_v37 = vld [vmem:[%s1664_s7 + $0x1a4] ss:$8 sps:$4 sm:$0xff]   ;;  %v1477_v38 = vld [vmem:[%s1664_s7 + $0x40] ss:$8 sps:$4 sm:$0xff]   ;;  %v1481_v39 = vld [vmem:[%s1664_s7 + $0x54] ss:$8 sps:$4 sm:$0xff]  }
  0x33   : > { %974 = vmatprep.subr.bf16.mxu0 %v1409_v13  ;;  %928 = vmatpush1.bf16.msra.mxu1 %v1459_v26  ;;  %v1432_v40 = vld [vmem:[%s1664_s7 + $0x1a0] ss:$8 sps:$4 sm:$0xff]   ;;  %v1433_v41 = vld [vmem:[%s1664_s7 + $0x1b4] ss:$8 sps:$4 sm:$0xff]   ;;  %v1483_v42 = vld [vmem:[%s1664_s7 + $0x50] ss:$8 sps:$4 sm:$0xff]  }
  0x34   : > { %929 = vmatprep.subr.bf16.mxu1 %v1463_v29  ;;  %v1487_v43 = vld [vmem:[%s1664_s7 + $0x64] ss:$8 sps:$4 sm:$0xff]   ;;  %v1435_v44 = vld [vmem:[%s1664_s7 + $0x1b0] ss:$8 sps:$4 sm:$0xff]   ;;  %v1489_v46 = vld [vmem:[%s1664_s7 + $0x60] ss:$8 sps:$4 sm:$0xff]  }
  0x35   : > { %v1436_v45 = vld [vmem:[%s1664_s7 + $0x1c4] ss:$8 sps:$4 sm:$0xff]   ;;  %v1493_v47 = vld [vmem:[%s1664_s7 + $0x74] ss:$8 sps:$4 sm:$0xff]   ;;  %v1438_v48 = vld [vmem:[%s1664_s7 + $0x1c0] ss:$8 sps:$4 sm:$0xff]  }
  0x36   : > { %975 = vmatpush1.bf16.msra.mxu0 %v1411_v14  ;;  %v1439_v49 = vld [vmem:[%s1664_s7 + $0x1d4] ss:$8 sps:$4 sm:$0xff]   ;;  %v1495_v50 = vld [vmem:[%s1664_s7 + $0x70] ss:$8 sps:$4 sm:$0xff]   ;;  %v1499_v51 = vld [vmem:[%s1664_s7 + $0x84] ss:$8 sps:$4 sm:$0xff]  }
  0x37   : > { %976 = vmatprep.subr.bf16.mxu0 %v1412_v15  ;;  %930 = vmatpush1.bf16.msra.mxu1 %v1465_v30  ;;  %v1441_v52 = vld [vmem:[%s1664_s7 + $0x1d0] ss:$8 sps:$4 sm:$0xff]   ;;  %v1442_v53 = vld [vmem:[%s1664_s7 + $0x1e4] ss:$8 sps:$4 sm:$0xff]   ;;  %v1501_v54 = vld [vmem:[%s1664_s7 + $0x80] ss:$8 sps:$4 sm:$0xff]  }
  0x38   : > { %931 = vmatprep.subr.bf16.mxu1 %v1469_v32  ;;  %v1505_v55 = vld [vmem:[%s1664_s7 + $0x94] ss:$8 sps:$4 sm:$0xff]   ;;  %v1444_v56 = vld [vmem:[%s1664_s7 + $0x1e0] ss:$8 sps:$4 sm:$0xff]   ;;  %v1507_v58 = vld [vmem:[%s1664_s7 + $0x90] ss:$8 sps:$4 sm:$0xff]  }
  0x39   : > { %v1445_v57 = vld [vmem:[%s1664_s7 + $0x1f4] ss:$8 sps:$4 sm:$0xff]   ;;  %v1511_v59 = vld [vmem:[%s1664_s7 + $0xa4] ss:$8 sps:$4 sm:$0xff]   ;;  %v1449_v60 = vld [vmem:[%s1664_s7 + $0x1f0] ss:$8 sps:$4 sm:$0xff]  }
  0x3a   : > { %977 = vmatpush1.bf16.msra.mxu0 %v1414_v16  ;;  %v1456_v61 = vld [vmem:[%s1664_s7 + $0x204] ss:$8 sps:$4 sm:$0xff]   ;;  %v1513_v62 = vld [vmem:[%s1664_s7 + $0xa0] ss:$8 sps:$4 sm:$0xff]   ;;  %v1517_v0 = vld [vmem:[%s1664_s7 + $0xb4] ss:$8 sps:$4 sm:$0xff]  }
  0x3b   : > { %978 = vmatprep.subr.bf16.mxu0 %v1415_v17  ;;  %932 = vmatpush1.bf16.msra.mxu1 %v1471_v34  ;;  %v1451_v63 = vld [vmem:[%s1666_s8 + $0x8] ss:$24 sps:$4 sm:$0xff]   ;;  %v1462_v2 = vld [vmem:[%s1664_s7 + $0x214] ss:$8 sps:$4 sm:$0xff]   ;;  %v1523_v5 = vld [vmem:[%s1664_s7 + $0xc4] ss:$8 sps:$4 sm:$0xff]  }
  0x3c   : > { %933 = vmatprep.subr.bf16.mxu1 %v1475_v35  ;;  %v1454_v1 = vld [vmem:[%s1664_s7 + $0x200] ss:$8 sps:$4 sm:$0xff]   ;;  %v1519_v3 = vld [vmem:[%s1664_s7 + $0xb0] ss:$8 sps:$4 sm:$0xff]   ;;  %v1546_v4 = vld [vmem:[%s1666_s8 + $0x4] ss:$24 sps:$4 sm:$0xff]  }
  0x3d   : > { %v1460_v6 = vld [vmem:[%s1664_s7 + $0x210] ss:$8 sps:$4 sm:$0xff]   ;;  %957 = vmatprep.mubr.bf16.mxu1 %v1546_v4  ;;  %v1552_v7 = vld [vmem:[%s1666_s8 + $0x14] ss:$24 sps:$4 sm:$0xff]   ;;  %v1525_v9 = vld [vmem:[%s1664_s7 + $0xc0] ss:$8 sps:$4 sm:$0xff]  }
  0x3e   : > { %979 = vmatpush1.bf16.msra.mxu0 %v1417_v18  ;;  %v1468_v8 = vld [vmem:[%s1664_s7 + $0x224] ss:$8 sps:$4 sm:$0xff]   ;;  %v1529_v10 = vld [vmem:[%s1664_s7 + $0xd4] ss:$8 sps:$4 sm:$0xff]   ;;  %v1466_v11 = vld [vmem:[%s1664_s7 + $0x220] ss:$8 sps:$4 sm:$0xff]  }
  0x3f   : > { %980 = vmatprep.subr.bf16.mxu0 %v1418_v19  ;;  %934 = vmatpush1.bf16.msra.mxu1 %v1477_v38  ;;  %v1474_v12 = vld [vmem:[%s1664_s7 + $0x234] ss:$8 sps:$4 sm:$0xff]   ;;  %v1531_v13 = vld [vmem:[%s1664_s7 + $0xd0] ss:$8 sps:$4 sm:$0xff]   ;;  %v1535_v14 = vld [vmem:[%s1664_s7 + $0xe4] ss:$8 sps:$4 sm:$0xff]  }
  0x40   : > { %935 = vmatprep.subr.bf16.mxu1 %v1481_v39  ;;  %v1472_v15 = vld [vmem:[%s1664_s7 + $0x230] ss:$8 sps:$4 sm:$0xff]   ;;  %v1480_v16 = vld [vmem:[%s1664_s7 + $0x244] ss:$8 sps:$4 sm:$0xff]   ;;  %v1537_v17 = vld [vmem:[%s1664_s7 + $0xe0] ss:$8 sps:$4 sm:$0xff]  }
  0x41   : > { %v1541_v18 = vld [vmem:[%s1664_s7 + $0xf4] ss:$8 sps:$4 sm:$0xff]   ;;  %v1478_v19 = vld [vmem:[%s1664_s7 + $0x240] ss:$8 sps:$4 sm:$0xff]   ;;  %v1543_v21 = vld [vmem:[%s1664_s7 + $0xf0] ss:$8 sps:$4 sm:$0xff]  }
  0x42   : > { %981 = vmatpush1.bf16.msra.mxu0 %v1420_v22  ;;  %v1486_v20 = vld [vmem:[%s1664_s7 + $0x254] ss:$8 sps:$4 sm:$0xff]   ;;  %v1484_v22 = vld [vmem:[%s1664_s7 + $0x250] ss:$8 sps:$4 sm:$0xff]   ;;  %v1492_v23 = vld [vmem:[%s1664_s7 + $0x264] ss:$8 sps:$4 sm:$0xff]  }
  0x43   : > { %982 = vmatprep.subr.bf16.mxu0 %v1421_v24  ;;  %936 = vmatpush1.bf16.msra.mxu1 %v1483_v42  ;;  %v1544_v24 = vld [vmem:[%s1666_s8] ss:$24 sps:$4 sm:$0xff]   ;;  %v1498_v26 = vld [vmem:[%s1664_s7 + $0x274] ss:$8 sps:$4 sm:$0xff]   ;;  %v1516_v32 = vld [vmem:[%s1664_s7 + $0x2a4] ss:$8 sps:$4 sm:$0xff]  }
  0x44   : > { %937 = vmatprep.subr.bf16.mxu1 %v1487_v43  ;;  %v1490_v25 = vld [vmem:[%s1664_s7 + $0x260] ss:$8 sps:$4 sm:$0xff]   ;;  %v1510_v30 = vld [vmem:[%s1664_s7 + $0x294] ss:$8 sps:$4 sm:$0xff]   ;;  %v1520_v35 = vld [vmem:[%s1664_s7 + $0x2b0] ss:$8 sps:$4 sm:$0xff]  }
  0x45   : > { %v1502_v29 = vld [vmem:[%s1664_s7 + $0x280] ss:$8 sps:$4 sm:$0xff]   ;;  %v1522_v34 = vld [vmem:[%s1664_s7 + $0x2b4] ss:$8 sps:$4 sm:$0xff]   ;;  %v1532_v39 = vld [vmem:[%s1664_s7 + $0x2d0] ss:$8 sps:$4 sm:$0xff]  }
  0x46   : > { %983 = vmatpush1.bf16.msra.mxu0 %v1423_v27  ;;  %v1496_v27 = vld [vmem:[%s1664_s7 + $0x270] ss:$8 sps:$4 sm:$0xff]   ;;  %v1534_v38 = vld [vmem:[%s1664_s7 + $0x2d4] ss:$8 sps:$4 sm:$0xff]   ;;  %p1338_p11 = scmp.ne.s32.totalorder %s1583_s14, 2 }
  0x47   : > { %984 = vmatprep.subr.bf16.mxu0 %v1424_v28  ;;  %938 = vmatpush1.bf16.msra.mxu1 %v1489_v46  ;;  %v1504_v28 = vld [vmem:[%s1664_s7 + $0x284] ss:$8 sps:$4 sm:$0xff]   ;;  %v1549_v42 = vld [vmem:[%s1664_s7 + $0x2f4] ss:$8 sps:$4 sm:$0xff]   ;;  %v1547_v43 = vld [vmem:[%s1664_s7 + $0x2f0] ss:$8 sps:$4 sm:$0xff]  }
  0x48   : > { %939 = vmatprep.subr.bf16.mxu1 %v1493_v47 }
  0x4a   : > { %985 = vmatpush1.bf16.msra.mxu0 %v1426_v31  ;;  %v1508_v31 = vld [vmem:[%s1664_s7 + $0x290] ss:$8 sps:$4 sm:$0xff]  }
  0x4b   : > { %986 = vmatprep.subr.bf16.mxu0 %v1427_v33  ;;  %940 = vmatpush1.bf16.msra.mxu1 %v1495_v50  ;;  %v1514_v33 = vld [vmem:[%s1664_s7 + $0x2a0] ss:$8 sps:$4 sm:$0xff]  }
  0x4c   : > { %941 = vmatprep.subr.bf16.mxu1 %v1499_v51 }
  0x4e   : > { %987 = vmatpush1.bf16.msra.mxu0 %v1429_v36  ;;  %v1528_v36 = vld [vmem:[%s1664_s7 + $0x2c4] ss:$8 sps:$4 sm:$0xff]  }
  0x4f   : > { %988 = vmatprep.subr.bf16.mxu0 %v1430_v37  ;;  %942 = vmatpush1.bf16.msra.mxu1 %v1501_v54  ;;  %v1526_v37 = vld [vmem:[%s1664_s7 + $0x2c0] ss:$8 sps:$4 sm:$0xff]  }
  0x50   : > { %943 = vmatprep.subr.bf16.mxu1 %v1505_v55  ;;  %v311_v55 = vld [vmem:[#allocation2 + $0x10] sm:$0xff] }
  0x52   : > { %989 = vmatpush1.bf16.msra.mxu0 %v1432_v40  ;;  %v1540_v40 = vld [vmem:[%s1664_s7 + $0x2e4] ss:$8 sps:$4 sm:$0xff]  }
  0x53   : > { %990 = vmatprep.subr.bf16.mxu0 %v1433_v41  ;;  %944 = vmatpush1.bf16.msra.mxu1 %v1507_v58  ;;  %v1538_v41 = vld [vmem:[%s1664_s7 + $0x2e0] ss:$8 sps:$4 sm:$0xff]  }
  0x54   : > { %945 = vmatprep.subr.bf16.mxu1 %v1511_v59  ;;  %v312_v59 = vld [vmem:[#allocation2 + $0x18] sm:$0xff] }
  0x56   : > { %991 = vmatpush1.bf16.msra.mxu0 %v1435_v44  ;;  %v1550_v44 = vld [vmem:[%s1666_s8 + $0x10] ss:$24 sps:$4 sm:$0xff]  }
  0x57   : > { %992 = vmatprep.subr.bf16.mxu0 %v1436_v45  ;;  %946 = vmatpush1.bf16.msra.mxu1 %v1513_v62 }
  0x58   : > { %947 = vmatprep.subr.bf16.mxu1 %v1517_v0 }
  0x5a   : > { %993 = vmatpush1.bf16.msra.mxu0 %v1438_v48 }
  0x5b   : > { %994 = vmatprep.subr.bf16.mxu0 %v1439_v49  ;;  %948 = vmatpush1.bf16.msra.mxu1 %v1519_v3  ;;  %v309_v49 = vld [vmem:[#allocation2] sm:$0xff] }
  0x5c   : > { %949 = vmatprep.subr.bf16.mxu1 %v1523_v5  ;;  %v1070_v3 = vld [vmem:[%s1798_s2] sm:$0x3] (!%p1338_p11) }
  0x5e   : > { %995 = vmatpush1.bf16.msra.mxu0 %v1441_v52  ;;  %v310_v52 = vld [vmem:[#allocation2 + $0x8] sm:$0xff] }
  0x5f   : > { %996 = vmatprep.subr.bf16.mxu0 %v1442_v53  ;;  %950 = vmatpush1.bf16.msra.mxu1 %v1525_v9 }
  0x60   : > { %951 = vmatprep.subr.bf16.mxu1 %v1529_v10 }
  0x62   : > { %997 = vmatpush1.bf16.msra.mxu0 %v1444_v56 }
  0x63   : > { %998 = vmatprep.subr.bf16.mxu0 %v1445_v57  ;;  %952 = vmatpush1.bf16.msra.mxu1 %v1531_v13 }
  0x64   : > { %953 = vmatprep.subr.bf16.mxu1 %v1535_v14 }
  0x66   : > { %999 = vmatpush1.bf16.msra.mxu0 %v1449_v60 }
  0x67   : > { %1011 = vmatprep.subr.bf16.mxu0 %v1456_v61  ;;  %954 = vmatpush1.bf16.msra.mxu1 %v1537_v17 }
  0x68   : > { %955 = vmatprep.subr.bf16.mxu1 %v1541_v18 }
  0x69   : > { %1001 = vmatmul.mubr.bf16.vlgmr.msra.gmra.mrb[0].mxu0 %v1451_v63 }
  0x6a   : > { %1012 = vmatpush1.bf16.msra.mxu0 %v1454_v1  ;;  %1043 = vmatprep.mubr.bf16.mxu0 %v1552_v7  ;;  %v1072_v1 = vlaneseq (!%p1338_p11) }
  0x6b   : > { %1013 = vmatprep.subr.bf16.mxu0 %v1462_v2  ;;  %956 = vmatpush1.bf16.msra.mxu1 %v1543_v21 }
  0x6c   : > { %v1073_v2 = vshrl.u32 (!%p1338_p11), %v1072_v1, 7 }
  0x6e   : > { %1014 = vmatpush1.bf16.msra.mxu0 %v1460_v6  ;;  %958 = vmatmul.mubr.bf16.vlgmr.msra.gmra.mrb[0].mxu1 %v1544_v24  ;;  %v1074_v5 = vsub.s32 (!%p1338_p11), 0, %v1073_v2  ;;  %v1078_v6 = vsub.s32 (!%p1338_p11), 1, %v1073_v2 }
  0x6f   : > { %1015 = vmatprep.subr.bf16.mxu0 %v1468_v8 }
  0x70   : > { %v1075_v10 = vrot.slane (!%p1338_p11), %v1070_v3, %v1074_v5 }
  0x72   : > { %1016 = vmatpush1.bf16.msra.mxu0 %v1466_v11  ;;  %v1079_v11 = vrot.slane (!%p1338_p11), %v1070_v3, %v1078_v6 }
  0x73   : > { %1017 = vmatprep.subr.bf16.mxu0 %v1474_v12 }
  0x76   : > { %1018 = vmatpush1.bf16.msra.mxu0 %v1472_v15 }
  0x77   : > { %1019 = vmatprep.subr.bf16.mxu0 %v1480_v16 }
  0x7a   : > { %1020 = vmatpush1.bf16.msra.mxu0 %v1478_v19 }
  0x7b   : > { %1021 = vmatprep.subr.bf16.mxu0 %v1486_v20 }
  0x7e   : > { %1022 = vmatpush1.bf16.msra.mxu0 %v1484_v22 }
  0x7f   : > { %1023 = vmatprep.subr.bf16.mxu0 %v1492_v23 }
  0x82   : > { %1024 = vmatpush1.bf16.msra.mxu0 %v1490_v25 }
  0x83   : > { %1025 = vmatprep.subr.bf16.mxu0 %v1498_v26 }
  0x86   : > { %1026 = vmatpush1.bf16.msra.mxu0 %v1496_v27 }
  0x87   : > { %1027 = vmatprep.subr.bf16.mxu0 %v1504_v28 }
  0x8a   : > { %1028 = vmatpush1.bf16.msra.mxu0 %v1502_v29 }
  0x8b   : > { %1029 = vmatprep.subr.bf16.mxu0 %v1510_v30 }
  0x8e   : > { %1030 = vmatpush1.bf16.msra.mxu0 %v1508_v31 }
  0x8f   : > { %1031 = vmatprep.subr.bf16.mxu0 %v1516_v32 }
  0x92   : > { %1032 = vmatpush1.bf16.msra.mxu0 %v1514_v33 }
  0x93   : > { %1033 = vmatprep.subr.bf16.mxu0 %v1522_v34 }
  0x96   : > { %1034 = vmatpush1.bf16.msra.mxu0 %v1520_v35 }
  0x97   : > { %1035 = vmatprep.subr.bf16.mxu0 %v1528_v36 }
  0x9a   : > { %1036 = vmatpush1.bf16.msra.mxu0 %v1526_v37 }
  0x9b   : > { %1037 = vmatprep.subr.bf16.mxu0 %v1534_v38 }
  0x9e   : > { %1038 = vmatpush1.bf16.msra.mxu0 %v1532_v39 }
  0x9f   : > { %1039 = vmatprep.subr.bf16.mxu0 %v1540_v40 }
  0xa2   : > { %1040 = vmatpush1.bf16.msra.mxu0 %v1538_v41 }
  0xa3   : > { %1041 = vmatprep.subr.bf16.mxu0 %v1549_v42 }
  0xa6   : > { %1042 = vmatpush1.bf16.msra.mxu0 %v1547_v43 }
  0xa9   : > { %1044 = vmatmul.mubr.bf16.vlgmr.msra.gmra.mrb[0].mxu0 %v1550_v44 }
 0x141   : > { %v959_v45 = vpop.f32.mrb[0].mxu1 }
 0x142   : > { %v961_v46 = vpop.f32.mrb[1].mxu1 }
 0x143   : > { %v963_v47 = vpop.f32.mrb[2].mxu1 }
 0x144   : > { %v965_v48 = vpop.f32.mrb[3].mxu1 }
 0x17c   : > { %v1045_v50 = vpop.f32.mrb[0].mxu0 }
 0x17d   : > { %v1349_v51 = vadd.f32 %v1045_v50, %v959_v45  ;;  %v1047_v53 = vpop.f32.mrb[1].mxu0 }
 0x17e   : > { %v1350_v54 = vadd.f32 %v1047_v53, %v961_v46  ;;  %v1049_v56 = vpop.f32.mrb[2].mxu0  ;;  %1065 = sbr.rel (%p1338_p11) target bundleno = 403 (0x193), region = 63 }
 0x17f   : > { %v1054_v57 = vadd.f32 %v1349_v51, %v309_v49  ;;  %v1351_v58 = vadd.f32 %v1049_v56, %v963_v47  ;;  %v1051_v60 = vpop.f32.mrb[3].mxu0 }
 0x180   : > { %v1055_v61 = vadd.f32 %v1350_v54, %v310_v52  ;;  %v1352_v62 = vadd.f32 %v1051_v60, %v965_v48 }
 0x181   : > { %1058 = vst [vmem:[#allocation2] sm:$0xff] %v1054_v57  ;;  %v1056_v63 = vadd.f32 %v1351_v58, %v311_v55 }
 0x182   : > { %1059 = vst [vmem:[#allocation2 + $0x8] sm:$0xff] %v1055_v61  ;;  %v1057_v0 = vadd.f32 %v1352_v62, %v312_v59 }
 0x183   : > { %1060 = vst [vmem:[#allocation2 + $0x10] sm:$0xff] %v1056_v63 }
 0x184   : > { %1061 = vst [vmem:[#allocation2 + $0x18] sm:$0xff] %v1057_v0 }
 0x188   : > { %v1066_v4 = vld [vmem:[#allocation2] sm:$0xff] }
 0x189   : > { %v1067_v7 = vld [vmem:[#allocation2 + $0x8] sm:$0xff]  ;;  %v1082_v12 = vadd.f32 %v1075_v10, %v1066_v4 }
 0x18a   : > { %v1068_v8 = vld [vmem:[#allocation2 + $0x10] sm:$0xff]  ;;  %v1083_v13 = vadd.f32 %v1079_v11, %v1067_v7 }
 0x18b   : > { %v1069_v9 = vld [vmem:[#allocation2 + $0x18] sm:$0xff]  ;;  %v1084_v14 = vadd.f32 %v1075_v10, %v1068_v8  ;;  %v1086_v16 = vmax.f32 %v1082_v12, 0.0 }
 0x18c   : > { %v1085_v15 = vadd.f32 %v1079_v11, %v1069_v9  ;;  %v1087_v17 = vmax.f32 %v1083_v13, 0.0 }
 0x18d   : > { %v1088_v18 = vmax.f32 %v1084_v14, 0.0 }
 0x18e   : > { %v1089_v19 = vmax.f32 %v1085_v15, 0.0  ;;  %v1347_v20 = vpack.c.bf16 %v1087_v17, %v1086_v16 }
 0x190   : > { %v1348_v21 = vpack.c.bf16 %v1089_v19, %v1088_v18  ;;  %1102 = vst [vmem:[%s1799_s3] sm:$0xff] %v1347_v20 }
 0x192   : > { %1103 = vst [vmem:[%s1799_s3 + $0x8] sm:$0xff] %v1348_v21 }
 0x193 PF: > { %s13_s16 = sadd.s32 1, %s1591_s16   ;;  %s1800_s12 = smov %s1579_s13 }
 0x194   : > { %p10_p12 = scmp.ge.s32.totalorder %s13_s16, 5   ;;  %s1801_s13 = smov %s1649_s20 }
 0x195   : > { %s1802_s14 = smov %s1587_s15  ;;  %s1803_s15 = smov %s1805_s17 }
 0x196   :  { %12 = sbr.rel (!%p10_p12) target bundleno = 3 (0x3), region = 104 }

// kernel: _lambda_.33
= control target key start
LH: loop header
LB: loop body
LE: loop exit
PB: predicated region body
PF: predicated region fallthrough
CT: control target
= control target key end

     0   :  { %s1719_s15 = smov 0   ;;  %s1721_s16 = smov 0   ;;  %s1907_s0 = inlined_call_operand.vmem [shape: bf16[16,2304], index: 0, kind: input, shape index: {}]   ;;  %s1908_s1 = inlined_call_operand.vmem [shape: bf16[2304,256], index: 1, kind: input, shape index: {}]   ;;  %s1909_s2 = inlined_call_operand.vmem [shape: f32[1,256], index: 2, kind: input, shape index: {}]   ;;  %s1910_s3 = inlined_call_operand.vmem [shape: bf16[16,256], index: 3, kind: input, shape index: {}]   ;;  %s1911_s4 = inlined_call_operand.vmem [shape: bf16[16,256], index: 4, kind: output, shape index: {}]  }
   0x1   :  { %s1723_s17 = smov 0   ;;  %s1725_s18 = smov 0  }
   0x2   :  { %s1727_s19 = smov 0  }
   0x3 LB: > { %s26_s20 = sadd.s32 1, %s1687_s18  ;;  %p49_p1 = scmp.ne.s32.totalorder %s1679_s16, %s1675_s15  ;;  %s1691_s19 = sphi %s1727_s19, %s14_s19   ;;  %s1687_s18 = sphi %s1725_s18, %s1915_s18   ;;  %s1683_s17 = sphi %s1723_s17, %s1914_s17   ;;  %s1679_s16 = sphi %s1721_s16, %s1913_s16   ;;  %s1675_s15 = sphi %s1719_s15, %s1912_s15  }
   0x4   : > { %p27_p0 = scmp.ge.s32.totalorder %s26_s20, 3  ;;  %p50_p2 = scmp.eq.s32.totalorder %s1691_s19, 0 }
   0x5   : > { %s42_s22 = sadd.s32 1, %s1679_s16  ;;  %p1330_p5 = scmp.ge.s32.totalorder %s1691_s19, 3 }
   0x6   : > { %s1917_s20 = smov (%p27_p0, %s26_s20), 0  ;;  %p51_p3 = por %p50_p2, %p49_p1 }
   0x7   : > { %s38_s21 = ssub.s32 %s1687_s18, %s1917_s20  ;;  %208 = sbr.rel (%p1330_p5) target bundleno = 22 (0x16), region = 24 }
   0x8   : > { %p40_p4 = scmp.eq.s32.totalorder %s38_s21, 0 }
   0xa   : > { %s1754_s23 = scalar_select %p40_p4, %s1679_s16, %s42_s22  }
   0xe   : > { %211 = sbr.rel (!%p51_p3) target bundleno = 22 (0x16), region = 28  ;;  %s213_s24 = sand.u32 (%p51_p3), 1, %s1679_s16  }
   0xf   : > { %s1445_s25 = smul.u32 (%p51_p3), 24, %s1687_s18 }
  0x10   : > { %s1457_s26 = smul.u32 (%p51_p3), 48, %s213_s24 }
  0x11   : > { %s221_s29 = scalar_lea.vmem (%p51_p3), %s1907_s0, %s1445_s25 }
  0x12   : > { %v234_v0 = vld [vmem:[%s221_s29] sm:$0xff] (%p51_p3)  ;;  %v236_v1 = vld [vmem:[%s221_s29 + $0x8] sm:$0xff] (%p51_p3)  ;;  %v238_v2 = vld [vmem:[%s221_s29 + $0x10] sm:$0xff] (%p51_p3)  ;;  %s215_s30 = scalar_lea.vmem (%p51_p3), [#allocation3], %s1457_s26 }
  0x13   : > { %235 = vst [vmem:[%s215_s30] sm:$0xff] (%p51_p3), %v234_v0  ;;  %237 = vst [vmem:[%s215_s30 + $0x8] sm:$0xff] (%p51_p3), %v236_v1  ;;  %v240_v3 = vld [vmem:[%s221_s29 + $0x48] sm:$0xff] (%p51_p3)  ;;  %v242_v4 = vld [vmem:[%s221_s29 + $0x50] sm:$0xff] (%p51_p3) }
  0x14   : > { %239 = vst [vmem:[%s215_s30 + $0x10] sm:$0xff] (%p51_p3), %v238_v2  ;;  %v244_v5 = vld [vmem:[%s221_s29 + $0x58] sm:$0xff] (%p51_p3)  ;;  %241 = vst [vmem:[%s215_s30 + $0x18] sm:$0xff] (%p51_p3), %v240_v3 }
  0x15   : > { %243 = vst [vmem:[%s215_s30 + $0x20] sm:$0xff] %v242_v4  ;;  %245 = vst [vmem:[%s215_s30 + $0x28] sm:$0xff] %v244_v5 }
  0x16 PF: > { %p1332_p6 = scmp.ge.s32.totalorder %s1691_s19, 1  ;;  %p265_p7 = scmp.lt.s32.totalorder %s1691_s19, 4 }
  0x18   : > { %p266_p8 = pnand %p1332_p6, %p265_p7 }
  0x19   : > { %s272_s5 = sand.u32 (!%p266_p8), 1, %s1675_s15   ;;  %s328_s6 = smul.u32 (!%p266_p8), 96, %s1683_s17 }
  0x1a   : > { %269 = sbr.rel (%p266_p8) target bundleno = 405 (0x195), region = 55  ;;  %p1335_p10 = scmp.ne.s32.totalorder (!%p266_p8), %s1683_s17, 0 }
  0x1b   : > { %s1458_s7 = smul.u32 (!%p266_p8), 48, %s272_s5  ;;  %p330_p9 = scmp.lt.s32.totalorder (!%p266_p8), %s328_s6, 287 }
  0x1d   : > { %s1771_s12 = scalar_lea.vmem (!%p266_p8), [#allocation3], %s1458_s7 }
  0x21   : > { %s1919_s6 = smov (!%p330_p9, %s328_s6), 287  ;;  %372 = sbr.rel (%p1335_p10) target bundleno = 40 (0x28), region = 63 }
  0x22   : > { %s1446_s8 = sshll.u32 %s1919_s6, 3  ;;  %v1693_v6 = vmov (!%p1335_p10), 0.0  }
  0x23   : > { %s1769_s11 = scalar_lea.vmem %s1908_s1, %s1446_s8  ;;  %373 = vst [vmem:[#allocation2] sm:$0xff] (!%p1335_p10), %v1693_v6  ;;  %374 = vst [vmem:[#allocation2 + $0x8] sm:$0xff] (!%p1335_p10), %v1693_v6 }
  0x24   : > { %375 = vst [vmem:[#allocation2 + $0x10] sm:$0xff] (!%p1335_p10), %v1693_v6  ;;  %376 = vst [vmem:[#allocation2 + $0x18] sm:$0xff] (!%p1335_p10), %v1693_v6 }
  0x28 PF: > { %v1500_v7 = vld [vmem:[%s1769_s11 + $0x104] ss:$8 sps:$4 sm:$0xff]   ;;  %v1502_v8 = vld [vmem:[%s1769_s11 + $0x100] ss:$8 sps:$4 sm:$0xff]   ;;  %v1503_v9 = vld [vmem:[%s1769_s11 + $0x114] ss:$8 sps:$4 sm:$0xff]  }
  0x29   : > { %1036 = vmatprep.subr.bf16.mxu0 %v1500_v7  ;;  %v1505_v10 = vld [vmem:[%s1769_s11 + $0x110] ss:$8 sps:$4 sm:$0xff]   ;;  %v1506_v11 = vld [vmem:[%s1769_s11 + $0x124] ss:$8 sps:$4 sm:$0xff]   ;;  %v1508_v12 = vld [vmem:[%s1769_s11 + $0x120] ss:$8 sps:$4 sm:$0xff]  }
  0x2a   : > { %1037 = vmatpush1.bf16.msra.mxu0 %v1502_v8  ;;  %v1509_v13 = vld [vmem:[%s1769_s11 + $0x134] ss:$8 sps:$4 sm:$0xff]   ;;  %v1511_v14 = vld [vmem:[%s1769_s11 + $0x130] ss:$8 sps:$4 sm:$0xff]   ;;  %v1512_v15 = vld [vmem:[%s1769_s11 + $0x144] ss:$8 sps:$4 sm:$0xff]  }
  0x2b   : > { %1038 = vmatprep.subr.bf16.mxu0 %v1503_v9  ;;  %v1514_v16 = vld [vmem:[%s1769_s11 + $0x140] ss:$8 sps:$4 sm:$0xff]   ;;  %v1515_v17 = vld [vmem:[%s1769_s11 + $0x154] ss:$8 sps:$4 sm:$0xff]   ;;  %v1517_v18 = vld [vmem:[%s1769_s11 + $0x150] ss:$8 sps:$4 sm:$0xff]  }
  0x2c   : > { %v1518_v19 = vld [vmem:[%s1769_s11 + $0x164] ss:$8 sps:$4 sm:$0xff]   ;;  %v1550_v21 = vld [vmem:[%s1769_s11] ss:$8 sps:$4 sm:$0xff]   ;;  %v1521_v24 = vld [vmem:[%s1769_s11 + $0x174] ss:$8 sps:$4 sm:$0xff]  }
  0x2d   : > { %v1547_v20 = vld [vmem:[%s1769_s11 + $0x4] ss:$8 sps:$4 sm:$0xff]   ;;  %v1520_v22 = vld [vmem:[%s1769_s11 + $0x160] ss:$8 sps:$4 sm:$0xff]   ;;  %v1557_v25 = vld [vmem:[%s1769_s11 + $0x14] ss:$8 sps:$4 sm:$0xff]  }
  0x2e   : > { %1039 = vmatpush1.bf16.msra.mxu0 %v1505_v10  ;;  %993 = vmatprep.subr.bf16.mxu1 %v1547_v20  ;;  %v1553_v23 = vld [vmem:[%s1771_s12 + $0xc] ss:$24 sps:$4 sm:$0xff]   ;;  %v1559_v26 = vld [vmem:[%s1769_s11 + $0x10] ss:$8 sps:$4 sm:$0xff]   ;;  %v1565_v30 = vld [vmem:[%s1769_s11 + $0x20] ss:$8 sps:$4 sm:$0xff]  }
  0x2f   : > { %1040 = vmatprep.subr.bf16.mxu0 %v1506_v11  ;;  %994 = vmatpush1.bf16.msra.mxu1 %v1550_v21  ;;  %v1523_v27 = vld [vmem:[%s1769_s11 + $0x170] ss:$8 sps:$4 sm:$0xff]   ;;  %v1524_v28 = vld [vmem:[%s1769_s11 + $0x184] ss:$8 sps:$4 sm:$0xff]   ;;  %v1526_v31 = vld [vmem:[%s1769_s11 + $0x180] ss:$8 sps:$4 sm:$0xff]  }
  0x30   : > { %1068 = vmatprep.mubr.bf16.mxu0 %v1553_v23  ;;  %995 = vmatprep.subr.bf16.mxu1 %v1557_v25  ;;  %v1563_v29 = vld [vmem:[%s1769_s11 + $0x24] ss:$8 sps:$4 sm:$0xff]   ;;  %v1569_v32 = vld [vmem:[%s1769_s11 + $0x34] ss:$8 sps:$4 sm:$0xff]   ;;  %v1571_v34 = vld [vmem:[%s1769_s11 + $0x30] ss:$8 sps:$4 sm:$0xff]  }
  0x31   : > { %v1527_v33 = vld [vmem:[%s1769_s11 + $0x194] ss:$8 sps:$4 sm:$0xff]   ;;  %v1575_v35 = vld [vmem:[%s1769_s11 + $0x44] ss:$8 sps:$4 sm:$0xff]   ;;  %v1529_v36 = vld [vmem:[%s1769_s11 + $0x190] ss:$8 sps:$4 sm:$0xff]  }
  0x32   : > { %1041 = vmatpush1.bf16.msra.mxu0 %v1508_v12  ;;  %v1530_v37 = vld [vmem:[%s1769_s11 + $0x1a4] ss:$8 sps:$4 sm:$0xff]   ;;  %v1577_v38 = vld [vmem:[%s1769_s11 + $0x40] ss:$8 sps:$4 sm:$0xff]   ;;  %v1581_v39 = vld [vmem:[%s1769_s11 + $0x54] ss:$8 sps:$4 sm:$0xff]  }
  0x33   : > { %1042 = vmatprep.subr.bf16.mxu0 %v1509_v13  ;;  %996 = vmatpush1.bf16.msra.mxu1 %v1559_v26  ;;  %v1532_v40 = vld [vmem:[%s1769_s11 + $0x1a0] ss:$8 sps:$4 sm:$0xff]   ;;  %v1533_v41 = vld [vmem:[%s1769_s11 + $0x1b4] ss:$8 sps:$4 sm:$0xff]   ;;  %v1583_v42 = vld [vmem:[%s1769_s11 + $0x50] ss:$8 sps:$4 sm:$0xff]  }
  0x34   : > { %997 = vmatprep.subr.bf16.mxu1 %v1563_v29  ;;  %v1587_v43 = vld [vmem:[%s1769_s11 + $0x64] ss:$8 sps:$4 sm:$0xff]   ;;  %v1535_v44 = vld [vmem:[%s1769_s11 + $0x1b0] ss:$8 sps:$4 sm:$0xff]   ;;  %v1589_v46 = vld [vmem:[%s1769_s11 + $0x60] ss:$8 sps:$4 sm:$0xff]  }
  0x35   : > { %v1536_v45 = vld [vmem:[%s1769_s11 + $0x1c4] ss:$8 sps:$4 sm:$0xff]   ;;  %v1593_v47 = vld [vmem:[%s1769_s11 + $0x74] ss:$8 sps:$4 sm:$0xff]   ;;  %v1538_v48 = vld [vmem:[%s1769_s11 + $0x1c0] ss:$8 sps:$4 sm:$0xff]  }
  0x36   : > { %1043 = vmatpush1.bf16.msra.mxu0 %v1511_v14  ;;  %v1539_v49 = vld [vmem:[%s1769_s11 + $0x1d4] ss:$8 sps:$4 sm:$0xff]   ;;  %v1595_v50 = vld [vmem:[%s1769_s11 + $0x70] ss:$8 sps:$4 sm:$0xff]   ;;  %v1599_v51 = vld [vmem:[%s1769_s11 + $0x84] ss:$8 sps:$4 sm:$0xff]  }
  0x37   : > { %1044 = vmatprep.subr.bf16.mxu0 %v1512_v15  ;;  %998 = vmatpush1.bf16.msra.mxu1 %v1565_v30  ;;  %v1541_v52 = vld [vmem:[%s1769_s11 + $0x1d0] ss:$8 sps:$4 sm:$0xff]   ;;  %v1542_v53 = vld [vmem:[%s1769_s11 + $0x1e4] ss:$8 sps:$4 sm:$0xff]   ;;  %v1601_v54 = vld [vmem:[%s1769_s11 + $0x80] ss:$8 sps:$4 sm:$0xff]  }
  0x38   : > { %999 = vmatprep.subr.bf16.mxu1 %v1569_v32  ;;  %v1605_v55 = vld [vmem:[%s1769_s11 + $0x94] ss:$8 sps:$4 sm:$0xff]   ;;  %v1544_v56 = vld [vmem:[%s1769_s11 + $0x1e0] ss:$8 sps:$4 sm:$0xff]   ;;  %v1607_v58 = vld [vmem:[%s1769_s11 + $0x90] ss:$8 sps:$4 sm:$0xff]  }
  0x39   : > { %v1545_v57 = vld [vmem:[%s1769_s11 + $0x1f4] ss:$8 sps:$4 sm:$0xff]   ;;  %v1611_v59 = vld [vmem:[%s1769_s11 + $0xa4] ss:$8 sps:$4 sm:$0xff]   ;;  %v1549_v60 = vld [vmem:[%s1769_s11 + $0x1f0] ss:$8 sps:$4 sm:$0xff]  }
  0x3a   : > { %1045 = vmatpush1.bf16.msra.mxu0 %v1514_v16  ;;  %v1556_v61 = vld [vmem:[%s1769_s11 + $0x204] ss:$8 sps:$4 sm:$0xff]   ;;  %v1613_v62 = vld [vmem:[%s1769_s11 + $0xa0] ss:$8 sps:$4 sm:$0xff]   ;;  %v1617_v0 = vld [vmem:[%s1769_s11 + $0xb4] ss:$8 sps:$4 sm:$0xff]  }
  0x3b   : > { %1046 = vmatprep.subr.bf16.mxu0 %v1515_v17  ;;  %1000 = vmatpush1.bf16.msra.mxu1 %v1571_v34  ;;  %v1551_v63 = vld [vmem:[%s1771_s12 + $0x8] ss:$24 sps:$4 sm:$0xff]   ;;  %v1562_v2 = vld [vmem:[%s1769_s11 + $0x214] ss:$8 sps:$4 sm:$0xff]   ;;  %v1623_v5 = vld [vmem:[%s1769_s11 + $0xc4] ss:$8 sps:$4 sm:$0xff]  }
  0x3c   : > { %1001 = vmatprep.subr.bf16.mxu1 %v1575_v35  ;;  %v1554_v1 = vld [vmem:[%s1769_s11 + $0x200] ss:$8 sps:$4 sm:$0xff]   ;;  %v1619_v3 = vld [vmem:[%s1769_s11 + $0xb0] ss:$8 sps:$4 sm:$0xff]   ;;  %v1646_v4 = vld [vmem:[%s1771_s12 + $0x4] ss:$24 sps:$4 sm:$0xff]  }
  0x3d   : > { %v1560_v6 = vld [vmem:[%s1769_s11 + $0x210] ss:$8 sps:$4 sm:$0xff]   ;;  %1025 = vmatprep.mubr.bf16.mxu1 %v1646_v4  ;;  %v1652_v7 = vld [vmem:[%s1771_s12 + $0x14] ss:$24 sps:$4 sm:$0xff]   ;;  %v1625_v9 = vld [vmem:[%s1769_s11 + $0xc0] ss:$8 sps:$4 sm:$0xff]  }
  0x3e   : > { %1047 = vmatpush1.bf16.msra.mxu0 %v1517_v18  ;;  %v1568_v8 = vld [vmem:[%s1769_s11 + $0x224] ss:$8 sps:$4 sm:$0xff]   ;;  %v1629_v10 = vld [vmem:[%s1769_s11 + $0xd4] ss:$8 sps:$4 sm:$0xff]   ;;  %v1566_v11 = vld [vmem:[%s1769_s11 + $0x220] ss:$8 sps:$4 sm:$0xff]  }
  0x3f   : > { %1048 = vmatprep.subr.bf16.mxu0 %v1518_v19  ;;  %1002 = vmatpush1.bf16.msra.mxu1 %v1577_v38  ;;  %v1574_v12 = vld [vmem:[%s1769_s11 + $0x234] ss:$8 sps:$4 sm:$0xff]   ;;  %v1631_v13 = vld [vmem:[%s1769_s11 + $0xd0] ss:$8 sps:$4 sm:$0xff]   ;;  %v1635_v14 = vld [vmem:[%s1769_s11 + $0xe4] ss:$8 sps:$4 sm:$0xff]  }
  0x40   : > { %1003 = vmatprep.subr.bf16.mxu1 %v1581_v39  ;;  %v1572_v15 = vld [vmem:[%s1769_s11 + $0x230] ss:$8 sps:$4 sm:$0xff]   ;;  %v1580_v16 = vld [vmem:[%s1769_s11 + $0x244] ss:$8 sps:$4 sm:$0xff]   ;;  %v1637_v17 = vld [vmem:[%s1769_s11 + $0xe0] ss:$8 sps:$4 sm:$0xff]  }
  0x41   : > { %v1641_v18 = vld [vmem:[%s1769_s11 + $0xf4] ss:$8 sps:$4 sm:$0xff]   ;;  %v1578_v19 = vld [vmem:[%s1769_s11 + $0x240] ss:$8 sps:$4 sm:$0xff]   ;;  %v1643_v21 = vld [vmem:[%s1769_s11 + $0xf0] ss:$8 sps:$4 sm:$0xff]  }
  0x42   : > { %1049 = vmatpush1.bf16.msra.mxu0 %v1520_v22  ;;  %v1586_v20 = vld [vmem:[%s1769_s11 + $0x254] ss:$8 sps:$4 sm:$0xff]   ;;  %v1584_v22 = vld [vmem:[%s1769_s11 + $0x250] ss:$8 sps:$4 sm:$0xff]   ;;  %v1592_v23 = vld [vmem:[%s1769_s11 + $0x264] ss:$8 sps:$4 sm:$0xff]  }
  0x43   : > { %1050 = vmatprep.subr.bf16.mxu0 %v1521_v24  ;;  %1004 = vmatpush1.bf16.msra.mxu1 %v1583_v42  ;;  %v1644_v24 = vld [vmem:[%s1771_s12] ss:$24 sps:$4 sm:$0xff]   ;;  %v1598_v26 = vld [vmem:[%s1769_s11 + $0x274] ss:$8 sps:$4 sm:$0xff]   ;;  %v1616_v32 = vld [vmem:[%s1769_s11 + $0x2a4] ss:$8 sps:$4 sm:$0xff]  }
  0x44   : > { %1005 = vmatprep.subr.bf16.mxu1 %v1587_v43  ;;  %v1590_v25 = vld [vmem:[%s1769_s11 + $0x260] ss:$8 sps:$4 sm:$0xff]   ;;  %v1610_v30 = vld [vmem:[%s1769_s11 + $0x294] ss:$8 sps:$4 sm:$0xff]   ;;  %v1620_v35 = vld [vmem:[%s1769_s11 + $0x2b0] ss:$8 sps:$4 sm:$0xff]  }
  0x45   : > { %v1602_v29 = vld [vmem:[%s1769_s11 + $0x280] ss:$8 sps:$4 sm:$0xff]   ;;  %v1622_v34 = vld [vmem:[%s1769_s11 + $0x2b4] ss:$8 sps:$4 sm:$0xff]   ;;  %v1632_v39 = vld [vmem:[%s1769_s11 + $0x2d0] ss:$8 sps:$4 sm:$0xff]  }
  0x46   : > { %1051 = vmatpush1.bf16.msra.mxu0 %v1523_v27  ;;  %v1596_v27 = vld [vmem:[%s1769_s11 + $0x270] ss:$8 sps:$4 sm:$0xff]   ;;  %v1634_v38 = vld [vmem:[%s1769_s11 + $0x2d4] ss:$8 sps:$4 sm:$0xff]   ;;  %p1438_p11 = scmp.ne.s32.totalorder %s1683_s17, 2 }
  0x47   : > { %1052 = vmatprep.subr.bf16.mxu0 %v1524_v28  ;;  %1006 = vmatpush1.bf16.msra.mxu1 %v1589_v46  ;;  %v1604_v28 = vld [vmem:[%s1769_s11 + $0x284] ss:$8 sps:$4 sm:$0xff]   ;;  %v1649_v42 = vld [vmem:[%s1769_s11 + $0x2f4] ss:$8 sps:$4 sm:$0xff]   ;;  %v1647_v43 = vld [vmem:[%s1769_s11 + $0x2f0] ss:$8 sps:$4 sm:$0xff]  }
  0x48   : > { %1007 = vmatprep.subr.bf16.mxu1 %v1593_v47  ;;  %v1138_v4 = vld [vmem:[%s1909_s2] sm:$0x3] (!%p1438_p11) }
  0x4a   : > { %1053 = vmatpush1.bf16.msra.mxu0 %v1526_v31  ;;  %v1608_v31 = vld [vmem:[%s1769_s11 + $0x290] ss:$8 sps:$4 sm:$0xff]  }
  0x4b   : > { %1054 = vmatprep.subr.bf16.mxu0 %v1527_v33  ;;  %1008 = vmatpush1.bf16.msra.mxu1 %v1595_v50  ;;  %v1614_v33 = vld [vmem:[%s1769_s11 + $0x2a0] ss:$8 sps:$4 sm:$0xff]  }
  0x4c   : > { %1009 = vmatprep.subr.bf16.mxu1 %v1599_v51 }
  0x4e   : > { %1055 = vmatpush1.bf16.msra.mxu0 %v1529_v36  ;;  %v1628_v36 = vld [vmem:[%s1769_s11 + $0x2c4] ss:$8 sps:$4 sm:$0xff]  }
  0x4f   : > { %1056 = vmatprep.subr.bf16.mxu0 %v1530_v37  ;;  %1010 = vmatpush1.bf16.msra.mxu1 %v1601_v54  ;;  %v1626_v37 = vld [vmem:[%s1769_s11 + $0x2c0] ss:$8 sps:$4 sm:$0xff]  }
  0x50   : > { %1011 = vmatprep.subr.bf16.mxu1 %v1605_v55  ;;  %v379_v55 = vld [vmem:[#allocation2 + $0x10] sm:$0xff] }
  0x52   : > { %1057 = vmatpush1.bf16.msra.mxu0 %v1532_v40  ;;  %v1640_v40 = vld [vmem:[%s1769_s11 + $0x2e4] ss:$8 sps:$4 sm:$0xff]  }
  0x53   : > { %1058 = vmatprep.subr.bf16.mxu0 %v1533_v41  ;;  %1012 = vmatpush1.bf16.msra.mxu1 %v1607_v58  ;;  %v1638_v41 = vld [vmem:[%s1769_s11 + $0x2e0] ss:$8 sps:$4 sm:$0xff]  }
  0x54   : > { %1013 = vmatprep.subr.bf16.mxu1 %v1611_v59  ;;  %v380_v59 = vld [vmem:[#allocation2 + $0x18] sm:$0xff] }
  0x56   : > { %1059 = vmatpush1.bf16.msra.mxu0 %v1535_v44  ;;  %v1650_v44 = vld [vmem:[%s1771_s12 + $0x10] ss:$24 sps:$4 sm:$0xff]  }
  0x57   : > { %1060 = vmatprep.subr.bf16.mxu0 %v1536_v45  ;;  %1014 = vmatpush1.bf16.msra.mxu1 %v1613_v62 }
  0x58   : > { %1015 = vmatprep.subr.bf16.mxu1 %v1617_v0 }
  0x5a   : > { %1061 = vmatpush1.bf16.msra.mxu0 %v1538_v48 }
  0x5b   : > { %1062 = vmatprep.subr.bf16.mxu0 %v1539_v49  ;;  %1016 = vmatpush1.bf16.msra.mxu1 %v1619_v3  ;;  %v377_v49 = vld [vmem:[#allocation2] sm:$0xff] }
  0x5c   : > { %1017 = vmatprep.subr.bf16.mxu1 %v1623_v5  ;;  %v1154_v3 = vld [vmem:[%s1910_s3] sm:$0xff] (!%p1438_p11)  ;;  %v1155_v5 = vld [vmem:[%s1910_s3 + $0x8] sm:$0xff] (!%p1438_p11) }
  0x5e   : > { %1063 = vmatpush1.bf16.msra.mxu0 %v1541_v52  ;;  %v378_v52 = vld [vmem:[#allocation2 + $0x8] sm:$0xff] }
  0x5f   : > { %1064 = vmatprep.subr.bf16.mxu0 %v1542_v53  ;;  %1018 = vmatpush1.bf16.msra.mxu1 %v1625_v9 }
  0x60   : > { %1019 = vmatprep.subr.bf16.mxu1 %v1629_v10  ;;  %v1156_v10 = vunpack.c.l.bf16 (!%p1438_p11), %v1154_v3 }
  0x62   : > { %1065 = vmatpush1.bf16.msra.mxu0 %v1544_v56 }
  0x63   : > { %1066 = vmatprep.subr.bf16.mxu0 %v1545_v57  ;;  %1020 = vmatpush1.bf16.msra.mxu1 %v1631_v13 }
  0x64   : > { %1021 = vmatprep.subr.bf16.mxu1 %v1635_v14 }
  0x66   : > { %1067 = vmatpush1.bf16.msra.mxu0 %v1549_v60 }
  0x67   : > { %1079 = vmatprep.subr.bf16.mxu0 %v1556_v61  ;;  %1022 = vmatpush1.bf16.msra.mxu1 %v1637_v17  ;;  %v1159_v17 = vunpack.c.h.bf16 (!%p1438_p11), %v1155_v5 }
  0x68   : > { %1023 = vmatprep.subr.bf16.mxu1 %v1641_v18 }
  0x69   : > { %1069 = vmatmul.mubr.bf16.vlgmr.msra.gmra.mrb[0].mxu0 %v1551_v63 }
  0x6a   : > { %1080 = vmatpush1.bf16.msra.mxu0 %v1554_v1  ;;  %1111 = vmatprep.mubr.bf16.mxu0 %v1652_v7  ;;  %v1140_v1 = vlaneseq (!%p1438_p11) }
  0x6b   : > { %1081 = vmatprep.subr.bf16.mxu0 %v1562_v2  ;;  %1024 = vmatpush1.bf16.msra.mxu1 %v1643_v21 }
  0x6c   : > { %v1141_v2 = vshrl.u32 (!%p1438_p11), %v1140_v1, 7 }
  0x6e   : > { %1082 = vmatpush1.bf16.msra.mxu0 %v1560_v6  ;;  %1026 = vmatmul.mubr.bf16.vlgmr.msra.gmra.mrb[0].mxu1 %v1644_v24  ;;  %v1142_v7 = vsub.s32 (!%p1438_p11), 0, %v1141_v2 }
  0x6f   : > { %1083 = vmatprep.subr.bf16.mxu0 %v1568_v8  ;;  %v1146_v8 = vsub.s32 (!%p1438_p11), 1, %v1141_v2 }
  0x70   : > { %v1143_v14 = vrot.slane (!%p1438_p11), %v1138_v4, %v1142_v7 }
  0x72   : > { %1084 = vmatpush1.bf16.msra.mxu0 %v1566_v11  ;;  %v1157_v11 = vunpack.c.h.bf16 (!%p1438_p11), %v1154_v3 }
  0x73   : > { %1085 = vmatprep.subr.bf16.mxu0 %v1574_v12 }
  0x76   : > { %1086 = vmatpush1.bf16.msra.mxu0 %v1572_v15  ;;  %v1147_v15 = vrot.slane (!%p1438_p11), %v1138_v4, %v1146_v8 }
  0x77   : > { %1087 = vmatprep.subr.bf16.mxu0 %v1580_v16  ;;  %v1158_v16 = vunpack.c.l.bf16 (!%p1438_p11), %v1155_v5 }
  0x7a   : > { %1088 = vmatpush1.bf16.msra.mxu0 %v1578_v19 }
  0x7b   : > { %1089 = vmatprep.subr.bf16.mxu0 %v1586_v20 }
  0x7e   : > { %1090 = vmatpush1.bf16.msra.mxu0 %v1584_v22 }
  0x7f   : > { %1091 = vmatprep.subr.bf16.mxu0 %v1592_v23 }
  0x82   : > { %1092 = vmatpush1.bf16.msra.mxu0 %v1590_v25 }
  0x83   : > { %1093 = vmatprep.subr.bf16.mxu0 %v1598_v26 }
  0x86   : > { %1094 = vmatpush1.bf16.msra.mxu0 %v1596_v27 }
  0x87   : > { %1095 = vmatprep.subr.bf16.mxu0 %v1604_v28 }
  0x8a   : > { %1096 = vmatpush1.bf16.msra.mxu0 %v1602_v29 }
  0x8b   : > { %1097 = vmatprep.subr.bf16.mxu0 %v1610_v30 }
  0x8e   : > { %1098 = vmatpush1.bf16.msra.mxu0 %v1608_v31 }
  0x8f   : > { %1099 = vmatprep.subr.bf16.mxu0 %v1616_v32 }
  0x92   : > { %1100 = vmatpush1.bf16.msra.mxu0 %v1614_v33 }
  0x93   : > { %1101 = vmatprep.subr.bf16.mxu0 %v1622_v34 }
  0x96   : > { %1102 = vmatpush1.bf16.msra.mxu0 %v1620_v35 }
  0x97   : > { %1103 = vmatprep.subr.bf16.mxu0 %v1628_v36 }
  0x9a   : > { %1104 = vmatpush1.bf16.msra.mxu0 %v1626_v37 }
  0x9b   : > { %1105 = vmatprep.subr.bf16.mxu0 %v1634_v38 }
  0x9e   : > { %1106 = vmatpush1.bf16.msra.mxu0 %v1632_v39 }
  0x9f   : > { %1107 = vmatprep.subr.bf16.mxu0 %v1640_v40 }
  0xa2   : > { %1108 = vmatpush1.bf16.msra.mxu0 %v1638_v41 }
  0xa3   : > { %1109 = vmatprep.subr.bf16.mxu0 %v1649_v42 }
  0xa6   : > { %1110 = vmatpush1.bf16.msra.mxu0 %v1647_v43 }
  0xa9   : > { %1112 = vmatmul.mubr.bf16.vlgmr.msra.gmra.mrb[0].mxu0 %v1650_v44 }
 0x141   : > { %v1027_v45 = vpop.f32.mrb[0].mxu1 }
 0x142   : > { %v1029_v46 = vpop.f32.mrb[1].mxu1 }
 0x143   : > { %v1031_v47 = vpop.f32.mrb[2].mxu1 }
 0x144   : > { %v1033_v48 = vpop.f32.mrb[3].mxu1 }
 0x17c   : > { %v1113_v50 = vpop.f32.mrb[0].mxu0 }
 0x17d   : > { %v1449_v51 = vadd.f32 %v1113_v50, %v1027_v45  ;;  %v1115_v53 = vpop.f32.mrb[1].mxu0 }
 0x17e   : > { %v1450_v54 = vadd.f32 %v1115_v53, %v1029_v46  ;;  %v1117_v56 = vpop.f32.mrb[2].mxu0  ;;  %1133 = sbr.rel (%p1438_p11) target bundleno = 405 (0x195), region = 67 }
 0x17f   : > { %v1122_v57 = vadd.f32 %v1449_v51, %v377_v49  ;;  %v1451_v58 = vadd.f32 %v1117_v56, %v1031_v47  ;;  %v1119_v60 = vpop.f32.mrb[3].mxu0 }
 0x180   : > { %v1123_v61 = vadd.f32 %v1450_v54, %v378_v52  ;;  %v1452_v62 = vadd.f32 %v1119_v60, %v1033_v48 }
 0x181   : > { %1126 = vst [vmem:[#allocation2] sm:$0xff] %v1122_v57  ;;  %v1124_v63 = vadd.f32 %v1451_v58, %v379_v55 }
 0x182   : > { %1127 = vst [vmem:[#allocation2 + $0x8] sm:$0xff] %v1123_v61  ;;  %v1125_v0 = vadd.f32 %v1452_v62, %v380_v59 }
 0x183   : > { %1128 = vst [vmem:[#allocation2 + $0x10] sm:$0xff] %v1124_v63 }
 0x184   : > { %1129 = vst [vmem:[#allocation2 + $0x18] sm:$0xff] %v1125_v0 }
 0x188   : > { %v1134_v6 = vld [vmem:[#allocation2] sm:$0xff] }
 0x189   : > { %v1135_v9 = vld [vmem:[#allocation2 + $0x8] sm:$0xff]  ;;  %v1150_v18 = vadd.f32 %v1143_v14, %v1134_v6 }
 0x18a   : > { %v1136_v12 = vld [vmem:[#allocation2 + $0x10] sm:$0xff]  ;;  %v1151_v19 = vadd.f32 %v1147_v15, %v1135_v9 }
 0x18b   : > { %v1137_v13 = vld [vmem:[#allocation2 + $0x18] sm:$0xff]  ;;  %v1152_v20 = vadd.f32 %v1143_v14, %v1136_v12  ;;  %v1160_v22 = vadd.f32 %v1156_v10, %v1150_v18 }
 0x18c   : > { %v1153_v21 = vadd.f32 %v1147_v15, %v1137_v13  ;;  %v1161_v23 = vadd.f32 %v1157_v11, %v1151_v19 }
 0x18d   : > { %v1162_v24 = vadd.f32 %v1158_v16, %v1152_v20  ;;  %v1164_v26 = vmax.f32 %v1160_v22, 0.0 }
 0x18e   : > { %v1163_v25 = vadd.f32 %v1159_v17, %v1153_v21  ;;  %v1165_v27 = vmax.f32 %v1161_v23, 0.0 }
 0x18f   : > { %v1166_v28 = vmax.f32 %v1162_v24, 0.0 }
 0x190   : > { %v1167_v29 = vmax.f32 %v1163_v25, 0.0  ;;  %v1447_v30 = vpack.c.bf16 %v1165_v27, %v1164_v26 }
 0x192   : > { %v1448_v31 = vpack.c.bf16 %v1167_v29, %v1166_v28  ;;  %1180 = vst [vmem:[%s1911_s4] sm:$0xff] %v1447_v30 }
 0x194   : > { %1181 = vst [vmem:[%s1911_s4 + $0x8] sm:$0xff] %v1448_v31 }
 0x195 PF: > { %s14_s19 = sadd.s32 1, %s1691_s19   ;;  %s1912_s15 = smov %s1679_s16 }
 0x196   : > { %p11_p12 = scmp.ge.s32.totalorder %s14_s19, 5   ;;  %s1913_s16 = smov %s1754_s23 }
 0x197   : > { %s1914_s17 = smov %s1687_s18  ;;  %s1915_s18 = smov %s1917_s20 }
 0x198   :  { %13 = sbr.rel (!%p11_p12) target bundleno = 3 (0x3), region = 111 }

// kernel: _lambda_.37
= control target key start
LH: loop header
LB: loop body
LE: loop exit
PB: predicated region body
PF: predicated region fallthrough
CT: control target
= control target key end

     0   :  { %s2615_s0 = inlined_call_operand.vmem [shape: bf16[16,2304], index: 0, kind: input, shape index: {}]   ;;  %s2616_s1 = inlined_call_operand.vmem [shape: bf16[2304,512], index: 1, kind: input, shape index: {}]   ;;  %s2617_s2 = inlined_call_operand.vmem [shape: f32[1,512], index: 2, kind: input, shape index: {}]   ;;  %s2618_s3 = inlined_call_operand.vmem [shape: bf16[16,512], index: 3, kind: output, shape index: {}]  }
   0x1   :  { %2620 = sst [smem:[#allocation7_spill]] %s2615_s0 }
   0x2   :  { %2621 = sst [smem:[#allocation8_spill]] %s2616_s1 }
   0x3   :  { %s2135_s12 = smov 0   ;;  %s2137_s13 = smov 0  }
   0x4   :  { %s2139_s14 = smov 0   ;;  %s2141_s15 = smov 0  }
   0x5   :  { %s2143_s16 = smov 0   ;;  %s2145_s17 = smov 0  }
   0x6   :  { %s2147_s18 = smov 0   ;;  %s2149_s19 = smov 0  }
   0x7   :  { %s2151_s20 = smov 0   ;;  %s2153_s21 = smov 0  }
   0x8   :  { %s2155_s22 = smov 0  }
   0x9 LB: > { %s1645_s23 = sadd.s32 4294967295, %s2112_s22   ;;  %s25_s24 = sadd.s32 1, %s2104_s20  ;;  %s2112_s22 = sphi %s2155_s22, %s13_s22   ;;  %s2108_s21 = sphi %s2153_s21, %s2638_s21   ;;  %s2104_s20 = sphi %s2151_s20, %s2637_s20   ;;  %s2100_s19 = sphi %s2149_s19, %s2636_s19   ;;  %s2096_s18 = sphi %s2147_s18, %s2635_s18   ;;  %s2092_s17 = sphi %s2145_s17, %s2634_s17   ;;  %s2088_s16 = sphi %s2143_s16, %s2633_s16   ;;  %s2084_s15 = sphi %s2141_s15, %s2632_s15   ;;  %s2080_s14 = sphi %s2139_s14, %s2631_s14   ;;  %s2076_s13 = sphi %s2137_s13, %s2630_s13   ;;  %s2072_s12 = sphi %s2135_s12, %s2629_s12  }
   0xa   : > { %p26_p0 = scmp.ge.s32.totalorder %s25_s24, 3  ;;  %s32_s25 = sadd.s32 1, %s2108_s21 }
   0xb   : > { %s41_s26 = sadd.s32 1, %s2092_s17  ;;  %p48_p1 = scmp.ne.s32.totalorder %s2092_s17, %s2088_s16 }
   0xc   : > { %s2640_s24 = smov (%p26_p0, %s25_s24), 0  ;;  %s2642_s25 = smov (!%p26_p0, %s32_s25), %s2108_s21 }
   0xd   : > { %s37_s27 = ssub.s32 %s2104_s20, %s2640_s24  ;;  %p49_p2 = scmp.eq.s32.totalorder %s2112_s22, 0 }
   0xe   : > { %p34_p3 = scmp.ge.s32.totalorder %s2642_s25, 2  ;;  %p39_p4 = scmp.eq.s32.totalorder %s37_s27, 0 }
   0xf   : > { %p2202_p5 = por %p49_p2, %p48_p1  ;;  %s69_s29 = sadd.s32 1, %s2084_s15 }
  0x10   : > { %s2644_s25 = smov (%p34_p3, %s2642_s25), 0  ;;  %p76_p6 = scmp.ne.s32.totalorder %s2084_s15, %s2080_s14 }
  0x11   : > { %2623 = sst [smem:[#allocation6_spill]] %s2644_s25  ;;  %s65_s4 = ssub.s32 %s2108_s21, %s2644_s25 }
  0x12   : > { %s2210_s30 = scalar_select %p39_p4, %s2092_s17, %s41_s26  }
  0x13   : > { %s66_s5 = sor.u32 %s65_s4, %s37_s27  ;;  %p121_p7 = scmp.eq.s32.totalorder %s65_s4, 0 }
  0x14   : > { %p67_p8 = scmp.eq.s32.totalorder %s66_s5, 0  ;;  %p2216_p9 = por %p76_p6, %p49_p2 }
  0x15   : > { %s123_s7 = sadd.s32 1, %s2076_s13  ;;  %p133_p10 = scmp.ne.s32.totalorder %s2076_s13, %s2072_s12 }
  0x16   : > { %s2224_s8 = scalar_select %p67_p8, %s2084_s15, %s69_s29  }
  0x17   : > { %s2227_s9 = scalar_select %p121_p7, %s2076_s13, %s123_s7  }
  0x18   : > { %p134_p11 = scmp.eq.s32.totalorder %s1645_s23, 5  ;;  %p1648_p13 = scmp.ge.s32.totalorder %s2112_s22, 6 }
  0x1a   : > { %p2229_p12 = por %p134_p11, %p133_p10  ;;  %156 = sbr.rel (%p1648_p13) target bundleno = 103 (0x67), region = 16 }
  0x21   : > { %159 = sbr.rel (!%p2202_p5) target bundleno = 45 (0x2d), region = 20  ;;  %s161_s11 = sand.u32 (%p2202_p5), 1, %s2092_s17  }
  0x22   : > { %s1767_s26 = smul.u32 (%p2202_p5), 24, %s2104_s20  ;;  %s2626_s0 = sld [smem:[#allocation7_spill]] (%p2202_p5) }
  0x23   : > { %s1780_s27 = smul.u32 (%p2202_p5), 48, %s161_s11 }
  0x25   : > { %s163_s23 = scalar_lea.vmem (%p2202_p5), [#allocation3], %s1780_s27 }
  0x28   : > { %s169_s5 = scalar_lea.vmem %s2626_s0, %s1767_s26 }
  0x29   : > { %v182_v0 = vld [vmem:[%s169_s5] sm:$0xff]  ;;  %v184_v1 = vld [vmem:[%s169_s5 + $0x8] sm:$0xff]  ;;  %v186_v2 = vld [vmem:[%s169_s5 + $0x10] sm:$0xff] }
  0x2a   : > { %183 = vst [vmem:[%s163_s23] sm:$0xff] %v182_v0  ;;  %185 = vst [vmem:[%s163_s23 + $0x8] sm:$0xff] %v184_v1  ;;  %v188_v3 = vld [vmem:[%s169_s5 + $0x48] sm:$0xff]  ;;  %v190_v4 = vld [vmem:[%s169_s5 + $0x50] sm:$0xff] }
  0x2b   : > { %187 = vst [vmem:[%s163_s23 + $0x10] sm:$0xff] %v186_v2  ;;  %v192_v5 = vld [vmem:[%s169_s5 + $0x58] sm:$0xff]  ;;  %189 = vst [vmem:[%s163_s23 + $0x18] sm:$0xff] %v188_v3 }
  0x2c   : > { %191 = vst [vmem:[%s163_s23 + $0x20] sm:$0xff] %v190_v4  ;;  %193 = vst [vmem:[%s163_s23 + $0x28] sm:$0xff] %v192_v5 }
  0x2d PF: > { %199 = sbr.rel (!%p2216_p9) target bundleno = 103 (0x67), region = 43  ;;  %s201_s28 = sand.u32 (%p2216_p9), 1, %s2084_s15  }
  0x2e   : > { %s1781_s7 = smul.u32 (%p2216_p9), 768, %s201_s28  ;;  %s1650_s11 = sshll.u32 (%p2216_p9), %s2108_s21, 1 }
  0x2f   : > { %s1768_s26 = smul.u32 (%p2216_p9), 384, %s2104_s20  ;;  %s2627_s1 = sld [smem:[#allocation8_spill]] (%p2216_p9) }
  0x30   : > { %s2254_s6 = scalar_lea.vmem (%p2216_p9), [#allocation4], %s1781_s7 }
  0x31   : > { %s207_s27 = sadd.s32 (%p2216_p9), %s1768_s26, %s1650_s11 }
  0x32   : > { %s1652_s29 = sshll.u32 (%p2216_p9), %s207_s27, 2 }
  0x35   : > { %s2249_s5 = scalar_lea.vmem %s2627_s1, %s1652_s29 }
  0x36   : > { %v427_v6 = vld [vmem:[%s2249_s5] sm:$0xff]  ;;  %v429_v7 = vld [vmem:[%s2249_s5 + $0x10] sm:$0xff] }
  0x37   : > { %v431_v8 = vld [vmem:[%s2249_s5 + $0x20] sm:$0xff]  ;;  %428 = vst [vmem:[%s2254_s6] sm:$0xff] %v427_v6  ;;  %430 = vst [vmem:[%s2254_s6 + $0x8] sm:$0xff] %v429_v7  ;;  %v433_v9 = vld [vmem:[%s2249_s5 + $0x30] sm:$0xff] }
  0x38   : > { %432 = vst [vmem:[%s2254_s6 + $0x10] sm:$0xff] %v431_v8  ;;  %v435_v10 = vld [vmem:[%s2249_s5 + $0x40] sm:$0xff]  ;;  %v437_v11 = vld [vmem:[%s2249_s5 + $0x50] sm:$0xff]  ;;  %434 = vst [vmem:[%s2254_s6 + $0x18] sm:$0xff] %v433_v9 }
  0x39   : > { %436 = vst [vmem:[%s2254_s6 + $0x20] sm:$0xff] %v435_v10  ;;  %438 = vst [vmem:[%s2254_s6 + $0x28] sm:$0xff] %v437_v11  ;;  %v439_v12 = vld [vmem:[%s2249_s5 + $0x60] sm:$0xff]  ;;  %v441_v13 = vld [vmem:[%s2249_s5 + $0x70] sm:$0xff] }
  0x3a   : > { %v443_v14 = vld [vmem:[%s2249_s5 + $0x80] sm:$0xff]  ;;  %440 = vst [vmem:[%s2254_s6 + $0x30] sm:$0xff] %v439_v12  ;;  %442 = vst [vmem:[%s2254_s6 + $0x38] sm:$0xff] %v441_v13  ;;  %v445_v15 = vld [vmem:[%s2249_s5 + $0x90] sm:$0xff] }
  0x3b   : > { %444 = vst [vmem:[%s2254_s6 + $0x40] sm:$0xff] %v443_v14  ;;  %v447_v16 = vld [vmem:[%s2249_s5 + $0xa0] sm:$0xff]  ;;  %v449_v17 = vld [vmem:[%s2249_s5 + $0xb0] sm:$0xff]  ;;  %446 = vst [vmem:[%s2254_s6 + $0x48] sm:$0xff] %v445_v15 }
  0x3c   : > { %448 = vst [vmem:[%s2254_s6 + $0x50] sm:$0xff] %v447_v16  ;;  %450 = vst [vmem:[%s2254_s6 + $0x58] sm:$0xff] %v449_v17  ;;  %v451_v18 = vld [vmem:[%s2249_s5 + $0xc0] sm:$0xff]  ;;  %v453_v19 = vld [vmem:[%s2249_s5 + $0xd0] sm:$0xff] }
  0x3d   : > { %v455_v20 = vld [vmem:[%s2249_s5 + $0xe0] sm:$0xff]  ;;  %452 = vst [vmem:[%s2254_s6 + $0x60] sm:$0xff] %v451_v18  ;;  %454 = vst [vmem:[%s2254_s6 + $0x68] sm:$0xff] %v453_v19  ;;  %v457_v21 = vld [vmem:[%s2249_s5 + $0xf0] sm:$0xff] }
  0x3e   : > { %456 = vst [vmem:[%s2254_s6 + $0x70] sm:$0xff] %v455_v20  ;;  %v459_v22 = vld [vmem:[%s2249_s5 + $0x100] sm:$0xff]  ;;  %v461_v23 = vld [vmem:[%s2249_s5 + $0x110] sm:$0xff]  ;;  %458 = vst [vmem:[%s2254_s6 + $0x78] sm:$0xff] %v457_v21 }
  0x3f   : > { %460 = vst [vmem:[%s2254_s6 + $0x80] sm:$0xff] %v459_v22  ;;  %462 = vst [vmem:[%s2254_s6 + $0x88] sm:$0xff] %v461_v23  ;;  %v463_v24 = vld [vmem:[%s2249_s5 + $0x120] sm:$0xff]  ;;  %v465_v25 = vld [vmem:[%s2249_s5 + $0x130] sm:$0xff] }
  0x40   : > { %v467_v26 = vld [vmem:[%s2249_s5 + $0x140] sm:$0xff]  ;;  %464 = vst [vmem:[%s2254_s6 + $0x90] sm:$0xff] %v463_v24  ;;  %466 = vst [vmem:[%s2254_s6 + $0x98] sm:$0xff] %v465_v25  ;;  %v469_v27 = vld [vmem:[%s2249_s5 + $0x150] sm:$0xff] }
  0x41   : > { %468 = vst [vmem:[%s2254_s6 + $0xa0] sm:$0xff] %v467_v26  ;;  %v471_v28 = vld [vmem:[%s2249_s5 + $0x160] sm:$0xff]  ;;  %v473_v29 = vld [vmem:[%s2249_s5 + $0x170] sm:$0xff]  ;;  %470 = vst [vmem:[%s2254_s6 + $0xa8] sm:$0xff] %v469_v27 }
  0x42   : > { %472 = vst [vmem:[%s2254_s6 + $0xb0] sm:$0xff] %v471_v28  ;;  %474 = vst [vmem:[%s2254_s6 + $0xb8] sm:$0xff] %v473_v29  ;;  %v475_v30 = vld [vmem:[%s2249_s5 + $0x180] sm:$0xff]  ;;  %v477_v31 = vld [vmem:[%s2249_s5 + $0x190] sm:$0xff] }
  0x43   : > { %v479_v32 = vld [vmem:[%s2249_s5 + $0x1a0] sm:$0xff]  ;;  %476 = vst [vmem:[%s2254_s6 + $0xc0] sm:$0xff] %v475_v30  ;;  %478 = vst [vmem:[%s2254_s6 + $0xc8] sm:$0xff] %v477_v31  ;;  %v481_v33 = vld [vmem:[%s2249_s5 + $0x1b0] sm:$0xff] }
  0x44   : > { %480 = vst [vmem:[%s2254_s6 + $0xd0] sm:$0xff] %v479_v32  ;;  %v483_v34 = vld [vmem:[%s2249_s5 + $0x1c0] sm:$0xff]  ;;  %v485_v35 = vld [vmem:[%s2249_s5 + $0x1d0] sm:$0xff]  ;;  %482 = vst [vmem:[%s2254_s6 + $0xd8] sm:$0xff] %v481_v33 }
  0x45   : > { %484 = vst [vmem:[%s2254_s6 + $0xe0] sm:$0xff] %v483_v34  ;;  %486 = vst [vmem:[%s2254_s6 + $0xe8] sm:$0xff] %v485_v35  ;;  %v487_v36 = vld [vmem:[%s2249_s5 + $0x1e0] sm:$0xff]  ;;  %v489_v37 = vld [vmem:[%s2249_s5 + $0x1f0] sm:$0xff] }
  0x46   : > { %v491_v38 = vld [vmem:[%s2249_s5 + $0x200] sm:$0xff]  ;;  %488 = vst [vmem:[%s2254_s6 + $0xf0] sm:$0xff] %v487_v36  ;;  %490 = vst [vmem:[%s2254_s6 + $0xf8] sm:$0xff] %v489_v37  ;;  %v493_v39 = vld [vmem:[%s2249_s5 + $0x210] sm:$0xff] }
  0x47   : > { %492 = vst [vmem:[%s2254_s6 + $0x100] sm:$0xff] %v491_v38  ;;  %v495_v40 = vld [vmem:[%s2249_s5 + $0x220] sm:$0xff]  ;;  %v497_v41 = vld [vmem:[%s2249_s5 + $0x230] sm:$0xff]  ;;  %494 = vst [vmem:[%s2254_s6 + $0x108] sm:$0xff] %v493_v39 }
  0x48   : > { %496 = vst [vmem:[%s2254_s6 + $0x110] sm:$0xff] %v495_v40  ;;  %498 = vst [vmem:[%s2254_s6 + $0x118] sm:$0xff] %v497_v41  ;;  %v499_v42 = vld [vmem:[%s2249_s5 + $0x240] sm:$0xff]  ;;  %v501_v43 = vld [vmem:[%s2249_s5 + $0x250] sm:$0xff] }
  0x49   : > { %v503_v44 = vld [vmem:[%s2249_s5 + $0x260] sm:$0xff]  ;;  %500 = vst [vmem:[%s2254_s6 + $0x120] sm:$0xff] %v499_v42  ;;  %502 = vst [vmem:[%s2254_s6 + $0x128] sm:$0xff] %v501_v43  ;;  %v505_v45 = vld [vmem:[%s2249_s5 + $0x270] sm:$0xff] }
  0x4a   : > { %504 = vst [vmem:[%s2254_s6 + $0x130] sm:$0xff] %v503_v44  ;;  %v507_v46 = vld [vmem:[%s2249_s5 + $0x280] sm:$0xff]  ;;  %v509_v47 = vld [vmem:[%s2249_s5 + $0x290] sm:$0xff]  ;;  %506 = vst [vmem:[%s2254_s6 + $0x138] sm:$0xff] %v505_v45 }
  0x4b   : > { %508 = vst [vmem:[%s2254_s6 + $0x140] sm:$0xff] %v507_v46  ;;  %510 = vst [vmem:[%s2254_s6 + $0x148] sm:$0xff] %v509_v47  ;;  %v511_v48 = vld [vmem:[%s2249_s5 + $0x2a0] sm:$0xff]  ;;  %v513_v49 = vld [vmem:[%s2249_s5 + $0x2b0] sm:$0xff] }
  0x4c   : > { %v515_v50 = vld [vmem:[%s2249_s5 + $0x2c0] sm:$0xff]  ;;  %512 = vst [vmem:[%s2254_s6 + $0x150] sm:$0xff] %v511_v48  ;;  %514 = vst [vmem:[%s2254_s6 + $0x158] sm:$0xff] %v513_v49  ;;  %v517_v51 = vld [vmem:[%s2249_s5 + $0x2d0] sm:$0xff] }
  0x4d   : > { %516 = vst [vmem:[%s2254_s6 + $0x160] sm:$0xff] %v515_v50  ;;  %v519_v52 = vld [vmem:[%s2249_s5 + $0x2e0] sm:$0xff]  ;;  %v521_v53 = vld [vmem:[%s2249_s5 + $0x2f0] sm:$0xff]  ;;  %518 = vst [vmem:[%s2254_s6 + $0x168] sm:$0xff] %v517_v51 }
  0x4e   : > { %520 = vst [vmem:[%s2254_s6 + $0x170] sm:$0xff] %v519_v52  ;;  %522 = vst [vmem:[%s2254_s6 + $0x178] sm:$0xff] %v521_v53  ;;  %v523_v54 = vld [vmem:[%s2249_s5 + $0x300] sm:$0xff]  ;;  %v525_v55 = vld [vmem:[%s2249_s5 + $0x310] sm:$0xff] }
  0x4f   : > { %v527_v56 = vld [vmem:[%s2249_s5 + $0x320] sm:$0xff]  ;;  %524 = vst [vmem:[%s2254_s6 + $0x180] sm:$0xff] %v523_v54  ;;  %526 = vst [vmem:[%s2254_s6 + $0x188] sm:$0xff] %v525_v55  ;;  %v529_v57 = vld [vmem:[%s2249_s5 + $0x330] sm:$0xff] }
  0x50   : > { %528 = vst [vmem:[%s2254_s6 + $0x190] sm:$0xff] %v527_v56  ;;  %v531_v58 = vld [vmem:[%s2249_s5 + $0x340] sm:$0xff]  ;;  %v533_v59 = vld [vmem:[%s2249_s5 + $0x350] sm:$0xff]  ;;  %530 = vst [vmem:[%s2254_s6 + $0x198] sm:$0xff] %v529_v57 }
  0x51   : > { %532 = vst [vmem:[%s2254_s6 + $0x1a0] sm:$0xff] %v531_v58  ;;  %534 = vst [vmem:[%s2254_s6 + $0x1a8] sm:$0xff] %v533_v59  ;;  %v535_v60 = vld [vmem:[%s2249_s5 + $0x360] sm:$0xff]  ;;  %v537_v61 = vld [vmem:[%s2249_s5 + $0x370] sm:$0xff] }
  0x52   : > { %v539_v62 = vld [vmem:[%s2249_s5 + $0x380] sm:$0xff]  ;;  %536 = vst [vmem:[%s2254_s6 + $0x1b0] sm:$0xff] %v535_v60  ;;  %538 = vst [vmem:[%s2254_s6 + $0x1b8] sm:$0xff] %v537_v61  ;;  %v541_v63 = vld [vmem:[%s2249_s5 + $0x390] sm:$0xff] }
  0x53   : > { %540 = vst [vmem:[%s2254_s6 + $0x1c0] sm:$0xff] %v539_v62  ;;  %v543_v0 = vld [vmem:[%s2249_s5 + $0x3a0] sm:$0xff]  ;;  %v545_v1 = vld [vmem:[%s2249_s5 + $0x3b0] sm:$0xff]  ;;  %542 = vst [vmem:[%s2254_s6 + $0x1c8] sm:$0xff] %v541_v63 }
  0x54   : > { %544 = vst [vmem:[%s2254_s6 + $0x1d0] sm:$0xff] %v543_v0  ;;  %546 = vst [vmem:[%s2254_s6 + $0x1d8] sm:$0xff] %v545_v1  ;;  %v547_v2 = vld [vmem:[%s2249_s5 + $0x3c0] sm:$0xff]  ;;  %v549_v3 = vld [vmem:[%s2249_s5 + $0x3d0] sm:$0xff] }
  0x55   : > { %v551_v4 = vld [vmem:[%s2249_s5 + $0x3e0] sm:$0xff]  ;;  %548 = vst [vmem:[%s2254_s6 + $0x1e0] sm:$0xff] %v547_v2  ;;  %550 = vst [vmem:[%s2254_s6 + $0x1e8] sm:$0xff] %v549_v3  ;;  %v553_v5 = vld [vmem:[%s2249_s5 + $0x3f0] sm:$0xff] }
  0x56   : > { %552 = vst [vmem:[%s2254_s6 + $0x1f0] sm:$0xff] %v551_v4  ;;  %v555_v6 = vld [vmem:[%s2249_s5 + $0x400] sm:$0xff]  ;;  %v557_v7 = vld [vmem:[%s2249_s5 + $0x410] sm:$0xff]  ;;  %554 = vst [vmem:[%s2254_s6 + $0x1f8] sm:$0xff] %v553_v5 }
  0x57   : > { %556 = vst [vmem:[%s2254_s6 + $0x200] sm:$0xff] %v555_v6  ;;  %558 = vst [vmem:[%s2254_s6 + $0x208] sm:$0xff] %v557_v7  ;;  %v559_v8 = vld [vmem:[%s2249_s5 + $0x420] sm:$0xff]  ;;  %v561_v9 = vld [vmem:[%s2249_s5 + $0x430] sm:$0xff] }
  0x58   : > { %v563_v10 = vld [vmem:[%s2249_s5 + $0x440] sm:$0xff]  ;;  %560 = vst [vmem:[%s2254_s6 + $0x210] sm:$0xff] %v559_v8  ;;  %562 = vst [vmem:[%s2254_s6 + $0x218] sm:$0xff] %v561_v9  ;;  %v565_v11 = vld [vmem:[%s2249_s5 + $0x450] sm:$0xff] }
  0x59   : > { %564 = vst [vmem:[%s2254_s6 + $0x220] sm:$0xff] %v563_v10  ;;  %v567_v12 = vld [vmem:[%s2249_s5 + $0x460] sm:$0xff]  ;;  %v569_v13 = vld [vmem:[%s2249_s5 + $0x470] sm:$0xff]  ;;  %566 = vst [vmem:[%s2254_s6 + $0x228] sm:$0xff] %v565_v11 }
  0x5a   : > { %568 = vst [vmem:[%s2254_s6 + $0x230] sm:$0xff] %v567_v12  ;;  %570 = vst [vmem:[%s2254_s6 + $0x238] sm:$0xff] %v569_v13  ;;  %v571_v14 = vld [vmem:[%s2249_s5 + $0x480] sm:$0xff]  ;;  %v573_v15 = vld [vmem:[%s2249_s5 + $0x490] sm:$0xff] }
  0x5b   : > { %v575_v16 = vld [vmem:[%s2249_s5 + $0x4a0] sm:$0xff]  ;;  %572 = vst [vmem:[%s2254_s6 + $0x240] sm:$0xff] %v571_v14  ;;  %574 = vst [vmem:[%s2254_s6 + $0x248] sm:$0xff] %v573_v15  ;;  %v577_v17 = vld [vmem:[%s2249_s5 + $0x4b0] sm:$0xff] }
  0x5c   : > { %576 = vst [vmem:[%s2254_s6 + $0x250] sm:$0xff] %v575_v16  ;;  %v579_v18 = vld [vmem:[%s2249_s5 + $0x4c0] sm:$0xff]  ;;  %v581_v19 = vld [vmem:[%s2249_s5 + $0x4d0] sm:$0xff]  ;;  %578 = vst [vmem:[%s2254_s6 + $0x258] sm:$0xff] %v577_v17 }
  0x5d   : > { %580 = vst [vmem:[%s2254_s6 + $0x260] sm:$0xff] %v579_v18  ;;  %582 = vst [vmem:[%s2254_s6 + $0x268] sm:$0xff] %v581_v19  ;;  %v583_v20 = vld [vmem:[%s2249_s5 + $0x4e0] sm:$0xff]  ;;  %v585_v21 = vld [vmem:[%s2249_s5 + $0x4f0] sm:$0xff] }
  0x5e   : > { %v587_v22 = vld [vmem:[%s2249_s5 + $0x500] sm:$0xff]  ;;  %584 = vst [vmem:[%s2254_s6 + $0x270] sm:$0xff] %v583_v20  ;;  %586 = vst [vmem:[%s2254_s6 + $0x278] sm:$0xff] %v585_v21  ;;  %v589_v23 = vld [vmem:[%s2249_s5 + $0x510] sm:$0xff] }
  0x5f   : > { %588 = vst [vmem:[%s2254_s6 + $0x280] sm:$0xff] %v587_v22  ;;  %v591_v24 = vld [vmem:[%s2249_s5 + $0x520] sm:$0xff]  ;;  %v593_v25 = vld [vmem:[%s2249_s5 + $0x530] sm:$0xff]  ;;  %590 = vst [vmem:[%s2254_s6 + $0x288] sm:$0xff] %v589_v23 }
  0x60   : > { %592 = vst [vmem:[%s2254_s6 + $0x290] sm:$0xff] %v591_v24  ;;  %594 = vst [vmem:[%s2254_s6 + $0x298] sm:$0xff] %v593_v25  ;;  %v595_v26 = vld [vmem:[%s2249_s5 + $0x540] sm:$0xff]  ;;  %v597_v27 = vld [vmem:[%s2249_s5 + $0x550] sm:$0xff] }
  0x61   : > { %v599_v28 = vld [vmem:[%s2249_s5 + $0x560] sm:$0xff]  ;;  %596 = vst [vmem:[%s2254_s6 + $0x2a0] sm:$0xff] %v595_v26  ;;  %598 = vst [vmem:[%s2254_s6 + $0x2a8] sm:$0xff] %v597_v27  ;;  %v601_v29 = vld [vmem:[%s2249_s5 + $0x570] sm:$0xff] }
  0x62   : > { %600 = vst [vmem:[%s2254_s6 + $0x2b0] sm:$0xff] %v599_v28  ;;  %v603_v30 = vld [vmem:[%s2249_s5 + $0x580] sm:$0xff]  ;;  %v605_v31 = vld [vmem:[%s2249_s5 + $0x590] sm:$0xff]  ;;  %602 = vst [vmem:[%s2254_s6 + $0x2b8] sm:$0xff] %v601_v29 }
  0x63   : > { %604 = vst [vmem:[%s2254_s6 + $0x2c0] sm:$0xff] %v603_v30  ;;  %606 = vst [vmem:[%s2254_s6 + $0x2c8] sm:$0xff] %v605_v31  ;;  %v607_v32 = vld [vmem:[%s2249_s5 + $0x5a0] sm:$0xff]  ;;  %v609_v33 = vld [vmem:[%s2249_s5 + $0x5b0] sm:$0xff] }
  0x64   : > { %v611_v34 = vld [vmem:[%s2249_s5 + $0x5c0] sm:$0xff]  ;;  %608 = vst [vmem:[%s2254_s6 + $0x2d0] sm:$0xff] %v607_v32  ;;  %610 = vst [vmem:[%s2254_s6 + $0x2d8] sm:$0xff] %v609_v33  ;;  %v613_v35 = vld [vmem:[%s2249_s5 + $0x5d0] sm:$0xff] }
  0x65   : > { %612 = vst [vmem:[%s2254_s6 + $0x2e0] sm:$0xff] %v611_v34  ;;  %v615_v36 = vld [vmem:[%s2249_s5 + $0x5e0] sm:$0xff]  ;;  %v617_v37 = vld [vmem:[%s2249_s5 + $0x5f0] sm:$0xff]  ;;  %614 = vst [vmem:[%s2254_s6 + $0x2e8] sm:$0xff] %v613_v35 }
  0x66   : > { %616 = vst [vmem:[%s2254_s6 + $0x2f0] sm:$0xff] %v615_v36  ;;  %618 = vst [vmem:[%s2254_s6 + $0x2f8] sm:$0xff] %v617_v37 }
  0x67 PF: > { %p1653_p0 = scmp.ge.s32.totalorder %s2112_s22, 1  ;;  %p631_p1 = scmp.lt.s32.totalorder %s2112_s22, 7 }
  0x69   : > { %p632_p2 = pnand %p1653_p0, %p631_p1 }
  0x6a   : > { %s638_s0 = sand.u32 (!%p632_p2), 1, %s2088_s16   ;;  %s645_s23 = sand.u32 (!%p632_p2), 1, %s2080_s14  }
  0x6b   : > { %635 = sbr.rel (%p632_p2) target bundleno = 492 (0x1ec), region = 85  ;;  %s672_s7 = sand.u32 (!%p632_p2), 1, %s2072_s12  }
  0x6c   : > { %s1782_s28 = smul.u32 (!%p632_p2), 48, %s638_s0  ;;  %s1654_s26 = sshll.u32 (!%p632_p2), %s672_s7, 4 }
  0x6d   : > { %s1783_s11 = smul.u32 (!%p632_p2), 768, %s645_s23  ;;  %s1655_s27 = sshll.u32 (!%p632_p2), %s2100_s19, 1 }
  0x6e   : > { %p680_p3 = scmp.lt.s32.totalorder (!%p632_p2), %s1655_s27, 3  ;;  %s2457_s6 = scalar_lea.vmem (!%p632_p2), [#allocation3], %s1782_s28 }
  0x6f   : > { %s2459_s1 = scalar_lea.vmem (!%p632_p2), [#allocation4], %s1783_s11  ;;  %s2461_s25 = scalar_lea.vmem (!%p632_p2), [#allocation5], %s1654_s26 }
  0x70   : > { %p1656_p4 = scmp.ne.s32.totalorder (!%p632_p2), %s2096_s18, 0 }
  0x72   : > { %s2646_s27 = smov (!%p680_p3, %s1655_s27), 3  ;;  %689 = sbr.rel (%p1656_p4) target bundleno = 121 (0x79), region = 97 }
  0x73   : > { %s682_s5 = scalar_lea.vmem %s2617_s2, %s2646_s27  ;;  %v2114_v38 = vmov (!%p1656_p4), 0.0  }
  0x74   : > { %690 = vst [vmem:[#allocation2] sm:$0xff] (!%p1656_p4), %v2114_v38  ;;  %691 = vst [vmem:[#allocation2 + $0x8] sm:$0xff] (!%p1656_p4), %v2114_v38 }
  0x75   : > { %692 = vst [vmem:[#allocation2 + $0x10] sm:$0xff] (!%p1656_p4), %v2114_v38  ;;  %693 = vst [vmem:[#allocation2 + $0x18] sm:$0xff] (!%p1656_p4), %v2114_v38 }
  0x79 PF: > { %v1873_v39 = vld [vmem:[%s2459_s1 + $0x104] ss:$8 sps:$4 sm:$0xff]   ;;  %v1875_v40 = vld [vmem:[%s2459_s1 + $0x100] ss:$8 sps:$4 sm:$0xff]   ;;  %v1876_v41 = vld [vmem:[%s2459_s1 + $0x114] ss:$8 sps:$4 sm:$0xff]  }
  0x7a   : > { %1353 = vmatprep.subr.bf16.mxu0 %v1873_v39  ;;  %v1878_v42 = vld [vmem:[%s2459_s1 + $0x110] ss:$8 sps:$4 sm:$0xff]   ;;  %v1879_v43 = vld [vmem:[%s2459_s1 + $0x124] ss:$8 sps:$4 sm:$0xff]   ;;  %v1881_v44 = vld [vmem:[%s2459_s1 + $0x120] ss:$8 sps:$4 sm:$0xff]  }
  0x7b   : > { %1354 = vmatpush1.bf16.msra.mxu0 %v1875_v40  ;;  %v1882_v45 = vld [vmem:[%s2459_s1 + $0x134] ss:$8 sps:$4 sm:$0xff]   ;;  %v1884_v46 = vld [vmem:[%s2459_s1 + $0x130] ss:$8 sps:$4 sm:$0xff]   ;;  %v1885_v47 = vld [vmem:[%s2459_s1 + $0x144] ss:$8 sps:$4 sm:$0xff]  }
  0x7c   : > { %1355 = vmatprep.subr.bf16.mxu0 %v1876_v41  ;;  %v1887_v48 = vld [vmem:[%s2459_s1 + $0x140] ss:$8 sps:$4 sm:$0xff]   ;;  %v1888_v49 = vld [vmem:[%s2459_s1 + $0x154] ss:$8 sps:$4 sm:$0xff]   ;;  %v1890_v50 = vld [vmem:[%s2459_s1 + $0x150] ss:$8 sps:$4 sm:$0xff]  }
  0x7d   : > { %v1891_v51 = vld [vmem:[%s2459_s1 + $0x164] ss:$8 sps:$4 sm:$0xff]   ;;  %v1923_v53 = vld [vmem:[%s2459_s1] ss:$8 sps:$4 sm:$0xff]   ;;  %v1894_v56 = vld [vmem:[%s2459_s1 + $0x174] ss:$8 sps:$4 sm:$0xff]  }
  0x7e   : > { %v1920_v52 = vld [vmem:[%s2459_s1 + $0x4] ss:$8 sps:$4 sm:$0xff]   ;;  %v1893_v54 = vld [vmem:[%s2459_s1 + $0x160] ss:$8 sps:$4 sm:$0xff]   ;;  %v1930_v57 = vld [vmem:[%s2459_s1 + $0x14] ss:$8 sps:$4 sm:$0xff]  }
  0x7f   : > { %1356 = vmatpush1.bf16.msra.mxu0 %v1878_v42  ;;  %1310 = vmatprep.subr.bf16.mxu1 %v1920_v52  ;;  %v1926_v55 = vld [vmem:[%s2457_s6 + $0xc] ss:$24 sps:$4 sm:$0xff]   ;;  %v1932_v58 = vld [vmem:[%s2459_s1 + $0x10] ss:$8 sps:$4 sm:$0xff]   ;;  %v1938_v62 = vld [vmem:[%s2459_s1 + $0x20] ss:$8 sps:$4 sm:$0xff]  }
  0x80   : > { %1357 = vmatprep.subr.bf16.mxu0 %v1879_v43  ;;  %1311 = vmatpush1.bf16.msra.mxu1 %v1923_v53  ;;  %v1896_v59 = vld [vmem:[%s2459_s1 + $0x170] ss:$8 sps:$4 sm:$0xff]   ;;  %v1897_v60 = vld [vmem:[%s2459_s1 + $0x184] ss:$8 sps:$4 sm:$0xff]   ;;  %v1899_v63 = vld [vmem:[%s2459_s1 + $0x180] ss:$8 sps:$4 sm:$0xff]  }
  0x81   : > { %1385 = vmatprep.mubr.bf16.mxu0 %v1926_v55  ;;  %1312 = vmatprep.subr.bf16.mxu1 %v1930_v57  ;;  %v1936_v61 = vld [vmem:[%s2459_s1 + $0x24] ss:$8 sps:$4 sm:$0xff]   ;;  %v1942_v0 = vld [vmem:[%s2459_s1 + $0x34] ss:$8 sps:$4 sm:$0xff]   ;;  %v1944_v2 = vld [vmem:[%s2459_s1 + $0x30] ss:$8 sps:$4 sm:$0xff]  }
  0x82   : > { %v1900_v1 = vld [vmem:[%s2459_s1 + $0x194] ss:$8 sps:$4 sm:$0xff]   ;;  %v1948_v3 = vld [vmem:[%s2459_s1 + $0x44] ss:$8 sps:$4 sm:$0xff]   ;;  %v1902_v4 = vld [vmem:[%s2459_s1 + $0x190] ss:$8 sps:$4 sm:$0xff]  }
  0x83   : > { %1358 = vmatpush1.bf16.msra.mxu0 %v1881_v44  ;;  %v1903_v5 = vld [vmem:[%s2459_s1 + $0x1a4] ss:$8 sps:$4 sm:$0xff]   ;;  %v1950_v6 = vld [vmem:[%s2459_s1 + $0x40] ss:$8 sps:$4 sm:$0xff]   ;;  %v1954_v7 = vld [vmem:[%s2459_s1 + $0x54] ss:$8 sps:$4 sm:$0xff]  }
  0x84   : > { %1359 = vmatprep.subr.bf16.mxu0 %v1882_v45  ;;  %1313 = vmatpush1.bf16.msra.mxu1 %v1932_v58  ;;  %v1905_v8 = vld [vmem:[%s2459_s1 + $0x1a0] ss:$8 sps:$4 sm:$0xff]   ;;  %v1906_v9 = vld [vmem:[%s2459_s1 + $0x1b4] ss:$8 sps:$4 sm:$0xff]   ;;  %v1956_v10 = vld [vmem:[%s2459_s1 + $0x50] ss:$8 sps:$4 sm:$0xff]  }
  0x85   : > { %1314 = vmatprep.subr.bf16.mxu1 %v1936_v61  ;;  %v1960_v11 = vld [vmem:[%s2459_s1 + $0x64] ss:$8 sps:$4 sm:$0xff]   ;;  %v1908_v12 = vld [vmem:[%s2459_s1 + $0x1b0] ss:$8 sps:$4 sm:$0xff]   ;;  %v1962_v14 = vld [vmem:[%s2459_s1 + $0x60] ss:$8 sps:$4 sm:$0xff]  }
  0x86   : > { %v1909_v13 = vld [vmem:[%s2459_s1 + $0x1c4] ss:$8 sps:$4 sm:$0xff]   ;;  %v1966_v15 = vld [vmem:[%s2459_s1 + $0x74] ss:$8 sps:$4 sm:$0xff]   ;;  %v1911_v16 = vld [vmem:[%s2459_s1 + $0x1c0] ss:$8 sps:$4 sm:$0xff]  }
  0x87   : > { %1360 = vmatpush1.bf16.msra.mxu0 %v1884_v46  ;;  %v1912_v17 = vld [vmem:[%s2459_s1 + $0x1d4] ss:$8 sps:$4 sm:$0xff]   ;;  %v1968_v18 = vld [vmem:[%s2459_s1 + $0x70] ss:$8 sps:$4 sm:$0xff]   ;;  %v1972_v19 = vld [vmem:[%s2459_s1 + $0x84] ss:$8 sps:$4 sm:$0xff]  }
  0x88   : > { %1361 = vmatprep.subr.bf16.mxu0 %v1885_v47  ;;  %1315 = vmatpush1.bf16.msra.mxu1 %v1938_v62  ;;  %v1914_v20 = vld [vmem:[%s2459_s1 + $0x1d0] ss:$8 sps:$4 sm:$0xff]   ;;  %v1915_v21 = vld [vmem:[%s2459_s1 + $0x1e4] ss:$8 sps:$4 sm:$0xff]   ;;  %v1974_v22 = vld [vmem:[%s2459_s1 + $0x80] ss:$8 sps:$4 sm:$0xff]  }
  0x89   : > { %1316 = vmatprep.subr.bf16.mxu1 %v1942_v0  ;;  %v1978_v23 = vld [vmem:[%s2459_s1 + $0x94] ss:$8 sps:$4 sm:$0xff]   ;;  %v1917_v24 = vld [vmem:[%s2459_s1 + $0x1e0] ss:$8 sps:$4 sm:$0xff]   ;;  %v1980_v26 = vld [vmem:[%s2459_s1 + $0x90] ss:$8 sps:$4 sm:$0xff]  }
  0x8a   : > { %v1918_v25 = vld [vmem:[%s2459_s1 + $0x1f4] ss:$8 sps:$4 sm:$0xff]   ;;  %v1984_v27 = vld [vmem:[%s2459_s1 + $0xa4] ss:$8 sps:$4 sm:$0xff]   ;;  %v1922_v28 = vld [vmem:[%s2459_s1 + $0x1f0] ss:$8 sps:$4 sm:$0xff]  }
  0x8b   : > { %1362 = vmatpush1.bf16.msra.mxu0 %v1887_v48  ;;  %v1929_v29 = vld [vmem:[%s2459_s1 + $0x204] ss:$8 sps:$4 sm:$0xff]   ;;  %v1986_v30 = vld [vmem:[%s2459_s1 + $0xa0] ss:$8 sps:$4 sm:$0xff]   ;;  %v1990_v32 = vld [vmem:[%s2459_s1 + $0xb4] ss:$8 sps:$4 sm:$0xff]  }
  0x8c   : > { %1363 = vmatprep.subr.bf16.mxu0 %v1888_v49  ;;  %1317 = vmatpush1.bf16.msra.mxu1 %v1944_v2  ;;  %v1924_v31 = vld [vmem:[%s2457_s6 + $0x8] ss:$24 sps:$4 sm:$0xff]   ;;  %v1935_v34 = vld [vmem:[%s2459_s1 + $0x214] ss:$8 sps:$4 sm:$0xff]   ;;  %v1996_v37 = vld [vmem:[%s2459_s1 + $0xc4] ss:$8 sps:$4 sm:$0xff]  }
  0x8d   : > { %1318 = vmatprep.subr.bf16.mxu1 %v1948_v3  ;;  %v1927_v33 = vld [vmem:[%s2459_s1 + $0x200] ss:$8 sps:$4 sm:$0xff]   ;;  %v1992_v35 = vld [vmem:[%s2459_s1 + $0xb0] ss:$8 sps:$4 sm:$0xff]   ;;  %v2019_v36 = vld [vmem:[%s2457_s6 + $0x4] ss:$24 sps:$4 sm:$0xff]  }
  0x8e   : > { %v1933_v38 = vld [vmem:[%s2459_s1 + $0x210] ss:$8 sps:$4 sm:$0xff]   ;;  %1342 = vmatprep.mubr.bf16.mxu1 %v2019_v36  ;;  %v2025_v39 = vld [vmem:[%s2457_s6 + $0x14] ss:$24 sps:$4 sm:$0xff]   ;;  %v1998_v41 = vld [vmem:[%s2459_s1 + $0xc0] ss:$8 sps:$4 sm:$0xff]  }
  0x8f   : > { %1364 = vmatpush1.bf16.msra.mxu0 %v1890_v50  ;;  %v1941_v40 = vld [vmem:[%s2459_s1 + $0x224] ss:$8 sps:$4 sm:$0xff]   ;;  %v2002_v42 = vld [vmem:[%s2459_s1 + $0xd4] ss:$8 sps:$4 sm:$0xff]   ;;  %v1939_v43 = vld [vmem:[%s2459_s1 + $0x220] ss:$8 sps:$4 sm:$0xff]  }
  0x90   : > { %1365 = vmatprep.subr.bf16.mxu0 %v1891_v51  ;;  %1319 = vmatpush1.bf16.msra.mxu1 %v1950_v6  ;;  %v1947_v44 = vld [vmem:[%s2459_s1 + $0x234] ss:$8 sps:$4 sm:$0xff]   ;;  %v2004_v45 = vld [vmem:[%s2459_s1 + $0xd0] ss:$8 sps:$4 sm:$0xff]   ;;  %v2008_v46 = vld [vmem:[%s2459_s1 + $0xe4] ss:$8 sps:$4 sm:$0xff]  }
  0x91   : > { %1320 = vmatprep.subr.bf16.mxu1 %v1954_v7  ;;  %v1945_v47 = vld [vmem:[%s2459_s1 + $0x230] ss:$8 sps:$4 sm:$0xff]   ;;  %v1953_v48 = vld [vmem:[%s2459_s1 + $0x244] ss:$8 sps:$4 sm:$0xff]   ;;  %v2010_v49 = vld [vmem:[%s2459_s1 + $0xe0] ss:$8 sps:$4 sm:$0xff]  }
  0x92   : > { %v2014_v50 = vld [vmem:[%s2459_s1 + $0xf4] ss:$8 sps:$4 sm:$0xff]   ;;  %v1951_v51 = vld [vmem:[%s2459_s1 + $0x240] ss:$8 sps:$4 sm:$0xff]   ;;  %v2016_v53 = vld [vmem:[%s2459_s1 + $0xf0] ss:$8 sps:$4 sm:$0xff]  }
  0x93   : > { %1366 = vmatpush1.bf16.msra.mxu0 %v1893_v54  ;;  %v1959_v52 = vld [vmem:[%s2459_s1 + $0x254] ss:$8 sps:$4 sm:$0xff]   ;;  %v1957_v54 = vld [vmem:[%s2459_s1 + $0x250] ss:$8 sps:$4 sm:$0xff]   ;;  %v1965_v55 = vld [vmem:[%s2459_s1 + $0x264] ss:$8 sps:$4 sm:$0xff]  }
  0x94   : > { %1367 = vmatprep.subr.bf16.mxu0 %v1894_v56  ;;  %1321 = vmatpush1.bf16.msra.mxu1 %v1956_v10  ;;  %v2017_v56 = vld [vmem:[%s2457_s6] ss:$24 sps:$4 sm:$0xff]   ;;  %v1971_v58 = vld [vmem:[%s2459_s1 + $0x274] ss:$8 sps:$4 sm:$0xff]   ;;  %v1989_v0 = vld [vmem:[%s2459_s1 + $0x2a4] ss:$8 sps:$4 sm:$0xff]  }
  0x95   : > { %1322 = vmatprep.subr.bf16.mxu1 %v1960_v11  ;;  %v1963_v57 = vld [vmem:[%s2459_s1 + $0x260] ss:$8 sps:$4 sm:$0xff]   ;;  %v1983_v62 = vld [vmem:[%s2459_s1 + $0x294] ss:$8 sps:$4 sm:$0xff]   ;;  %v1993_v3 = vld [vmem:[%s2459_s1 + $0x2b0] ss:$8 sps:$4 sm:$0xff]  }
  0x96   : > { %v1975_v61 = vld [vmem:[%s2459_s1 + $0x280] ss:$8 sps:$4 sm:$0xff]   ;;  %v1995_v2 = vld [vmem:[%s2459_s1 + $0x2b4] ss:$8 sps:$4 sm:$0xff]   ;;  %v2005_v7 = vld [vmem:[%s2459_s1 + $0x2d0] ss:$8 sps:$4 sm:$0xff]  }
  0x97   : > { %1368 = vmatpush1.bf16.msra.mxu0 %v1896_v59  ;;  %v1969_v59 = vld [vmem:[%s2459_s1 + $0x270] ss:$8 sps:$4 sm:$0xff]   ;;  %v2007_v6 = vld [vmem:[%s2459_s1 + $0x2d4] ss:$8 sps:$4 sm:$0xff]   ;;  %p1759_p5 = scmp.ne.s32.totalorder %s2096_s18, 2 }
  0x98   : > { %1369 = vmatprep.subr.bf16.mxu0 %v1897_v60  ;;  %1323 = vmatpush1.bf16.msra.mxu1 %v1962_v14  ;;  %v1977_v60 = vld [vmem:[%s2459_s1 + $0x284] ss:$8 sps:$4 sm:$0xff]   ;;  %v2022_v10 = vld [vmem:[%s2459_s1 + $0x2f4] ss:$8 sps:$4 sm:$0xff]   ;;  %v2020_v11 = vld [vmem:[%s2459_s1 + $0x2f0] ss:$8 sps:$4 sm:$0xff]  }
  0x99   : > { %1324 = vmatprep.subr.bf16.mxu1 %v1966_v15 }
  0x9b   : > { %1370 = vmatpush1.bf16.msra.mxu0 %v1899_v63  ;;  %v1981_v63 = vld [vmem:[%s2459_s1 + $0x290] ss:$8 sps:$4 sm:$0xff]  }
  0x9c   : > { %1371 = vmatprep.subr.bf16.mxu0 %v1900_v1  ;;  %1325 = vmatpush1.bf16.msra.mxu1 %v1968_v18  ;;  %v1987_v1 = vld [vmem:[%s2459_s1 + $0x2a0] ss:$8 sps:$4 sm:$0xff]  }
  0x9d   : > { %1326 = vmatprep.subr.bf16.mxu1 %v1972_v19 }
  0x9f   : > { %1372 = vmatpush1.bf16.msra.mxu0 %v1902_v4  ;;  %v2001_v4 = vld [vmem:[%s2459_s1 + $0x2c4] ss:$8 sps:$4 sm:$0xff]  }
  0xa0   : > { %1373 = vmatprep.subr.bf16.mxu0 %v1903_v5  ;;  %1327 = vmatpush1.bf16.msra.mxu1 %v1974_v22  ;;  %v1999_v5 = vld [vmem:[%s2459_s1 + $0x2c0] ss:$8 sps:$4 sm:$0xff]  }
  0xa1   : > { %1328 = vmatprep.subr.bf16.mxu1 %v1978_v23  ;;  %v696_v23 = vld [vmem:[#allocation2 + $0x10] sm:$0xff] }
  0xa3   : > { %1374 = vmatpush1.bf16.msra.mxu0 %v1905_v8  ;;  %v2013_v8 = vld [vmem:[%s2459_s1 + $0x2e4] ss:$8 sps:$4 sm:$0xff]  }
  0xa4   : > { %1375 = vmatprep.subr.bf16.mxu0 %v1906_v9  ;;  %1329 = vmatpush1.bf16.msra.mxu1 %v1980_v26  ;;  %v2011_v9 = vld [vmem:[%s2459_s1 + $0x2e0] ss:$8 sps:$4 sm:$0xff]  }
  0xa5   : > { %1330 = vmatprep.subr.bf16.mxu1 %v1984_v27  ;;  %v697_v27 = vld [vmem:[#allocation2 + $0x18] sm:$0xff] }
  0xa7   : > { %1376 = vmatpush1.bf16.msra.mxu0 %v1908_v12  ;;  %v2023_v12 = vld [vmem:[%s2457_s6 + $0x10] ss:$24 sps:$4 sm:$0xff]  }
  0xa8   : > { %1377 = vmatprep.subr.bf16.mxu0 %v1909_v13  ;;  %1331 = vmatpush1.bf16.msra.mxu1 %v1986_v30 }
  0xa9   : > { %1332 = vmatprep.subr.bf16.mxu1 %v1990_v32 }
  0xab   : > { %1378 = vmatpush1.bf16.msra.mxu0 %v1911_v16 }
  0xac   : > { %1379 = vmatprep.subr.bf16.mxu0 %v1912_v17  ;;  %1333 = vmatpush1.bf16.msra.mxu1 %v1992_v35  ;;  %v694_v17 = vld [vmem:[#allocation2] sm:$0xff] }
  0xad   : > { %1334 = vmatprep.subr.bf16.mxu1 %v1996_v37  ;;  %v1455_v35 = vld [vmem:[%s682_s5] sm:$0x3] (!%p1759_p5) }
  0xaf   : > { %1380 = vmatpush1.bf16.msra.mxu0 %v1914_v20  ;;  %v695_v20 = vld [vmem:[#allocation2 + $0x8] sm:$0xff] }
  0xb0   : > { %1381 = vmatprep.subr.bf16.mxu0 %v1915_v21  ;;  %1335 = vmatpush1.bf16.msra.mxu1 %v1998_v41 }
  0xb1   : > { %1336 = vmatprep.subr.bf16.mxu1 %v2002_v42 }
  0xb3   : > { %1382 = vmatpush1.bf16.msra.mxu0 %v1917_v24 }
  0xb4   : > { %1383 = vmatprep.subr.bf16.mxu0 %v1918_v25  ;;  %1337 = vmatpush1.bf16.msra.mxu1 %v2004_v45 }
  0xb5   : > { %1338 = vmatprep.subr.bf16.mxu1 %v2008_v46 }
  0xb7   : > { %1384 = vmatpush1.bf16.msra.mxu0 %v1922_v28 }
  0xb8   : > { %1396 = vmatprep.subr.bf16.mxu0 %v1929_v29  ;;  %1339 = vmatpush1.bf16.msra.mxu1 %v2010_v49 }
  0xb9   : > { %1340 = vmatprep.subr.bf16.mxu1 %v2014_v50 }
  0xba   : > { %1386 = vmatmul.mubr.bf16.vlgmr.msra.gmra.mrb[0].mxu0 %v1924_v31 }
  0xbb   : > { %1397 = vmatpush1.bf16.msra.mxu0 %v1927_v33  ;;  %1428 = vmatprep.mubr.bf16.mxu0 %v2025_v39  ;;  %v1457_v33 = vlaneseq (!%p1759_p5) }
  0xbc   : > { %1398 = vmatprep.subr.bf16.mxu0 %v1935_v34  ;;  %1341 = vmatpush1.bf16.msra.mxu1 %v2016_v53 }
  0xbd   : > { %v1458_v34 = vshrl.u32 (!%p1759_p5), %v1457_v33, 7 }
  0xbf   : > { %1399 = vmatpush1.bf16.msra.mxu0 %v1933_v38  ;;  %1343 = vmatmul.mubr.bf16.vlgmr.msra.gmra.mrb[0].mxu1 %v2017_v56  ;;  %v1459_v37 = vsub.s32 (!%p1759_p5), 0, %v1458_v34  ;;  %v1463_v38 = vsub.s32 (!%p1759_p5), 1, %v1458_v34 }
  0xc0   : > { %1400 = vmatprep.subr.bf16.mxu0 %v1941_v40 }
  0xc1   : > { %v1460_v42 = vrot.slane (!%p1759_p5), %v1455_v35, %v1459_v37 }
  0xc3   : > { %1401 = vmatpush1.bf16.msra.mxu0 %v1939_v43  ;;  %v1464_v43 = vrot.slane (!%p1759_p5), %v1455_v35, %v1463_v38 }
  0xc4   : > { %1402 = vmatprep.subr.bf16.mxu0 %v1947_v44 }
  0xc7   : > { %1403 = vmatpush1.bf16.msra.mxu0 %v1945_v47 }
  0xc8   : > { %1404 = vmatprep.subr.bf16.mxu0 %v1953_v48 }
  0xcb   : > { %1405 = vmatpush1.bf16.msra.mxu0 %v1951_v51 }
  0xcc   : > { %1406 = vmatprep.subr.bf16.mxu0 %v1959_v52 }
  0xcf   : > { %1407 = vmatpush1.bf16.msra.mxu0 %v1957_v54 }
  0xd0   : > { %1408 = vmatprep.subr.bf16.mxu0 %v1965_v55 }
  0xd3   : > { %1409 = vmatpush1.bf16.msra.mxu0 %v1963_v57 }
  0xd4   : > { %1410 = vmatprep.subr.bf16.mxu0 %v1971_v58 }
  0xd7   : > { %1411 = vmatpush1.bf16.msra.mxu0 %v1969_v59 }
  0xd8   : > { %1412 = vmatprep.subr.bf16.mxu0 %v1977_v60 }
  0xdb   : > { %1413 = vmatpush1.bf16.msra.mxu0 %v1975_v61 }
  0xdc   : > { %1414 = vmatprep.subr.bf16.mxu0 %v1983_v62 }
  0xdf   : > { %1415 = vmatpush1.bf16.msra.mxu0 %v1981_v63 }
  0xe0   : > { %1416 = vmatprep.subr.bf16.mxu0 %v1989_v0 }
  0xe3   : > { %1417 = vmatpush1.bf16.msra.mxu0 %v1987_v1 }
  0xe4   : > { %1418 = vmatprep.subr.bf16.mxu0 %v1995_v2 }
  0xe7   : > { %1419 = vmatpush1.bf16.msra.mxu0 %v1993_v3 }
  0xe8   : > { %1420 = vmatprep.subr.bf16.mxu0 %v2001_v4 }
  0xeb   : > { %1421 = vmatpush1.bf16.msra.mxu0 %v1999_v5 }
  0xec   : > { %1422 = vmatprep.subr.bf16.mxu0 %v2007_v6 }
  0xef   : > { %1423 = vmatpush1.bf16.msra.mxu0 %v2005_v7 }
  0xf0   : > { %1424 = vmatprep.subr.bf16.mxu0 %v2013_v8 }
  0xf3   : > { %1425 = vmatpush1.bf16.msra.mxu0 %v2011_v9 }
  0xf4   : > { %1426 = vmatprep.subr.bf16.mxu0 %v2022_v10 }
  0xf7   : > { %1427 = vmatpush1.bf16.msra.mxu0 %v2020_v11 }
  0xfa   : > { %1429 = vmatmul.mubr.bf16.vlgmr.msra.gmra.mrb[0].mxu0 %v2023_v12 }
 0x192   : > { %v1344_v13 = vpop.f32.mrb[0].mxu1 }
 0x193   : > { %v1346_v14 = vpop.f32.mrb[1].mxu1 }
 0x194   : > { %v1348_v15 = vpop.f32.mrb[2].mxu1 }
 0x195   : > { %v1350_v16 = vpop.f32.mrb[3].mxu1 }
 0x1cd   : > { %v1430_v18 = vpop.f32.mrb[0].mxu0 }
 0x1ce   : > { %v1772_v19 = vadd.f32 %v1430_v18, %v1344_v13  ;;  %v1432_v21 = vpop.f32.mrb[1].mxu0 }
 0x1cf   : > { %v1773_v22 = vadd.f32 %v1432_v21, %v1346_v14  ;;  %v1434_v24 = vpop.f32.mrb[2].mxu0  ;;  %1450 = sbr.rel (%p1759_p5) target bundleno = 484 (0x1e4), region = 101 }
 0x1d0   : > { %v1439_v25 = vadd.f32 %v1772_v19, %v694_v17  ;;  %v1774_v26 = vadd.f32 %v1434_v24, %v1348_v15  ;;  %v1436_v28 = vpop.f32.mrb[3].mxu0 }
 0x1d1   : > { %v1440_v29 = vadd.f32 %v1773_v22, %v695_v20  ;;  %v1775_v30 = vadd.f32 %v1436_v28, %v1350_v16 }
 0x1d2   : > { %1443 = vst [vmem:[#allocation2] sm:$0xff] %v1439_v25  ;;  %v1441_v31 = vadd.f32 %v1774_v26, %v696_v23 }
 0x1d3   : > { %1444 = vst [vmem:[#allocation2 + $0x8] sm:$0xff] %v1440_v29  ;;  %v1442_v32 = vadd.f32 %v1775_v30, %v697_v27 }
 0x1d4   : > { %1445 = vst [vmem:[#allocation2 + $0x10] sm:$0xff] %v1441_v31 }
 0x1d5   : > { %1446 = vst [vmem:[#allocation2 + $0x18] sm:$0xff] %v1442_v32 }
 0x1d9   : > { %v1451_v36 = vld [vmem:[#allocation2] sm:$0xff] }
 0x1da   : > { %v1452_v39 = vld [vmem:[#allocation2 + $0x8] sm:$0xff]  ;;  %v1467_v44 = vadd.f32 %v1460_v42, %v1451_v36 }
 0x1db   : > { %v1453_v40 = vld [vmem:[#allocation2 + $0x10] sm:$0xff]  ;;  %v1468_v45 = vadd.f32 %v1464_v43, %v1452_v39 }
 0x1dc   : > { %v1454_v41 = vld [vmem:[#allocation2 + $0x18] sm:$0xff]  ;;  %v1469_v46 = vadd.f32 %v1460_v42, %v1453_v40  ;;  %v1471_v48 = vmax.f32 %v1467_v44, 0.0 }
 0x1dd   : > { %v1470_v47 = vadd.f32 %v1464_v43, %v1454_v41  ;;  %v1472_v49 = vmax.f32 %v1468_v45, 0.0 }
 0x1de   : > { %v1473_v50 = vmax.f32 %v1469_v46, 0.0 }
 0x1df   : > { %v1474_v51 = vmax.f32 %v1470_v47, 0.0  ;;  %v1769_v52 = vpack.c.bf16 %v1472_v49, %v1471_v48 }
 0x1e1   : > { %v1770_v53 = vpack.c.bf16 %v1474_v51, %v1473_v50  ;;  %1487 = vst [vmem:[%s2461_s25] sm:$0xff] %v1769_v52 }
 0x1e3   : > { %1488 = vst [vmem:[%s2461_s25 + $0x8] sm:$0xff] %v1770_v53 }
 0x1e4 PF: > { %1495 = sbr.rel (!%p2229_p12) target bundleno = 492 (0x1ec), region = 105  ;;  %s1771_s14 = sshll.u32 (%p2229_p12), %s2100_s19, 3 }
 0x1e5   : > { %s1501_s0 = scalar_lea.vmem (%p2229_p12), %s2618_s3, %s1771_s14 }
 0x1e8   : > { %v1531_v54 = vld [vmem:[%s2461_s25] sm:$0xff] (%p2229_p12) }
 0x1e9   : > { %1532 = vst [vmem:[%s1501_s0] sm:$0xff] (%p2229_p12), %v1531_v54 }
 0x1ea   : > { %v1533_v55 = vld [vmem:[%s2461_s25 + $0x8] sm:$0xff] (%p2229_p12) }
 0x1eb   : > { %1534 = vst [vmem:[%s1501_s0 + $0x10] sm:$0xff] %v1533_v55 }
 0x1ec PF: > { %s13_s22 = sadd.s32 1, %s2112_s22   ;;  %s2628_s25 = sld [smem:[#allocation6_spill]] }
 0x1ed   : > { %p10_p6 = scmp.ge.s32.totalorder %s13_s22, 8   ;;  %s2629_s12 = smov %s2076_s13 }
 0x1ee   : > { %s2630_s13 = smov %s2227_s9  ;;  %s2631_s14 = smov %s2084_s15 }
 0x1ef   : > { %s2632_s15 = smov %s2224_s8  ;;  %s2633_s16 = smov %s2092_s17 }
 0x1f0   : > { %s2634_s17 = smov %s2210_s30  ;;  %s2635_s18 = smov %s2104_s20 }
 0x1f1   : > { %s2636_s19 = smov %s2108_s21  ;;  %s2637_s20 = smov %s2640_s24 }
 0x1f2   : > { %s2638_s21 = smov %s2628_s25  ;;  %12 = sbr.rel (!%p10_p6) target bundleno = 9 (0x9), region = 185 }

// kernel: _lambda_.36
= control target key start
LH: loop header
LB: loop body
LE: loop exit
PB: predicated region body
PF: predicated region fallthrough
CT: control target
= control target key end

     0   :  { %s1079_s12 = smov 0   ;;  %s1081_s13 = smov 0   ;;  %s1267_s0 = inlined_call_operand.vmem [shape: bf16[16,256], index: 0, kind: input, shape index: {}]   ;;  %s1268_s1 = inlined_call_operand.vmem [shape: bf16[256,512], index: 1, kind: input, shape index: {}]   ;;  %s1269_s2 = inlined_call_operand.vmem [shape: f32[1,512], index: 2, kind: input, shape index: {}]   ;;  %s1270_s3 = inlined_call_operand.vmem [shape: bf16[16,512], index: 3, kind: output, shape index: {}]  }
   0x1   :  { %s1083_s14 = smov 0   ;;  %s1085_s15 = smov 0  }
   0x2   :  { %s1087_s16 = smov 0  }
   0x3 LB: > { %s32_s17 = sadd.s32 1, %s1053_s15  ;;  %s871_s18 = sadd.s32 4294967295, %s1057_s16   ;;  %s1057_s16 = sphi %s1087_s16, %s13_s16   ;;  %s1053_s15 = sphi %s1085_s15, %s1275_s15   ;;  %s1049_s14 = sphi %s1083_s14, %s1274_s14   ;;  %s1045_s13 = sphi %s1081_s13, %s1273_s13   ;;  %s1041_s12 = sphi %s1079_s12, %s1272_s12  }
   0x4   : > { %p34_p0 = scmp.ge.s32.totalorder %s32_s17, 2  ;;  %p76_p1 = scmp.ne.s32.totalorder %s1045_s13, %s1041_s12 }
   0x5   : > { %p77_p2 = scmp.eq.s32.totalorder %s1057_s16, 0  ;;  %p134_p4 = scmp.eq.s32.totalorder %s871_s18, 1 }
   0x6   : > { %s1277_s17 = smov (%p34_p0, %s32_s17), 0  ;;  %s69_s20 = sadd.s32 1, %s1045_s13 }
   0x7   : > { %p78_p3 = por %p77_p2, %p76_p1  ;;  %s65_s19 = ssub.s32 %s1053_s15, %s1277_s17 }
   0x8   : > { %p67_p5 = scmp.eq.s32.totalorder %s65_s19, 0  ;;  %p1114_p6 = por %p134_p4, %p76_p1 }
   0x9   : > { %p875_p7 = scmp.ge.s32.totalorder %s1057_s16, 2 }
   0xa   : > { %s1119_s22 = scalar_select %p67_p5, %s1045_s13, %s69_s20  }
   0xb   : > { %171 = sbr.rel (%p875_p7) target bundleno = 38 (0x26), region = 20 }
  0x12   : > { %174 = sbr.rel (!%p78_p3) target bundleno = 38 (0x26), region = 24  ;;  %s176_s23 = sand.u32 (%p78_p3), 1, %s1045_s13  }
  0x13   : > { %s924_s24 = sshll.u32 (%p78_p3), %s1053_s15, 3  ;;  %s876_s25 = sshll.u32 (%p78_p3), %s176_s23, 8 }
  0x14   : > { %s1127_s28 = scalar_lea.vmem (%p78_p3), %s1268_s1, %s924_s24  ;;  %s1132_s29 = scalar_lea.vmem (%p78_p3), [#allocation3], %s876_s25 }
  0x15   : > { %v274_v0 = vld [vmem:[%s1127_s28] sm:$0xff] (%p78_p3)  ;;  %v276_v1 = vld [vmem:[%s1127_s28 + $0x10] sm:$0xff] (%p78_p3) }
  0x16   : > { %v278_v2 = vld [vmem:[%s1127_s28 + $0x20] sm:$0xff] (%p78_p3)  ;;  %275 = vst [vmem:[%s1132_s29] sm:$0xff] (%p78_p3), %v274_v0  ;;  %277 = vst [vmem:[%s1132_s29 + $0x8] sm:$0xff] (%p78_p3), %v276_v1  ;;  %v280_v3 = vld [vmem:[%s1127_s28 + $0x30] sm:$0xff] (%p78_p3) }
  0x17   : > { %279 = vst [vmem:[%s1132_s29 + $0x10] sm:$0xff] (%p78_p3), %v278_v2  ;;  %v282_v4 = vld [vmem:[%s1127_s28 + $0x40] sm:$0xff] (%p78_p3)  ;;  %v284_v5 = vld [vmem:[%s1127_s28 + $0x50] sm:$0xff] (%p78_p3)  ;;  %281 = vst [vmem:[%s1132_s29 + $0x18] sm:$0xff] (%p78_p3), %v280_v3 }
  0x18   : > { %283 = vst [vmem:[%s1132_s29 + $0x20] sm:$0xff] (%p78_p3), %v282_v4  ;;  %285 = vst [vmem:[%s1132_s29 + $0x28] sm:$0xff] (%p78_p3), %v284_v5  ;;  %v286_v6 = vld [vmem:[%s1127_s28 + $0x60] sm:$0xff] (%p78_p3)  ;;  %v288_v7 = vld [vmem:[%s1127_s28 + $0x70] sm:$0xff] (%p78_p3) }
  0x19   : > { %v290_v8 = vld [vmem:[%s1127_s28 + $0x80] sm:$0xff]  ;;  %287 = vst [vmem:[%s1132_s29 + $0x30] sm:$0xff] %v286_v6  ;;  %289 = vst [vmem:[%s1132_s29 + $0x38] sm:$0xff] %v288_v7  ;;  %v292_v9 = vld [vmem:[%s1127_s28 + $0x90] sm:$0xff] }
  0x1a   : > { %291 = vst [vmem:[%s1132_s29 + $0x40] sm:$0xff] %v290_v8  ;;  %v294_v10 = vld [vmem:[%s1127_s28 + $0xa0] sm:$0xff]  ;;  %v296_v11 = vld [vmem:[%s1127_s28 + $0xb0] sm:$0xff]  ;;  %293 = vst [vmem:[%s1132_s29 + $0x48] sm:$0xff] %v292_v9 }
  0x1b   : > { %295 = vst [vmem:[%s1132_s29 + $0x50] sm:$0xff] %v294_v10  ;;  %297 = vst [vmem:[%s1132_s29 + $0x58] sm:$0xff] %v296_v11  ;;  %v298_v12 = vld [vmem:[%s1127_s28 + $0xc0] sm:$0xff]  ;;  %v300_v13 = vld [vmem:[%s1127_s28 + $0xd0] sm:$0xff] }
  0x1c   : > { %v302_v14 = vld [vmem:[%s1127_s28 + $0xe0] sm:$0xff]  ;;  %299 = vst [vmem:[%s1132_s29 + $0x60] sm:$0xff] %v298_v12  ;;  %301 = vst [vmem:[%s1132_s29 + $0x68] sm:$0xff] %v300_v13  ;;  %v304_v15 = vld [vmem:[%s1127_s28 + $0xf0] sm:$0xff] }
  0x1d   : > { %303 = vst [vmem:[%s1132_s29 + $0x70] sm:$0xff] %v302_v14  ;;  %v306_v16 = vld [vmem:[%s1127_s28 + $0x100] sm:$0xff]  ;;  %v308_v17 = vld [vmem:[%s1127_s28 + $0x110] sm:$0xff]  ;;  %305 = vst [vmem:[%s1132_s29 + $0x78] sm:$0xff] %v304_v15 }
  0x1e   : > { %307 = vst [vmem:[%s1132_s29 + $0x80] sm:$0xff] %v306_v16  ;;  %309 = vst [vmem:[%s1132_s29 + $0x88] sm:$0xff] %v308_v17  ;;  %v310_v18 = vld [vmem:[%s1127_s28 + $0x120] sm:$0xff]  ;;  %v312_v19 = vld [vmem:[%s1127_s28 + $0x130] sm:$0xff] }
  0x1f   : > { %v314_v20 = vld [vmem:[%s1127_s28 + $0x140] sm:$0xff]  ;;  %311 = vst [vmem:[%s1132_s29 + $0x90] sm:$0xff] %v310_v18  ;;  %313 = vst [vmem:[%s1132_s29 + $0x98] sm:$0xff] %v312_v19  ;;  %v316_v21 = vld [vmem:[%s1127_s28 + $0x150] sm:$0xff] }
  0x20   : > { %315 = vst [vmem:[%s1132_s29 + $0xa0] sm:$0xff] %v314_v20  ;;  %v318_v22 = vld [vmem:[%s1127_s28 + $0x160] sm:$0xff]  ;;  %v320_v23 = vld [vmem:[%s1127_s28 + $0x170] sm:$0xff]  ;;  %317 = vst [vmem:[%s1132_s29 + $0xa8] sm:$0xff] %v316_v21 }
  0x21   : > { %319 = vst [vmem:[%s1132_s29 + $0xb0] sm:$0xff] %v318_v22  ;;  %321 = vst [vmem:[%s1132_s29 + $0xb8] sm:$0xff] %v320_v23  ;;  %v322_v24 = vld [vmem:[%s1127_s28 + $0x180] sm:$0xff]  ;;  %v324_v25 = vld [vmem:[%s1127_s28 + $0x190] sm:$0xff] }
  0x22   : > { %v326_v26 = vld [vmem:[%s1127_s28 + $0x1a0] sm:$0xff]  ;;  %323 = vst [vmem:[%s1132_s29 + $0xc0] sm:$0xff] %v322_v24  ;;  %325 = vst [vmem:[%s1132_s29 + $0xc8] sm:$0xff] %v324_v25  ;;  %v328_v27 = vld [vmem:[%s1127_s28 + $0x1b0] sm:$0xff] }
  0x23   : > { %327 = vst [vmem:[%s1132_s29 + $0xd0] sm:$0xff] %v326_v26  ;;  %v330_v28 = vld [vmem:[%s1127_s28 + $0x1c0] sm:$0xff]  ;;  %v332_v29 = vld [vmem:[%s1127_s28 + $0x1d0] sm:$0xff]  ;;  %329 = vst [vmem:[%s1132_s29 + $0xd8] sm:$0xff] %v328_v27 }
  0x24   : > { %331 = vst [vmem:[%s1132_s29 + $0xe0] sm:$0xff] %v330_v28  ;;  %333 = vst [vmem:[%s1132_s29 + $0xe8] sm:$0xff] %v332_v29  ;;  %v334_v30 = vld [vmem:[%s1127_s28 + $0x1e0] sm:$0xff]  ;;  %v336_v31 = vld [vmem:[%s1127_s28 + $0x1f0] sm:$0xff] }
  0x25   : > { %335 = vst [vmem:[%s1132_s29 + $0xf0] sm:$0xff] %v334_v30  ;;  %337 = vst [vmem:[%s1132_s29 + $0xf8] sm:$0xff] %v336_v31 }
  0x26 PF: > { %p879_p8 = scmp.ge.s32.totalorder %s1057_s16, 1  ;;  %p350_p9 = scmp.lt.s32.totalorder %s1057_s16, 3 }
  0x28   : > { %p351_p10 = pnand %p879_p8, %p350_p9 }
  0x29   : > { %s357_s30 = sand.u32 (!%p351_p10), 1, %s1041_s12   ;;  %v1018_v32 = vld [vmem:[%s1267_s0 + $0x4] ss:$8 sps:$4 sm:$0xff] (!%p351_p10)   ;;  %v1016_v1 = vld [vmem:[%s1267_s0] ss:$8 sps:$4 sm:$0xff] (!%p351_p10)   ;;  %s882_s10 = sshll.u32 (!%p351_p10), %s1049_s14, 1  ;;  %v690_v2 = vlaneseq (!%p351_p10) }
  0x2a   : > { %354 = sbr.rel (%p351_p10) target bundleno = 337 (0x151), region = 66  ;;  %s880_s4 = sshll.u32 (!%p351_p10), %s357_s30, 8  ;;  %662 = vmatprep.mubr.bf16.mxu0 (!%p351_p10), %v1018_v32 }
  0x2b   : > { %s1203_s7 = scalar_lea.vmem (!%p351_p10), [#allocation3], %s880_s4  ;;  %p408_p11 = scmp.lt.s32.totalorder (!%p351_p10), %s882_s10, 3  ;;  %v691_v3 = vshrl.u32 (!%p351_p10), %v690_v2, 7 }
  0x2c   : > { %v968_v33 = vld [vmem:[%s1203_s7 + $0x4] ss:$8 sps:$4 sm:$0xff] (!%p351_p10)   ;;  %v970_v34 = vld [vmem:[%s1203_s7] ss:$8 sps:$4 sm:$0xff] (!%p351_p10)   ;;  %v971_v35 = vld [vmem:[%s1203_s7 + $0x14] ss:$8 sps:$4 sm:$0xff] (!%p351_p10)  }
  0x2d   : > { %630 = vmatprep.subr.bf16.mxu0 (!%p351_p10), %v968_v33  ;;  %v973_v36 = vld [vmem:[%s1203_s7 + $0x10] ss:$8 sps:$4 sm:$0xff] (!%p351_p10)   ;;  %v974_v37 = vld [vmem:[%s1203_s7 + $0x24] ss:$8 sps:$4 sm:$0xff] (!%p351_p10)   ;;  %v976_v38 = vld [vmem:[%s1203_s7 + $0x20] ss:$8 sps:$4 sm:$0xff] (!%p351_p10)  }
  0x2e   : > { %631 = vmatpush1.bf16.msra.mxu0 (!%p351_p10), %v970_v34  ;;  %v977_v39 = vld [vmem:[%s1203_s7 + $0x34] ss:$8 sps:$4 sm:$0xff] (!%p351_p10)   ;;  %v979_v40 = vld [vmem:[%s1203_s7 + $0x30] ss:$8 sps:$4 sm:$0xff] (!%p351_p10)   ;;  %v980_v41 = vld [vmem:[%s1203_s7 + $0x44] ss:$8 sps:$4 sm:$0xff] (!%p351_p10)  }
  0x2f   : > { %632 = vmatprep.subr.bf16.mxu0 (!%p351_p10), %v971_v35  ;;  %v982_v42 = vld [vmem:[%s1203_s7 + $0x40] ss:$8 sps:$4 sm:$0xff] (!%p351_p10)   ;;  %v983_v43 = vld [vmem:[%s1203_s7 + $0x54] ss:$8 sps:$4 sm:$0xff] (!%p351_p10)   ;;  %v985_v44 = vld [vmem:[%s1203_s7 + $0x50] ss:$8 sps:$4 sm:$0xff] (!%p351_p10)  }
  0x30   : > { %v986_v45 = vld [vmem:[%s1203_s7 + $0x64] ss:$8 sps:$4 sm:$0xff] (!%p351_p10)   ;;  %v988_v46 = vld [vmem:[%s1203_s7 + $0x60] ss:$8 sps:$4 sm:$0xff] (!%p351_p10)   ;;  %v989_v47 = vld [vmem:[%s1203_s7 + $0x74] ss:$8 sps:$4 sm:$0xff] (!%p351_p10)  }
  0x31   : > { %v991_v48 = vld [vmem:[%s1203_s7 + $0x70] ss:$8 sps:$4 sm:$0xff]   ;;  %v992_v49 = vld [vmem:[%s1203_s7 + $0x84] ss:$8 sps:$4 sm:$0xff]   ;;  %v994_v50 = vld [vmem:[%s1203_s7 + $0x80] ss:$8 sps:$4 sm:$0xff]  }
  0x32   : > { %633 = vmatpush1.bf16.msra.mxu0 %v973_v36  ;;  %v995_v51 = vld [vmem:[%s1203_s7 + $0x94] ss:$8 sps:$4 sm:$0xff]   ;;  %v997_v52 = vld [vmem:[%s1203_s7 + $0x90] ss:$8 sps:$4 sm:$0xff]   ;;  %v998_v53 = vld [vmem:[%s1203_s7 + $0xa4] ss:$8 sps:$4 sm:$0xff]  }
  0x33   : > { %634 = vmatprep.subr.bf16.mxu0 %v974_v37  ;;  %v1000_v54 = vld [vmem:[%s1203_s7 + $0xa0] ss:$8 sps:$4 sm:$0xff]   ;;  %v1001_v55 = vld [vmem:[%s1203_s7 + $0xb4] ss:$8 sps:$4 sm:$0xff]   ;;  %v1003_v56 = vld [vmem:[%s1203_s7 + $0xb0] ss:$8 sps:$4 sm:$0xff]  }
  0x34   : > { %v1004_v57 = vld [vmem:[%s1203_s7 + $0xc4] ss:$8 sps:$4 sm:$0xff]   ;;  %v1006_v58 = vld [vmem:[%s1203_s7 + $0xc0] ss:$8 sps:$4 sm:$0xff]   ;;  %v1007_v59 = vld [vmem:[%s1203_s7 + $0xd4] ss:$8 sps:$4 sm:$0xff]  }
  0x35   : > { %v1009_v60 = vld [vmem:[%s1203_s7 + $0xd0] ss:$8 sps:$4 sm:$0xff]   ;;  %v1010_v61 = vld [vmem:[%s1203_s7 + $0xe4] ss:$8 sps:$4 sm:$0xff]   ;;  %v1012_v62 = vld [vmem:[%s1203_s7 + $0xe0] ss:$8 sps:$4 sm:$0xff]  }
  0x36   : > { %635 = vmatpush1.bf16.msra.mxu0 %v976_v38  ;;  %v1013_v63 = vld [vmem:[%s1203_s7 + $0xf4] ss:$8 sps:$4 sm:$0xff]   ;;  %v1015_v0 = vld [vmem:[%s1203_s7 + $0xf0] ss:$8 sps:$4 sm:$0xff]   ;;  %s1279_s10 = smov (!%p408_p11, %s882_s10), 3  ;;  %v692_v4 = vsub.s32 0, %v691_v3 }
  0x37   : > { %636 = vmatprep.subr.bf16.mxu0 %v977_v39  ;;  %s410_s19 = scalar_lea.vmem %s1269_s2, %s1279_s10  ;;  %v696_v6 = vsub.s32 1, %v691_v3  ;;  %s881_s20 = sshll.u32 %s357_s30, 4 }
  0x38   : > { %v688_v5 = vld [vmem:[%s410_s19] sm:$0x3]  ;;  %s392_s23 = scalar_lea.vmem [#allocation4], %s881_s20  ;;  %s927_s24 = sshll.u32 (%p1114_p6), %s1049_s14, 3 }
  0x39   : > { %v693_v7 = vrot.slane %v688_v5, %v692_v4  ;;  %v697_v8 = vrot.slane %v688_v5, %v696_v6  ;;  %s730_s26 = scalar_lea.vmem (%p1114_p6), %s1270_s3, %s927_s24 }
  0x3a   : > { %637 = vmatpush1.bf16.msra.mxu0 %v979_v40 }
  0x3b   : > { %638 = vmatprep.subr.bf16.mxu0 %v980_v41 }
  0x3e   : > { %639 = vmatpush1.bf16.msra.mxu0 %v982_v42 }
  0x3f   : > { %640 = vmatprep.subr.bf16.mxu0 %v983_v43 }
  0x42   : > { %641 = vmatpush1.bf16.msra.mxu0 %v985_v44 }
  0x43   : > { %642 = vmatprep.subr.bf16.mxu0 %v986_v45 }
  0x46   : > { %643 = vmatpush1.bf16.msra.mxu0 %v988_v46 }
  0x47   : > { %644 = vmatprep.subr.bf16.mxu0 %v989_v47 }
  0x4a   : > { %645 = vmatpush1.bf16.msra.mxu0 %v991_v48 }
  0x4b   : > { %646 = vmatprep.subr.bf16.mxu0 %v992_v49 }
  0x4e   : > { %647 = vmatpush1.bf16.msra.mxu0 %v994_v50 }
  0x4f   : > { %648 = vmatprep.subr.bf16.mxu0 %v995_v51 }
  0x52   : > { %649 = vmatpush1.bf16.msra.mxu0 %v997_v52 }
  0x53   : > { %650 = vmatprep.subr.bf16.mxu0 %v998_v53 }
  0x56   : > { %651 = vmatpush1.bf16.msra.mxu0 %v1000_v54 }
  0x57   : > { %652 = vmatprep.subr.bf16.mxu0 %v1001_v55 }
  0x5a   : > { %653 = vmatpush1.bf16.msra.mxu0 %v1003_v56 }
  0x5b   : > { %654 = vmatprep.subr.bf16.mxu0 %v1004_v57 }
  0x5e   : > { %655 = vmatpush1.bf16.msra.mxu0 %v1006_v58 }
  0x5f   : > { %656 = vmatprep.subr.bf16.mxu0 %v1007_v59 }
  0x62   : > { %657 = vmatpush1.bf16.msra.mxu0 %v1009_v60 }
  0x63   : > { %658 = vmatprep.subr.bf16.mxu0 %v1010_v61 }
  0x66   : > { %659 = vmatpush1.bf16.msra.mxu0 %v1012_v62 }
  0x67   : > { %660 = vmatprep.subr.bf16.mxu0 %v1013_v63 }
  0x6a   : > { %661 = vmatpush1.bf16.msra.mxu0 %v1015_v0 }
  0x6d   : > { %663 = vmatmul.mubr.bf16.vlgmr.msra.gmra.mrb[0].mxu0 %v1016_v1 }
 0x140   : > { %v664_v9 = vpop.f32.mrb[0].mxu0 }
 0x141   : > { %v700_v10 = vadd.f32 %v693_v7, %v664_v9  ;;  %v666_v11 = vpop.f32.mrb[1].mxu0 }
 0x142   : > { %v701_v12 = vadd.f32 %v697_v8, %v666_v11  ;;  %v668_v13 = vpop.f32.mrb[2].mxu0  ;;  %724 = sbr.rel (!%p1114_p6) target bundleno = 337 (0x151), region = 82 }
 0x143   : > { %v702_v14 = vadd.f32 %v693_v7, %v668_v13  ;;  %v670_v15 = vpop.f32.mrb[3].mxu0 }
 0x144   : > { %v925_v16 = vpack.c.bf16 %v701_v12, %v700_v10  ;;  %v703_v17 = vadd.f32 %v697_v8, %v670_v15 }
 0x146   : > { %716 = vst [vmem:[%s392_s23] sm:$0xff] %v925_v16  ;;  %v926_v18 = vpack.c.bf16 %v703_v17, %v702_v14 }
 0x148   : > { %717 = vst [vmem:[%s392_s23 + $0x8] sm:$0xff] %v926_v18 }
 0x14d   : > { %v760_v19 = vld [vmem:[%s392_s23] sm:$0xff] }
 0x14e   : > { %761 = vst [vmem:[%s730_s26] sm:$0xff] %v760_v19 }
 0x14f   : > { %v762_v20 = vld [vmem:[%s392_s23 + $0x8] sm:$0xff] }
 0x150   : > { %763 = vst [vmem:[%s730_s26 + $0x10] sm:$0xff] %v762_v20 }
 0x151 PF: > { %s13_s16 = sadd.s32 1, %s1057_s16   ;;  %s1272_s12 = smov %s1045_s13 }
 0x152   : > { %p10_p12 = scmp.ge.s32.totalorder %s13_s16, 4   ;;  %s1273_s13 = smov %s1119_s22 }
 0x153   : > { %s1274_s14 = smov %s1053_s15  ;;  %s1275_s15 = smov %s1277_s17 }
 0x154   :  { %12 = sbr.rel (!%p10_p12) target bundleno = 3 (0x3), region = 157 }

// kernel: _lambda_.39
= control target key start
LH: loop header
LB: loop body
LE: loop exit
PB: predicated region body
PF: predicated region fallthrough
CT: control target
= control target key end

     0   :  { %s2615_s0 = inlined_call_operand.vmem [shape: bf16[16,4608], index: 0, kind: input, shape index: {}]   ;;  %s2616_s1 = inlined_call_operand.vmem [shape: bf16[4608,512], index: 1, kind: input, shape index: {}]   ;;  %s2617_s2 = inlined_call_operand.vmem [shape: f32[1,512], index: 2, kind: input, shape index: {}]   ;;  %s2618_s3 = inlined_call_operand.vmem [shape: bf16[16,512], index: 3, kind: output, shape index: {}]  }
   0x1   :  { %2620 = sst [smem:[#allocation7_spill]] %s2615_s0 }
   0x2   :  { %2621 = sst [smem:[#allocation8_spill]] %s2616_s1 }
   0x3   :  { %s2135_s12 = smov 0   ;;  %s2137_s13 = smov 0  }
   0x4   :  { %s2139_s14 = smov 0   ;;  %s2141_s15 = smov 0  }
   0x5   :  { %s2143_s16 = smov 0   ;;  %s2145_s17 = smov 0  }
   0x6   :  { %s2147_s18 = smov 0   ;;  %s2149_s19 = smov 0  }
   0x7   :  { %s2151_s20 = smov 0   ;;  %s2153_s21 = smov 0  }
   0x8   :  { %s2155_s22 = smov 0  }
   0x9 LB: > { %s1645_s23 = sadd.s32 4294967295, %s2112_s22   ;;  %s25_s24 = sadd.s32 1, %s2104_s20  ;;  %s2112_s22 = sphi %s2155_s22, %s13_s22   ;;  %s2108_s21 = sphi %s2153_s21, %s2638_s21   ;;  %s2104_s20 = sphi %s2151_s20, %s2637_s20   ;;  %s2100_s19 = sphi %s2149_s19, %s2636_s19   ;;  %s2096_s18 = sphi %s2147_s18, %s2635_s18   ;;  %s2092_s17 = sphi %s2145_s17, %s2634_s17   ;;  %s2088_s16 = sphi %s2143_s16, %s2633_s16   ;;  %s2084_s15 = sphi %s2141_s15, %s2632_s15   ;;  %s2080_s14 = sphi %s2139_s14, %s2631_s14   ;;  %s2076_s13 = sphi %s2137_s13, %s2630_s13   ;;  %s2072_s12 = sphi %s2135_s12, %s2629_s12  }
   0xa   : > { %p26_p0 = scmp.ge.s32.totalorder %s25_s24, 6  ;;  %s32_s25 = sadd.s32 1, %s2108_s21 }
   0xb   : > { %s41_s26 = sadd.s32 1, %s2092_s17  ;;  %p48_p1 = scmp.ne.s32.totalorder %s2092_s17, %s2088_s16 }
   0xc   : > { %s2640_s24 = smov (%p26_p0, %s25_s24), 0  ;;  %s2642_s25 = smov (!%p26_p0, %s32_s25), %s2108_s21 }
   0xd   : > { %s37_s27 = ssub.s32 %s2104_s20, %s2640_s24  ;;  %p49_p2 = scmp.eq.s32.totalorder %s2112_s22, 0 }
   0xe   : > { %p34_p3 = scmp.ge.s32.totalorder %s2642_s25, 2  ;;  %p39_p4 = scmp.eq.s32.totalorder %s37_s27, 0 }
   0xf   : > { %p2202_p5 = por %p49_p2, %p48_p1  ;;  %s69_s29 = sadd.s32 1, %s2084_s15 }
  0x10   : > { %s2644_s25 = smov (%p34_p3, %s2642_s25), 0  ;;  %p76_p6 = scmp.ne.s32.totalorder %s2084_s15, %s2080_s14 }
  0x11   : > { %2623 = sst [smem:[#allocation6_spill]] %s2644_s25  ;;  %s65_s4 = ssub.s32 %s2108_s21, %s2644_s25 }
  0x12   : > { %s2210_s30 = scalar_select %p39_p4, %s2092_s17, %s41_s26  }
  0x13   : > { %s66_s5 = sor.u32 %s65_s4, %s37_s27  ;;  %p121_p7 = scmp.eq.s32.totalorder %s65_s4, 0 }
  0x14   : > { %p67_p8 = scmp.eq.s32.totalorder %s66_s5, 0  ;;  %p2216_p9 = por %p76_p6, %p49_p2 }
  0x15   : > { %s123_s7 = sadd.s32 1, %s2076_s13  ;;  %p133_p10 = scmp.ne.s32.totalorder %s2076_s13, %s2072_s12 }
  0x16   : > { %s2224_s8 = scalar_select %p67_p8, %s2084_s15, %s69_s29  }
  0x17   : > { %s2227_s9 = scalar_select %p121_p7, %s2076_s13, %s123_s7  }
  0x18   : > { %p134_p11 = scmp.eq.s32.totalorder %s1645_s23, 11  ;;  %p1648_p13 = scmp.ge.s32.totalorder %s2112_s22, 12 }
  0x1a   : > { %p2229_p12 = por %p134_p11, %p133_p10  ;;  %156 = sbr.rel (%p1648_p13) target bundleno = 103 (0x67), region = 16 }
  0x21   : > { %159 = sbr.rel (!%p2202_p5) target bundleno = 45 (0x2d), region = 20  ;;  %s161_s11 = sand.u32 (%p2202_p5), 1, %s2092_s17  }
  0x22   : > { %s1767_s26 = smul.u32 (%p2202_p5), 24, %s2104_s20  ;;  %s2626_s0 = sld [smem:[#allocation7_spill]] (%p2202_p5) }
  0x23   : > { %s1780_s27 = smul.u32 (%p2202_p5), 48, %s161_s11 }
  0x25   : > { %s163_s23 = scalar_lea.vmem (%p2202_p5), [#allocation3], %s1780_s27 }
  0x28   : > { %s169_s5 = scalar_lea.vmem %s2626_s0, %s1767_s26 }
  0x29   : > { %v182_v0 = vld [vmem:[%s169_s5] sm:$0xff]  ;;  %v184_v1 = vld [vmem:[%s169_s5 + $0x8] sm:$0xff]  ;;  %v186_v2 = vld [vmem:[%s169_s5 + $0x10] sm:$0xff] }
  0x2a   : > { %183 = vst [vmem:[%s163_s23] sm:$0xff] %v182_v0  ;;  %185 = vst [vmem:[%s163_s23 + $0x8] sm:$0xff] %v184_v1  ;;  %v188_v3 = vld [vmem:[%s169_s5 + $0x90] sm:$0xff]  ;;  %v190_v4 = vld [vmem:[%s169_s5 + $0x98] sm:$0xff] }
  0x2b   : > { %187 = vst [vmem:[%s163_s23 + $0x10] sm:$0xff] %v186_v2  ;;  %v192_v5 = vld [vmem:[%s169_s5 + $0xa0] sm:$0xff]  ;;  %189 = vst [vmem:[%s163_s23 + $0x18] sm:$0xff] %v188_v3 }
  0x2c   : > { %191 = vst [vmem:[%s163_s23 + $0x20] sm:$0xff] %v190_v4  ;;  %193 = vst [vmem:[%s163_s23 + $0x28] sm:$0xff] %v192_v5 }
  0x2d PF: > { %199 = sbr.rel (!%p2216_p9) target bundleno = 103 (0x67), region = 43  ;;  %s201_s28 = sand.u32 (%p2216_p9), 1, %s2084_s15  }
  0x2e   : > { %s1781_s7 = smul.u32 (%p2216_p9), 768, %s201_s28  ;;  %s1650_s11 = sshll.u32 (%p2216_p9), %s2108_s21, 1 }
  0x2f   : > { %s1768_s26 = smul.u32 (%p2216_p9), 384, %s2104_s20  ;;  %s2627_s1 = sld [smem:[#allocation8_spill]] (%p2216_p9) }
  0x30   : > { %s2254_s6 = scalar_lea.vmem (%p2216_p9), [#allocation4], %s1781_s7 }
  0x31   : > { %s207_s27 = sadd.s32 (%p2216_p9), %s1768_s26, %s1650_s11 }
  0x32   : > { %s1652_s29 = sshll.u32 (%p2216_p9), %s207_s27, 2 }
  0x35   : > { %s2249_s5 = scalar_lea.vmem %s2627_s1, %s1652_s29 }
  0x36   : > { %v427_v6 = vld [vmem:[%s2249_s5] sm:$0xff]  ;;  %v429_v7 = vld [vmem:[%s2249_s5 + $0x10] sm:$0xff] }
  0x37   : > { %v431_v8 = vld [vmem:[%s2249_s5 + $0x20] sm:$0xff]  ;;  %428 = vst [vmem:[%s2254_s6] sm:$0xff] %v427_v6  ;;  %430 = vst [vmem:[%s2254_s6 + $0x8] sm:$0xff] %v429_v7  ;;  %v433_v9 = vld [vmem:[%s2249_s5 + $0x30] sm:$0xff] }
  0x38   : > { %432 = vst [vmem:[%s2254_s6 + $0x10] sm:$0xff] %v431_v8  ;;  %v435_v10 = vld [vmem:[%s2249_s5 + $0x40] sm:$0xff]  ;;  %v437_v11 = vld [vmem:[%s2249_s5 + $0x50] sm:$0xff]  ;;  %434 = vst [vmem:[%s2254_s6 + $0x18] sm:$0xff] %v433_v9 }
  0x39   : > { %436 = vst [vmem:[%s2254_s6 + $0x20] sm:$0xff] %v435_v10  ;;  %438 = vst [vmem:[%s2254_s6 + $0x28] sm:$0xff] %v437_v11  ;;  %v439_v12 = vld [vmem:[%s2249_s5 + $0x60] sm:$0xff]  ;;  %v441_v13 = vld [vmem:[%s2249_s5 + $0x70] sm:$0xff] }
  0x3a   : > { %v443_v14 = vld [vmem:[%s2249_s5 + $0x80] sm:$0xff]  ;;  %440 = vst [vmem:[%s2254_s6 + $0x30] sm:$0xff] %v439_v12  ;;  %442 = vst [vmem:[%s2254_s6 + $0x38] sm:$0xff] %v441_v13  ;;  %v445_v15 = vld [vmem:[%s2249_s5 + $0x90] sm:$0xff] }
  0x3b   : > { %444 = vst [vmem:[%s2254_s6 + $0x40] sm:$0xff] %v443_v14  ;;  %v447_v16 = vld [vmem:[%s2249_s5 + $0xa0] sm:$0xff]  ;;  %v449_v17 = vld [vmem:[%s2249_s5 + $0xb0] sm:$0xff]  ;;  %446 = vst [vmem:[%s2254_s6 + $0x48] sm:$0xff] %v445_v15 }
  0x3c   : > { %448 = vst [vmem:[%s2254_s6 + $0x50] sm:$0xff] %v447_v16  ;;  %450 = vst [vmem:[%s2254_s6 + $0x58] sm:$0xff] %v449_v17  ;;  %v451_v18 = vld [vmem:[%s2249_s5 + $0xc0] sm:$0xff]  ;;  %v453_v19 = vld [vmem:[%s2249_s5 + $0xd0] sm:$0xff] }
  0x3d   : > { %v455_v20 = vld [vmem:[%s2249_s5 + $0xe0] sm:$0xff]  ;;  %452 = vst [vmem:[%s2254_s6 + $0x60] sm:$0xff] %v451_v18  ;;  %454 = vst [vmem:[%s2254_s6 + $0x68] sm:$0xff] %v453_v19  ;;  %v457_v21 = vld [vmem:[%s2249_s5 + $0xf0] sm:$0xff] }
  0x3e   : > { %456 = vst [vmem:[%s2254_s6 + $0x70] sm:$0xff] %v455_v20  ;;  %v459_v22 = vld [vmem:[%s2249_s5 + $0x100] sm:$0xff]  ;;  %v461_v23 = vld [vmem:[%s2249_s5 + $0x110] sm:$0xff]  ;;  %458 = vst [vmem:[%s2254_s6 + $0x78] sm:$0xff] %v457_v21 }
  0x3f   : > { %460 = vst [vmem:[%s2254_s6 + $0x80] sm:$0xff] %v459_v22  ;;  %462 = vst [vmem:[%s2254_s6 + $0x88] sm:$0xff] %v461_v23  ;;  %v463_v24 = vld [vmem:[%s2249_s5 + $0x120] sm:$0xff]  ;;  %v465_v25 = vld [vmem:[%s2249_s5 + $0x130] sm:$0xff] }
  0x40   : > { %v467_v26 = vld [vmem:[%s2249_s5 + $0x140] sm:$0xff]  ;;  %464 = vst [vmem:[%s2254_s6 + $0x90] sm:$0xff] %v463_v24  ;;  %466 = vst [vmem:[%s2254_s6 + $0x98] sm:$0xff] %v465_v25  ;;  %v469_v27 = vld [vmem:[%s2249_s5 + $0x150] sm:$0xff] }
  0x41   : > { %468 = vst [vmem:[%s2254_s6 + $0xa0] sm:$0xff] %v467_v26  ;;  %v471_v28 = vld [vmem:[%s2249_s5 + $0x160] sm:$0xff]  ;;  %v473_v29 = vld [vmem:[%s2249_s5 + $0x170] sm:$0xff]  ;;  %470 = vst [vmem:[%s2254_s6 + $0xa8] sm:$0xff] %v469_v27 }
  0x42   : > { %472 = vst [vmem:[%s2254_s6 + $0xb0] sm:$0xff] %v471_v28  ;;  %474 = vst [vmem:[%s2254_s6 + $0xb8] sm:$0xff] %v473_v29  ;;  %v475_v30 = vld [vmem:[%s2249_s5 + $0x180] sm:$0xff]  ;;  %v477_v31 = vld [vmem:[%s2249_s5 + $0x190] sm:$0xff] }
  0x43   : > { %v479_v32 = vld [vmem:[%s2249_s5 + $0x1a0] sm:$0xff]  ;;  %476 = vst [vmem:[%s2254_s6 + $0xc0] sm:$0xff] %v475_v30  ;;  %478 = vst [vmem:[%s2254_s6 + $0xc8] sm:$0xff] %v477_v31  ;;  %v481_v33 = vld [vmem:[%s2249_s5 + $0x1b0] sm:$0xff] }
  0x44   : > { %480 = vst [vmem:[%s2254_s6 + $0xd0] sm:$0xff] %v479_v32  ;;  %v483_v34 = vld [vmem:[%s2249_s5 + $0x1c0] sm:$0xff]  ;;  %v485_v35 = vld [vmem:[%s2249_s5 + $0x1d0] sm:$0xff]  ;;  %482 = vst [vmem:[%s2254_s6 + $0xd8] sm:$0xff] %v481_v33 }
  0x45   : > { %484 = vst [vmem:[%s2254_s6 + $0xe0] sm:$0xff] %v483_v34  ;;  %486 = vst [vmem:[%s2254_s6 + $0xe8] sm:$0xff] %v485_v35  ;;  %v487_v36 = vld [vmem:[%s2249_s5 + $0x1e0] sm:$0xff]  ;;  %v489_v37 = vld [vmem:[%s2249_s5 + $0x1f0] sm:$0xff] }
  0x46   : > { %v491_v38 = vld [vmem:[%s2249_s5 + $0x200] sm:$0xff]  ;;  %488 = vst [vmem:[%s2254_s6 + $0xf0] sm:$0xff] %v487_v36  ;;  %490 = vst [vmem:[%s2254_s6 + $0xf8] sm:$0xff] %v489_v37  ;;  %v493_v39 = vld [vmem:[%s2249_s5 + $0x210] sm:$0xff] }
  0x47   : > { %492 = vst [vmem:[%s2254_s6 + $0x100] sm:$0xff] %v491_v38  ;;  %v495_v40 = vld [vmem:[%s2249_s5 + $0x220] sm:$0xff]  ;;  %v497_v41 = vld [vmem:[%s2249_s5 + $0x230] sm:$0xff]  ;;  %494 = vst [vmem:[%s2254_s6 + $0x108] sm:$0xff] %v493_v39 }
  0x48   : > { %496 = vst [vmem:[%s2254_s6 + $0x110] sm:$0xff] %v495_v40  ;;  %498 = vst [vmem:[%s2254_s6 + $0x118] sm:$0xff] %v497_v41  ;;  %v499_v42 = vld [vmem:[%s2249_s5 + $0x240] sm:$0xff]  ;;  %v501_v43 = vld [vmem:[%s2249_s5 + $0x250] sm:$0xff] }
  0x49   : > { %v503_v44 = vld [vmem:[%s2249_s5 + $0x260] sm:$0xff]  ;;  %500 = vst [vmem:[%s2254_s6 + $0x120] sm:$0xff] %v499_v42  ;;  %502 = vst [vmem:[%s2254_s6 + $0x128] sm:$0xff] %v501_v43  ;;  %v505_v45 = vld [vmem:[%s2249_s5 + $0x270] sm:$0xff] }
  0x4a   : > { %504 = vst [vmem:[%s2254_s6 + $0x130] sm:$0xff] %v503_v44  ;;  %v507_v46 = vld [vmem:[%s2249_s5 + $0x280] sm:$0xff]  ;;  %v509_v47 = vld [vmem:[%s2249_s5 + $0x290] sm:$0xff]  ;;  %506 = vst [vmem:[%s2254_s6 + $0x138] sm:$0xff] %v505_v45 }
  0x4b   : > { %508 = vst [vmem:[%s2254_s6 + $0x140] sm:$0xff] %v507_v46  ;;  %510 = vst [vmem:[%s2254_s6 + $0x148] sm:$0xff] %v509_v47  ;;  %v511_v48 = vld [vmem:[%s2249_s5 + $0x2a0] sm:$0xff]  ;;  %v513_v49 = vld [vmem:[%s2249_s5 + $0x2b0] sm:$0xff] }
  0x4c   : > { %v515_v50 = vld [vmem:[%s2249_s5 + $0x2c0] sm:$0xff]  ;;  %512 = vst [vmem:[%s2254_s6 + $0x150] sm:$0xff] %v511_v48  ;;  %514 = vst [vmem:[%s2254_s6 + $0x158] sm:$0xff] %v513_v49  ;;  %v517_v51 = vld [vmem:[%s2249_s5 + $0x2d0] sm:$0xff] }
  0x4d   : > { %516 = vst [vmem:[%s2254_s6 + $0x160] sm:$0xff] %v515_v50  ;;  %v519_v52 = vld [vmem:[%s2249_s5 + $0x2e0] sm:$0xff]  ;;  %v521_v53 = vld [vmem:[%s2249_s5 + $0x2f0] sm:$0xff]  ;;  %518 = vst [vmem:[%s2254_s6 + $0x168] sm:$0xff] %v517_v51 }
  0x4e   : > { %520 = vst [vmem:[%s2254_s6 + $0x170] sm:$0xff] %v519_v52  ;;  %522 = vst [vmem:[%s2254_s6 + $0x178] sm:$0xff] %v521_v53  ;;  %v523_v54 = vld [vmem:[%s2249_s5 + $0x300] sm:$0xff]  ;;  %v525_v55 = vld [vmem:[%s2249_s5 + $0x310] sm:$0xff] }
  0x4f   : > { %v527_v56 = vld [vmem:[%s2249_s5 + $0x320] sm:$0xff]  ;;  %524 = vst [vmem:[%s2254_s6 + $0x180] sm:$0xff] %v523_v54  ;;  %526 = vst [vmem:[%s2254_s6 + $0x188] sm:$0xff] %v525_v55  ;;  %v529_v57 = vld [vmem:[%s2249_s5 + $0x330] sm:$0xff] }
  0x50   : > { %528 = vst [vmem:[%s2254_s6 + $0x190] sm:$0xff] %v527_v56  ;;  %v531_v58 = vld [vmem:[%s2249_s5 + $0x340] sm:$0xff]  ;;  %v533_v59 = vld [vmem:[%s2249_s5 + $0x350] sm:$0xff]  ;;  %530 = vst [vmem:[%s2254_s6 + $0x198] sm:$0xff] %v529_v57 }
  0x51   : > { %532 = vst [vmem:[%s2254_s6 + $0x1a0] sm:$0xff] %v531_v58  ;;  %534 = vst [vmem:[%s2254_s6 + $0x1a8] sm:$0xff] %v533_v59  ;;  %v535_v60 = vld [vmem:[%s2249_s5 + $0x360] sm:$0xff]  ;;  %v537_v61 = vld [vmem:[%s2249_s5 + $0x370] sm:$0xff] }
  0x52   : > { %v539_v62 = vld [vmem:[%s2249_s5 + $0x380] sm:$0xff]  ;;  %536 = vst [vmem:[%s2254_s6 + $0x1b0] sm:$0xff] %v535_v60  ;;  %538 = vst [vmem:[%s2254_s6 + $0x1b8] sm:$0xff] %v537_v61  ;;  %v541_v63 = vld [vmem:[%s2249_s5 + $0x390] sm:$0xff] }
  0x53   : > { %540 = vst [vmem:[%s2254_s6 + $0x1c0] sm:$0xff] %v539_v62  ;;  %v543_v0 = vld [vmem:[%s2249_s5 + $0x3a0] sm:$0xff]  ;;  %v545_v1 = vld [vmem:[%s2249_s5 + $0x3b0] sm:$0xff]  ;;  %542 = vst [vmem:[%s2254_s6 + $0x1c8] sm:$0xff] %v541_v63 }
  0x54   : > { %544 = vst [vmem:[%s2254_s6 + $0x1d0] sm:$0xff] %v543_v0  ;;  %546 = vst [vmem:[%s2254_s6 + $0x1d8] sm:$0xff] %v545_v1  ;;  %v547_v2 = vld [vmem:[%s2249_s5 + $0x3c0] sm:$0xff]  ;;  %v549_v3 = vld [vmem:[%s2249_s5 + $0x3d0] sm:$0xff] }
  0x55   : > { %v551_v4 = vld [vmem:[%s2249_s5 + $0x3e0] sm:$0xff]  ;;  %548 = vst [vmem:[%s2254_s6 + $0x1e0] sm:$0xff] %v547_v2  ;;  %550 = vst [vmem:[%s2254_s6 + $0x1e8] sm:$0xff] %v549_v3  ;;  %v553_v5 = vld [vmem:[%s2249_s5 + $0x3f0] sm:$0xff] }
  0x56   : > { %552 = vst [vmem:[%s2254_s6 + $0x1f0] sm:$0xff] %v551_v4  ;;  %v555_v6 = vld [vmem:[%s2249_s5 + $0x400] sm:$0xff]  ;;  %v557_v7 = vld [vmem:[%s2249_s5 + $0x410] sm:$0xff]  ;;  %554 = vst [vmem:[%s2254_s6 + $0x1f8] sm:$0xff] %v553_v5 }
  0x57   : > { %556 = vst [vmem:[%s2254_s6 + $0x200] sm:$0xff] %v555_v6  ;;  %558 = vst [vmem:[%s2254_s6 + $0x208] sm:$0xff] %v557_v7  ;;  %v559_v8 = vld [vmem:[%s2249_s5 + $0x420] sm:$0xff]  ;;  %v561_v9 = vld [vmem:[%s2249_s5 + $0x430] sm:$0xff] }
  0x58   : > { %v563_v10 = vld [vmem:[%s2249_s5 + $0x440] sm:$0xff]  ;;  %560 = vst [vmem:[%s2254_s6 + $0x210] sm:$0xff] %v559_v8  ;;  %562 = vst [vmem:[%s2254_s6 + $0x218] sm:$0xff] %v561_v9  ;;  %v565_v11 = vld [vmem:[%s2249_s5 + $0x450] sm:$0xff] }
  0x59   : > { %564 = vst [vmem:[%s2254_s6 + $0x220] sm:$0xff] %v563_v10  ;;  %v567_v12 = vld [vmem:[%s2249_s5 + $0x460] sm:$0xff]  ;;  %v569_v13 = vld [vmem:[%s2249_s5 + $0x470] sm:$0xff]  ;;  %566 = vst [vmem:[%s2254_s6 + $0x228] sm:$0xff] %v565_v11 }
  0x5a   : > { %568 = vst [vmem:[%s2254_s6 + $0x230] sm:$0xff] %v567_v12  ;;  %570 = vst [vmem:[%s2254_s6 + $0x238] sm:$0xff] %v569_v13  ;;  %v571_v14 = vld [vmem:[%s2249_s5 + $0x480] sm:$0xff]  ;;  %v573_v15 = vld [vmem:[%s2249_s5 + $0x490] sm:$0xff] }
  0x5b   : > { %v575_v16 = vld [vmem:[%s2249_s5 + $0x4a0] sm:$0xff]  ;;  %572 = vst [vmem:[%s2254_s6 + $0x240] sm:$0xff] %v571_v14  ;;  %574 = vst [vmem:[%s2254_s6 + $0x248] sm:$0xff] %v573_v15  ;;  %v577_v17 = vld [vmem:[%s2249_s5 + $0x4b0] sm:$0xff] }
  0x5c   : > { %576 = vst [vmem:[%s2254_s6 + $0x250] sm:$0xff] %v575_v16  ;;  %v579_v18 = vld [vmem:[%s2249_s5 + $0x4c0] sm:$0xff]  ;;  %v581_v19 = vld [vmem:[%s2249_s5 + $0x4d0] sm:$0xff]  ;;  %578 = vst [vmem:[%s2254_s6 + $0x258] sm:$0xff] %v577_v17 }
  0x5d   : > { %580 = vst [vmem:[%s2254_s6 + $0x260] sm:$0xff] %v579_v18  ;;  %582 = vst [vmem:[%s2254_s6 + $0x268] sm:$0xff] %v581_v19  ;;  %v583_v20 = vld [vmem:[%s2249_s5 + $0x4e0] sm:$0xff]  ;;  %v585_v21 = vld [vmem:[%s2249_s5 + $0x4f0] sm:$0xff] }
  0x5e   : > { %v587_v22 = vld [vmem:[%s2249_s5 + $0x500] sm:$0xff]  ;;  %584 = vst [vmem:[%s2254_s6 + $0x270] sm:$0xff] %v583_v20  ;;  %586 = vst [vmem:[%s2254_s6 + $0x278] sm:$0xff] %v585_v21  ;;  %v589_v23 = vld [vmem:[%s2249_s5 + $0x510] sm:$0xff] }
  0x5f   : > { %588 = vst [vmem:[%s2254_s6 + $0x280] sm:$0xff] %v587_v22  ;;  %v591_v24 = vld [vmem:[%s2249_s5 + $0x520] sm:$0xff]  ;;  %v593_v25 = vld [vmem:[%s2249_s5 + $0x530] sm:$0xff]  ;;  %590 = vst [vmem:[%s2254_s6 + $0x288] sm:$0xff] %v589_v23 }
  0x60   : > { %592 = vst [vmem:[%s2254_s6 + $0x290] sm:$0xff] %v591_v24  ;;  %594 = vst [vmem:[%s2254_s6 + $0x298] sm:$0xff] %v593_v25  ;;  %v595_v26 = vld [vmem:[%s2249_s5 + $0x540] sm:$0xff]  ;;  %v597_v27 = vld [vmem:[%s2249_s5 + $0x550] sm:$0xff] }
  0x61   : > { %v599_v28 = vld [vmem:[%s2249_s5 + $0x560] sm:$0xff]  ;;  %596 = vst [vmem:[%s2254_s6 + $0x2a0] sm:$0xff] %v595_v26  ;;  %598 = vst [vmem:[%s2254_s6 + $0x2a8] sm:$0xff] %v597_v27  ;;  %v601_v29 = vld [vmem:[%s2249_s5 + $0x570] sm:$0xff] }
  0x62   : > { %600 = vst [vmem:[%s2254_s6 + $0x2b0] sm:$0xff] %v599_v28  ;;  %v603_v30 = vld [vmem:[%s2249_s5 + $0x580] sm:$0xff]  ;;  %v605_v31 = vld [vmem:[%s2249_s5 + $0x590] sm:$0xff]  ;;  %602 = vst [vmem:[%s2254_s6 + $0x2b8] sm:$0xff] %v601_v29 }
  0x63   : > { %604 = vst [vmem:[%s2254_s6 + $0x2c0] sm:$0xff] %v603_v30  ;;  %606 = vst [vmem:[%s2254_s6 + $0x2c8] sm:$0xff] %v605_v31  ;;  %v607_v32 = vld [vmem:[%s2249_s5 + $0x5a0] sm:$0xff]  ;;  %v609_v33 = vld [vmem:[%s2249_s5 + $0x5b0] sm:$0xff] }
  0x64   : > { %v611_v34 = vld [vmem:[%s2249_s5 + $0x5c0] sm:$0xff]  ;;  %608 = vst [vmem:[%s2254_s6 + $0x2d0] sm:$0xff] %v607_v32  ;;  %610 = vst [vmem:[%s2254_s6 + $0x2d8] sm:$0xff] %v609_v33  ;;  %v613_v35 = vld [vmem:[%s2249_s5 + $0x5d0] sm:$0xff] }
  0x65   : > { %612 = vst [vmem:[%s2254_s6 + $0x2e0] sm:$0xff] %v611_v34  ;;  %v615_v36 = vld [vmem:[%s2249_s5 + $0x5e0] sm:$0xff]  ;;  %v617_v37 = vld [vmem:[%s2249_s5 + $0x5f0] sm:$0xff]  ;;  %614 = vst [vmem:[%s2254_s6 + $0x2e8] sm:$0xff] %v613_v35 }
  0x66   : > { %616 = vst [vmem:[%s2254_s6 + $0x2f0] sm:$0xff] %v615_v36  ;;  %618 = vst [vmem:[%s2254_s6 + $0x2f8] sm:$0xff] %v617_v37 }
  0x67 PF: > { %p1653_p0 = scmp.ge.s32.totalorder %s2112_s22, 1  ;;  %p631_p1 = scmp.lt.s32.totalorder %s2112_s22, 13 }
  0x69   : > { %p632_p2 = pnand %p1653_p0, %p631_p1 }
  0x6a   : > { %s638_s0 = sand.u32 (!%p632_p2), 1, %s2088_s16   ;;  %s645_s23 = sand.u32 (!%p632_p2), 1, %s2080_s14  }
  0x6b   : > { %635 = sbr.rel (%p632_p2) target bundleno = 492 (0x1ec), region = 85  ;;  %s672_s7 = sand.u32 (!%p632_p2), 1, %s2072_s12  }
  0x6c   : > { %s1782_s28 = smul.u32 (!%p632_p2), 48, %s638_s0  ;;  %s1654_s26 = sshll.u32 (!%p632_p2), %s672_s7, 4 }
  0x6d   : > { %s1783_s11 = smul.u32 (!%p632_p2), 768, %s645_s23  ;;  %s1655_s27 = sshll.u32 (!%p632_p2), %s2100_s19, 1 }
  0x6e   : > { %p680_p3 = scmp.lt.s32.totalorder (!%p632_p2), %s1655_s27, 3  ;;  %s2457_s6 = scalar_lea.vmem (!%p632_p2), [#allocation3], %s1782_s28 }
  0x6f   : > { %s2459_s1 = scalar_lea.vmem (!%p632_p2), [#allocation4], %s1783_s11  ;;  %s2461_s25 = scalar_lea.vmem (!%p632_p2), [#allocation5], %s1654_s26 }
  0x70   : > { %p1656_p4 = scmp.ne.s32.totalorder (!%p632_p2), %s2096_s18, 0 }
  0x72   : > { %s2646_s27 = smov (!%p680_p3, %s1655_s27), 3  ;;  %689 = sbr.rel (%p1656_p4) target bundleno = 121 (0x79), region = 97 }
  0x73   : > { %s682_s5 = scalar_lea.vmem %s2617_s2, %s2646_s27  ;;  %v2114_v38 = vmov (!%p1656_p4), 0.0  }
  0x74   : > { %690 = vst [vmem:[#allocation2] sm:$0xff] (!%p1656_p4), %v2114_v38  ;;  %691 = vst [vmem:[#allocation2 + $0x8] sm:$0xff] (!%p1656_p4), %v2114_v38 }
  0x75   : > { %692 = vst [vmem:[#allocation2 + $0x10] sm:$0xff] (!%p1656_p4), %v2114_v38  ;;  %693 = vst [vmem:[#allocation2 + $0x18] sm:$0xff] (!%p1656_p4), %v2114_v38 }
  0x79 PF: > { %v1873_v39 = vld [vmem:[%s2459_s1 + $0x104] ss:$8 sps:$4 sm:$0xff]   ;;  %v1875_v40 = vld [vmem:[%s2459_s1 + $0x100] ss:$8 sps:$4 sm:$0xff]   ;;  %v1876_v41 = vld [vmem:[%s2459_s1 + $0x114] ss:$8 sps:$4 sm:$0xff]  }
  0x7a   : > { %1353 = vmatprep.subr.bf16.mxu0 %v1873_v39  ;;  %v1878_v42 = vld [vmem:[%s2459_s1 + $0x110] ss:$8 sps:$4 sm:$0xff]   ;;  %v1879_v43 = vld [vmem:[%s2459_s1 + $0x124] ss:$8 sps:$4 sm:$0xff]   ;;  %v1881_v44 = vld [vmem:[%s2459_s1 + $0x120] ss:$8 sps:$4 sm:$0xff]  }
  0x7b   : > { %1354 = vmatpush1.bf16.msra.mxu0 %v1875_v40  ;;  %v1882_v45 = vld [vmem:[%s2459_s1 + $0x134] ss:$8 sps:$4 sm:$0xff]   ;;  %v1884_v46 = vld [vmem:[%s2459_s1 + $0x130] ss:$8 sps:$4 sm:$0xff]   ;;  %v1885_v47 = vld [vmem:[%s2459_s1 + $0x144] ss:$8 sps:$4 sm:$0xff]  }
  0x7c   : > { %1355 = vmatprep.subr.bf16.mxu0 %v1876_v41  ;;  %v1887_v48 = vld [vmem:[%s2459_s1 + $0x140] ss:$8 sps:$4 sm:$0xff]   ;;  %v1888_v49 = vld [vmem:[%s2459_s1 + $0x154] ss:$8 sps:$4 sm:$0xff]   ;;  %v1890_v50 = vld [vmem:[%s2459_s1 + $0x150] ss:$8 sps:$4 sm:$0xff]  }
  0x7d   : > { %v1891_v51 = vld [vmem:[%s2459_s1 + $0x164] ss:$8 sps:$4 sm:$0xff]   ;;  %v1923_v53 = vld [vmem:[%s2459_s1] ss:$8 sps:$4 sm:$0xff]   ;;  %v1894_v56 = vld [vmem:[%s2459_s1 + $0x174] ss:$8 sps:$4 sm:$0xff]  }
  0x7e   : > { %v1920_v52 = vld [vmem:[%s2459_s1 + $0x4] ss:$8 sps:$4 sm:$0xff]   ;;  %v1893_v54 = vld [vmem:[%s2459_s1 + $0x160] ss:$8 sps:$4 sm:$0xff]   ;;  %v1930_v57 = vld [vmem:[%s2459_s1 + $0x14] ss:$8 sps:$4 sm:$0xff]  }
  0x7f   : > { %1356 = vmatpush1.bf16.msra.mxu0 %v1878_v42  ;;  %1310 = vmatprep.subr.bf16.mxu1 %v1920_v52  ;;  %v1926_v55 = vld [vmem:[%s2457_s6 + $0xc] ss:$24 sps:$4 sm:$0xff]   ;;  %v1932_v58 = vld [vmem:[%s2459_s1 + $0x10] ss:$8 sps:$4 sm:$0xff]   ;;  %v1938_v62 = vld [vmem:[%s2459_s1 + $0x20] ss:$8 sps:$4 sm:$0xff]  }
  0x80   : > { %1357 = vmatprep.subr.bf16.mxu0 %v1879_v43  ;;  %1311 = vmatpush1.bf16.msra.mxu1 %v1923_v53  ;;  %v1896_v59 = vld [vmem:[%s2459_s1 + $0x170] ss:$8 sps:$4 sm:$0xff]   ;;  %v1897_v60 = vld [vmem:[%s2459_s1 + $0x184] ss:$8 sps:$4 sm:$0xff]   ;;  %v1899_v63 = vld [vmem:[%s2459_s1 + $0x180] ss:$8 sps:$4 sm:$0xff]  }
  0x81   : > { %1385 = vmatprep.mubr.bf16.mxu0 %v1926_v55  ;;  %1312 = vmatprep.subr.bf16.mxu1 %v1930_v57  ;;  %v1936_v61 = vld [vmem:[%s2459_s1 + $0x24] ss:$8 sps:$4 sm:$0xff]   ;;  %v1942_v0 = vld [vmem:[%s2459_s1 + $0x34] ss:$8 sps:$4 sm:$0xff]   ;;  %v1944_v2 = vld [vmem:[%s2459_s1 + $0x30] ss:$8 sps:$4 sm:$0xff]  }
  0x82   : > { %v1900_v1 = vld [vmem:[%s2459_s1 + $0x194] ss:$8 sps:$4 sm:$0xff]   ;;  %v1948_v3 = vld [vmem:[%s2459_s1 + $0x44] ss:$8 sps:$4 sm:$0xff]   ;;  %v1902_v4 = vld [vmem:[%s2459_s1 + $0x190] ss:$8 sps:$4 sm:$0xff]  }
  0x83   : > { %1358 = vmatpush1.bf16.msra.mxu0 %v1881_v44  ;;  %v1903_v5 = vld [vmem:[%s2459_s1 + $0x1a4] ss:$8 sps:$4 sm:$0xff]   ;;  %v1950_v6 = vld [vmem:[%s2459_s1 + $0x40] ss:$8 sps:$4 sm:$0xff]   ;;  %v1954_v7 = vld [vmem:[%s2459_s1 + $0x54] ss:$8 sps:$4 sm:$0xff]  }
  0x84   : > { %1359 = vmatprep.subr.bf16.mxu0 %v1882_v45  ;;  %1313 = vmatpush1.bf16.msra.mxu1 %v1932_v58  ;;  %v1905_v8 = vld [vmem:[%s2459_s1 + $0x1a0] ss:$8 sps:$4 sm:$0xff]   ;;  %v1906_v9 = vld [vmem:[%s2459_s1 + $0x1b4] ss:$8 sps:$4 sm:$0xff]   ;;  %v1956_v10 = vld [vmem:[%s2459_s1 + $0x50] ss:$8 sps:$4 sm:$0xff]  }
  0x85   : > { %1314 = vmatprep.subr.bf16.mxu1 %v1936_v61  ;;  %v1960_v11 = vld [vmem:[%s2459_s1 + $0x64] ss:$8 sps:$4 sm:$0xff]   ;;  %v1908_v12 = vld [vmem:[%s2459_s1 + $0x1b0] ss:$8 sps:$4 sm:$0xff]   ;;  %v1962_v14 = vld [vmem:[%s2459_s1 + $0x60] ss:$8 sps:$4 sm:$0xff]  }
  0x86   : > { %v1909_v13 = vld [vmem:[%s2459_s1 + $0x1c4] ss:$8 sps:$4 sm:$0xff]   ;;  %v1966_v15 = vld [vmem:[%s2459_s1 + $0x74] ss:$8 sps:$4 sm:$0xff]   ;;  %v1911_v16 = vld [vmem:[%s2459_s1 + $0x1c0] ss:$8 sps:$4 sm:$0xff]  }
  0x87   : > { %1360 = vmatpush1.bf16.msra.mxu0 %v1884_v46  ;;  %v1912_v17 = vld [vmem:[%s2459_s1 + $0x1d4] ss:$8 sps:$4 sm:$0xff]   ;;  %v1968_v18 = vld [vmem:[%s2459_s1 + $0x70] ss:$8 sps:$4 sm:$0xff]   ;;  %v1972_v19 = vld [vmem:[%s2459_s1 + $0x84] ss:$8 sps:$4 sm:$0xff]  }
  0x88   : > { %1361 = vmatprep.subr.bf16.mxu0 %v1885_v47  ;;  %1315 = vmatpush1.bf16.msra.mxu1 %v1938_v62  ;;  %v1914_v20 = vld [vmem:[%s2459_s1 + $0x1d0] ss:$8 sps:$4 sm:$0xff]   ;;  %v1915_v21 = vld [vmem:[%s2459_s1 + $0x1e4] ss:$8 sps:$4 sm:$0xff]   ;;  %v1974_v22 = vld [vmem:[%s2459_s1 + $0x80] ss:$8 sps:$4 sm:$0xff]  }
  0x89   : > { %1316 = vmatprep.subr.bf16.mxu1 %v1942_v0  ;;  %v1978_v23 = vld [vmem:[%s2459_s1 + $0x94] ss:$8 sps:$4 sm:$0xff]   ;;  %v1917_v24 = vld [vmem:[%s2459_s1 + $0x1e0] ss:$8 sps:$4 sm:$0xff]   ;;  %v1980_v26 = vld [vmem:[%s2459_s1 + $0x90] ss:$8 sps:$4 sm:$0xff]  }
  0x8a   : > { %v1918_v25 = vld [vmem:[%s2459_s1 + $0x1f4] ss:$8 sps:$4 sm:$0xff]   ;;  %v1984_v27 = vld [vmem:[%s2459_s1 + $0xa4] ss:$8 sps:$4 sm:$0xff]   ;;  %v1922_v28 = vld [vmem:[%s2459_s1 + $0x1f0] ss:$8 sps:$4 sm:$0xff]  }
  0x8b   : > { %1362 = vmatpush1.bf16.msra.mxu0 %v1887_v48  ;;  %v1929_v29 = vld [vmem:[%s2459_s1 + $0x204] ss:$8 sps:$4 sm:$0xff]   ;;  %v1986_v30 = vld [vmem:[%s2459_s1 + $0xa0] ss:$8 sps:$4 sm:$0xff]   ;;  %v1990_v32 = vld [vmem:[%s2459_s1 + $0xb4] ss:$8 sps:$4 sm:$0xff]  }
  0x8c   : > { %1363 = vmatprep.subr.bf16.mxu0 %v1888_v49  ;;  %1317 = vmatpush1.bf16.msra.mxu1 %v1944_v2  ;;  %v1924_v31 = vld [vmem:[%s2457_s6 + $0x8] ss:$24 sps:$4 sm:$0xff]   ;;  %v1935_v34 = vld [vmem:[%s2459_s1 + $0x214] ss:$8 sps:$4 sm:$0xff]   ;;  %v1996_v37 = vld [vmem:[%s2459_s1 + $0xc4] ss:$8 sps:$4 sm:$0xff]  }
  0x8d   : > { %1318 = vmatprep.subr.bf16.mxu1 %v1948_v3  ;;  %v1927_v33 = vld [vmem:[%s2459_s1 + $0x200] ss:$8 sps:$4 sm:$0xff]   ;;  %v1992_v35 = vld [vmem:[%s2459_s1 + $0xb0] ss:$8 sps:$4 sm:$0xff]   ;;  %v2019_v36 = vld [vmem:[%s2457_s6 + $0x4] ss:$24 sps:$4 sm:$0xff]  }
  0x8e   : > { %v1933_v38 = vld [vmem:[%s2459_s1 + $0x210] ss:$8 sps:$4 sm:$0xff]   ;;  %1342 = vmatprep.mubr.bf16.mxu1 %v2019_v36  ;;  %v2025_v39 = vld [vmem:[%s2457_s6 + $0x14] ss:$24 sps:$4 sm:$0xff]   ;;  %v1998_v41 = vld [vmem:[%s2459_s1 + $0xc0] ss:$8 sps:$4 sm:$0xff]  }
  0x8f   : > { %1364 = vmatpush1.bf16.msra.mxu0 %v1890_v50  ;;  %v1941_v40 = vld [vmem:[%s2459_s1 + $0x224] ss:$8 sps:$4 sm:$0xff]   ;;  %v2002_v42 = vld [vmem:[%s2459_s1 + $0xd4] ss:$8 sps:$4 sm:$0xff]   ;;  %v1939_v43 = vld [vmem:[%s2459_s1 + $0x220] ss:$8 sps:$4 sm:$0xff]  }
  0x90   : > { %1365 = vmatprep.subr.bf16.mxu0 %v1891_v51  ;;  %1319 = vmatpush1.bf16.msra.mxu1 %v1950_v6  ;;  %v1947_v44 = vld [vmem:[%s2459_s1 + $0x234] ss:$8 sps:$4 sm:$0xff]   ;;  %v2004_v45 = vld [vmem:[%s2459_s1 + $0xd0] ss:$8 sps:$4 sm:$0xff]   ;;  %v2008_v46 = vld [vmem:[%s2459_s1 + $0xe4] ss:$8 sps:$4 sm:$0xff]  }
  0x91   : > { %1320 = vmatprep.subr.bf16.mxu1 %v1954_v7  ;;  %v1945_v47 = vld [vmem:[%s2459_s1 + $0x230] ss:$8 sps:$4 sm:$0xff]   ;;  %v1953_v48 = vld [vmem:[%s2459_s1 + $0x244] ss:$8 sps:$4 sm:$0xff]   ;;  %v2010_v49 = vld [vmem:[%s2459_s1 + $0xe0] ss:$8 sps:$4 sm:$0xff]  }
  0x92   : > { %v2014_v50 = vld [vmem:[%s2459_s1 + $0xf4] ss:$8 sps:$4 sm:$0xff]   ;;  %v1951_v51 = vld [vmem:[%s2459_s1 + $0x240] ss:$8 sps:$4 sm:$0xff]   ;;  %v2016_v53 = vld [vmem:[%s2459_s1 + $0xf0] ss:$8 sps:$4 sm:$0xff]  }
  0x93   : > { %1366 = vmatpush1.bf16.msra.mxu0 %v1893_v54  ;;  %v1959_v52 = vld [vmem:[%s2459_s1 + $0x254] ss:$8 sps:$4 sm:$0xff]   ;;  %v1957_v54 = vld [vmem:[%s2459_s1 + $0x250] ss:$8 sps:$4 sm:$0xff]   ;;  %v1965_v55 = vld [vmem:[%s2459_s1 + $0x264] ss:$8 sps:$4 sm:$0xff]  }
  0x94   : > { %1367 = vmatprep.subr.bf16.mxu0 %v1894_v56  ;;  %1321 = vmatpush1.bf16.msra.mxu1 %v1956_v10  ;;  %v2017_v56 = vld [vmem:[%s2457_s6] ss:$24 sps:$4 sm:$0xff]   ;;  %v1971_v58 = vld [vmem:[%s2459_s1 + $0x274] ss:$8 sps:$4 sm:$0xff]   ;;  %v1989_v0 = vld [vmem:[%s2459_s1 + $0x2a4] ss:$8 sps:$4 sm:$0xff]  }
  0x95   : > { %1322 = vmatprep.subr.bf16.mxu1 %v1960_v11  ;;  %v1963_v57 = vld [vmem:[%s2459_s1 + $0x260] ss:$8 sps:$4 sm:$0xff]   ;;  %v1983_v62 = vld [vmem:[%s2459_s1 + $0x294] ss:$8 sps:$4 sm:$0xff]   ;;  %v1993_v3 = vld [vmem:[%s2459_s1 + $0x2b0] ss:$8 sps:$4 sm:$0xff]  }
  0x96   : > { %v1975_v61 = vld [vmem:[%s2459_s1 + $0x280] ss:$8 sps:$4 sm:$0xff]   ;;  %v1995_v2 = vld [vmem:[%s2459_s1 + $0x2b4] ss:$8 sps:$4 sm:$0xff]   ;;  %v2005_v7 = vld [vmem:[%s2459_s1 + $0x2d0] ss:$8 sps:$4 sm:$0xff]  }
  0x97   : > { %1368 = vmatpush1.bf16.msra.mxu0 %v1896_v59  ;;  %v1969_v59 = vld [vmem:[%s2459_s1 + $0x270] ss:$8 sps:$4 sm:$0xff]   ;;  %v2007_v6 = vld [vmem:[%s2459_s1 + $0x2d4] ss:$8 sps:$4 sm:$0xff]   ;;  %p1759_p5 = scmp.ne.s32.totalorder %s2096_s18, 5 }
  0x98   : > { %1369 = vmatprep.subr.bf16.mxu0 %v1897_v60  ;;  %1323 = vmatpush1.bf16.msra.mxu1 %v1962_v14  ;;  %v1977_v60 = vld [vmem:[%s2459_s1 + $0x284] ss:$8 sps:$4 sm:$0xff]   ;;  %v2022_v10 = vld [vmem:[%s2459_s1 + $0x2f4] ss:$8 sps:$4 sm:$0xff]   ;;  %v2020_v11 = vld [vmem:[%s2459_s1 + $0x2f0] ss:$8 sps:$4 sm:$0xff]  }
  0x99   : > { %1324 = vmatprep.subr.bf16.mxu1 %v1966_v15 }
  0x9b   : > { %1370 = vmatpush1.bf16.msra.mxu0 %v1899_v63  ;;  %v1981_v63 = vld [vmem:[%s2459_s1 + $0x290] ss:$8 sps:$4 sm:$0xff]  }
  0x9c   : > { %1371 = vmatprep.subr.bf16.mxu0 %v1900_v1  ;;  %1325 = vmatpush1.bf16.msra.mxu1 %v1968_v18  ;;  %v1987_v1 = vld [vmem:[%s2459_s1 + $0x2a0] ss:$8 sps:$4 sm:$0xff]  }
  0x9d   : > { %1326 = vmatprep.subr.bf16.mxu1 %v1972_v19 }
  0x9f   : > { %1372 = vmatpush1.bf16.msra.mxu0 %v1902_v4  ;;  %v2001_v4 = vld [vmem:[%s2459_s1 + $0x2c4] ss:$8 sps:$4 sm:$0xff]  }
  0xa0   : > { %1373 = vmatprep.subr.bf16.mxu0 %v1903_v5  ;;  %1327 = vmatpush1.bf16.msra.mxu1 %v1974_v22  ;;  %v1999_v5 = vld [vmem:[%s2459_s1 + $0x2c0] ss:$8 sps:$4 sm:$0xff]  }
  0xa1   : > { %1328 = vmatprep.subr.bf16.mxu1 %v1978_v23  ;;  %v696_v23 = vld [vmem:[#allocation2 + $0x10] sm:$0xff] }
  0xa3   : > { %1374 = vmatpush1.bf16.msra.mxu0 %v1905_v8  ;;  %v2013_v8 = vld [vmem:[%s2459_s1 + $0x2e4] ss:$8 sps:$4 sm:$0xff]  }
  0xa4   : > { %1375 = vmatprep.subr.bf16.mxu0 %v1906_v9  ;;  %1329 = vmatpush1.bf16.msra.mxu1 %v1980_v26  ;;  %v2011_v9 = vld [vmem:[%s2459_s1 + $0x2e0] ss:$8 sps:$4 sm:$0xff]  }
  0xa5   : > { %1330 = vmatprep.subr.bf16.mxu1 %v1984_v27  ;;  %v697_v27 = vld [vmem:[#allocation2 + $0x18] sm:$0xff] }
  0xa7   : > { %1376 = vmatpush1.bf16.msra.mxu0 %v1908_v12  ;;  %v2023_v12 = vld [vmem:[%s2457_s6 + $0x10] ss:$24 sps:$4 sm:$0xff]  }
  0xa8   : > { %1377 = vmatprep.subr.bf16.mxu0 %v1909_v13  ;;  %1331 = vmatpush1.bf16.msra.mxu1 %v1986_v30 }
  0xa9   : > { %1332 = vmatprep.subr.bf16.mxu1 %v1990_v32 }
  0xab   : > { %1378 = vmatpush1.bf16.msra.mxu0 %v1911_v16 }
  0xac   : > { %1379 = vmatprep.subr.bf16.mxu0 %v1912_v17  ;;  %1333 = vmatpush1.bf16.msra.mxu1 %v1992_v35  ;;  %v694_v17 = vld [vmem:[#allocation2] sm:$0xff] }
  0xad   : > { %1334 = vmatprep.subr.bf16.mxu1 %v1996_v37  ;;  %v1455_v35 = vld [vmem:[%s682_s5] sm:$0x3] (!%p1759_p5) }
  0xaf   : > { %1380 = vmatpush1.bf16.msra.mxu0 %v1914_v20  ;;  %v695_v20 = vld [vmem:[#allocation2 + $0x8] sm:$0xff] }
  0xb0   : > { %1381 = vmatprep.subr.bf16.mxu0 %v1915_v21  ;;  %1335 = vmatpush1.bf16.msra.mxu1 %v1998_v41 }
  0xb1   : > { %1336 = vmatprep.subr.bf16.mxu1 %v2002_v42 }
  0xb3   : > { %1382 = vmatpush1.bf16.msra.mxu0 %v1917_v24 }
  0xb4   : > { %1383 = vmatprep.subr.bf16.mxu0 %v1918_v25  ;;  %1337 = vmatpush1.bf16.msra.mxu1 %v2004_v45 }
  0xb5   : > { %1338 = vmatprep.subr.bf16.mxu1 %v2008_v46 }
  0xb7   : > { %1384 = vmatpush1.bf16.msra.mxu0 %v1922_v28 }
  0xb8   : > { %1396 = vmatprep.subr.bf16.mxu0 %v1929_v29  ;;  %1339 = vmatpush1.bf16.msra.mxu1 %v2010_v49 }
  0xb9   : > { %1340 = vmatprep.subr.bf16.mxu1 %v2014_v50 }
  0xba   : > { %1386 = vmatmul.mubr.bf16.vlgmr.msra.gmra.mrb[0].mxu0 %v1924_v31 }
  0xbb   : > { %1397 = vmatpush1.bf16.msra.mxu0 %v1927_v33  ;;  %1428 = vmatprep.mubr.bf16.mxu0 %v2025_v39  ;;  %v1457_v33 = vlaneseq (!%p1759_p5) }
  0xbc   : > { %1398 = vmatprep.subr.bf16.mxu0 %v1935_v34  ;;  %1341 = vmatpush1.bf16.msra.mxu1 %v2016_v53 }
  0xbd   : > { %v1458_v34 = vshrl.u32 (!%p1759_p5), %v1457_v33, 7 }
  0xbf   : > { %1399 = vmatpush1.bf16.msra.mxu0 %v1933_v38  ;;  %1343 = vmatmul.mubr.bf16.vlgmr.msra.gmra.mrb[0].mxu1 %v2017_v56  ;;  %v1459_v37 = vsub.s32 (!%p1759_p5), 0, %v1458_v34  ;;  %v1463_v38 = vsub.s32 (!%p1759_p5), 1, %v1458_v34 }
  0xc0   : > { %1400 = vmatprep.subr.bf16.mxu0 %v1941_v40 }
  0xc1   : > { %v1460_v42 = vrot.slane (!%p1759_p5), %v1455_v35, %v1459_v37 }
  0xc3   : > { %1401 = vmatpush1.bf16.msra.mxu0 %v1939_v43  ;;  %v1464_v43 = vrot.slane (!%p1759_p5), %v1455_v35, %v1463_v38 }
  0xc4   : > { %1402 = vmatprep.subr.bf16.mxu0 %v1947_v44 }
  0xc7   : > { %1403 = vmatpush1.bf16.msra.mxu0 %v1945_v47 }
  0xc8   : > { %1404 = vmatprep.subr.bf16.mxu0 %v1953_v48 }
  0xcb   : > { %1405 = vmatpush1.bf16.msra.mxu0 %v1951_v51 }
  0xcc   : > { %1406 = vmatprep.subr.bf16.mxu0 %v1959_v52 }
  0xcf   : > { %1407 = vmatpush1.bf16.msra.mxu0 %v1957_v54 }
  0xd0   : > { %1408 = vmatprep.subr.bf16.mxu0 %v1965_v55 }
  0xd3   : > { %1409 = vmatpush1.bf16.msra.mxu0 %v1963_v57 }
  0xd4   : > { %1410 = vmatprep.subr.bf16.mxu0 %v1971_v58 }
  0xd7   : > { %1411 = vmatpush1.bf16.msra.mxu0 %v1969_v59 }
  0xd8   : > { %1412 = vmatprep.subr.bf16.mxu0 %v1977_v60 }
  0xdb   : > { %1413 = vmatpush1.bf16.msra.mxu0 %v1975_v61 }
  0xdc   : > { %1414 = vmatprep.subr.bf16.mxu0 %v1983_v62 }
  0xdf   : > { %1415 = vmatpush1.bf16.msra.mxu0 %v1981_v63 }
  0xe0   : > { %1416 = vmatprep.subr.bf16.mxu0 %v1989_v0 }
  0xe3   : > { %1417 = vmatpush1.bf16.msra.mxu0 %v1987_v1 }
  0xe4   : > { %1418 = vmatprep.subr.bf16.mxu0 %v1995_v2 }
  0xe7   : > { %1419 = vmatpush1.bf16.msra.mxu0 %v1993_v3 }
  0xe8   : > { %1420 = vmatprep.subr.bf16.mxu0 %v2001_v4 }
  0xeb   : > { %1421 = vmatpush1.bf16.msra.mxu0 %v1999_v5 }
  0xec   : > { %1422 = vmatprep.subr.bf16.mxu0 %v2007_v6 }
  0xef   : > { %1423 = vmatpush1.bf16.msra.mxu0 %v2005_v7 }
  0xf0   : > { %1424 = vmatprep.subr.bf16.mxu0 %v2013_v8 }
  0xf3   : > { %1425 = vmatpush1.bf16.msra.mxu0 %v2011_v9 }
  0xf4   : > { %1426 = vmatprep.subr.bf16.mxu0 %v2022_v10 }
  0xf7   : > { %1427 = vmatpush1.bf16.msra.mxu0 %v2020_v11 }
  0xfa   : > { %1429 = vmatmul.mubr.bf16.vlgmr.msra.gmra.mrb[0].mxu0 %v2023_v12 }
 0x192   : > { %v1344_v13 = vpop.f32.mrb[0].mxu1 }
 0x193   : > { %v1346_v14 = vpop.f32.mrb[1].mxu1 }
 0x194   : > { %v1348_v15 = vpop.f32.mrb[2].mxu1 }
 0x195   : > { %v1350_v16 = vpop.f32.mrb[3].mxu1 }
 0x1cd   : > { %v1430_v18 = vpop.f32.mrb[0].mxu0 }
 0x1ce   : > { %v1772_v19 = vadd.f32 %v1430_v18, %v1344_v13  ;;  %v1432_v21 = vpop.f32.mrb[1].mxu0 }
 0x1cf   : > { %v1773_v22 = vadd.f32 %v1432_v21, %v1346_v14  ;;  %v1434_v24 = vpop.f32.mrb[2].mxu0  ;;  %1450 = sbr.rel (%p1759_p5) target bundleno = 484 (0x1e4), region = 101 }
 0x1d0   : > { %v1439_v25 = vadd.f32 %v1772_v19, %v694_v17  ;;  %v1774_v26 = vadd.f32 %v1434_v24, %v1348_v15  ;;  %v1436_v28 = vpop.f32.mrb[3].mxu0 }
 0x1d1   : > { %v1440_v29 = vadd.f32 %v1773_v22, %v695_v20  ;;  %v1775_v30 = vadd.f32 %v1436_v28, %v1350_v16 }
 0x1d2   : > { %1443 = vst [vmem:[#allocation2] sm:$0xff] %v1439_v25  ;;  %v1441_v31 = vadd.f32 %v1774_v26, %v696_v23 }
 0x1d3   : > { %1444 = vst [vmem:[#allocation2 + $0x8] sm:$0xff] %v1440_v29  ;;  %v1442_v32 = vadd.f32 %v1775_v30, %v697_v27 }
 0x1d4   : > { %1445 = vst [vmem:[#allocation2 + $0x10] sm:$0xff] %v1441_v31 }
 0x1d5   : > { %1446 = vst [vmem:[#allocation2 + $0x18] sm:$0xff] %v1442_v32 }
 0x1d9   : > { %v1451_v36 = vld [vmem:[#allocation2] sm:$0xff] }
 0x1da   : > { %v1452_v39 = vld [vmem:[#allocation2 + $0x8] sm:$0xff]  ;;  %v1467_v44 = vadd.f32 %v1460_v42, %v1451_v36 }
 0x1db   : > { %v1453_v40 = vld [vmem:[#allocation2 + $0x10] sm:$0xff]  ;;  %v1468_v45 = vadd.f32 %v1464_v43, %v1452_v39 }
 0x1dc   : > { %v1454_v41 = vld [vmem:[#allocation2 + $0x18] sm:$0xff]  ;;  %v1469_v46 = vadd.f32 %v1460_v42, %v1453_v40  ;;  %v1471_v48 = vmax.f32 %v1467_v44, 0.0 }
 0x1dd   : > { %v1470_v47 = vadd.f32 %v1464_v43, %v1454_v41  ;;  %v1472_v49 = vmax.f32 %v1468_v45, 0.0 }
 0x1de   : > { %v1473_v50 = vmax.f32 %v1469_v46, 0.0 }
 0x1df   : > { %v1474_v51 = vmax.f32 %v1470_v47, 0.0  ;;  %v1769_v52 = vpack.c.bf16 %v1472_v49, %v1471_v48 }
 0x1e1   : > { %v1770_v53 = vpack.c.bf16 %v1474_v51, %v1473_v50  ;;  %1487 = vst [vmem:[%s2461_s25] sm:$0xff] %v1769_v52 }
 0x1e3   : > { %1488 = vst [vmem:[%s2461_s25 + $0x8] sm:$0xff] %v1770_v53 }
 0x1e4 PF: > { %1495 = sbr.rel (!%p2229_p12) target bundleno = 492 (0x1ec), region = 105  ;;  %s1771_s14 = sshll.u32 (%p2229_p12), %s2100_s19, 3 }
 0x1e5   : > { %s1501_s0 = scalar_lea.vmem (%p2229_p12), %s2618_s3, %s1771_s14 }
 0x1e8   : > { %v1531_v54 = vld [vmem:[%s2461_s25] sm:$0xff] (%p2229_p12) }
 0x1e9   : > { %1532 = vst [vmem:[%s1501_s0] sm:$0xff] (%p2229_p12), %v1531_v54 }
 0x1ea   : > { %v1533_v55 = vld [vmem:[%s2461_s25 + $0x8] sm:$0xff] (%p2229_p12) }
 0x1eb   : > { %1534 = vst [vmem:[%s1501_s0 + $0x10] sm:$0xff] %v1533_v55 }
 0x1ec PF: > { %s13_s22 = sadd.s32 1, %s2112_s22   ;;  %s2628_s25 = sld [smem:[#allocation6_spill]] }
 0x1ed   : > { %p10_p6 = scmp.ge.s32.totalorder %s13_s22, 14   ;;  %s2629_s12 = smov %s2076_s13 }
 0x1ee   : > { %s2630_s13 = smov %s2227_s9  ;;  %s2631_s14 = smov %s2084_s15 }
 0x1ef   : > { %s2632_s15 = smov %s2224_s8  ;;  %s2633_s16 = smov %s2092_s17 }
 0x1f0   : > { %s2634_s17 = smov %s2210_s30  ;;  %s2635_s18 = smov %s2104_s20 }
 0x1f1   : > { %s2636_s19 = smov %s2108_s21  ;;  %s2637_s20 = smov %s2640_s24 }
 0x1f2   : > { %s2638_s21 = smov %s2628_s25  ;;  %12 = sbr.rel (!%p10_p6) target bundleno = 9 (0x9), region = 185 }

// kernel: _lambda_.38
= control target key start
LH: loop header
LB: loop body
LE: loop exit
PB: predicated region body
PF: predicated region fallthrough
CT: control target
= control target key end

     0   :  { %s2774_s0 = inlined_call_operand.vmem [shape: bf16[16,4608], index: 0, kind: input, shape index: {}]   ;;  %s2775_s1 = inlined_call_operand.vmem [shape: bf16[4608,512], index: 1, kind: input, shape index: {}]   ;;  %s2776_s2 = inlined_call_operand.vmem [shape: f32[1,512], index: 2, kind: input, shape index: {}]   ;;  %s2777_s3 = inlined_call_operand.vmem [shape: bf16[16,512], index: 3, kind: input, shape index: {}]   ;;  %s2778_s4 = inlined_call_operand.vmem [shape: bf16[16,512], index: 4, kind: output, shape index: {}]  }
   0x1   :  { %2781 = sst [smem:[#allocation9_spill]] %s2774_s0 }
   0x2   :  { %s2269_s15 = smov 0   ;;  %s2271_s16 = smov 0  }
   0x3   :  { %s2273_s17 = smov 0   ;;  %s2275_s18 = smov 0  }
   0x4   :  { %s2277_s19 = smov 0   ;;  %s2279_s20 = smov 0  }
   0x5   :  { %s2281_s21 = smov 0   ;;  %s2283_s22 = smov 0  }
   0x6   :  { %s2285_s23 = smov 0   ;;  %s2287_s24 = smov 0  }
   0x7   :  { %s2289_s25 = smov 0  }
   0x8 LB: > { %s1769_s26 = sadd.s32 4294967295, %s2241_s25   ;;  %s26_s27 = sadd.s32 1, %s2233_s23  ;;  %s2241_s25 = sphi %s2289_s25, %s14_s25   ;;  %s2237_s24 = sphi %s2287_s24, %s2800_s24   ;;  %s2233_s23 = sphi %s2285_s23, %s2799_s23   ;;  %s2229_s22 = sphi %s2283_s22, %s2798_s22   ;;  %s2225_s21 = sphi %s2281_s21, %s2797_s21   ;;  %s2221_s20 = sphi %s2279_s20, %s2796_s20   ;;  %s2217_s19 = sphi %s2277_s19, %s2795_s19   ;;  %s2213_s18 = sphi %s2275_s18, %s2794_s18   ;;  %s2209_s17 = sphi %s2273_s17, %s2793_s17   ;;  %s2205_s16 = sphi %s2271_s16, %s2792_s16   ;;  %s2201_s15 = sphi %s2269_s15, %s2791_s15  }
   0x9   : > { %p27_p0 = scmp.ge.s32.totalorder %s26_s27, 6  ;;  %s33_s28 = sadd.s32 1, %s2237_s24 }
   0xa   : > { %s42_s29 = sadd.s32 1, %s2221_s20  ;;  %p49_p1 = scmp.ne.s32.totalorder %s2221_s20, %s2217_s19 }
   0xb   : > { %s2802_s27 = smov (%p27_p0, %s26_s27), 0  ;;  %s2804_s28 = smov (!%p27_p0, %s33_s28), %s2237_s24 }
   0xc   : > { %2782 = sst [smem:[#allocation7_spill]] %s2802_s27  ;;  %s38_s30 = ssub.s32 %s2233_s23, %s2802_s27 }
   0xd   : > { %p50_p2 = scmp.eq.s32.totalorder %s2241_s25, 0  ;;  %p35_p3 = scmp.ge.s32.totalorder %s2804_s28, 2 }
   0xe   : > { %p40_p4 = scmp.eq.s32.totalorder %s38_s30, 0  ;;  %s70_s6 = sadd.s32 1, %s2213_s18 }
   0xf   : > { %p2338_p5 = por %p50_p2, %p49_p1  ;;  %s2806_s28 = smov (%p35_p3, %s2804_s28), 0 }
  0x10   : > { %2784 = sst [smem:[#allocation8_spill]] %s2806_s28  ;;  %s66_s8 = ssub.s32 %s2237_s24, %s2806_s28 }
  0x11   : > { %s2346_s7 = scalar_select %p40_p4, %s2221_s20, %s42_s29  }
  0x12   : > { %p77_p6 = scmp.ne.s32.totalorder %s2213_s18, %s2209_s17  ;;  %s67_s9 = sor.u32 %s66_s8, %s38_s30 }
  0x13   : > { %p122_p7 = scmp.eq.s32.totalorder %s66_s8, 0  ;;  %p68_p8 = scmp.eq.s32.totalorder %s67_s9, 0 }
  0x14   : > { %p2354_p9 = por %p77_p6, %p50_p2  ;;  %s124_s11 = sadd.s32 1, %s2205_s16 }
  0x15   : > { %p131_p10 = scmp.ne.s32.totalorder %s2205_s16, %s2201_s15  ;;  %p163_p12 = scmp.eq.s32.totalorder %s1769_s26, 11 }
  0x16   : > { %s2362_s12 = scalar_select %p68_p8, %s2213_s18, %s70_s6  }
  0x17   : > { %s2365_s13 = scalar_select %p122_p7, %s2205_s16, %s124_s11  }
  0x18   : > { %p2369_p11 = por %p131_p10, %p50_p2  ;;  %p2373_p13 = por %p163_p12, %p131_p10 }
  0x19   : > { %p1772_p0 = scmp.ge.s32.totalorder %s2241_s25, 12 }
  0x1b   : > { %185 = sbr.rel (%p1772_p0) target bundleno = 109 (0x6d), region = 16 }
  0x22   : > { %188 = sbr.rel (!%p2338_p5) target bundleno = 46 (0x2e), region = 20  ;;  %s190_s30 = sand.u32 (%p2338_p5), 1, %s2221_s20  }
  0x23   : > { %s1895_s6 = smul.u32 (%p2338_p5), 24, %s2233_s23  ;;  %s2788_s0 = sld [smem:[#allocation9_spill]] (%p2338_p5) }
  0x24   : > { %s1909_s8 = smul.u32 (%p2338_p5), 48, %s190_s30 }
  0x26   : > { %s192_s26 = scalar_lea.vmem (%p2338_p5), [#allocation3], %s1909_s8 }
  0x29   : > { %s198_s28 = scalar_lea.vmem %s2788_s0, %s1895_s6 }
  0x2a   : > { %v211_v0 = vld [vmem:[%s198_s28] sm:$0xff]  ;;  %v213_v1 = vld [vmem:[%s198_s28 + $0x8] sm:$0xff]  ;;  %v215_v2 = vld [vmem:[%s198_s28 + $0x10] sm:$0xff] }
  0x2b   : > { %212 = vst [vmem:[%s192_s26] sm:$0xff] %v211_v0  ;;  %214 = vst [vmem:[%s192_s26 + $0x8] sm:$0xff] %v213_v1  ;;  %v217_v3 = vld [vmem:[%s198_s28 + $0x90] sm:$0xff]  ;;  %v219_v4 = vld [vmem:[%s198_s28 + $0x98] sm:$0xff] }
  0x2c   : > { %216 = vst [vmem:[%s192_s26 + $0x10] sm:$0xff] %v215_v2  ;;  %v221_v5 = vld [vmem:[%s198_s28 + $0xa0] sm:$0xff]  ;;  %218 = vst [vmem:[%s192_s26 + $0x18] sm:$0xff] %v217_v3 }
  0x2d   : > { %220 = vst [vmem:[%s192_s26 + $0x20] sm:$0xff] %v219_v4  ;;  %222 = vst [vmem:[%s192_s26 + $0x28] sm:$0xff] %v221_v5 }
  0x2e PF: > { %228 = sbr.rel (!%p2354_p9) target bundleno = 102 (0x66), region = 43  ;;  %s230_s5 = sand.u32 (%p2354_p9), 1, %s2213_s18  }
  0x2f   : > { %s1910_s30 = smul.u32 (%p2354_p9), 768, %s230_s5  ;;  %s1774_s6 = sshll.u32 (%p2354_p9), %s2237_s24, 1 }
  0x30   : > { %s1896_s8 = smul.u32 (%p2354_p9), 384, %s2233_s23 }
  0x31   : > { %s2398_s10 = scalar_lea.vmem (%p2354_p9), [#allocation4], %s1910_s30 }
  0x32   : > { %s236_s9 = sadd.s32 (%p2354_p9), %s1896_s8, %s1774_s6 }
  0x33   : > { %s1776_s11 = sshll.u32 (%p2354_p9), %s236_s9, 2 }
  0x34   : > { %s2393_s28 = scalar_lea.vmem (%p2354_p9), %s2775_s1, %s1776_s11 }
  0x35   : > { %v456_v6 = vld [vmem:[%s2393_s28] sm:$0xff]  ;;  %v458_v7 = vld [vmem:[%s2393_s28 + $0x10] sm:$0xff] }
  0x36   : > { %v460_v8 = vld [vmem:[%s2393_s28 + $0x20] sm:$0xff]  ;;  %457 = vst [vmem:[%s2398_s10] sm:$0xff] %v456_v6  ;;  %459 = vst [vmem:[%s2398_s10 + $0x8] sm:$0xff] %v458_v7  ;;  %v462_v9 = vld [vmem:[%s2393_s28 + $0x30] sm:$0xff] }
  0x37   : > { %461 = vst [vmem:[%s2398_s10 + $0x10] sm:$0xff] %v460_v8  ;;  %v464_v10 = vld [vmem:[%s2393_s28 + $0x40] sm:$0xff]  ;;  %v466_v11 = vld [vmem:[%s2393_s28 + $0x50] sm:$0xff]  ;;  %463 = vst [vmem:[%s2398_s10 + $0x18] sm:$0xff] %v462_v9 }
  0x38   : > { %465 = vst [vmem:[%s2398_s10 + $0x20] sm:$0xff] %v464_v10  ;;  %467 = vst [vmem:[%s2398_s10 + $0x28] sm:$0xff] %v466_v11  ;;  %v468_v12 = vld [vmem:[%s2393_s28 + $0x60] sm:$0xff]  ;;  %v470_v13 = vld [vmem:[%s2393_s28 + $0x70] sm:$0xff] }
  0x39   : > { %v472_v14 = vld [vmem:[%s2393_s28 + $0x80] sm:$0xff]  ;;  %469 = vst [vmem:[%s2398_s10 + $0x30] sm:$0xff] %v468_v12  ;;  %471 = vst [vmem:[%s2398_s10 + $0x38] sm:$0xff] %v470_v13  ;;  %v474_v15 = vld [vmem:[%s2393_s28 + $0x90] sm:$0xff] }
  0x3a   : > { %473 = vst [vmem:[%s2398_s10 + $0x40] sm:$0xff] %v472_v14  ;;  %v476_v16 = vld [vmem:[%s2393_s28 + $0xa0] sm:$0xff]  ;;  %v478_v17 = vld [vmem:[%s2393_s28 + $0xb0] sm:$0xff]  ;;  %475 = vst [vmem:[%s2398_s10 + $0x48] sm:$0xff] %v474_v15 }
  0x3b   : > { %477 = vst [vmem:[%s2398_s10 + $0x50] sm:$0xff] %v476_v16  ;;  %479 = vst [vmem:[%s2398_s10 + $0x58] sm:$0xff] %v478_v17  ;;  %v480_v18 = vld [vmem:[%s2393_s28 + $0xc0] sm:$0xff]  ;;  %v482_v19 = vld [vmem:[%s2393_s28 + $0xd0] sm:$0xff] }
  0x3c   : > { %v484_v20 = vld [vmem:[%s2393_s28 + $0xe0] sm:$0xff]  ;;  %481 = vst [vmem:[%s2398_s10 + $0x60] sm:$0xff] %v480_v18  ;;  %483 = vst [vmem:[%s2398_s10 + $0x68] sm:$0xff] %v482_v19  ;;  %v486_v21 = vld [vmem:[%s2393_s28 + $0xf0] sm:$0xff] }
  0x3d   : > { %485 = vst [vmem:[%s2398_s10 + $0x70] sm:$0xff] %v484_v20  ;;  %v488_v22 = vld [vmem:[%s2393_s28 + $0x100] sm:$0xff]  ;;  %v490_v23 = vld [vmem:[%s2393_s28 + $0x110] sm:$0xff]  ;;  %487 = vst [vmem:[%s2398_s10 + $0x78] sm:$0xff] %v486_v21 }
  0x3e   : > { %489 = vst [vmem:[%s2398_s10 + $0x80] sm:$0xff] %v488_v22  ;;  %491 = vst [vmem:[%s2398_s10 + $0x88] sm:$0xff] %v490_v23  ;;  %v492_v24 = vld [vmem:[%s2393_s28 + $0x120] sm:$0xff]  ;;  %v494_v25 = vld [vmem:[%s2393_s28 + $0x130] sm:$0xff] }
  0x3f   : > { %v496_v26 = vld [vmem:[%s2393_s28 + $0x140] sm:$0xff]  ;;  %493 = vst [vmem:[%s2398_s10 + $0x90] sm:$0xff] %v492_v24  ;;  %495 = vst [vmem:[%s2398_s10 + $0x98] sm:$0xff] %v494_v25  ;;  %v498_v27 = vld [vmem:[%s2393_s28 + $0x150] sm:$0xff] }
  0x40   : > { %497 = vst [vmem:[%s2398_s10 + $0xa0] sm:$0xff] %v496_v26  ;;  %v500_v28 = vld [vmem:[%s2393_s28 + $0x160] sm:$0xff]  ;;  %v502_v29 = vld [vmem:[%s2393_s28 + $0x170] sm:$0xff]  ;;  %499 = vst [vmem:[%s2398_s10 + $0xa8] sm:$0xff] %v498_v27 }
  0x41   : > { %501 = vst [vmem:[%s2398_s10 + $0xb0] sm:$0xff] %v500_v28  ;;  %503 = vst [vmem:[%s2398_s10 + $0xb8] sm:$0xff] %v502_v29  ;;  %v504_v30 = vld [vmem:[%s2393_s28 + $0x180] sm:$0xff]  ;;  %v506_v31 = vld [vmem:[%s2393_s28 + $0x190] sm:$0xff] }
  0x42   : > { %v508_v32 = vld [vmem:[%s2393_s28 + $0x1a0] sm:$0xff]  ;;  %505 = vst [vmem:[%s2398_s10 + $0xc0] sm:$0xff] %v504_v30  ;;  %507 = vst [vmem:[%s2398_s10 + $0xc8] sm:$0xff] %v506_v31  ;;  %v510_v33 = vld [vmem:[%s2393_s28 + $0x1b0] sm:$0xff] }
  0x43   : > { %509 = vst [vmem:[%s2398_s10 + $0xd0] sm:$0xff] %v508_v32  ;;  %v512_v34 = vld [vmem:[%s2393_s28 + $0x1c0] sm:$0xff]  ;;  %v514_v35 = vld [vmem:[%s2393_s28 + $0x1d0] sm:$0xff]  ;;  %511 = vst [vmem:[%s2398_s10 + $0xd8] sm:$0xff] %v510_v33 }
  0x44   : > { %513 = vst [vmem:[%s2398_s10 + $0xe0] sm:$0xff] %v512_v34  ;;  %515 = vst [vmem:[%s2398_s10 + $0xe8] sm:$0xff] %v514_v35  ;;  %v516_v36 = vld [vmem:[%s2393_s28 + $0x1e0] sm:$0xff]  ;;  %v518_v37 = vld [vmem:[%s2393_s28 + $0x1f0] sm:$0xff] }
  0x45   : > { %v520_v38 = vld [vmem:[%s2393_s28 + $0x200] sm:$0xff]  ;;  %517 = vst [vmem:[%s2398_s10 + $0xf0] sm:$0xff] %v516_v36  ;;  %519 = vst [vmem:[%s2398_s10 + $0xf8] sm:$0xff] %v518_v37  ;;  %v522_v39 = vld [vmem:[%s2393_s28 + $0x210] sm:$0xff] }
  0x46   : > { %521 = vst [vmem:[%s2398_s10 + $0x100] sm:$0xff] %v520_v38  ;;  %v524_v40 = vld [vmem:[%s2393_s28 + $0x220] sm:$0xff]  ;;  %v526_v41 = vld [vmem:[%s2393_s28 + $0x230] sm:$0xff]  ;;  %523 = vst [vmem:[%s2398_s10 + $0x108] sm:$0xff] %v522_v39 }
  0x47   : > { %525 = vst [vmem:[%s2398_s10 + $0x110] sm:$0xff] %v524_v40  ;;  %527 = vst [vmem:[%s2398_s10 + $0x118] sm:$0xff] %v526_v41  ;;  %v528_v42 = vld [vmem:[%s2393_s28 + $0x240] sm:$0xff]  ;;  %v530_v43 = vld [vmem:[%s2393_s28 + $0x250] sm:$0xff] }
  0x48   : > { %v532_v44 = vld [vmem:[%s2393_s28 + $0x260] sm:$0xff]  ;;  %529 = vst [vmem:[%s2398_s10 + $0x120] sm:$0xff] %v528_v42  ;;  %531 = vst [vmem:[%s2398_s10 + $0x128] sm:$0xff] %v530_v43  ;;  %v534_v45 = vld [vmem:[%s2393_s28 + $0x270] sm:$0xff] }
  0x49   : > { %533 = vst [vmem:[%s2398_s10 + $0x130] sm:$0xff] %v532_v44  ;;  %v536_v46 = vld [vmem:[%s2393_s28 + $0x280] sm:$0xff]  ;;  %v538_v47 = vld [vmem:[%s2393_s28 + $0x290] sm:$0xff]  ;;  %535 = vst [vmem:[%s2398_s10 + $0x138] sm:$0xff] %v534_v45 }
  0x4a   : > { %537 = vst [vmem:[%s2398_s10 + $0x140] sm:$0xff] %v536_v46  ;;  %539 = vst [vmem:[%s2398_s10 + $0x148] sm:$0xff] %v538_v47  ;;  %v540_v48 = vld [vmem:[%s2393_s28 + $0x2a0] sm:$0xff]  ;;  %v542_v49 = vld [vmem:[%s2393_s28 + $0x2b0] sm:$0xff] }
  0x4b   : > { %v544_v50 = vld [vmem:[%s2393_s28 + $0x2c0] sm:$0xff]  ;;  %541 = vst [vmem:[%s2398_s10 + $0x150] sm:$0xff] %v540_v48  ;;  %543 = vst [vmem:[%s2398_s10 + $0x158] sm:$0xff] %v542_v49  ;;  %v546_v51 = vld [vmem:[%s2393_s28 + $0x2d0] sm:$0xff] }
  0x4c   : > { %545 = vst [vmem:[%s2398_s10 + $0x160] sm:$0xff] %v544_v50  ;;  %v548_v52 = vld [vmem:[%s2393_s28 + $0x2e0] sm:$0xff]  ;;  %v550_v53 = vld [vmem:[%s2393_s28 + $0x2f0] sm:$0xff]  ;;  %547 = vst [vmem:[%s2398_s10 + $0x168] sm:$0xff] %v546_v51 }
  0x4d   : > { %549 = vst [vmem:[%s2398_s10 + $0x170] sm:$0xff] %v548_v52  ;;  %551 = vst [vmem:[%s2398_s10 + $0x178] sm:$0xff] %v550_v53  ;;  %v552_v54 = vld [vmem:[%s2393_s28 + $0x300] sm:$0xff]  ;;  %v554_v55 = vld [vmem:[%s2393_s28 + $0x310] sm:$0xff] }
  0x4e   : > { %v556_v56 = vld [vmem:[%s2393_s28 + $0x320] sm:$0xff]  ;;  %553 = vst [vmem:[%s2398_s10 + $0x180] sm:$0xff] %v552_v54  ;;  %555 = vst [vmem:[%s2398_s10 + $0x188] sm:$0xff] %v554_v55  ;;  %v558_v57 = vld [vmem:[%s2393_s28 + $0x330] sm:$0xff] }
  0x4f   : > { %557 = vst [vmem:[%s2398_s10 + $0x190] sm:$0xff] %v556_v56  ;;  %v560_v58 = vld [vmem:[%s2393_s28 + $0x340] sm:$0xff]  ;;  %v562_v59 = vld [vmem:[%s2393_s28 + $0x350] sm:$0xff]  ;;  %559 = vst [vmem:[%s2398_s10 + $0x198] sm:$0xff] %v558_v57 }
  0x50   : > { %561 = vst [vmem:[%s2398_s10 + $0x1a0] sm:$0xff] %v560_v58  ;;  %563 = vst [vmem:[%s2398_s10 + $0x1a8] sm:$0xff] %v562_v59  ;;  %v564_v60 = vld [vmem:[%s2393_s28 + $0x360] sm:$0xff]  ;;  %v566_v61 = vld [vmem:[%s2393_s28 + $0x370] sm:$0xff] }
  0x51   : > { %v568_v62 = vld [vmem:[%s2393_s28 + $0x380] sm:$0xff]  ;;  %565 = vst [vmem:[%s2398_s10 + $0x1b0] sm:$0xff] %v564_v60  ;;  %567 = vst [vmem:[%s2398_s10 + $0x1b8] sm:$0xff] %v566_v61  ;;  %v570_v63 = vld [vmem:[%s2393_s28 + $0x390] sm:$0xff] }
  0x52   : > { %569 = vst [vmem:[%s2398_s10 + $0x1c0] sm:$0xff] %v568_v62  ;;  %v572_v0 = vld [vmem:[%s2393_s28 + $0x3a0] sm:$0xff]  ;;  %v574_v1 = vld [vmem:[%s2393_s28 + $0x3b0] sm:$0xff]  ;;  %571 = vst [vmem:[%s2398_s10 + $0x1c8] sm:$0xff] %v570_v63 }
  0x53   : > { %573 = vst [vmem:[%s2398_s10 + $0x1d0] sm:$0xff] %v572_v0  ;;  %575 = vst [vmem:[%s2398_s10 + $0x1d8] sm:$0xff] %v574_v1  ;;  %v576_v2 = vld [vmem:[%s2393_s28 + $0x3c0] sm:$0xff]  ;;  %v578_v3 = vld [vmem:[%s2393_s28 + $0x3d0] sm:$0xff] }
  0x54   : > { %v580_v4 = vld [vmem:[%s2393_s28 + $0x3e0] sm:$0xff]  ;;  %577 = vst [vmem:[%s2398_s10 + $0x1e0] sm:$0xff] %v576_v2  ;;  %579 = vst [vmem:[%s2398_s10 + $0x1e8] sm:$0xff] %v578_v3  ;;  %v582_v5 = vld [vmem:[%s2393_s28 + $0x3f0] sm:$0xff] }
  0x55   : > { %581 = vst [vmem:[%s2398_s10 + $0x1f0] sm:$0xff] %v580_v4  ;;  %v584_v6 = vld [vmem:[%s2393_s28 + $0x400] sm:$0xff]  ;;  %v586_v7 = vld [vmem:[%s2393_s28 + $0x410] sm:$0xff]  ;;  %583 = vst [vmem:[%s2398_s10 + $0x1f8] sm:$0xff] %v582_v5 }
  0x56   : > { %585 = vst [vmem:[%s2398_s10 + $0x200] sm:$0xff] %v584_v6  ;;  %587 = vst [vmem:[%s2398_s10 + $0x208] sm:$0xff] %v586_v7  ;;  %v588_v8 = vld [vmem:[%s2393_s28 + $0x420] sm:$0xff]  ;;  %v590_v9 = vld [vmem:[%s2393_s28 + $0x430] sm:$0xff] }
  0x57   : > { %v592_v10 = vld [vmem:[%s2393_s28 + $0x440] sm:$0xff]  ;;  %589 = vst [vmem:[%s2398_s10 + $0x210] sm:$0xff] %v588_v8  ;;  %591 = vst [vmem:[%s2398_s10 + $0x218] sm:$0xff] %v590_v9  ;;  %v594_v11 = vld [vmem:[%s2393_s28 + $0x450] sm:$0xff] }
  0x58   : > { %593 = vst [vmem:[%s2398_s10 + $0x220] sm:$0xff] %v592_v10  ;;  %v596_v12 = vld [vmem:[%s2393_s28 + $0x460] sm:$0xff]  ;;  %v598_v13 = vld [vmem:[%s2393_s28 + $0x470] sm:$0xff]  ;;  %595 = vst [vmem:[%s2398_s10 + $0x228] sm:$0xff] %v594_v11 }
  0x59   : > { %597 = vst [vmem:[%s2398_s10 + $0x230] sm:$0xff] %v596_v12  ;;  %599 = vst [vmem:[%s2398_s10 + $0x238] sm:$0xff] %v598_v13  ;;  %v600_v14 = vld [vmem:[%s2393_s28 + $0x480] sm:$0xff]  ;;  %v602_v15 = vld [vmem:[%s2393_s28 + $0x490] sm:$0xff] }
  0x5a   : > { %v604_v16 = vld [vmem:[%s2393_s28 + $0x4a0] sm:$0xff]  ;;  %601 = vst [vmem:[%s2398_s10 + $0x240] sm:$0xff] %v600_v14  ;;  %603 = vst [vmem:[%s2398_s10 + $0x248] sm:$0xff] %v602_v15  ;;  %v606_v17 = vld [vmem:[%s2393_s28 + $0x4b0] sm:$0xff] }
  0x5b   : > { %605 = vst [vmem:[%s2398_s10 + $0x250] sm:$0xff] %v604_v16  ;;  %v608_v18 = vld [vmem:[%s2393_s28 + $0x4c0] sm:$0xff]  ;;  %v610_v19 = vld [vmem:[%s2393_s28 + $0x4d0] sm:$0xff]  ;;  %607 = vst [vmem:[%s2398_s10 + $0x258] sm:$0xff] %v606_v17 }
  0x5c   : > { %609 = vst [vmem:[%s2398_s10 + $0x260] sm:$0xff] %v608_v18  ;;  %611 = vst [vmem:[%s2398_s10 + $0x268] sm:$0xff] %v610_v19  ;;  %v612_v20 = vld [vmem:[%s2393_s28 + $0x4e0] sm:$0xff]  ;;  %v614_v21 = vld [vmem:[%s2393_s28 + $0x4f0] sm:$0xff] }
  0x5d   : > { %v616_v22 = vld [vmem:[%s2393_s28 + $0x500] sm:$0xff]  ;;  %613 = vst [vmem:[%s2398_s10 + $0x270] sm:$0xff] %v612_v20  ;;  %615 = vst [vmem:[%s2398_s10 + $0x278] sm:$0xff] %v614_v21  ;;  %v618_v23 = vld [vmem:[%s2393_s28 + $0x510] sm:$0xff] }
  0x5e   : > { %617 = vst [vmem:[%s2398_s10 + $0x280] sm:$0xff] %v616_v22  ;;  %v620_v24 = vld [vmem:[%s2393_s28 + $0x520] sm:$0xff]  ;;  %v622_v25 = vld [vmem:[%s2393_s28 + $0x530] sm:$0xff]  ;;  %619 = vst [vmem:[%s2398_s10 + $0x288] sm:$0xff] %v618_v23 }
  0x5f   : > { %621 = vst [vmem:[%s2398_s10 + $0x290] sm:$0xff] %v620_v24  ;;  %623 = vst [vmem:[%s2398_s10 + $0x298] sm:$0xff] %v622_v25  ;;  %v624_v26 = vld [vmem:[%s2393_s28 + $0x540] sm:$0xff]  ;;  %v626_v27 = vld [vmem:[%s2393_s28 + $0x550] sm:$0xff] }
  0x60   : > { %v628_v28 = vld [vmem:[%s2393_s28 + $0x560] sm:$0xff]  ;;  %625 = vst [vmem:[%s2398_s10 + $0x2a0] sm:$0xff] %v624_v26  ;;  %627 = vst [vmem:[%s2398_s10 + $0x2a8] sm:$0xff] %v626_v27  ;;  %v630_v29 = vld [vmem:[%s2393_s28 + $0x570] sm:$0xff] }
  0x61   : > { %629 = vst [vmem:[%s2398_s10 + $0x2b0] sm:$0xff] %v628_v28  ;;  %v632_v30 = vld [vmem:[%s2393_s28 + $0x580] sm:$0xff]  ;;  %v634_v31 = vld [vmem:[%s2393_s28 + $0x590] sm:$0xff]  ;;  %631 = vst [vmem:[%s2398_s10 + $0x2b8] sm:$0xff] %v630_v29 }
  0x62   : > { %633 = vst [vmem:[%s2398_s10 + $0x2c0] sm:$0xff] %v632_v30  ;;  %635 = vst [vmem:[%s2398_s10 + $0x2c8] sm:$0xff] %v634_v31  ;;  %v636_v32 = vld [vmem:[%s2393_s28 + $0x5a0] sm:$0xff]  ;;  %v638_v33 = vld [vmem:[%s2393_s28 + $0x5b0] sm:$0xff] }
  0x63   : > { %v640_v34 = vld [vmem:[%s2393_s28 + $0x5c0] sm:$0xff]  ;;  %637 = vst [vmem:[%s2398_s10 + $0x2d0] sm:$0xff] %v636_v32  ;;  %639 = vst [vmem:[%s2398_s10 + $0x2d8] sm:$0xff] %v638_v33  ;;  %v642_v35 = vld [vmem:[%s2393_s28 + $0x5d0] sm:$0xff] }
  0x64   : > { %641 = vst [vmem:[%s2398_s10 + $0x2e0] sm:$0xff] %v640_v34  ;;  %v644_v36 = vld [vmem:[%s2393_s28 + $0x5e0] sm:$0xff]  ;;  %v646_v37 = vld [vmem:[%s2393_s28 + $0x5f0] sm:$0xff]  ;;  %643 = vst [vmem:[%s2398_s10 + $0x2e8] sm:$0xff] %v642_v35 }
  0x65   : > { %645 = vst [vmem:[%s2398_s10 + $0x2f0] sm:$0xff] %v644_v36  ;;  %647 = vst [vmem:[%s2398_s10 + $0x2f8] sm:$0xff] %v646_v37 }
  0x66 PF: > { %661 = sbr.rel (!%p2369_p11) target bundleno = 109 (0x6d), region = 85  ;;  %s663_s0 = sand.u32 (%p2369_p11), 1, %s2205_s16  }
  0x67   : > { %s1897_s27 = sshll.u32 (%p2369_p11), %s2237_s24, 3  ;;  %s1777_s26 = sshll.u32 (%p2369_p11), %s663_s0, 4 }
  0x68   : > { %s671_s6 = scalar_lea.vmem (%p2369_p11), %s2777_s3, %s1897_s27  ;;  %s665_s8 = scalar_lea.vmem (%p2369_p11), [#allocation5], %s1777_s26 }
  0x69   : > { %v701_v38 = vld [vmem:[%s671_s6] sm:$0xff] (%p2369_p11)  ;;  %v703_v39 = vld [vmem:[%s671_s6 + $0x10] sm:$0xff] (%p2369_p11) }
  0x6a   : > { %702 = vst [vmem:[%s665_s8] sm:$0xff] (%p2369_p11), %v701_v38  ;;  %704 = vst [vmem:[%s665_s8 + $0x8] sm:$0xff] (%p2369_p11), %v703_v39 }
  0x6d PF: > { %p1780_p1 = scmp.ge.s32.totalorder %s2241_s25, 1  ;;  %p709_p2 = scmp.lt.s32.totalorder %s2241_s25, 13 }
  0x6f   : > { %p710_p3 = pnand %p1780_p1, %p709_p2 }
  0x70   : > { %s716_s14 = sand.u32 (!%p710_p3), 1, %s2217_s19   ;;  %s723_s9 = sand.u32 (!%p710_p3), 1, %s2209_s17  }
  0x71   : > { %713 = sbr.rel (%p710_p3) target bundleno = 500 (0x1f4), region = 123  ;;  %s730_s28 = sand.u32 (!%p710_p3), 1, %s2201_s15  }
  0x72   : > { %s1911_s11 = smul.u32 (!%p710_p3), 48, %s716_s14  ;;  %s2601_s0 = sshll.u32 (!%p710_p3), %s730_s28, 4 }
  0x73   : > { %s1912_s10 = smul.u32 (!%p710_p3), 768, %s723_s9  ;;  %s1783_s27 = sshll.u32 (!%p710_p3), %s2229_s22, 1 }
  0x74   : > { %p771_p4 = scmp.lt.s32.totalorder (!%p710_p3), %s1783_s27, 3  ;;  %s2610_s6 = scalar_lea.vmem (!%p710_p3), [#allocation3], %s1911_s11 }
  0x75   : > { %s2612_s19 = scalar_lea.vmem (!%p710_p3), [#allocation4], %s1912_s10  ;;  %s732_s17 = scalar_lea.vmem (!%p710_p3), [#allocation5], %s2601_s0 }
  0x76   : > { %s2616_s15 = scalar_lea.vmem (!%p710_p3), [#allocation6], %s2601_s0  ;;  %p1784_p5 = scmp.ne.s32.totalorder (!%p710_p3), %s2225_s21, 0 }
  0x78   : > { %s2808_s27 = smov (!%p771_p4, %s1783_s27), 3  ;;  %782 = sbr.rel (%p1784_p5) target bundleno = 127 (0x7f), region = 139 }
  0x79   : > { %s773_s30 = scalar_lea.vmem %s2776_s2, %s2808_s27  ;;  %v2243_v40 = vmov (!%p1784_p5), 0.0  }
  0x7a   : > { %783 = vst [vmem:[#allocation2] sm:$0xff] (!%p1784_p5), %v2243_v40  ;;  %784 = vst [vmem:[#allocation2 + $0x8] sm:$0xff] (!%p1784_p5), %v2243_v40 }
  0x7b   : > { %785 = vst [vmem:[#allocation2 + $0x10] sm:$0xff] (!%p1784_p5), %v2243_v40  ;;  %786 = vst [vmem:[#allocation2 + $0x18] sm:$0xff] (!%p1784_p5), %v2243_v40 }
  0x7f PF: > { %v2002_v41 = vld [vmem:[%s2612_s19 + $0x104] ss:$8 sps:$4 sm:$0xff]   ;;  %v2004_v42 = vld [vmem:[%s2612_s19 + $0x100] ss:$8 sps:$4 sm:$0xff]   ;;  %v2005_v43 = vld [vmem:[%s2612_s19 + $0x114] ss:$8 sps:$4 sm:$0xff]  }
  0x80   : > { %1446 = vmatprep.subr.bf16.mxu0 %v2002_v41  ;;  %v2007_v44 = vld [vmem:[%s2612_s19 + $0x110] ss:$8 sps:$4 sm:$0xff]   ;;  %v2008_v45 = vld [vmem:[%s2612_s19 + $0x124] ss:$8 sps:$4 sm:$0xff]   ;;  %v2010_v46 = vld [vmem:[%s2612_s19 + $0x120] ss:$8 sps:$4 sm:$0xff]  }
  0x81   : > { %1447 = vmatpush1.bf16.msra.mxu0 %v2004_v42  ;;  %v2011_v47 = vld [vmem:[%s2612_s19 + $0x134] ss:$8 sps:$4 sm:$0xff]   ;;  %v2013_v48 = vld [vmem:[%s2612_s19 + $0x130] ss:$8 sps:$4 sm:$0xff]   ;;  %v2014_v49 = vld [vmem:[%s2612_s19 + $0x144] ss:$8 sps:$4 sm:$0xff]  }
  0x82   : > { %1448 = vmatprep.subr.bf16.mxu0 %v2005_v43  ;;  %v2016_v50 = vld [vmem:[%s2612_s19 + $0x140] ss:$8 sps:$4 sm:$0xff]   ;;  %v2017_v51 = vld [vmem:[%s2612_s19 + $0x154] ss:$8 sps:$4 sm:$0xff]   ;;  %v2019_v52 = vld [vmem:[%s2612_s19 + $0x150] ss:$8 sps:$4 sm:$0xff]  }
  0x83   : > { %v2020_v53 = vld [vmem:[%s2612_s19 + $0x164] ss:$8 sps:$4 sm:$0xff]   ;;  %v2052_v55 = vld [vmem:[%s2612_s19] ss:$8 sps:$4 sm:$0xff]   ;;  %v2023_v58 = vld [vmem:[%s2612_s19 + $0x174] ss:$8 sps:$4 sm:$0xff]  }
  0x84   : > { %v2049_v54 = vld [vmem:[%s2612_s19 + $0x4] ss:$8 sps:$4 sm:$0xff]   ;;  %v2022_v56 = vld [vmem:[%s2612_s19 + $0x160] ss:$8 sps:$4 sm:$0xff]   ;;  %v2059_v59 = vld [vmem:[%s2612_s19 + $0x14] ss:$8 sps:$4 sm:$0xff]  }
  0x85   : > { %1449 = vmatpush1.bf16.msra.mxu0 %v2007_v44  ;;  %1403 = vmatprep.subr.bf16.mxu1 %v2049_v54  ;;  %v2055_v57 = vld [vmem:[%s2610_s6 + $0xc] ss:$24 sps:$4 sm:$0xff]   ;;  %v2061_v60 = vld [vmem:[%s2612_s19 + $0x10] ss:$8 sps:$4 sm:$0xff]   ;;  %v2067_v0 = vld [vmem:[%s2612_s19 + $0x20] ss:$8 sps:$4 sm:$0xff]  }
  0x86   : > { %1450 = vmatprep.subr.bf16.mxu0 %v2008_v45  ;;  %1404 = vmatpush1.bf16.msra.mxu1 %v2052_v55  ;;  %v2025_v61 = vld [vmem:[%s2612_s19 + $0x170] ss:$8 sps:$4 sm:$0xff]   ;;  %v2026_v62 = vld [vmem:[%s2612_s19 + $0x184] ss:$8 sps:$4 sm:$0xff]   ;;  %v2028_v1 = vld [vmem:[%s2612_s19 + $0x180] ss:$8 sps:$4 sm:$0xff]  }
  0x87   : > { %1478 = vmatprep.mubr.bf16.mxu0 %v2055_v57  ;;  %1405 = vmatprep.subr.bf16.mxu1 %v2059_v59  ;;  %v2065_v63 = vld [vmem:[%s2612_s19 + $0x24] ss:$8 sps:$4 sm:$0xff]   ;;  %v2071_v2 = vld [vmem:[%s2612_s19 + $0x34] ss:$8 sps:$4 sm:$0xff]   ;;  %v2073_v4 = vld [vmem:[%s2612_s19 + $0x30] ss:$8 sps:$4 sm:$0xff]  }
  0x88   : > { %v2029_v3 = vld [vmem:[%s2612_s19 + $0x194] ss:$8 sps:$4 sm:$0xff]   ;;  %v2077_v5 = vld [vmem:[%s2612_s19 + $0x44] ss:$8 sps:$4 sm:$0xff]   ;;  %v2031_v6 = vld [vmem:[%s2612_s19 + $0x190] ss:$8 sps:$4 sm:$0xff]  }
  0x89   : > { %1451 = vmatpush1.bf16.msra.mxu0 %v2010_v46  ;;  %v2032_v7 = vld [vmem:[%s2612_s19 + $0x1a4] ss:$8 sps:$4 sm:$0xff]   ;;  %v2079_v8 = vld [vmem:[%s2612_s19 + $0x40] ss:$8 sps:$4 sm:$0xff]   ;;  %v2083_v9 = vld [vmem:[%s2612_s19 + $0x54] ss:$8 sps:$4 sm:$0xff]  }
  0x8a   : > { %1452 = vmatprep.subr.bf16.mxu0 %v2011_v47  ;;  %1406 = vmatpush1.bf16.msra.mxu1 %v2061_v60  ;;  %v2034_v10 = vld [vmem:[%s2612_s19 + $0x1a0] ss:$8 sps:$4 sm:$0xff]   ;;  %v2035_v11 = vld [vmem:[%s2612_s19 + $0x1b4] ss:$8 sps:$4 sm:$0xff]   ;;  %v2085_v12 = vld [vmem:[%s2612_s19 + $0x50] ss:$8 sps:$4 sm:$0xff]  }
  0x8b   : > { %1407 = vmatprep.subr.bf16.mxu1 %v2065_v63  ;;  %v2089_v13 = vld [vmem:[%s2612_s19 + $0x64] ss:$8 sps:$4 sm:$0xff]   ;;  %v2037_v14 = vld [vmem:[%s2612_s19 + $0x1b0] ss:$8 sps:$4 sm:$0xff]   ;;  %v2091_v16 = vld [vmem:[%s2612_s19 + $0x60] ss:$8 sps:$4 sm:$0xff]  }
  0x8c   : > { %v2038_v15 = vld [vmem:[%s2612_s19 + $0x1c4] ss:$8 sps:$4 sm:$0xff]   ;;  %v2095_v17 = vld [vmem:[%s2612_s19 + $0x74] ss:$8 sps:$4 sm:$0xff]   ;;  %v2040_v18 = vld [vmem:[%s2612_s19 + $0x1c0] ss:$8 sps:$4 sm:$0xff]  }
  0x8d   : > { %1453 = vmatpush1.bf16.msra.mxu0 %v2013_v48  ;;  %v2041_v19 = vld [vmem:[%s2612_s19 + $0x1d4] ss:$8 sps:$4 sm:$0xff]   ;;  %v2097_v20 = vld [vmem:[%s2612_s19 + $0x70] ss:$8 sps:$4 sm:$0xff]   ;;  %v2101_v21 = vld [vmem:[%s2612_s19 + $0x84] ss:$8 sps:$4 sm:$0xff]  }
  0x8e   : > { %1454 = vmatprep.subr.bf16.mxu0 %v2014_v49  ;;  %1408 = vmatpush1.bf16.msra.mxu1 %v2067_v0  ;;  %v2043_v22 = vld [vmem:[%s2612_s19 + $0x1d0] ss:$8 sps:$4 sm:$0xff]   ;;  %v2044_v23 = vld [vmem:[%s2612_s19 + $0x1e4] ss:$8 sps:$4 sm:$0xff]   ;;  %v2103_v24 = vld [vmem:[%s2612_s19 + $0x80] ss:$8 sps:$4 sm:$0xff]  }
  0x8f   : > { %1409 = vmatprep.subr.bf16.mxu1 %v2071_v2  ;;  %v2107_v25 = vld [vmem:[%s2612_s19 + $0x94] ss:$8 sps:$4 sm:$0xff]   ;;  %v2046_v26 = vld [vmem:[%s2612_s19 + $0x1e0] ss:$8 sps:$4 sm:$0xff]   ;;  %v2109_v28 = vld [vmem:[%s2612_s19 + $0x90] ss:$8 sps:$4 sm:$0xff]  }
  0x90   : > { %v2047_v27 = vld [vmem:[%s2612_s19 + $0x1f4] ss:$8 sps:$4 sm:$0xff]   ;;  %v2113_v29 = vld [vmem:[%s2612_s19 + $0xa4] ss:$8 sps:$4 sm:$0xff]   ;;  %v2051_v30 = vld [vmem:[%s2612_s19 + $0x1f0] ss:$8 sps:$4 sm:$0xff]  }
  0x91   : > { %1455 = vmatpush1.bf16.msra.mxu0 %v2016_v50  ;;  %v2058_v31 = vld [vmem:[%s2612_s19 + $0x204] ss:$8 sps:$4 sm:$0xff]   ;;  %v2115_v32 = vld [vmem:[%s2612_s19 + $0xa0] ss:$8 sps:$4 sm:$0xff]   ;;  %v2119_v34 = vld [vmem:[%s2612_s19 + $0xb4] ss:$8 sps:$4 sm:$0xff]  }
  0x92   : > { %1456 = vmatprep.subr.bf16.mxu0 %v2017_v51  ;;  %1410 = vmatpush1.bf16.msra.mxu1 %v2073_v4  ;;  %v2053_v33 = vld [vmem:[%s2610_s6 + $0x8] ss:$24 sps:$4 sm:$0xff]   ;;  %v2064_v36 = vld [vmem:[%s2612_s19 + $0x214] ss:$8 sps:$4 sm:$0xff]   ;;  %v2125_v39 = vld [vmem:[%s2612_s19 + $0xc4] ss:$8 sps:$4 sm:$0xff]  }
  0x93   : > { %1411 = vmatprep.subr.bf16.mxu1 %v2077_v5  ;;  %v2056_v35 = vld [vmem:[%s2612_s19 + $0x200] ss:$8 sps:$4 sm:$0xff]   ;;  %v2121_v37 = vld [vmem:[%s2612_s19 + $0xb0] ss:$8 sps:$4 sm:$0xff]   ;;  %v2148_v38 = vld [vmem:[%s2610_s6 + $0x4] ss:$24 sps:$4 sm:$0xff]  }
  0x94   : > { %v2062_v40 = vld [vmem:[%s2612_s19 + $0x210] ss:$8 sps:$4 sm:$0xff]   ;;  %1435 = vmatprep.mubr.bf16.mxu1 %v2148_v38  ;;  %v2154_v41 = vld [vmem:[%s2610_s6 + $0x14] ss:$24 sps:$4 sm:$0xff]   ;;  %v2127_v43 = vld [vmem:[%s2612_s19 + $0xc0] ss:$8 sps:$4 sm:$0xff]  }
  0x95   : > { %1457 = vmatpush1.bf16.msra.mxu0 %v2019_v52  ;;  %v2070_v42 = vld [vmem:[%s2612_s19 + $0x224] ss:$8 sps:$4 sm:$0xff]   ;;  %v2131_v44 = vld [vmem:[%s2612_s19 + $0xd4] ss:$8 sps:$4 sm:$0xff]   ;;  %v2068_v45 = vld [vmem:[%s2612_s19 + $0x220] ss:$8 sps:$4 sm:$0xff]  }
  0x96   : > { %1458 = vmatprep.subr.bf16.mxu0 %v2020_v53  ;;  %1412 = vmatpush1.bf16.msra.mxu1 %v2079_v8  ;;  %v2076_v46 = vld [vmem:[%s2612_s19 + $0x234] ss:$8 sps:$4 sm:$0xff]   ;;  %v2133_v47 = vld [vmem:[%s2612_s19 + $0xd0] ss:$8 sps:$4 sm:$0xff]   ;;  %v2137_v48 = vld [vmem:[%s2612_s19 + $0xe4] ss:$8 sps:$4 sm:$0xff]  }
  0x97   : > { %1413 = vmatprep.subr.bf16.mxu1 %v2083_v9  ;;  %v2074_v49 = vld [vmem:[%s2612_s19 + $0x230] ss:$8 sps:$4 sm:$0xff]   ;;  %v2082_v50 = vld [vmem:[%s2612_s19 + $0x244] ss:$8 sps:$4 sm:$0xff]   ;;  %v2139_v51 = vld [vmem:[%s2612_s19 + $0xe0] ss:$8 sps:$4 sm:$0xff]  }
  0x98   : > { %v2143_v52 = vld [vmem:[%s2612_s19 + $0xf4] ss:$8 sps:$4 sm:$0xff]   ;;  %v2080_v53 = vld [vmem:[%s2612_s19 + $0x240] ss:$8 sps:$4 sm:$0xff]   ;;  %v2145_v55 = vld [vmem:[%s2612_s19 + $0xf0] ss:$8 sps:$4 sm:$0xff]  }
  0x99   : > { %1459 = vmatpush1.bf16.msra.mxu0 %v2022_v56  ;;  %v2088_v54 = vld [vmem:[%s2612_s19 + $0x254] ss:$8 sps:$4 sm:$0xff]   ;;  %v2086_v56 = vld [vmem:[%s2612_s19 + $0x250] ss:$8 sps:$4 sm:$0xff]   ;;  %v2094_v57 = vld [vmem:[%s2612_s19 + $0x264] ss:$8 sps:$4 sm:$0xff]  }
  0x9a   : > { %1460 = vmatprep.subr.bf16.mxu0 %v2023_v58  ;;  %1414 = vmatpush1.bf16.msra.mxu1 %v2085_v12  ;;  %v2146_v58 = vld [vmem:[%s2610_s6] ss:$24 sps:$4 sm:$0xff]   ;;  %v2100_v60 = vld [vmem:[%s2612_s19 + $0x274] ss:$8 sps:$4 sm:$0xff]   ;;  %v2118_v2 = vld [vmem:[%s2612_s19 + $0x2a4] ss:$8 sps:$4 sm:$0xff]  }
  0x9b   : > { %1415 = vmatprep.subr.bf16.mxu1 %v2089_v13  ;;  %v2092_v59 = vld [vmem:[%s2612_s19 + $0x260] ss:$8 sps:$4 sm:$0xff]   ;;  %v2112_v0 = vld [vmem:[%s2612_s19 + $0x294] ss:$8 sps:$4 sm:$0xff]   ;;  %v2122_v5 = vld [vmem:[%s2612_s19 + $0x2b0] ss:$8 sps:$4 sm:$0xff]  }
  0x9c   : > { %v2104_v63 = vld [vmem:[%s2612_s19 + $0x280] ss:$8 sps:$4 sm:$0xff]   ;;  %v2124_v4 = vld [vmem:[%s2612_s19 + $0x2b4] ss:$8 sps:$4 sm:$0xff]   ;;  %v2134_v9 = vld [vmem:[%s2612_s19 + $0x2d0] ss:$8 sps:$4 sm:$0xff]  }
  0x9d   : > { %1461 = vmatpush1.bf16.msra.mxu0 %v2025_v61  ;;  %v2098_v61 = vld [vmem:[%s2612_s19 + $0x270] ss:$8 sps:$4 sm:$0xff]   ;;  %v2136_v8 = vld [vmem:[%s2612_s19 + $0x2d4] ss:$8 sps:$4 sm:$0xff]   ;;  %p1887_p6 = scmp.ne.s32.totalorder %s2225_s21, 5 }
  0x9e   : > { %1462 = vmatprep.subr.bf16.mxu0 %v2026_v62  ;;  %1416 = vmatpush1.bf16.msra.mxu1 %v2091_v16  ;;  %v2106_v62 = vld [vmem:[%s2612_s19 + $0x284] ss:$8 sps:$4 sm:$0xff]   ;;  %v2151_v12 = vld [vmem:[%s2612_s19 + $0x2f4] ss:$8 sps:$4 sm:$0xff]   ;;  %v2149_v13 = vld [vmem:[%s2612_s19 + $0x2f0] ss:$8 sps:$4 sm:$0xff]  }
  0x9f   : > { %1417 = vmatprep.subr.bf16.mxu1 %v2095_v17  ;;  %v1548_v38 = vld [vmem:[%s773_s30] sm:$0x3] (!%p1887_p6) }
  0xa1   : > { %1463 = vmatpush1.bf16.msra.mxu0 %v2028_v1  ;;  %v2110_v1 = vld [vmem:[%s2612_s19 + $0x290] ss:$8 sps:$4 sm:$0xff]  }
  0xa2   : > { %1464 = vmatprep.subr.bf16.mxu0 %v2029_v3  ;;  %1418 = vmatpush1.bf16.msra.mxu1 %v2097_v20  ;;  %v2116_v3 = vld [vmem:[%s2612_s19 + $0x2a0] ss:$8 sps:$4 sm:$0xff]  }
  0xa3   : > { %1419 = vmatprep.subr.bf16.mxu1 %v2101_v21 }
  0xa5   : > { %1465 = vmatpush1.bf16.msra.mxu0 %v2031_v6  ;;  %v2130_v6 = vld [vmem:[%s2612_s19 + $0x2c4] ss:$8 sps:$4 sm:$0xff]  }
  0xa6   : > { %1466 = vmatprep.subr.bf16.mxu0 %v2032_v7  ;;  %1420 = vmatpush1.bf16.msra.mxu1 %v2103_v24  ;;  %v2128_v7 = vld [vmem:[%s2612_s19 + $0x2c0] ss:$8 sps:$4 sm:$0xff]  }
  0xa7   : > { %1421 = vmatprep.subr.bf16.mxu1 %v2107_v25  ;;  %v789_v25 = vld [vmem:[#allocation2 + $0x10] sm:$0xff] }
  0xa9   : > { %1467 = vmatpush1.bf16.msra.mxu0 %v2034_v10  ;;  %v2142_v10 = vld [vmem:[%s2612_s19 + $0x2e4] ss:$8 sps:$4 sm:$0xff]  }
  0xaa   : > { %1468 = vmatprep.subr.bf16.mxu0 %v2035_v11  ;;  %1422 = vmatpush1.bf16.msra.mxu1 %v2109_v28  ;;  %v2140_v11 = vld [vmem:[%s2612_s19 + $0x2e0] ss:$8 sps:$4 sm:$0xff]  }
  0xab   : > { %1423 = vmatprep.subr.bf16.mxu1 %v2113_v29  ;;  %v790_v29 = vld [vmem:[#allocation2 + $0x18] sm:$0xff] }
  0xad   : > { %1469 = vmatpush1.bf16.msra.mxu0 %v2037_v14  ;;  %v2152_v14 = vld [vmem:[%s2610_s6 + $0x10] ss:$24 sps:$4 sm:$0xff]  }
  0xae   : > { %1470 = vmatprep.subr.bf16.mxu0 %v2038_v15  ;;  %1424 = vmatpush1.bf16.msra.mxu1 %v2115_v32 }
  0xaf   : > { %1425 = vmatprep.subr.bf16.mxu1 %v2119_v34 }
  0xb1   : > { %1471 = vmatpush1.bf16.msra.mxu0 %v2040_v18 }
  0xb2   : > { %1472 = vmatprep.subr.bf16.mxu0 %v2041_v19  ;;  %1426 = vmatpush1.bf16.msra.mxu1 %v2121_v37  ;;  %v787_v19 = vld [vmem:[#allocation2] sm:$0xff] }
  0xb3   : > { %1427 = vmatprep.subr.bf16.mxu1 %v2125_v39  ;;  %v1564_v37 = vld [vmem:[%s732_s17] sm:$0xff] (!%p1887_p6)  ;;  %v1565_v39 = vld [vmem:[%s732_s17 + $0x8] sm:$0xff] (!%p1887_p6) }
  0xb5   : > { %1473 = vmatpush1.bf16.msra.mxu0 %v2043_v22  ;;  %v788_v22 = vld [vmem:[#allocation2 + $0x8] sm:$0xff] }
  0xb6   : > { %1474 = vmatprep.subr.bf16.mxu0 %v2044_v23  ;;  %1428 = vmatpush1.bf16.msra.mxu1 %v2127_v43 }
  0xb7   : > { %1429 = vmatprep.subr.bf16.mxu1 %v2131_v44  ;;  %v1566_v44 = vunpack.c.l.bf16 (!%p1887_p6), %v1564_v37 }
  0xb9   : > { %1475 = vmatpush1.bf16.msra.mxu0 %v2046_v26 }
  0xba   : > { %1476 = vmatprep.subr.bf16.mxu0 %v2047_v27  ;;  %1430 = vmatpush1.bf16.msra.mxu1 %v2133_v47 }
  0xbb   : > { %1431 = vmatprep.subr.bf16.mxu1 %v2137_v48 }
  0xbd   : > { %1477 = vmatpush1.bf16.msra.mxu0 %v2051_v30 }
  0xbe   : > { %1489 = vmatprep.subr.bf16.mxu0 %v2058_v31  ;;  %1432 = vmatpush1.bf16.msra.mxu1 %v2139_v51  ;;  %v1569_v51 = vunpack.c.h.bf16 (!%p1887_p6), %v1565_v39 }
  0xbf   : > { %1433 = vmatprep.subr.bf16.mxu1 %v2143_v52 }
  0xc0   : > { %1479 = vmatmul.mubr.bf16.vlgmr.msra.gmra.mrb[0].mxu0 %v2053_v33 }
  0xc1   : > { %1490 = vmatpush1.bf16.msra.mxu0 %v2056_v35  ;;  %1521 = vmatprep.mubr.bf16.mxu0 %v2154_v41  ;;  %v1550_v35 = vlaneseq (!%p1887_p6) }
  0xc2   : > { %1491 = vmatprep.subr.bf16.mxu0 %v2064_v36  ;;  %1434 = vmatpush1.bf16.msra.mxu1 %v2145_v55 }
  0xc3   : > { %v1551_v36 = vshrl.u32 (!%p1887_p6), %v1550_v35, 7 }
  0xc5   : > { %1492 = vmatpush1.bf16.msra.mxu0 %v2062_v40  ;;  %1436 = vmatmul.mubr.bf16.vlgmr.msra.gmra.mrb[0].mxu1 %v2146_v58  ;;  %v1552_v41 = vsub.s32 (!%p1887_p6), 0, %v1551_v36 }
  0xc6   : > { %1493 = vmatprep.subr.bf16.mxu0 %v2070_v42  ;;  %v1556_v42 = vsub.s32 (!%p1887_p6), 1, %v1551_v36 }
  0xc7   : > { %v1553_v48 = vrot.slane (!%p1887_p6), %v1548_v38, %v1552_v41 }
  0xc9   : > { %1494 = vmatpush1.bf16.msra.mxu0 %v2068_v45  ;;  %v1567_v45 = vunpack.c.h.bf16 (!%p1887_p6), %v1564_v37 }
  0xca   : > { %1495 = vmatprep.subr.bf16.mxu0 %v2076_v46 }
  0xcd   : > { %1496 = vmatpush1.bf16.msra.mxu0 %v2074_v49  ;;  %v1557_v49 = vrot.slane (!%p1887_p6), %v1548_v38, %v1556_v42 }
  0xce   : > { %1497 = vmatprep.subr.bf16.mxu0 %v2082_v50  ;;  %v1568_v50 = vunpack.c.l.bf16 (!%p1887_p6), %v1565_v39 }
  0xd1   : > { %1498 = vmatpush1.bf16.msra.mxu0 %v2080_v53 }
  0xd2   : > { %1499 = vmatprep.subr.bf16.mxu0 %v2088_v54 }
  0xd5   : > { %1500 = vmatpush1.bf16.msra.mxu0 %v2086_v56 }
  0xd6   : > { %1501 = vmatprep.subr.bf16.mxu0 %v2094_v57 }
  0xd9   : > { %1502 = vmatpush1.bf16.msra.mxu0 %v2092_v59 }
  0xda   : > { %1503 = vmatprep.subr.bf16.mxu0 %v2100_v60 }
  0xdd   : > { %1504 = vmatpush1.bf16.msra.mxu0 %v2098_v61 }
  0xde   : > { %1505 = vmatprep.subr.bf16.mxu0 %v2106_v62 }
  0xe1   : > { %1506 = vmatpush1.bf16.msra.mxu0 %v2104_v63 }
  0xe2   : > { %1507 = vmatprep.subr.bf16.mxu0 %v2112_v0 }
  0xe5   : > { %1508 = vmatpush1.bf16.msra.mxu0 %v2110_v1 }
  0xe6   : > { %1509 = vmatprep.subr.bf16.mxu0 %v2118_v2 }
  0xe9   : > { %1510 = vmatpush1.bf16.msra.mxu0 %v2116_v3 }
  0xea   : > { %1511 = vmatprep.subr.bf16.mxu0 %v2124_v4 }
  0xed   : > { %1512 = vmatpush1.bf16.msra.mxu0 %v2122_v5 }
  0xee   : > { %1513 = vmatprep.subr.bf16.mxu0 %v2130_v6 }
  0xf1   : > { %1514 = vmatpush1.bf16.msra.mxu0 %v2128_v7 }
  0xf2   : > { %1515 = vmatprep.subr.bf16.mxu0 %v2136_v8 }
  0xf5   : > { %1516 = vmatpush1.bf16.msra.mxu0 %v2134_v9 }
  0xf6   : > { %1517 = vmatprep.subr.bf16.mxu0 %v2142_v10 }
  0xf9   : > { %1518 = vmatpush1.bf16.msra.mxu0 %v2140_v11 }
  0xfa   : > { %1519 = vmatprep.subr.bf16.mxu0 %v2151_v12 }
  0xfd   : > { %1520 = vmatpush1.bf16.msra.mxu0 %v2149_v13 }
 0x100   : > { %1522 = vmatmul.mubr.bf16.vlgmr.msra.gmra.mrb[0].mxu0 %v2152_v14 }
 0x198   : > { %v1437_v15 = vpop.f32.mrb[0].mxu1 }
 0x199   : > { %v1439_v16 = vpop.f32.mrb[1].mxu1 }
 0x19a   : > { %v1441_v17 = vpop.f32.mrb[2].mxu1 }
 0x19b   : > { %v1443_v18 = vpop.f32.mrb[3].mxu1 }
 0x1d3   : > { %v1523_v20 = vpop.f32.mrb[0].mxu0 }
 0x1d4   : > { %v1901_v21 = vadd.f32 %v1523_v20, %v1437_v15  ;;  %v1525_v23 = vpop.f32.mrb[1].mxu0 }
 0x1d5   : > { %v1902_v24 = vadd.f32 %v1525_v23, %v1439_v16  ;;  %v1527_v26 = vpop.f32.mrb[2].mxu0  ;;  %1543 = sbr.rel (%p1887_p6) target bundleno = 492 (0x1ec), region = 143 }
 0x1d6   : > { %v1532_v27 = vadd.f32 %v1901_v21, %v787_v19  ;;  %v1903_v28 = vadd.f32 %v1527_v26, %v1441_v17  ;;  %v1529_v30 = vpop.f32.mrb[3].mxu0 }
 0x1d7   : > { %v1533_v31 = vadd.f32 %v1902_v24, %v788_v22  ;;  %v1904_v32 = vadd.f32 %v1529_v30, %v1443_v18 }
 0x1d8   : > { %1536 = vst [vmem:[#allocation2] sm:$0xff] %v1532_v27  ;;  %v1534_v33 = vadd.f32 %v1903_v28, %v789_v25 }
 0x1d9   : > { %1537 = vst [vmem:[#allocation2 + $0x8] sm:$0xff] %v1533_v31  ;;  %v1535_v34 = vadd.f32 %v1904_v32, %v790_v29 }
 0x1da   : > { %1538 = vst [vmem:[#allocation2 + $0x10] sm:$0xff] %v1534_v33 }
 0x1db   : > { %1539 = vst [vmem:[#allocation2 + $0x18] sm:$0xff] %v1535_v34 }
 0x1df   : > { %v1544_v40 = vld [vmem:[#allocation2] sm:$0xff] }
 0x1e0   : > { %v1545_v43 = vld [vmem:[#allocation2 + $0x8] sm:$0xff]  ;;  %v1560_v52 = vadd.f32 %v1553_v48, %v1544_v40 }
 0x1e1   : > { %v1546_v46 = vld [vmem:[#allocation2 + $0x10] sm:$0xff]  ;;  %v1561_v53 = vadd.f32 %v1557_v49, %v1545_v43 }
 0x1e2   : > { %v1547_v47 = vld [vmem:[#allocation2 + $0x18] sm:$0xff]  ;;  %v1562_v54 = vadd.f32 %v1553_v48, %v1546_v46  ;;  %v1570_v56 = vadd.f32 %v1566_v44, %v1560_v52 }
 0x1e3   : > { %v1563_v55 = vadd.f32 %v1557_v49, %v1547_v47  ;;  %v1571_v57 = vadd.f32 %v1567_v45, %v1561_v53 }
 0x1e4   : > { %v1572_v58 = vadd.f32 %v1568_v50, %v1562_v54  ;;  %v1574_v60 = vmax.f32 %v1570_v56, 0.0 }
 0x1e5   : > { %v1573_v59 = vadd.f32 %v1569_v51, %v1563_v55  ;;  %v1575_v61 = vmax.f32 %v1571_v57, 0.0 }
 0x1e6   : > { %v1576_v62 = vmax.f32 %v1572_v58, 0.0 }
 0x1e7   : > { %v1577_v63 = vmax.f32 %v1573_v59, 0.0  ;;  %v1898_v0 = vpack.c.bf16 %v1575_v61, %v1574_v60 }
 0x1e9   : > { %v1899_v1 = vpack.c.bf16 %v1577_v63, %v1576_v62  ;;  %1590 = vst [vmem:[%s2616_s15] sm:$0xff] %v1898_v0 }
 0x1eb   : > { %1591 = vst [vmem:[%s2616_s15 + $0x8] sm:$0xff] %v1899_v1 }
 0x1ec PF: > { %1598 = sbr.rel (!%p2373_p13) target bundleno = 500 (0x1f4), region = 147  ;;  %s1900_s21 = sshll.u32 (%p2373_p13), %s2229_s22, 3 }
 0x1ed   : > { %s1604_s28 = scalar_lea.vmem (%p2373_p13), %s2778_s4, %s1900_s21 }
 0x1f0   : > { %v1634_v2 = vld [vmem:[%s2616_s15] sm:$0xff] (%p2373_p13) }
 0x1f1   : > { %1635 = vst [vmem:[%s1604_s28] sm:$0xff] (%p2373_p13), %v1634_v2 }
 0x1f2   : > { %v1636_v3 = vld [vmem:[%s2616_s15 + $0x8] sm:$0xff] (%p2373_p13) }
 0x1f3   : > { %1637 = vst [vmem:[%s1604_s28 + $0x10] sm:$0xff] %v1636_v3 }
 0x1f4 PF: > { %s14_s25 = sadd.s32 1, %s2241_s25   ;;  %s2789_s29 = sld [smem:[#allocation7_spill]] }
 0x1f5   : > { %p11_p7 = scmp.ge.s32.totalorder %s14_s25, 14   ;;  %s2790_s10 = sld [smem:[#allocation8_spill]] }
 0x1f6   : > { %s2791_s15 = smov %s2205_s16  ;;  %s2792_s16 = smov %s2365_s13 }
 0x1f7   : > { %s2793_s17 = smov %s2213_s18  ;;  %s2794_s18 = smov %s2362_s12 }
 0x1f8   : > { %s2795_s19 = smov %s2221_s20  ;;  %s2796_s20 = smov %s2346_s7 }
 0x1f9   : > { %s2797_s21 = smov %s2233_s23  ;;  %s2798_s22 = smov %s2237_s24 }
 0x1fa   : > { %s2799_s23 = smov %s2789_s29  ;;  %13 = sbr.rel (!%p11_p7) target bundleno = 8 (0x8), region = 235 }
 0x1fb   : > { %s2800_s24 = smov %s2790_s10 }

// kernel: _lambda_.41
= control target key start
LH: loop header
LB: loop body
LE: loop exit
PB: predicated region body
PF: predicated region fallthrough
CT: control target
= control target key end

     0   :  { %v24_v23 = vlaneseq  ;;  %s740_s0 = inlined_call_operand.vmem [shape: bf16[2,1,512], index: 0, kind: input, shape index: {}]   ;;  %s741_s1 = inlined_call_operand.vmem [shape: bf16[512,128], index: 1, kind: input, shape index: {}]   ;;  %s742_s2 = inlined_call_operand.vmem [shape: f32[1,128], index: 2, kind: input, shape index: {}]   ;;  %s743_s3 = inlined_call_operand.hbm [shape: f32[2,128], index: 3, kind: output, shape index: {}]  }
   0x1   :  { %v545_v0 = vld [vmem:[%s741_s1 + $0x40] sm:$0xff]   ;;  %v549_v4 = vld [vmem:[%s741_s1 + $0x48] sm:$0xff]   ;;  %v553_v8 = vld [vmem:[%s741_s1 + $0x50] sm:$0xff]  }
   0x2   :  { %v546_v1 = vld [vmem:[%s741_s1 + $0xc0] sm:$0xff]   ;;  %500 = vmatprep.subr.bf16.mxu0 %v545_v0  ;;  %v550_v5 = vld [vmem:[%s741_s1 + $0xc8] sm:$0xff]   ;;  %v554_v9 = vld [vmem:[%s741_s1 + $0xd0] sm:$0xff]   ;;  %v25_v28 = vshrl.u32 %v24_v23, 7 }
   0x3   :  { %v547_v2 = vld [vmem:[%s741_s1] sm:$0xff]   ;;  %522 = vmatprep.subr.bf16.mxu1 %v546_v1  ;;  %v551_v6 = vld [vmem:[%s741_s1 + $0x8] sm:$0xff]   ;;  %v555_v10 = vld [vmem:[%s741_s1 + $0x10] sm:$0xff]  }
   0x4   :  { %v548_v3 = vld [vmem:[%s741_s1 + $0x80] sm:$0xff]   ;;  %501 = vmatpush3.bf16.msra.mxu0 %v547_v2  ;;  %v552_v7 = vld [vmem:[%s741_s1 + $0x88] sm:$0xff]   ;;  %v556_v11 = vld [vmem:[%s741_s1 + $0x90] sm:$0xff]   ;;  %v30_v33 = vsub.s32 2, %v25_v28  ;;  %v38_v35 = vsub.s32 6, %v25_v28  ;;  %v26_v37 = vsub.s32 0, %v25_v28 }
   0x5   :  { %523 = vmatpush3.bf16.msra.mxu1 %v548_v3  ;;  %502 = vmatprep.subr.bf16.mxu0 %v549_v4  ;;  %v557_v12 = vld [vmem:[%s741_s1 + $0x58] sm:$0xff]   ;;  %v561_v16 = vld [vmem:[%s741_s1 + $0x60] sm:$0xff]   ;;  %v565_v20 = vld [vmem:[%s741_s1 + $0x68] sm:$0xff]   ;;  %v34_v38 = vsub.s32 4, %v25_v28 }
   0x6   :  { %524 = vmatprep.subr.bf16.mxu1 %v550_v5  ;;  %v558_v13 = vld [vmem:[%s741_s1 + $0xd8] sm:$0xff]   ;;  %v562_v17 = vld [vmem:[%s741_s1 + $0xe0] sm:$0xff]   ;;  %v566_v21 = vld [vmem:[%s741_s1 + $0xe8] sm:$0xff]  }
   0x7   :  { %v559_v14 = vld [vmem:[%s741_s1 + $0x18] sm:$0xff]   ;;  %v563_v18 = vld [vmem:[%s741_s1 + $0x20] sm:$0xff]   ;;  %v567_v22 = vld [vmem:[%s741_s1 + $0x28] sm:$0xff]  }
   0x8   :  { %503 = vmatpush3.bf16.msra.mxu0 %v551_v6  ;;  %v560_v15 = vld [vmem:[%s741_s1 + $0x98] sm:$0xff]   ;;  %v564_v19 = vld [vmem:[%s741_s1 + $0xa0] sm:$0xff]   ;;  %v568_v24 = vld [vmem:[%s741_s1 + $0xa8] sm:$0xff]  }
   0x9   :  { %525 = vmatpush3.bf16.msra.mxu1 %v552_v7  ;;  %504 = vmatprep.subr.bf16.mxu0 %v553_v8  ;;  %v569_v25 = vld [vmem:[%s741_s1 + $0x70] sm:$0xff]   ;;  %v573_v30 = vld [vmem:[%s741_s1 + $0x78] sm:$0xff]   ;;  %v497_v36 = vld [vmem:[%s740_s0] sm:$0xff]  }
   0xa   :  { %526 = vmatprep.subr.bf16.mxu1 %v554_v9  ;;  %v570_v26 = vld [vmem:[%s741_s1 + $0xf0] sm:$0xff]   ;;  %v574_v31 = vld [vmem:[%s741_s1 + $0xf8] sm:$0xff]  }
   0xb   :  { %v571_v27 = vld [vmem:[%s741_s1 + $0x30] sm:$0xff]   ;;  %v575_v32 = vld [vmem:[%s741_s1 + $0x38] sm:$0xff]  }
   0xc   :  { %505 = vmatpush3.bf16.msra.mxu0 %v555_v10  ;;  %v572_v29 = vld [vmem:[%s741_s1 + $0xb0] sm:$0xff]   ;;  %v576_v34 = vld [vmem:[%s741_s1 + $0xb8] sm:$0xff]  }
   0xd   :  { %527 = vmatpush3.bf16.msra.mxu1 %v556_v11  ;;  %506 = vmatprep.subr.bf16.mxu0 %v557_v12 }
   0xe   :  { %528 = vmatprep.subr.bf16.mxu1 %v558_v13 }
  0x10   :  { %507 = vmatpush3.bf16.msra.mxu0 %v559_v14 }
  0x11   :  { %529 = vmatpush3.bf16.msra.mxu1 %v560_v15  ;;  %508 = vmatprep.subr.bf16.mxu0 %v561_v16 }
  0x12   :  { %530 = vmatprep.subr.bf16.mxu1 %v562_v17 }
  0x14   :  { %509 = vmatpush3.bf16.msra.mxu0 %v563_v18 }
  0x15   :  { %531 = vmatpush3.bf16.msra.mxu1 %v564_v19  ;;  %510 = vmatprep.subr.bf16.mxu0 %v565_v20 }
  0x16   :  { %532 = vmatprep.subr.bf16.mxu1 %v566_v21 }
  0x18   :  { %511 = vmatpush3.bf16.msra.mxu0 %v567_v22 }
  0x19   :  { %533 = vmatpush3.bf16.msra.mxu1 %v568_v24  ;;  %512 = vmatprep.subr.bf16.mxu0 %v569_v25 }
  0x1a   :  { %534 = vmatprep.subr.bf16.mxu1 %v570_v26 }
  0x1c   :  { %513 = vmatpush3.bf16.msra.mxu0 %v571_v27 }
  0x1d   :  { %535 = vmatpush3.bf16.msra.mxu1 %v572_v29  ;;  %514 = vmatprep.subr.bf16.mxu0 %v573_v30 }
  0x1e   :  { %536 = vmatprep.subr.bf16.mxu1 %v574_v31 }
  0x20   :  { %515 = vmatpush3.bf16.msra.mxu0 %v575_v32 }
  0x21   :  { %8 = vsyncpa [#allocation3], 0  ;;  %537 = vmatpush3.bf16.msra.mxu1 %v576_v34  ;;  %v498_v39 = vunpack.c.l.bf16 %v497_v36  ;;  %v499_v40 = vunpack.c.h.bf16 %v497_v36  ;;  %vm160_vm0 = vcmask 1041409   ;;  %v463_v15 = vld [vmem:[%s742_s2] ss:$0 sm:$0xff]  ;;  %s601_s24 = smov [#allocation2]  }
  0x22   :  { %s455_s25 = sshll.u32 %s601_s24, 4  ;;  %s456_s25 = int_to_ptr.vmem [resolvable:$true] %s455_s25 }
  0x23   :  { %v31_v41 = vrot.slane %v498_v39, %v30_v33  ;;  %v47_v42 = vrot.slane %v499_v40, %v30_v33  ;;  %v39_v43 = vrot.slane %v498_v39, %v38_v35  ;;  %v55_v44 = vrot.slane %v499_v40, %v38_v35  ;;  %s577_s26 = scalar_lea.vmem %s456_s25, 32  ;;  %p582_p1 = scmp.lt.s32.totalorder %s456_s25, %s456_s25 }
  0x24   :  { %v27_v45 = vrot.slane %v498_v39, %v26_v37  ;;  %v43_v46 = vrot.slane %v499_v40, %v26_v37  ;;  %v35_v47 = vrot.slane %v498_v39, %v34_v38  ;;  %v51_v48 = vrot.slane %v499_v40, %v34_v38  ;;  %p578_p0 = scmp.ne.s32.totalorder %s456_s25, %s577_s26  ;;  %p583_p2 = scmp.lt.s32.totalorder %s577_s26, %s577_s26 }
  0x25   :  { %v65_v49 = vpack.c.bf16 %v31_v41, %v31_v41  ;;  %v69_v50 = vpack.c.bf16 %v47_v42, %v47_v42  ;;  %v67_v51 = vpack.c.bf16 %v39_v43, %v39_v43  ;;  %v71_v52 = vpack.c.bf16 %v55_v44, %v55_v44 }
  0x26   :  { %v64_v53 = vpack.c.bf16 %v27_v45, %v27_v45  ;;  %v68_v54 = vpack.c.bf16 %v43_v46, %v43_v46  ;;  %v66_v55 = vpack.c.bf16 %v35_v47, %v35_v47  ;;  %v70_v56 = vpack.c.bf16 %v51_v48, %v51_v48  ;;  %p584_p3 = por %p583_p2, %p582_p1 }
  0x27   :  { %v152_v57 = vunpack.c.l.b16 %v65_v49  ;;  %v156_v58 = vunpack.c.l.b16 %v69_v50  ;;  %v154_v59 = vunpack.c.l.b16 %v67_v51  ;;  %v158_v60 = vunpack.c.l.b16 %v71_v52 }
  0x28   :  { %v151_v61 = vunpack.c.l.b16 %v64_v53  ;;  %v155_v62 = vunpack.c.l.b16 %v68_v54  ;;  %v153_v63 = vunpack.c.l.b16 %v66_v55  ;;  %v157_v0 = vunpack.c.l.b16 %v70_v56  ;;  %p585_p4 = pnand %p584_p3, %p578_p0 }
  0x29   :  { %v162_v1 = vrot.slane %v156_v58, 7  ;;  %v166_v2 = vrot.slane %v158_v60, 7 }
  0x2a   :  { %v159_v3 = vrot.slane %v155_v62, 7  ;;  %v164_v4 = vrot.slane %v157_v0, 7 }
  0x2b   :  { %v163_v5 = vsel %vm160_vm0, %v162_v1, %v152_v57  ;;  %v167_v6 = vsel %vm160_vm0, %v166_v2, %v154_v59 }
  0x2c   :  { %v169_v7 = vpack.c.b16 %v163_v5, %v163_v5  ;;  %v171_v8 = vpack.c.b16 %v167_v6, %v167_v6  ;;  %v161_v9 = vsel %vm160_vm0, %v159_v3, %v151_v61  ;;  %v165_v10 = vsel %vm160_vm0, %v164_v4, %v153_v63 }
  0x2d   :  { %v168_v11 = vpack.c.b16 %v161_v9, %v161_v9  ;;  %v170_v12 = vpack.c.b16 %v165_v10, %v165_v10 }
  0x2e   :  { %400 = vmatprep.mubr.bf16.mxu0 %v169_v7  ;;  %440 = vmatprep.mubr.bf16.mxu1 %v171_v8 }
  0x2f   :  { %401 = vmatmul.mubr.bf16.vlgmr.msra.gmra.mrb[0].mxu0 %v168_v11  ;;  %441 = vmatmul.mubr.bf16.vlgmr.msra.gmra.mrb[0].mxu1 %v170_v12 }
 0x102   :  { %v516_v13 = vpop.f32.mrb[0].mxu0  ;;  %v538_v14 = vpop.f32.mrb[0].mxu1 }
 0x103   :  { %v517_v16 = vpop.f32.mrb[1].mxu0  ;;  %v539_v17 = vpop.f32.mrb[1].mxu1 }
 0x104   :  { %v518_v18 = vadd.f32 %v517_v16, %v516_v13  ;;  %v540_v19 = vadd.f32 %v539_v17, %v538_v14  ;;  %v519_v20 = vpop.f32.mrb[2].mxu0  ;;  %v541_v21 = vpop.f32.mrb[2].mxu1 }
 0x105   :  { %v520_v22 = vpop.f32.mrb[3].mxu0  ;;  %v542_v23 = vpop.f32.mrb[3].mxu1 }
 0x106   :  { %v403_v24 = vadd.f32 %v518_v18, %v463_v15 }
 0x108   :  { %v443_v25 = vadd.f32 %v540_v19, %v403_v24 }
 0x10a   :  { %448 = vst [vmem:[#allocation2] sm:$0x3] %v443_v25 }
 0x10b   :  { %588 = shalt.err (!%p585_p4)
}
 0x10c   :  { %s589_s28 = scalar_lea.hbm %s743_s3, 32 }
 0x10d   :  { %p590_p5 = scmp.ne.s32.totalorder %s743_s3, %s589_s28  ;;  %p593_p6 = scmp.lt.u32.totalorder %s589_s28, %s743_s3 }
 0x10f   :  { %p595_p7 = pnand %p593_p6, %p590_p5 }
 0x111   :  { %598 = shalt.err (!%p595_p7)
}
 0x112   :  { %458 = dma.vmem_to_hbm [thread:$0]  %s456_s25, 32, %s743_s3, [#allocation3]  }
 0x113   :  { %599 = dma.done.wait [#allocation3], 32  }
 0x114   :  { %600 = vsyncadd [#allocation3], 4294967264 }
 0x115   :  { %462 = vsyncpa [#allocation3], 1 }

</bundles_post_ra>
